<compile_context>
chip_gen: v7x
topology: tpu7x:2x2x1
jax: 0.10.0
libtpu: 0.0.40
codegen_flags: <defaults>
</compile_context>

<pallas_src>
import numpy as np

import jax
import jax.numpy as jnp
from jax import lax
from jax.experimental import pallas as pl
from jax.experimental.pallas import tpu as pltpu

BN_EPS = 1e-5
LEAKY_SLOPE = 0.2

# (kh, kw, stride, pad, use_bn, use_leaky) for the four conv layers (reference).
LAYER_CFG = [
    (4, 4, 2, 1, False, True),
    (4, 4, 2, 1, True, True),
    (3, 3, 2, 0, True, True),
    (3, 3, 1, 0, False, False),
]


def _round8(n):
    return ((n + 7) // 8) * 8


def _w_mat(w_oihw):
    """(Cout, Cin, kh, kw) -> (kh*kw*Cin, Cout), row order (ki, kj, cin)."""
    cout, cin, kh, kw = w_oihw.shape
    return jnp.transpose(w_oihw, (2, 3, 1, 0)).reshape(kh * kw * cin, cout)


# ---------------------------------------------------------------------------
# Full Discriminator forward: one fused, gridless pallas_call.
# ---------------------------------------------------------------------------
def discriminator_forward(x_nchw, params):
    B, C, H, W = x_nchw.shape
    assert H == W, "square inputs only"
    f32, bf16 = jnp.float32, jnp.bfloat16

    c1 = params[0]["w"].shape[0]          # 32
    c2 = params[1]["w"].shape[0]          # 64
    c3 = params[2]["w"].shape[0]          # 128

    # ---- Layer-1 im2col (k4 s2 p1), built by XLA, fused with the HBM read of x.
    x = jnp.transpose(x_nchw, (0, 2, 3, 1)).astype(bf16)          # NHWC, bf16 early
    xp = jnp.pad(x, ((0, 0), (1, 1), (1, 1), (0, 0)))
    h1 = (H + 2 - 4) // 2 + 1                                     # 14
    cols = [xp[:, i:i + 2 * h1 - 1:2, j:j + 2 * h1 - 1:2, :]
            for i in range(4) for j in range(4)]
    p1 = jnp.concatenate(cols, axis=-1)                           # (B,14,14,176)

    # Embed layer-1 output positions onto the (grid x grid) padded grid used by
    # layer 2: the all-zero border patch rows produce exactly-zero conv outputs
    # (bias=False), i.e. layer 2's zero padding, for free.
    grid = h1 + 2                                                 # 16
    rows_b = grid * grid                                          # 256
    R = B * rows_b                                                # 512 (B=2)
    pad1 = _round8(3 * grid + 3)                                  # layer-2 shift slack
    pad2 = _round8(4 * grid + 4)                                  # layer-3 shift slack
    p1 = jnp.pad(p1, ((0, 0), (1, 1), (1, 1), (0, 0)))            # (B,16,16,176)
    p1 = p1.reshape(R, 4 * 4 * C)
    p1 = jnp.pad(p1, ((0, pad1), (0, 0)))                         # zero slack rows

    # ---- Weights in single-matmul im2col form (bf16 operands, f32 accumulate).
    w1 = _w_mat(params[0]["w"]).astype(bf16)                      # (176, c1)
    w2 = _w_mat(params[1]["w"]).astype(bf16)                      # (512, c2)
    w3 = _w_mat(params[2]["w"]).astype(bf16)                      # (576, c3)

    # Layer 4 (Conv c3 -> 1, k3 s1) folded into a per-grid-position weight map:
    # the layer-3 output (a, b) lives at grid position (4a, 4b).
    w4 = params[3]["w"]                                           # (1, c3, 3, 3)
    w4map = jnp.zeros((grid, grid, c3), f32)
    for a in range(3):
        for b_ in range(3):
            w4map = w4map.at[4 * a, 4 * b_, :].set(w4[0, :, a, b_])
    w4map = w4map.reshape(rows_b, c3)

    # ---- Validity masks for the over-computed grid rows (BatchNorm statistics).
    yy, xx = np.meshgrid(np.arange(grid), np.arange(grid), indexing="ij")
    v2 = (yy % 2 == 0) & (xx % 2 == 0) & (yy <= grid - 4) & (xx <= grid - 4)
    v3 = (yy % 4 == 0) & (xx % 4 == 0) & (yy <= grid - 8) & (xx <= grid - 8)
    m2 = jnp.asarray(np.tile(v2.reshape(-1, 1), (B, 1)).astype(np.float32))
    m3 = jnp.asarray(np.tile(v3.reshape(-1, 1), (B, 1)).astype(np.float32))
    n2 = float(B * int(v2.sum()))                                 # B * 49
    n3 = float(B * int(v3.sum()))                                 # B * 9

    g2, b2 = params[1]["gamma"], params[1]["beta"]
    g3, b3 = params[2]["gamma"], params[2]["beta"]

    def kernel(p1_ref, w1_ref, w2_ref, g2_ref, b2_ref, w3_ref, g3_ref, b3_ref,
               w4_ref, m2_ref, m3_ref, o_ref, y1_s, y2_s):
        def leaky(v):
            return jnp.where(v > 0, v, LEAKY_SLOPE * v)

        def bn(z, mask, n_valid, gamma, beta):
            # Training-mode BatchNorm2d with masked (valid-row) biased stats; f32.
            zm = z * mask
            mean = jnp.sum(zm, axis=0, keepdims=True) * (1.0 / n_valid)
            ex2 = jnp.sum(zm * zm, axis=0, keepdims=True) * (1.0 / n_valid)
            var = ex2 - mean * mean
            return (z - mean) * lax.rsqrt(var + BN_EPS) * gamma + beta

        # ---- Layer 1: Conv(C->c1, k4 s2 p1) + LeakyReLU, on the padded grid.
        y1 = leaky(jnp.dot(p1_ref[...], w1_ref[...],
                           preferred_element_type=jnp.float32))
        y1_s[...] = y1.astype(jnp.bfloat16)                       # (R+pad1, c1)

        # ---- Layer 2: Conv(c1->c2, k4) + BN + LeakyReLU as ONE im2col matmul.
        # Kernel offset (ki,kj) == contiguous row window shifted by ki*grid+kj.
        pieces = [y1_s[ki * grid + kj: ki * grid + kj + R, :]
                  for ki in range(4) for kj in range(4)]
        z2 = jnp.dot(jnp.concatenate(pieces, axis=1), w2_ref[...],
                     preferred_element_type=jnp.float32)          # (R, c2) f32
        y2 = leaky(bn(z2, m2_ref[...], n2, g2_ref[...], b2_ref[...]))
        y2_s[0:R, :] = y2.astype(jnp.bfloat16)
        y2_s[R:, :] = jnp.zeros((pad2, y2_s.shape[1]), jnp.bfloat16)

        # ---- Layer 3: Conv(c2->c3, k3 s2) == 2-dilated k3 conv on the grid;
        # again a single im2col matmul from shifted contiguous row windows.
        pieces = [y2_s[2 * ki * grid + 2 * kj: 2 * ki * grid + 2 * kj + R, :]
                  for ki in range(3) for kj in range(3)]
        z3 = jnp.dot(jnp.concatenate(pieces, axis=1), w3_ref[...],
                     preferred_element_type=jnp.float32)          # (R, c3) f32
        y3 = leaky(bn(z3, m3_ref[...], n3, g3_ref[...], b3_ref[...]))

        # ---- Layer 4: Conv(c3->1, k3 s1) folded into a VPU multiply + reduce.
        # w4_ref is zero at every grid row that is not a true layer-3 output.
        prod = y3.reshape(B, rows_b, y3.shape[1]) * w4_ref[...][None, :, :]
        o_ref[...] = jnp.sum(jnp.sum(prod, axis=2, keepdims=True),
                             axis=1).astype(o_ref.dtype)

    args = (p1, w1, w2, g2, b2, w3, g3, b3, w4map, m2, m3)
    vmem = pl.BlockSpec(memory_space=pltpu.MemorySpace.VMEM)
    flops = 2 * ((R + pad1) * w1.shape[0] * c1 + R * 512 * c2 + R * 576 * c3)
    bytes_in = sum(int(np.prod(a.shape)) * a.dtype.itemsize for a in args)
    cost = pl.CostEstimate(flops=flops, transcendentals=0,
                           bytes_accessed=bytes_in + B * 4)

    return pl.pallas_call(
        kernel,
        out_shape=jax.ShapeDtypeStruct((B, 1), jnp.float32),
        in_specs=[vmem] * len(args),
        out_specs=vmem,
        scratch_shapes=[pltpu.VMEM((R + pad1, c1), jnp.bfloat16),
                        pltpu.VMEM((R + pad2, c2), jnp.bfloat16)],
        cost_estimate=cost,
    )(*args)


# ---------------------------------------------------------------------------
# Pure-JAX reference (lax.conv) at matching precision (bf16 inputs, f32 acc).
# ---------------------------------------------------------------------------
def reference_forward(x_nchw, params):
    y = x_nchw.astype(jnp.float32)
    for (kh, kw, stride, pad, use_bn, use_leaky), p in zip(LAYER_CFG, params):
        y = lax.conv_general_dilated(
            y.astype(jnp.bfloat16), p["w"].astype(jnp.bfloat16),
            (stride, stride), [(pad, pad), (pad, pad)],
            dimension_numbers=("NCHW", "OIHW", "NCHW"),
            preferred_element_type=jnp.float32,
        )
        if use_bn:
            mean = jnp.mean(y, axis=(0, 2, 3), keepdims=True)
            var = jnp.mean((y - mean) ** 2, axis=(0, 2, 3), keepdims=True)
            y = (y - mean) * lax.rsqrt(var + BN_EPS)
            y = y * p["gamma"].reshape(1, -1, 1, 1) + p["beta"].reshape(1, -1, 1, 1)
        if use_leaky:
            y = jnp.where(y > 0, y, LEAKY_SLOPE * y)
    return y.reshape(y.shape[0], -1)


def init_params(key, input_dim=11, hidden_dim=32):
    shapes = [
        (hidden_dim, input_dim, 4, 4),
        (hidden_dim * 2, hidden_dim, 4, 4),
        (hidden_dim * 4, hidden_dim * 2, 3, 3),
        (1, hidden_dim * 4, 3, 3),
    ]
    params = []
    for shp in shapes:
        key, sub = jax.random.split(key)
        cout = shp[0]
        params.append(
            {
                "w": 0.05 * jax.random.normal(sub, shp, dtype=jnp.float32),
                # BatchNorm affine at PyTorch default init (gamma=1, beta=0);
                # only consumed by the two BN layers.
                "gamma": jnp.ones((1, cout), jnp.float32),
                "beta": jnp.zeros((1, cout), jnp.float32),
            }
        )
    return params


if __name__ == "__main__":
    key = jax.random.PRNGKey(0)
    k_x, k_p = jax.random.split(key)

    B, C, H, W = 2, 11, 28, 28  # image + one-hot label channels (MNIST-style)
    x = jax.random.normal(k_x, (B, C, H, W), dtype=jnp.float32)
    params = init_params(k_p)

    out = jax.block_until_ready(jax.jit(discriminator_forward)(x, params))
    assert out.shape == (B, 1), out.shape

    ref = jax.block_until_ready(reference_forward(x, params))
    assert jnp.allclose(out, ref, rtol=5e-2, atol=5e-2), (out, ref)

    print("KERNEL_OK")
</pallas_src>

<mosaic_0001>
module attributes {stable_mosaic.version = 11 : i64} {
  func.func @kernel(%arg0: memref<568x176xbf16, #tpu.memory_space<vmem>>, %arg1: memref<176x32xbf16, #tpu.memory_space<vmem>>, %arg2: memref<512x64xbf16, #tpu.memory_space<vmem>>, %arg3: memref<1x64xf32, #tpu.memory_space<vmem>>, %arg4: memref<1x64xf32, #tpu.memory_space<vmem>>, %arg5: memref<576x128xbf16, #tpu.memory_space<vmem>>, %arg6: memref<1x128xf32, #tpu.memory_space<vmem>>, %arg7: memref<1x128xf32, #tpu.memory_space<vmem>>, %arg8: memref<256x128xf32, #tpu.memory_space<vmem>>, %arg9: memref<512x1xf32, #tpu.memory_space<vmem>>, %arg10: memref<512x1xf32, #tpu.memory_space<vmem>>, %arg11: memref<2x1xf32, #tpu.memory_space<vmem>>, %arg12: memref<568x32xbf16, #tpu.memory_space<vmem>>, %arg13: memref<584x64xbf16, #tpu.memory_space<vmem>>) attributes {dimension_semantics = [], scalar_prefetch = 0 : i64, scratch_operands = 2 : i64, tpu.core_type = #tpu.core_type<tc>} {
    %c0 = arith.constant 0 : index
    %c0_0 = arith.constant 0 : index
    %0 = vector.load %arg0[%c0, %c0_0] : memref<568x176xbf16, #tpu.memory_space<vmem>>, vector<568x176xbf16>
    %c0_1 = arith.constant 0 : index
    %c0_2 = arith.constant 0 : index
    %1 = vector.load %arg1[%c0_1, %c0_2] : memref<176x32xbf16, #tpu.memory_space<vmem>>, vector<176x32xbf16>
    %cst = arith.constant dense<0.000000e+00> : vector<568x32xf32>
    %2 = tpu.matmul %0, %1, %cst {dimension_numbers = #tpu.dot_dimension_numbers<[1], [0], [0], [1], [0, 0, 1, 1], [], []>} : vector<568x176xbf16>, vector<176x32xbf16>, vector<568x32xf32> -> vector<568x32xf32>
    %cst_3 = arith.constant 0.000000e+00 : f32
    %3 = vector.broadcast %cst_3 : f32 to vector<568x32xf32>
    %4 = arith.cmpf ogt, %2, %3 : vector<568x32xf32>
    %cst_4 = arith.constant 2.000000e-01 : f32
    %5 = vector.broadcast %cst_4 : f32 to vector<568x32xf32>
    %6 = arith.mulf %5, %2 : vector<568x32xf32>
    %7 = arith.select %4, %2, %6 : vector<568x32xi1>, vector<568x32xf32>
    %8 = arith.truncf %7 : vector<568x32xf32> to vector<568x32xbf16>
    %c0_5 = arith.constant 0 : index
    %c0_6 = arith.constant 0 : index
    %9 = vector.load %arg12[%c0_5, %c0_6] : memref<568x32xbf16, #tpu.memory_space<vmem>>, vector<568x32xbf16>
    tpu.vector_store %arg12[%c0_5, %c0_6], %8 {strides = array<i32>} : memref<568x32xbf16, #tpu.memory_space<vmem>>, vector<568x32xbf16>,
    %c0_7 = arith.constant 0 : index
    %c0_8 = arith.constant 0 : index
    %10 = vector.load %arg12[%c0_7, %c0_8] : memref<568x32xbf16, #tpu.memory_space<vmem>>, vector<512x32xbf16>
    %c1 = arith.constant 1 : index
    %c0_9 = arith.constant 0 : index
    %11 = vector.load %arg12[%c1, %c0_9] : memref<568x32xbf16, #tpu.memory_space<vmem>>, vector<512x32xbf16>
    %c2 = arith.constant 2 : index
    %c0_10 = arith.constant 0 : index
    %12 = vector.load %arg12[%c2, %c0_10] : memref<568x32xbf16, #tpu.memory_space<vmem>>, vector<512x32xbf16>
    %c3 = arith.constant 3 : index
    %c0_11 = arith.constant 0 : index
    %13 = vector.load %arg12[%c3, %c0_11] : memref<568x32xbf16, #tpu.memory_space<vmem>>, vector<512x32xbf16>
    %c16 = arith.constant 16 : index
    %c0_12 = arith.constant 0 : index
    %14 = vector.load %arg12[%c16, %c0_12] : memref<568x32xbf16, #tpu.memory_space<vmem>>, vector<512x32xbf16>
    %c17 = arith.constant 17 : index
    %c0_13 = arith.constant 0 : index
    %15 = vector.load %arg12[%c17, %c0_13] : memref<568x32xbf16, #tpu.memory_space<vmem>>, vector<512x32xbf16>
    %c18 = arith.constant 18 : index
    %c0_14 = arith.constant 0 : index
    %16 = vector.load %arg12[%c18, %c0_14] : memref<568x32xbf16, #tpu.memory_space<vmem>>, vector<512x32xbf16>
    %c19 = arith.constant 19 : index
    %c0_15 = arith.constant 0 : index
    %17 = vector.load %arg12[%c19, %c0_15] : memref<568x32xbf16, #tpu.memory_space<vmem>>, vector<512x32xbf16>
    %c32 = arith.constant 32 : index
    %c0_16 = arith.constant 0 : index
    %18 = vector.load %arg12[%c32, %c0_16] : memref<568x32xbf16, #tpu.memory_space<vmem>>, vector<512x32xbf16>
    %c33 = arith.constant 33 : index
    %c0_17 = arith.constant 0 : index
    %19 = vector.load %arg12[%c33, %c0_17] : memref<568x32xbf16, #tpu.memory_space<vmem>>, vector<512x32xbf16>
    %c34 = arith.constant 34 : index
    %c0_18 = arith.constant 0 : index
    %20 = vector.load %arg12[%c34, %c0_18] : memref<568x32xbf16, #tpu.memory_space<vmem>>, vector<512x32xbf16>
    %c35 = arith.constant 35 : index
    %c0_19 = arith.constant 0 : index
    %21 = vector.load %arg12[%c35, %c0_19] : memref<568x32xbf16, #tpu.memory_space<vmem>>, vector<512x32xbf16>
    %c48 = arith.constant 48 : index
    %c0_20 = arith.constant 0 : index
    %22 = vector.load %arg12[%c48, %c0_20] : memref<568x32xbf16, #tpu.memory_space<vmem>>, vector<512x32xbf16>
    %c49 = arith.constant 49 : index
    %c0_21 = arith.constant 0 : index
    %23 = vector.load %arg12[%c49, %c0_21] : memref<568x32xbf16, #tpu.memory_space<vmem>>, vector<512x32xbf16>
    %c50 = arith.constant 50 : index
    %c0_22 = arith.constant 0 : index
    %24 = vector.load %arg12[%c50, %c0_22] : memref<568x32xbf16, #tpu.memory_space<vmem>>, vector<512x32xbf16>
    %c51 = arith.constant 51 : index
    %c0_23 = arith.constant 0 : index
    %25 = vector.load %arg12[%c51, %c0_23] : memref<568x32xbf16, #tpu.memory_space<vmem>>, vector<512x32xbf16>
    %26 = tpu.concatenate %10, %11, %12, %13, %14, %15, %16, %17, %18, %19, %20, %21, %22, %23, %24, %25 in 1 : vector<512x32xbf16>, vector<512x32xbf16>, vector<512x32xbf16>, vector<512x32xbf16>, vector<512x32xbf16>, vector<512x32xbf16>, vector<512x32xbf16>, vector<512x32xbf16>, vector<512x32xbf16>, vector<512x32xbf16>, vector<512x32xbf16>, vector<512x32xbf16>, vector<512x32xbf16>, vector<512x32xbf16>, vector<512x32xbf16>, vector<512x32xbf16> -> vector<512x512xbf16>
    %c0_24 = arith.constant 0 : index
    %c0_25 = arith.constant 0 : index
    %27 = vector.load %arg2[%c0_24, %c0_25] : memref<512x64xbf16, #tpu.memory_space<vmem>>, vector<512x64xbf16>
    %cst_26 = arith.constant dense<0.000000e+00> : vector<512x64xf32>
    %28 = tpu.matmul %26, %27, %cst_26 {dimension_numbers = #tpu.dot_dimension_numbers<[1], [0], [0], [1], [0, 0, 1, 1], [], []>} : vector<512x512xbf16>, vector<512x64xbf16>, vector<512x64xf32> -> vector<512x64xf32>
    %c0_27 = arith.constant 0 : index
    %c0_28 = arith.constant 0 : index
    %29 = vector.load %arg9[%c0_27, %c0_28] : memref<512x1xf32, #tpu.memory_space<vmem>>, vector<512x1xf32>
    %c0_29 = arith.constant 0 : index
    %c0_30 = arith.constant 0 : index
    %30 = vector.load %arg3[%c0_29, %c0_30] : memref<1x64xf32, #tpu.memory_space<vmem>>, vector<1x64xf32>
    %c0_31 = arith.constant 0 : index
    %c0_32 = arith.constant 0 : index
    %31 = vector.load %arg4[%c0_31, %c0_32] : memref<1x64xf32, #tpu.memory_space<vmem>>, vector<1x64xf32>
    %32 = vector.broadcast %29 : vector<512x1xf32> to vector<512x64xf32>
    %33 = arith.mulf %28, %32 : vector<512x64xf32>
    %cst_33 = arith.constant dense<0.000000e+00> : vector<64xf32>
    %34 = vector.multi_reduction <add>, %33, %cst_33 [0] : vector<512x64xf32> to vector<64xf32>
    %35 = vector.shape_cast %34 : vector<64xf32> to vector<1x64xf32>
    %cst_34 = arith.constant 0.0102040814 : f32
    %36 = vector.broadcast %cst_34 : f32 to vector<1x64xf32>
    %37 = arith.mulf %35, %36 : vector<1x64xf32>
    %38 = arith.mulf %33, %33 : vector<512x64xf32>
    %cst_35 = arith.constant dense<0.000000e+00> : vector<64xf32>
    %39 = vector.multi_reduction <add>, %38, %cst_35 [0] : vector<512x64xf32> to vector<64xf32>
    %40 = vector.shape_cast %39 : vector<64xf32> to vector<1x64xf32>
    %cst_36 = arith.constant 0.0102040814 : f32
    %41 = vector.broadcast %cst_36 : f32 to vector<1x64xf32>
    %42 = arith.mulf %40, %41 : vector<1x64xf32>
    %43 = arith.mulf %37, %37 : vector<1x64xf32>
    %44 = arith.subf %42, %43 : vector<1x64xf32>
    %45 = vector.broadcast %37 : vector<1x64xf32> to vector<512x64xf32>
    %46 = arith.subf %28, %45 : vector<512x64xf32>
    %cst_37 = arith.constant 9.99999974E-6 : f32
    %47 = vector.broadcast %cst_37 : f32 to vector<1x64xf32>
    %48 = arith.addf %44, %47 : vector<1x64xf32>
    %49 = math.rsqrt %48 : vector<1x64xf32>
    %50 = vector.broadcast %49 : vector<1x64xf32> to vector<512x64xf32>
    %51 = arith.mulf %46, %50 : vector<512x64xf32>
    %52 = vector.broadcast %30 : vector<1x64xf32> to vector<512x64xf32>
    %53 = arith.mulf %51, %52 : vector<512x64xf32>
    %54 = vector.broadcast %31 : vector<1x64xf32> to vector<512x64xf32>
    %55 = arith.addf %53, %54 : vector<512x64xf32>
    %cst_38 = arith.constant 0.000000e+00 : f32
    %56 = vector.broadcast %cst_38 : f32 to vector<512x64xf32>
    %57 = arith.cmpf ogt, %55, %56 : vector<512x64xf32>
    %cst_39 = arith.constant 2.000000e-01 : f32
    %58 = vector.broadcast %cst_39 : f32 to vector<512x64xf32>
    %59 = arith.mulf %58, %55 : vector<512x64xf32>
    %60 = arith.select %57, %55, %59 : vector<512x64xi1>, vector<512x64xf32>
    %61 = arith.truncf %60 : vector<512x64xf32> to vector<512x64xbf16>
    %c0_40 = arith.constant 0 : index
    %c0_41 = arith.constant 0 : index
    %62 = vector.load %arg13[%c0_40, %c0_41] : memref<584x64xbf16, #tpu.memory_space<vmem>>, vector<512x64xbf16>
    tpu.vector_store %arg13[%c0_40, %c0_41], %61 {strides = array<i32>} : memref<584x64xbf16, #tpu.memory_space<vmem>>, vector<512x64xbf16>,
    %cst_42 = arith.constant 0.000000e+00 : bf16
    %63 = vector.broadcast %cst_42 : bf16 to vector<72x64xbf16>
    %c512 = arith.constant 512 : index
    %c0_43 = arith.constant 0 : index
    %64 = vector.load %arg13[%c512, %c0_43] : memref<584x64xbf16, #tpu.memory_space<vmem>>, vector<72x64xbf16>
    tpu.vector_store %arg13[%c512, %c0_43], %63 {strides = array<i32>} : memref<584x64xbf16, #tpu.memory_space<vmem>>, vector<72x64xbf16>,
    %c0_44 = arith.constant 0 : index
    %c0_45 = arith.constant 0 : index
    %65 = vector.load %arg13[%c0_44, %c0_45] : memref<584x64xbf16, #tpu.memory_space<vmem>>, vector<512x64xbf16>
    %c2_46 = arith.constant 2 : index
    %c0_47 = arith.constant 0 : index
    %66 = vector.load %arg13[%c2_46, %c0_47] : memref<584x64xbf16, #tpu.memory_space<vmem>>, vector<512x64xbf16>
    %c4 = arith.constant 4 : index
    %c0_48 = arith.constant 0 : index
    %67 = vector.load %arg13[%c4, %c0_48] : memref<584x64xbf16, #tpu.memory_space<vmem>>, vector<512x64xbf16>
    %c32_49 = arith.constant 32 : index
    %c0_50 = arith.constant 0 : index
    %68 = vector.load %arg13[%c32_49, %c0_50] : memref<584x64xbf16, #tpu.memory_space<vmem>>, vector<512x64xbf16>
    %c34_51 = arith.constant 34 : index
    %c0_52 = arith.constant 0 : index
    %69 = vector.load %arg13[%c34_51, %c0_52] : memref<584x64xbf16, #tpu.memory_space<vmem>>, vector<512x64xbf16>
    %c36 = arith.constant 36 : index
    %c0_53 = arith.constant 0 : index
    %70 = vector.load %arg13[%c36, %c0_53] : memref<584x64xbf16, #tpu.memory_space<vmem>>, vector<512x64xbf16>
    %c64 = arith.constant 64 : index
    %c0_54 = arith.constant 0 : index
    %71 = vector.load %arg13[%c64, %c0_54] : memref<584x64xbf16, #tpu.memory_space<vmem>>, vector<512x64xbf16>
    %c66 = arith.constant 66 : index
    %c0_55 = arith.constant 0 : index
    %72 = vector.load %arg13[%c66, %c0_55] : memref<584x64xbf16, #tpu.memory_space<vmem>>, vector<512x64xbf16>
    %c68 = arith.constant 68 : index
    %c0_56 = arith.constant 0 : index
    %73 = vector.load %arg13[%c68, %c0_56] : memref<584x64xbf16, #tpu.memory_space<vmem>>, vector<512x64xbf16>
    %74 = tpu.concatenate %65, %66, %67, %68, %69, %70, %71, %72, %73 in 1 : vector<512x64xbf16>, vector<512x64xbf16>, vector<512x64xbf16>, vector<512x64xbf16>, vector<512x64xbf16>, vector<512x64xbf16>, vector<512x64xbf16>, vector<512x64xbf16>, vector<512x64xbf16> -> vector<512x576xbf16>
    %c0_57 = arith.constant 0 : index
    %c0_58 = arith.constant 0 : index
    %75 = vector.load %arg5[%c0_57, %c0_58] : memref<576x128xbf16, #tpu.memory_space<vmem>>, vector<576x128xbf16>
    %cst_59 = arith.constant dense<0.000000e+00> : vector<512x128xf32>
    %76 = tpu.matmul %74, %75, %cst_59 {dimension_numbers = #tpu.dot_dimension_numbers<[1], [0], [0], [1], [0, 0, 1, 1], [], []>} : vector<512x576xbf16>, vector<576x128xbf16>, vector<512x128xf32> -> vector<512x128xf32>
    %c0_60 = arith.constant 0 : index
    %c0_61 = arith.constant 0 : index
    %77 = vector.load %arg10[%c0_60, %c0_61] : memref<512x1xf32, #tpu.memory_space<vmem>>, vector<512x1xf32>
    %c0_62 = arith.constant 0 : index
    %c0_63 = arith.constant 0 : index
    %78 = vector.load %arg6[%c0_62, %c0_63] : memref<1x128xf32, #tpu.memory_space<vmem>>, vector<1x128xf32>
    %c0_64 = arith.constant 0 : index
    %c0_65 = arith.constant 0 : index
    %79 = vector.load %arg7[%c0_64, %c0_65] : memref<1x128xf32, #tpu.memory_space<vmem>>, vector<1x128xf32>
    %80 = vector.broadcast %77 : vector<512x1xf32> to vector<512x128xf32>
    %81 = arith.mulf %76, %80 : vector<512x128xf32>
    %cst_66 = arith.constant dense<0.000000e+00> : vector<128xf32>
    %82 = vector.multi_reduction <add>, %81, %cst_66 [0] : vector<512x128xf32> to vector<128xf32>
    %83 = vector.shape_cast %82 : vector<128xf32> to vector<1x128xf32>
    %cst_67 = arith.constant 0.055555556 : f32
    %84 = vector.broadcast %cst_67 : f32 to vector<1x128xf32>
    %85 = arith.mulf %83, %84 : vector<1x128xf32>
    %86 = arith.mulf %81, %81 : vector<512x128xf32>
    %cst_68 = arith.constant dense<0.000000e+00> : vector<128xf32>
    %87 = vector.multi_reduction <add>, %86, %cst_68 [0] : vector<512x128xf32> to vector<128xf32>
    %88 = vector.shape_cast %87 : vector<128xf32> to vector<1x128xf32>
    %cst_69 = arith.constant 0.055555556 : f32
    %89 = vector.broadcast %cst_69 : f32 to vector<1x128xf32>
    %90 = arith.mulf %88, %89 : vector<1x128xf32>
    %91 = arith.mulf %85, %85 : vector<1x128xf32>
    %92 = arith.subf %90, %91 : vector<1x128xf32>
    %93 = vector.broadcast %85 : vector<1x128xf32> to vector<512x128xf32>
    %94 = arith.subf %76, %93 : vector<512x128xf32>
    %cst_70 = arith.constant 9.99999974E-6 : f32
    %95 = vector.broadcast %cst_70 : f32 to vector<1x128xf32>
    %96 = arith.addf %92, %95 : vector<1x128xf32>
    %97 = math.rsqrt %96 : vector<1x128xf32>
    %98 = vector.broadcast %97 : vector<1x128xf32> to vector<512x128xf32>
    %99 = arith.mulf %94, %98 : vector<512x128xf32>
    %100 = vector.broadcast %78 : vector<1x128xf32> to vector<512x128xf32>
    %101 = arith.mulf %99, %100 : vector<512x128xf32>
    %102 = vector.broadcast %79 : vector<1x128xf32> to vector<512x128xf32>
    %103 = arith.addf %101, %102 : vector<512x128xf32>
    %cst_71 = arith.constant 0.000000e+00 : f32
    %104 = vector.broadcast %cst_71 : f32 to vector<512x128xf32>
    %105 = arith.cmpf ogt, %103, %104 : vector<512x128xf32>
    %cst_72 = arith.constant 2.000000e-01 : f32
    %106 = vector.broadcast %cst_72 : f32 to vector<512x128xf32>
    %107 = arith.mulf %106, %103 : vector<512x128xf32>
    %108 = arith.select %105, %103, %107 : vector<512x128xi1>, vector<512x128xf32>
    %109 = vector.shape_cast %108 : vector<512x128xf32> to vector<2x256x128xf32>
    %c0_73 = arith.constant 0 : index
    %c0_74 = arith.constant 0 : index
    %110 = vector.load %arg8[%c0_73, %c0_74] : memref<256x128xf32, #tpu.memory_space<vmem>>, vector<256x128xf32>
    %111 = vector.shape_cast %110 : vector<256x128xf32> to vector<1x256x128xf32>
    %112 = vector.broadcast %111 : vector<1x256x128xf32> to vector<2x256x128xf32>
    %113 = arith.mulf %109, %112 : vector<2x256x128xf32>
    %cst_75 = arith.constant dense<0.000000e+00> : vector<2x256xf32>
    %114 = vector.multi_reduction <add>, %113, %cst_75 [2] : vector<2x256x128xf32> to vector<2x256xf32>
    %115 = vector.shape_cast %114 : vector<2x256xf32> to vector<2x256x1xf32>
    %cst_76 = arith.constant dense<0.000000e+00> : vector<2x1xf32>
    %116 = vector.multi_reduction <add>, %115, %cst_76 [1] : vector<2x256x1xf32> to vector<2x1xf32>
    %c0_77 = arith.constant 0 : index
    %c0_78 = arith.constant 0 : index
    %117 = vector.load %arg11[%c0_77, %c0_78] : memref<2x1xf32, #tpu.memory_space<vmem>>, vector<2x1xf32>
    tpu.vector_store %arg11[%c0_77, %c0_78], %116 {strides = array<i32>} : memref<2x1xf32, #tpu.memory_space<vmem>>, vector<2x1xf32>,
    return
  }
}

</mosaic_0001>

<bundles_post_ra>
// kernel: discriminator_forward.1
= control target key start
LH: loop header
LB: loop body
LE: loop exit
PB: predicated region body
PF: predicated region fallthrough
CT: control target
= control target key end

     0   :  { %v16867_v0 = vmov 0   ;;  %vm519_vm0 = vcmask 392192   ;;  %vm1446_vm2 = vcmask 257024   ;;  %vm16934_vm8 = vcmask 1046528   ;;  %s10357_s13 = smov 64   ;;  %s10358_s16 = smov 32   ;;  %s16855_s1 = inlined_call_operand.vmem [shape: bf16[176,32], index: 1, kind: input, shape index: {}]   ;;  %s16856_s0 = inlined_call_operand.vmem [shape: bf16[568,176], index: 0, kind: input, shape index: {}]   ;;  %s16857_s2 = inlined_call_operand.vmem [shape: bf16[512,64], index: 2, kind: input, shape index: {}]   ;;  %s16858_s9 = inlined_call_operand.vmem [shape: f32[512,1], index: 9, kind: input, shape index: {}]   ;;  %s16859_s5 = inlined_call_operand.vmem [shape: bf16[576,128], index: 5, kind: input, shape index: {}]   ;;  %s16860_s3 = inlined_call_operand.vmem [shape: f32[1,64], index: 3, kind: input, shape index: {}]   ;;  %s16861_s4 = inlined_call_operand.vmem [shape: f32[1,64], index: 4, kind: input, shape index: {}]   ;;  %s16862_s10 = inlined_call_operand.vmem [shape: f32[512,1], index: 10, kind: input, shape index: {}]   ;;  %s16863_s6 = inlined_call_operand.vmem [shape: f32[1,128], index: 6, kind: input, shape index: {}]   ;;  %s16864_s7 = inlined_call_operand.vmem [shape: f32[1,128], index: 7, kind: input, shape index: {}]   ;;  %s16865_s8 = inlined_call_operand.vmem [shape: f32[256,128], index: 8, kind: input, shape index: {}]   ;;  %s16866_s11 = inlined_call_operand.vmem [shape: f32[2,1], index: 11, kind: output, shape index: {}]  }
   0x1   :  { %628 = vmatprep.subr.bf16.mxu0 %v16867_v0  ;;  %v10042_v1 = vld [vmem:[%s16855_s1] sm:$0xff]   ;;  %9758 = vmatprep.subr.bf16.mxu1 %v16867_v0  ;;  %v10043_v2 = vld [vmem:[%s16855_s1 + $0x8] sm:$0xff]   ;;  %v10044_v3 = vld [vmem:[%s16855_s1 + $0x10] sm:$0xff]   ;;  %vm1763_vm9 = vsmask.f32 7424  ;;  %s10359_s17 = smov 96  }
   0x2   :  { %10041 = vset.pattern.permute.xlu1 %v16867_v0  ;;  %10040 = vset.pattern.permute.xlu0 %v16867_v0  ;;  %v10045_v4 = vld [vmem:[%s16855_s1 + $0x18] sm:$0xff]   ;;  %v10055_v5 = vld [vmem:[%s16856_s0 + $0x4] ss:$8 sps:$4 sm:$0xff]   ;;  %v10048_v8 = vld [vmem:[%s16855_s1 + $0x30] sm:$0xff]   ;;  %vm2224_vm12 = vsmask.f32 6400 }
   0x3   :  { %629 = vmatpush1.bf16.msra.mxu0 %v10042_v1  ;;  %9769 = vmatpush1.bf16.msra.mxu1 %v10042_v1  ;;  %v10046_v6 = vld [vmem:[%s16855_s1 + $0x20] sm:$0xff]   ;;  %v10047_v7 = vld [vmem:[%s16855_s1 + $0x28] sm:$0xff]   ;;  %v10049_v9 = vld [vmem:[%s16855_s1 + $0x38] sm:$0xff]  }
   0x4   :  { %630 = vmatprep.subr.bf16.mxu0 %v16867_v0  ;;  %9759 = vmatprep.subr.bf16.mxu1 %v16867_v0  ;;  %v10050_v10 = vld [vmem:[%s16855_s1 + $0x40] sm:$0xff]   ;;  %v10051_v11 = vld [vmem:[%s16855_s1 + $0x48] sm:$0xff]   ;;  %v10052_v12 = vld [vmem:[%s16855_s1 + $0x50] sm:$0xff]  }
   0x5   :  { %9145 = vmatprep.mubr.msk.bf16.mxu0 %vm519_vm0, %v10055_v5  ;;  %v10053_v13 = vld [vmem:[%s16856_s0] ss:$8 sps:$4 sm:$0xff]   ;;  %v10056_v14 = vld [vmem:[%s16856_s0 + $0x14] ss:$8 sps:$4 sm:$0xff]   ;;  %v10058_v15 = vld [vmem:[%s16856_s0 + $0x10] ss:$8 sps:$4 sm:$0xff]  }
   0x6   :  { %v10059_v16 = vld [vmem:[%s16856_s0 + $0x24] ss:$8 sps:$4 sm:$0xff]   ;;  %v10061_v17 = vld [vmem:[%s16856_s0 + $0x20] ss:$8 sps:$4 sm:$0xff]   ;;  %v10062_v18 = vld [vmem:[%s16856_s0 + $0x34] ss:$8 sps:$4 sm:$0xff]  }
   0x7   :  { %631 = vmatpush1.bf16.msra.mxu0 %v10043_v2  ;;  %9770 = vmatpush1.bf16.msra.mxu1 %v10043_v2  ;;  %v10064_v19 = vld [vmem:[%s16856_s0 + $0x30] ss:$8 sps:$4 sm:$0xff]   ;;  %v10065_v20 = vld [vmem:[%s16856_s0 + $0x44] ss:$8 sps:$4 sm:$0xff]   ;;  %v10067_v21 = vld [vmem:[%s16856_s0 + $0x40] ss:$8 sps:$4 sm:$0xff]  }
   0x8   :  { %632 = vmatprep.subr.bf16.mxu0 %v16867_v0  ;;  %9760 = vmatprep.subr.bf16.mxu1 %v16867_v0  ;;  %v10068_v22 = vld [vmem:[%s16856_s0 + $0x54] ss:$8 sps:$4 sm:$0xff]   ;;  %v10070_v23 = vld [vmem:[%s16856_s0 + $0x50] ss:$8 sps:$4 sm:$0xff]   ;;  %v10071_v24 = vld [vmem:[%s16856_s0 + $0x64] ss:$8 sps:$4 sm:$0xff]  }
   0x9   :  { %v10073_v25 = vld [vmem:[%s16856_s0 + $0x60] ss:$8 sps:$4 sm:$0xff]   ;;  %v10074_v26 = vld [vmem:[%s16856_s0 + $0x74] ss:$8 sps:$4 sm:$0xff]   ;;  %v10076_v27 = vld [vmem:[%s16856_s0 + $0x70] ss:$8 sps:$4 sm:$0xff]  }
   0xa   :  { %v10077_v28 = vld [vmem:[%s16856_s0 + $0x84] ss:$8 sps:$4 sm:$0xff]   ;;  %v10127_v29 = vld [vmem:[%s16856_s0 + $0x1a0] ss:$8 sps:$4 sm:$0xff]   ;;  %v10080_v32 = vld [vmem:[%s16856_s0 + $0x94] ss:$8 sps:$4 sm:$0xff]  }
   0xb   :  { %633 = vmatpush1.bf16.msra.mxu0 %v10044_v3  ;;  %9771 = vmatpush1.bf16.msra.mxu1 %v10044_v3  ;;  %v10129_v30 = vld [vmem:[%s16856_s0 + $0x1a4] ss:$8 sps:$4 sm:$0xff]   ;;  %v10079_v31 = vld [vmem:[%s16856_s0 + $0x80] ss:$8 sps:$4 sm:$0xff]   ;;  %v10133_v33 = vld [vmem:[%s16856_s0 + $0x1b4] ss:$8 sps:$4 sm:$0xff]  }
   0xc   :  { %634 = vmatprep.subr.bf16.mxu0 %v16867_v0  ;;  %9761 = vmatprep.subr.bf16.mxu1 %v16867_v0  ;;  %v10082_v34 = vld [vmem:[%s16856_s0 + $0x90] ss:$8 sps:$4 sm:$0xff]   ;;  %v10083_v35 = vld [vmem:[%s16856_s0 + $0xa4] ss:$8 sps:$4 sm:$0xff]   ;;  %v10085_v38 = vld [vmem:[%s16856_s0 + $0xa0] ss:$8 sps:$4 sm:$0xff]  }
   0xd   :  { %9171 = vmatprep.mubr.msk.bf16.mxu1 %vm519_vm0, %v10129_v30  ;;  %v10136_v36 = vld [vmem:[%s16856_s0 + $0x1b0] ss:$8 sps:$4 sm:$0xff]   ;;  %v10137_v37 = vld [vmem:[%s16856_s0 + $0x1c4] ss:$8 sps:$4 sm:$0xff]   ;;  %v10139_v39 = vld [vmem:[%s16856_s0 + $0x1c0] ss:$8 sps:$4 sm:$0xff]  }
   0xe   :  { %v10086_v40 = vld [vmem:[%s16856_s0 + $0xb4] ss:$8 sps:$4 sm:$0xff]   ;;  %v10088_v41 = vld [vmem:[%s16856_s0 + $0xb0] ss:$8 sps:$4 sm:$0xff]   ;;  %v10089_v42 = vld [vmem:[%s16856_s0 + $0xc4] ss:$8 sps:$4 sm:$0xff]  }
   0xf   :  { %635 = vmatpush1.bf16.msra.mxu0 %v10045_v4  ;;  %9772 = vmatpush1.bf16.msra.mxu1 %v10045_v4  ;;  %v10140_v43 = vld [vmem:[%s16856_s0 + $0x1d4] ss:$8 sps:$4 sm:$0xff]   ;;  %v10142_v44 = vld [vmem:[%s16856_s0 + $0x1d0] ss:$8 sps:$4 sm:$0xff]   ;;  %v10091_v45 = vld [vmem:[%s16856_s0 + $0xc0] ss:$8 sps:$4 sm:$0xff]  }
  0x10   :  { %636 = vmatprep.subr.bf16.mxu0 %v16867_v0  ;;  %9762 = vmatprep.subr.bf16.mxu1 %v16867_v0  ;;  %v10092_v46 = vld [vmem:[%s16856_s0 + $0xd4] ss:$8 sps:$4 sm:$0xff]   ;;  %v10143_v47 = vld [vmem:[%s16856_s0 + $0x1e4] ss:$8 sps:$4 sm:$0xff]   ;;  %v10145_v48 = vld [vmem:[%s16856_s0 + $0x1e0] ss:$8 sps:$4 sm:$0xff]  }
  0x11   :  { %v10094_v49 = vld [vmem:[%s16856_s0 + $0xd0] ss:$8 sps:$4 sm:$0xff]   ;;  %v10095_v50 = vld [vmem:[%s16856_s0 + $0xe4] ss:$8 sps:$4 sm:$0xff]   ;;  %v10146_v51 = vld [vmem:[%s16856_s0 + $0x1f4] ss:$8 sps:$4 sm:$0xff]  }
  0x12   :  { %v10148_v52 = vld [vmem:[%s16856_s0 + $0x1f0] ss:$8 sps:$4 sm:$0xff]   ;;  %v10097_v53 = vld [vmem:[%s16856_s0 + $0xe0] ss:$8 sps:$4 sm:$0xff]   ;;  %v10098_v54 = vld [vmem:[%s16856_s0 + $0xf4] ss:$8 sps:$4 sm:$0xff]  }
  0x13   :  { %637 = vmatpush1.bf16.msra.mxu0 %v10046_v6  ;;  %9773 = vmatpush1.bf16.msra.mxu1 %v10046_v6  ;;  %v10149_v55 = vld [vmem:[%s16856_s0 + $0x204] ss:$8 sps:$4 sm:$0xff]   ;;  %v10151_v56 = vld [vmem:[%s16856_s0 + $0x200] ss:$8 sps:$4 sm:$0xff]   ;;  %v10100_v57 = vld [vmem:[%s16856_s0 + $0xf0] ss:$8 sps:$4 sm:$0xff]  }
  0x14   :  { %638 = vmatprep.subr.bf16.mxu0 %v16867_v0  ;;  %9763 = vmatprep.subr.bf16.mxu1 %v16867_v0  ;;  %v10101_v58 = vld [vmem:[%s16856_s0 + $0x104] ss:$8 sps:$4 sm:$0xff]   ;;  %v10156_v59 = vld [vmem:[%s16856_s0 + $0x214] ss:$8 sps:$4 sm:$0xff]   ;;  %v10158_v60 = vld [vmem:[%s16856_s0 + $0x210] ss:$8 sps:$4 sm:$0xff]  }
  0x15   :  { %v10103_v61 = vld [vmem:[%s16856_s0 + $0x100] ss:$8 sps:$4 sm:$0xff]   ;;  %v10104_v62 = vld [vmem:[%s16856_s0 + $0x114] ss:$8 sps:$4 sm:$0xff]   ;;  %v10106_v63 = vld [vmem:[%s16856_s0 + $0x110] ss:$8 sps:$4 sm:$0xff]  }
  0x16   :  { %v10107_v1 = vld [vmem:[%s16856_s0 + $0x124] ss:$8 sps:$4 sm:$0xff]   ;;  %v10109_v6 = vld [vmem:[%s16856_s0 + $0x120] ss:$8 sps:$4 sm:$0xff]   ;;  %v10178_v30 = vld [vmem:[%s16857_s2 + $0x30] sm:$0xff]  }
  0x17   :  { %639 = vmatpush1.bf16.msra.mxu0 %v10047_v7  ;;  %9774 = vmatpush1.bf16.msra.mxu1 %v10047_v7  ;;  %v107_v2 = vld [vmem:[%s16856_s0 + $0x220] sm:$0xff]  ;;  %v108_v3 = vld [vmem:[%s16856_s0 + $0x228] sm:$0xff]  ;;  %v10110_v7 = vld [vmem:[%s16856_s0 + $0x134] ss:$8 sps:$4 sm:$0xff]  }
  0x18   :  { %640 = vmatprep.subr.bf16.mxu0 %v16867_v0  ;;  %9764 = vmatprep.subr.bf16.mxu1 %v16867_v0  ;;  %v10160_v4 = vld [vmem:[%s16856_s0 + $0x224] ss:$8 sps:$4 sm:$0xff]   ;;  %v9130_v5 = vcombine.low %v107_v2, %v108_v3 }
  0x1b   :  { %641 = vmatpush1.bf16.msra.mxu0 %v10048_v8  ;;  %9775 = vmatpush1.bf16.msra.mxu1 %v10048_v8  ;;  %v10112_v8 = vld [vmem:[%s16856_s0 + $0x130] ss:$8 sps:$4 sm:$0xff]  }
  0x1c   :  { %642 = vmatprep.subr.bf16.mxu0 %v16867_v0  ;;  %9765 = vmatprep.subr.bf16.mxu1 %v16867_v0 }
  0x1f   :  { %643 = vmatpush1.bf16.msra.mxu0 %v10049_v9  ;;  %9776 = vmatpush1.bf16.msra.mxu1 %v10049_v9  ;;  %v10113_v9 = vld [vmem:[%s16856_s0 + $0x144] ss:$8 sps:$4 sm:$0xff]  }
  0x20   :  { %644 = vmatprep.subr.bf16.mxu0 %v16867_v0  ;;  %9766 = vmatprep.subr.bf16.mxu1 %v16867_v0 }
  0x23   :  { %645 = vmatpush1.bf16.msra.mxu0 %v10050_v10  ;;  %9777 = vmatpush1.bf16.msra.mxu1 %v10050_v10  ;;  %v109_v10 = vld [vmem:[%s16856_s0 + $0x230] sm:$0xff] }
  0x24   :  { %646 = vmatprep.subr.bf16.mxu0 %v16867_v0  ;;  %9767 = vmatprep.subr.bf16.mxu1 %v16867_v0 }
  0x27   :  { %647 = vmatpush1.bf16.msra.mxu0 %v10051_v11  ;;  %9778 = vmatpush1.bf16.msra.mxu1 %v10051_v11  ;;  %v9133_v11 = vcombine.high %v109_v10, %v109_v10 }
  0x28   :  { %648 = vmatprep.subr.bf16.mxu0 %v16867_v0  ;;  %9768 = vmatprep.subr.bf16.mxu1 %v16867_v0 }
  0x2b   :  { %649 = vmatpush1.bf16.msra.mxu0 %v10052_v12  ;;  %9779 = vmatpush1.bf16.msra.mxu1 %v10052_v12  ;;  %v9132_v12 = vcombine.low %v109_v10, %v109_v10 }
  0x2c   :  { %6768 = vmatprep.subr.bf16.mxu0 %v16867_v0  ;;  %3183 = vmatprep.subr.bf16.mxu1 %v16867_v0 }
  0x2e   :  { %661 = vmatmul.mubr.bf16.vlgmr.msra.gmra.mrb[0].mxu0 %v10053_v13  ;;  %869 = vmatmul.mubr.bf16.vlgmr.msra.gmra.mrb[0].mxu1 %v10127_v29  ;;  %v10115_v13 = vld [vmem:[%s16856_s0 + $0x140] ss:$8 sps:$4 sm:$0xff]   ;;  %v10135_v29 = vld [vmem:[%s16856_s0 + $0x190] ss:$8 sps:$4 sm:$0xff]  }
  0x2f   :  { %9146 = vmatprep.mubr.msk.bf16.mxu0 %vm519_vm0, %v10056_v14  ;;  %9172 = vmatprep.mubr.msk.bf16.mxu1 %vm519_vm0, %v10133_v33  ;;  %v10116_v14 = vld [vmem:[%s16856_s0 + $0x154] ss:$8 sps:$4 sm:$0xff]   ;;  %v10181_v33 = vld [vmem:[%s16857_s2 + $0x40] sm:$0xff]  }
  0x36   :  { %669 = vmatmul.mubr.bf16.gmra.mrb[4].mxu0 %v10058_v15  ;;  %877 = vmatmul.mubr.bf16.gmra.mrb[4].mxu1 %v10136_v36  ;;  %v10118_v15 = vld [vmem:[%s16856_s0 + $0x150] ss:$8 sps:$4 sm:$0xff]  }
  0x37   :  { %9147 = vmatprep.mubr.msk.bf16.mxu0 %vm519_vm0, %v10059_v16  ;;  %9173 = vmatprep.mubr.msk.bf16.mxu1 %vm519_vm0, %v10137_v37  ;;  %v10119_v16 = vld [vmem:[%s16856_s0 + $0x164] ss:$8 sps:$4 sm:$0xff]  }
  0x3e   :  { %677 = vmatmul.mubr.bf16.gmra.mrb[8].mxu0 %v10061_v17  ;;  %885 = vmatmul.mubr.bf16.gmra.mrb[8].mxu1 %v10139_v39  ;;  %v10121_v17 = vld [vmem:[%s16856_s0 + $0x160] ss:$8 sps:$4 sm:$0xff]  }
  0x3f   :  { %9148 = vmatprep.mubr.msk.bf16.mxu0 %vm519_vm0, %v10062_v18  ;;  %9174 = vmatprep.mubr.msk.bf16.mxu1 %vm519_vm0, %v10140_v43  ;;  %v10122_v18 = vld [vmem:[%s16856_s0 + $0x174] ss:$8 sps:$4 sm:$0xff]   ;;  %v10183_v43 = vld [vmem:[%s16857_s2 + $0x48] sm:$0xff]  }
  0x46   :  { %685 = vmatmul.mubr.bf16.gmra.mrb[12].mxu0 %v10064_v19  ;;  %893 = vmatmul.mubr.bf16.gmra.mrb[12].mxu1 %v10142_v44  ;;  %v10168_v19 = vld [vmem:[%s16857_s2] sm:$0xff]  }
  0x47   :  { %9149 = vmatprep.mubr.msk.bf16.mxu0 %vm519_vm0, %v10065_v20  ;;  %9175 = vmatprep.mubr.msk.bf16.mxu1 %vm519_vm0, %v10143_v47  ;;  %v10170_v20 = vld [vmem:[%s16857_s2 + $0x8] sm:$0xff]  }
  0x48   :  { %3184 = vmatpush1.bf16.msra.mxu1 %v10168_v19 }
  0x49   :  { %3185 = vmatprep.subr.bf16.mxu1 %v16867_v0 }
  0x4c   :  { %3186 = vmatpush1.bf16.msra.mxu1 %v10170_v20 }
  0x4d   :  { %3187 = vmatprep.subr.bf16.mxu1 %v16867_v0 }
  0x4e   :  { %693 = vmatmul.mubr.bf16.gmra.mrb[16].mxu0 %v10067_v21  ;;  %901 = vmatmul.mubr.bf16.gmra.mrb[16].mxu1 %v10145_v48  ;;  %v10124_v21 = vld [vmem:[%s16856_s0 + $0x170] ss:$8 sps:$4 sm:$0xff]  }
  0x4f   :  { %9150 = vmatprep.mubr.msk.bf16.mxu0 %vm519_vm0, %v10068_v22  ;;  %9176 = vmatprep.mubr.msk.bf16.mxu1 %vm519_vm0, %v10146_v51  ;;  %v10125_v22 = vld [vmem:[%s16856_s0 + $0x184] ss:$8 sps:$4 sm:$0xff]  }
  0x56   :  { %701 = vmatmul.mubr.bf16.gmra.mrb[20].mxu0 %v10070_v23  ;;  %909 = vmatmul.mubr.bf16.gmra.mrb[20].mxu1 %v10148_v52  ;;  %v10171_v23 = vld [vmem:[%s16857_s2 + $0x10] sm:$0xff]  }
  0x57   :  { %9151 = vmatprep.mubr.msk.bf16.mxu0 %vm519_vm0, %v10071_v24  ;;  %9177 = vmatprep.mubr.msk.bf16.mxu1 %vm519_vm0, %v10149_v55  ;;  %v10130_v24 = vld [vmem:[%s16856_s0 + $0x180] ss:$8 sps:$4 sm:$0xff]   ;;  %v10186_v55 = vld [vmem:[%s16857_s2 + $0x58] sm:$0xff]  }
  0x58   :  { %3188 = vmatpush1.bf16.msra.mxu1 %v10171_v23 }
  0x59   :  { %3189 = vmatprep.subr.bf16.mxu1 %v16867_v0 }
  0x5e   :  { %709 = vmatmul.mubr.bf16.gmra.mrb[24].mxu0 %v10073_v25  ;;  %917 = vmatmul.mubr.bf16.gmra.mrb[24].mxu1 %v10151_v56  ;;  %v10131_v25 = vld [vmem:[%s16856_s0 + $0x194] ss:$8 sps:$4 sm:$0xff]  }
  0x5f   :  { %9152 = vmatprep.mubr.msk.bf16.mxu0 %vm519_vm0, %v10074_v26  ;;  %9178 = vmatprep.mubr.msk.bf16.mxu1 %vm519_vm0, %v10156_v59  ;;  %v10173_v26 = vld [vmem:[%s16857_s2 + $0x18] sm:$0xff]  }
  0x60   :  { %3190 = vmatpush1.bf16.msra.mxu1 %v10173_v26 }
  0x61   :  { %3191 = vmatprep.subr.bf16.mxu1 %v16867_v0 }
  0x66   :  { %717 = vmatmul.mubr.bf16.gmra.mrb[28].mxu0 %v10076_v27  ;;  %925 = vmatmul.mubr.bf16.gmra.mrb[28].mxu1 %v10158_v60  ;;  %v10174_v27 = vld [vmem:[%s16857_s2 + $0x20] sm:$0xff]  }
  0x67   :  { %9153 = vmatprep.mubr.msk.bf16.mxu0 %vm519_vm0, %v10077_v28  ;;  %9179 = vmatprep.mubr.msk.bf16.mxu1 %vm519_vm0, %v10160_v4  ;;  %v10176_v28 = vld [vmem:[%s16857_s2 + $0x28] sm:$0xff]   ;;  %v10187_v60 = vld [vmem:[%s16857_s2 + $0x60] sm:$0xff]  }
  0x68   :  { %3192 = vmatpush1.bf16.msra.mxu1 %v10174_v27 }
  0x69   :  { %3193 = vmatprep.subr.bf16.mxu1 %v16867_v0 }
  0x6c   :  { %3194 = vmatpush1.bf16.msra.mxu1 %v10176_v28  ;;  %v10191_v28 = vld [vmem:[%s16857_s2 + $0x70] sm:$0xff]  }
  0x6d   :  { %3195 = vmatprep.subr.bf16.mxu1 %v16867_v0 }
  0x6e   :  { %725 = vmatmul.mubr.bf16.gmra.mrb[32].mxu0 %v10079_v31  ;;  %933 = vmatmul.mubr.bf16.gmra.mrb[32].mxu1 %v9130_v5  ;;  %v10179_v31 = vld [vmem:[%s16857_s2 + $0x38] sm:$0xff]  }
  0x6f   :  { %9154 = vmatprep.mubr.msk.bf16.mxu0 %vm519_vm0, %v10080_v32  ;;  %9180 = vmatprep.mubr.msk.bf16.mxu1 %vm519_vm0, %v9133_v11  ;;  %v10189_v11 = vld [vmem:[%s16857_s2 + $0x68] sm:$0xff]  }
  0x70   :  { %3196 = vmatpush1.bf16.msra.mxu1 %v10178_v30 }
  0x71   :  { %3197 = vmatprep.subr.bf16.mxu1 %v16867_v0 }
  0x74   :  { %3198 = vmatpush1.bf16.msra.mxu1 %v10179_v31 }
  0x75   :  { %3199 = vmatprep.subr.bf16.mxu1 %v16867_v0 }
  0x76   :  { %733 = vmatmul.mubr.bf16.gmra.mrb[36].mxu0 %v10082_v34  ;;  %941 = vmatmul.mubr.bf16.gmra.mrb[36].mxu1 %v9132_v12 }
  0x77   :  { %9155 = vmatprep.mubr.msk.bf16.mxu0 %vm519_vm0, %v10083_v35 }
  0x78   :  { %3200 = vmatpush1.bf16.msra.mxu1 %v10181_v33 }
  0x79   :  { %3201 = vmatprep.subr.bf16.mxu1 %v16867_v0 }
  0x7c   :  { %3202 = vmatpush1.bf16.msra.mxu1 %v10183_v43 }
  0x7d   :  { %3203 = vmatprep.subr.bf16.mxu1 %v16867_v0 }
  0x7e   :  { %741 = vmatmul.mubr.bf16.gmra.mrb[40].mxu0 %v10085_v38 }
  0x7f   :  { %9156 = vmatprep.mubr.msk.bf16.mxu0 %vm519_vm0, %v10086_v40 }
  0x86   :  { %749 = vmatmul.mubr.bf16.gmra.mrb[44].mxu0 %v10088_v41 }
  0x87   :  { %9157 = vmatprep.mubr.msk.bf16.mxu0 %vm519_vm0, %v10089_v42 }
  0x8e   :  { %757 = vmatmul.mubr.bf16.gmra.mrb[48].mxu0 %v10091_v45  ;;  %v10184_v45 = vld [vmem:[%s16857_s2 + $0x50] sm:$0xff]  }
  0x8f   :  { %9158 = vmatprep.mubr.msk.bf16.mxu0 %vm519_vm0, %v10092_v46  ;;  %3204 = vmatpush1.bf16.msra.mxu1 %v10184_v45  ;;  %v10192_v45 = vld [vmem:[%s16857_s2 + $0x78] sm:$0xff]  }
  0x90   :  { %3205 = vmatprep.subr.bf16.mxu1 %v16867_v0 }
  0x93   :  { %3206 = vmatpush1.bf16.msra.mxu1 %v10186_v55 }
  0x94   :  { %3207 = vmatprep.subr.bf16.mxu1 %v16867_v0 }
  0x96   :  { %765 = vmatmul.mubr.bf16.gmra.mrb[52].mxu0 %v10094_v49 }
  0x97   :  { %9159 = vmatprep.mubr.msk.bf16.mxu0 %vm519_vm0, %v10095_v50  ;;  %3208 = vmatpush1.bf16.msra.mxu1 %v10187_v60 }
  0x98   :  { %3209 = vmatprep.subr.bf16.mxu1 %v16867_v0 }
  0x9b   :  { %3210 = vmatpush1.bf16.msra.mxu1 %v10189_v11 }
  0x9c   :  { %3211 = vmatprep.subr.bf16.mxu1 %v16867_v0 }
  0x9e   :  { %773 = vmatmul.mubr.bf16.gmra.mrb[56].mxu0 %v10097_v53 }
  0x9f   :  { %9160 = vmatprep.mubr.msk.bf16.mxu0 %vm519_vm0, %v10098_v54  ;;  %3212 = vmatpush1.bf16.msra.mxu1 %v10191_v28 }
  0xa0   :  { %3213 = vmatprep.subr.bf16.mxu1 %v16867_v0 }
  0xa3   :  { %3214 = vmatpush1.bf16.msra.mxu1 %v10192_v45 }
  0xa4   :  { %3472 = vmatprep.subr.bf16.mxu1 %v16867_v0 }
  0xa6   :  { %781 = vmatmul.mubr.bf16.gmra.mrb[60].mxu0 %v10100_v57 }
  0xa7   :  { %9161 = vmatprep.mubr.msk.bf16.mxu0 %vm519_vm0, %v10101_v58 }
  0xae   :  { %789 = vmatmul.mubr.bf16.gmra.mrb[64].mxu0 %v10103_v61 }
  0xaf   :  { %9162 = vmatprep.mubr.msk.bf16.mxu0 %vm519_vm0, %v10104_v62 }
  0xb6   :  { %797 = vmatmul.mubr.bf16.gmra.mrb[68].mxu0 %v10106_v63 }
  0xb7   :  { %9163 = vmatprep.mubr.msk.bf16.mxu0 %vm519_vm0, %v10107_v1 }
  0xbe   :  { %805 = vmatmul.mubr.bf16.gmra.mrb[72].mxu0 %v10109_v6 }
  0xbf   :  { %9164 = vmatprep.mubr.msk.bf16.mxu0 %vm519_vm0, %v10110_v7 }
  0xc6   :  { %813 = vmatmul.mubr.bf16.gmra.mrb[76].mxu0 %v10112_v8 }
  0xc7   :  { %9165 = vmatprep.mubr.msk.bf16.mxu0 %vm519_vm0, %v10113_v9 }
  0xce   :  { %821 = vmatmul.mubr.bf16.gmra.mrb[80].mxu0 %v10115_v13 }
  0xcf   :  { %9166 = vmatprep.mubr.msk.bf16.mxu0 %vm519_vm0, %v10116_v14 }
  0xd6   :  { %829 = vmatmul.mubr.bf16.gmra.mrb[84].mxu0 %v10118_v15 }
  0xd7   :  { %9167 = vmatprep.mubr.msk.bf16.mxu0 %vm519_vm0, %v10119_v16 }
  0xde   :  { %837 = vmatmul.mubr.bf16.gmra.mrb[88].mxu0 %v10121_v17 }
  0xdf   :  { %9168 = vmatprep.mubr.msk.bf16.mxu0 %vm519_vm0, %v10122_v18 }
  0xe6   :  { %845 = vmatmul.mubr.bf16.gmra.mrb[92].mxu0 %v10124_v21 }
  0xe7   :  { %9169 = vmatprep.mubr.msk.bf16.mxu0 %vm519_vm0, %v10125_v22 }
  0xee   :  { %853 = vmatmul.mubr.bf16.gmra.mrb[96].mxu0 %v10130_v24 }
  0xef   :  { %9170 = vmatprep.mubr.msk.bf16.mxu0 %vm519_vm0, %v10131_v25 }
  0xf6   :  { %861 = vmatmul.mubr.bf16.gmra.mrb[100].mxu0 %v10135_v29 }
 0x101   :  { %v662_v32 = vpop.f32.mrb[0].mxu0 }
 0x102   :  { %vm948_vm1 = vcmp.gt.f32.partialorder %v662_v32, 0.0  ;;  %v1019_v34 = vmul.f32 0.2, %v662_v32  ;;  %v664_v35 = vpop.f32.mrb[1].mxu0 }
 0x103   :  { %v665_v36 = vpop.f32.mrb[2].mxu0 }
 0x104   :  { %v1090_v37 = vsel %vm948_vm1, %v662_v32, %v1019_v34  ;;  %vm949_vm3 = vcmp.gt.f32.partialorder %v665_v36, 0.0  ;;  %v1020_v38 = vmul.f32 0.2, %v665_v36  ;;  %v667_v39 = vpop.f32.mrb[3].mxu0 }
 0x105   :  { %v9515_v40 = vpack.c.bf16 %v1090_v37, %v1090_v37 }
 0x106   :  { %v1091_v41 = vsel %vm949_vm3, %v665_v36, %v1020_v38 }
 0x107   :  { %1447 = vst.msk [vmem:[#allocation2] sm:$0xf] %vm1446_vm2, %v9515_v40  ;;  %v9516_v42 = vpack.c.bf16 %v1091_v41, %v1091_v41 }
 0x109   :  { %1448 = vst.msk [vmem:[#allocation2 + $0x4] sm:$0xf] %vm1446_vm2, %v9516_v42  ;;  %v670_v44 = vpop.f32.mrb[4].mxu0 }
 0x10a   :  { %vm950_vm4 = vcmp.gt.f32.partialorder %v670_v44, 0.0  ;;  %v1021_v46 = vmul.f32 0.2, %v670_v44  ;;  %v672_v47 = vpop.f32.mrb[5].mxu0 }
 0x10b   :  { %v673_v48 = vpop.f32.mrb[6].mxu0 }
 0x10c   :  { %v1092_v49 = vsel %vm950_vm4, %v670_v44, %v1021_v46  ;;  %vm951_vm5 = vcmp.gt.f32.partialorder %v673_v48, 0.0  ;;  %v1022_v50 = vmul.f32 0.2, %v673_v48  ;;  %v675_v51 = vpop.f32.mrb[7].mxu0 }
 0x10d   :  { %v9517_v52 = vpack.c.bf16 %v1092_v49, %v1092_v49 }
 0x10e   :  { %v1093_v53 = vsel %vm951_vm5, %v673_v48, %v1022_v50  ;;  %v1518_v57 = vld [vmem:[#allocation2] sm:$0xf] }
 0x10f   :  { %1449 = vst.msk [vmem:[#allocation2 + $0x8] sm:$0xf] %vm1446_vm2, %v9517_v52  ;;  %v9518_v54 = vpack.c.bf16 %v1093_v53, %v1093_v53  ;;  %v1583_v5 = vld [vmem:[#allocation2] sm:$0xe] }
 0x110   :  { %v1519_v56 = vld [vmem:[#allocation2 + $0x4] sm:$0xf] }
 0x111   :  { %1450 = vst.msk [vmem:[#allocation2 + $0xc] sm:$0xf] %vm1446_vm2, %v9518_v54  ;;  %v678_v58 = vpop.f32.mrb[8].mxu0  ;;  %v10782_v59 = vcombine.low %v1518_v57, %v1519_v56  ;;  %v9285_v7 = vcombine.low %v1583_v5, %v1519_v56 }
 0x112   :  { %vm952_vm6 = vcmp.gt.f32.partialorder %v678_v58, 0.0  ;;  %v1023_v61 = vmul.f32 0.2, %v678_v58  ;;  %v680_v62 = vpop.f32.mrb[9].mxu0 }
 0x113   :  { %v681_v63 = vpop.f32.mrb[10].mxu0  ;;  %v1767_v1 = vshll.u32 %v10782_v59, 16  ;;  %v2092_v17 = vrot.slane %v9285_v7, 1  ;;  %v1765_v21 = vshrl.u32 %v10782_v59, 16  ;;  %v2226_v22 = vshrl.u32 %v9285_v7, 16 }
 0x114   :  { %v1094_v2 = vsel %vm952_vm6, %v678_v58, %v1023_v61  ;;  %vm953_vm7 = vcmp.gt.f32.partialorder %v681_v63, 0.0  ;;  %v1024_v3 = vmul.f32 0.2, %v681_v63  ;;  %v683_v4 = vpop.f32.mrb[11].mxu0  ;;  %v2229_v27 = vshll.u32 %v9285_v7, 16 }
 0x115   :  { %v9519_v6 = vpack.c.bf16 %v1094_v2, %v1094_v2  ;;  %v1769_v10 = vrot.slane %v1767_v1, 1  ;;  %v2228_v38 = vrot.slane %v2226_v22, 1 }
 0x116   :  { %v1095_v8 = vsel %vm953_vm7, %v681_v63, %v1024_v3  ;;  %v1520_v12 = vld [vmem:[#allocation2 + $0x8] sm:$0xf]  ;;  %v2231_v43 = vrot.slane %v2229_v27, 2 }
 0x117   :  { %1451 = vst.msk [vmem:[#allocation2 + $0x10] sm:$0xf] %vm1446_vm2, %v9519_v6  ;;  %v9520_v9 = vpack.c.bf16 %v1095_v8, %v1095_v8  ;;  %v1588_v14 = vld [vmem:[#allocation2 + $0x8] sm:$0xe]  ;;  %v1770_v32 = vor.u32 %v1769_v10, %v1765_v21 }
 0x118   :  { %v1521_v13 = vld [vmem:[#allocation2 + $0xc] sm:$0xf]  ;;  %v2232_v10 = vor.u32 %v2231_v43, %v2228_v38 }
 0x119   :  { %1452 = vst.msk [vmem:[#allocation2 + $0x14] sm:$0xf] %vm1446_vm2, %v9520_v9  ;;  %v686_v15 = vpop.f32.mrb[12].mxu0  ;;  %v10795_v16 = vcombine.low %v1520_v12, %v1521_v13  ;;  %v10797_v18 = vcombine.low %v1588_v14, %v1521_v13 }
 0x11a   :  { %vm954_vm10 = vcmp.gt.f32.partialorder %v686_v15, 0.0  ;;  %v1025_v19 = vmul.f32 0.2, %v686_v15  ;;  %v688_v20 = vpop.f32.mrb[13].mxu0 }
 0x11b   :  { %v689_v23 = vpop.f32.mrb[14].mxu0  ;;  %v2093_v24 = vrot.slane %v10795_v16, 1  ;;  %v1772_v25 = vshll.u32 %v10795_v16, 16  ;;  %v1776_v26 = vshrl.u32 %v10795_v16, 16  ;;  %v2474_v36 = vshrl.u32 %v10797_v18, 16 }
 0x11c   :  { %v1096_v29 = vsel %vm954_vm10, %v686_v15, %v1025_v19  ;;  %vm955_vm11 = vcmp.gt.f32.partialorder %v689_v23, 0.0  ;;  %v1026_v30 = vmul.f32 0.2, %v689_v23  ;;  %v691_v31 = vpop.f32.mrb[15].mxu0  ;;  %v2477_v44 = vshll.u32 %v10797_v18, 16 }
 0x11d   :  { %v9521_v33 = vpack.c.bf16 %v1096_v29, %v1096_v29  ;;  %v2094_v34 = vsel %vm16934_vm8, %v2092_v17, %v2093_v24  ;;  %v1774_v35 = vrot.slane %v1772_v25, 1  ;;  %v2233_v39 = vrot.slane %v1776_v26, 1 }
 0x11e   :  { %v1097_v37 = vsel %vm955_vm11, %v689_v23, %v1026_v30  ;;  %2157 = vrot.lane.b32.xlu1 %v2094_v34, %s10357_s13  ;;  %v2234_v40 = vrot.slane %v1772_v25, 2  ;;  %v1522_v46 = vld [vmem:[#allocation2 + $0x10] sm:$0xf]  ;;  %v2458_v51 = vrot.slane %v10797_v18, 1  ;;  %v2476_v52 = vrot.slane %v2474_v36, 1 }
 0x11f   :  { %1453 = vst.msk [vmem:[#allocation2 + $0x18] sm:$0xf] %vm1446_vm2, %v9521_v33  ;;  %v9522_v41 = vpack.c.bf16 %v1097_v37, %v1097_v37  ;;  %v1775_v42 = vsel %vm1763_vm9, %v1770_v32, %v1774_v35  ;;  %v1593_v48 = vld [vmem:[#allocation2 + $0x10] sm:$0xe]  ;;  %v1778_v56 = vor.u32 %v1776_v26, %v1774_v35  ;;  %v2479_v63 = vrot.slane %v2477_v44, 2 }
 0x120   :  { %2024 = vrot.lane.b32.xlu0 %v1775_v42, %s10358_s16  ;;  %v1523_v47 = vld [vmem:[#allocation2 + $0x14] sm:$0xf]  ;;  %v10826_v57 = vor.u32 %v2234_v40, %v2233_v39 }
 0x121   :  { %1454 = vst.msk [vmem:[#allocation2 + $0x1c] sm:$0xf] %vm1446_vm2, %v9522_v41  ;;  %v694_v49 = vpop.f32.mrb[16].mxu0  ;;  %v10821_v50 = vcombine.low %v1522_v46, %v1523_v47  ;;  %v10824_v53 = vcombine.low %v1593_v48, %v1523_v47  ;;  %v2480_v20 = vor.u32 %v2479_v63, %v2476_v52 }
 0x122   :  { %vm956_vm13 = vcmp.gt.f32.partialorder %v694_v49, 0.0  ;;  %v1027_v54 = vmul.f32 0.2, %v694_v49  ;;  %v696_v55 = vpop.f32.mrb[17].mxu0  ;;  %v2236_v18 = vsel %vm2224_vm12, %v2232_v10, %v10826_v57 }
 0x123   :  { %v697_v58 = vpop.f32.mrb[18].mxu0  ;;  %v2095_v60 = vrot.slane %v10821_v50, 1  ;;  %v1780_v61 = vshll.u32 %v10821_v50, 16  ;;  %v1784_v62 = vshrl.u32 %v10821_v50, 16  ;;  %v2545_v4 = vshrl.u32 %v10824_v53, 16 }
 0x124   :  { %v1098_v1 = vsel %vm956_vm13, %v694_v49, %v1027_v54  ;;  %vm957_vm14 = vcmp.gt.f32.partialorder %v697_v58, 0.0  ;;  %v1028_v2 = vmul.f32 0.2, %v697_v58  ;;  %v699_v3 = vpop.f32.mrb[19].mxu0  ;;  %v2548_v17 = vshll.u32 %v10824_v53, 16 }
 0x125   :  { %v9523_v5 = vpack.c.bf16 %v1098_v1, %v1098_v1  ;;  %v2459_v6 = vsel %vm16934_vm8, %v2458_v51, %v2095_v60  ;;  %v1782_v7 = vrot.slane %v1780_v61, 1  ;;  %v2237_v8 = vrot.slane %v1784_v62, 1 }
 0x126   :  { %v1099_v9 = vsel %vm957_vm14, %v697_v58, %v1028_v2  ;;  %2464 = vrot.lane.b32.xlu1 %v2459_v6, %s10357_s13  ;;  %v2238_v11 = vrot.slane %v1780_v61, 2  ;;  %v1524_v12 = vld [vmem:[#allocation2 + $0x18] sm:$0xf]  ;;  %v2096_v25 = vsel %vm16934_vm8, %v2093_v24, %v2095_v60  ;;  %v2529_v26 = vrot.slane %v10824_v53, 1 }
 0x127   :  { %1455 = vst.msk [vmem:[#allocation2 + $0x20] sm:$0xf] %vm1446_vm2, %v9523_v5  ;;  %v9524_v13 = vpack.c.bf16 %v1099_v9, %v1099_v9  ;;  %v1783_v14 = vsel %vm1763_vm9, %v1778_v56, %v1782_v7  ;;  %v1598_v15 = vld [vmem:[#allocation2 + $0x18] sm:$0xe]  ;;  %v2547_v27 = vrot.slane %v2545_v4, 1  ;;  %v2550_v31 = vrot.slane %v2548_v17, 2 }
 0x128   :  { %2026 = vrot.lane.b32.xlu0 %v1783_v14, %s10358_s16  ;;  %v10841_v19 = vor.u32 %v2238_v11, %v2237_v8  ;;  %v1525_v21 = vld [vmem:[#allocation2 + $0x1c] sm:$0xf]  ;;  %v1786_v39 = vor.u32 %v1784_v62, %v1782_v7 }
 0x129   :  { %1456 = vst.msk [vmem:[#allocation2 + $0x24] sm:$0xf] %vm1446_vm2, %v9524_v13  ;;  %v702_v22 = vpop.f32.mrb[20].mxu0  ;;  %v10844_v23 = vcombine.low %v1524_v12, %v1525_v21  ;;  %v9297_v30 = vcombine.low %v1598_v15, %v1525_v21  ;;  %v2551_v47 = vor.u32 %v2550_v31, %v2547_v27 }
 0x12a   :  { %vm958_vm15 = vcmp.gt.f32.partialorder %v702_v22, 0.0  ;;  %v1029_v28 = vmul.f32 0.2, %v702_v22  ;;  %2366 = vrot.lane.b32.xlu1 %v2236_v18, %s10359_s17  ;;  %v704_v29 = vpop.f32.mrb[21].mxu0  ;;  %v2481_v33 = vsel %vm2224_vm12, %v2480_v20, %v10841_v19  ;;  %v2240_v20 = vsel %vm2224_vm12, %v10826_v57, %v10841_v19 }
 0x12b   :  { %v705_v32 = vpop.f32.mrb[22].mxu0  ;;  %v10854_v34 = vrot.slane %v10844_v23, 1  ;;  %v1788_v24 = vshll.u32 %v10844_v23, 16  ;;  %v1792_v35 = vshrl.u32 %v10844_v23, 16  ;;  %v2616_v51 = vshrl.u32 %v9297_v30, 16 }
 0x12c   :  { %v1100_v36 = vsel %vm958_vm15, %v702_v22, %v1029_v28  ;;  %vm959_vm0 = vcmp.gt.f32.partialorder %v705_v32, 0.0  ;;  %v1030_v37 = vmul.f32 0.2, %v705_v32  ;;  %2495 = vrot.lane.b32.xlu0 %v2481_v33, %s10359_s17  ;;  %v707_v38 = vpop.f32.mrb[23].mxu0  ;;  %v2619_v52 = vshll.u32 %v9297_v30, 16 }
 0x12d   :  { %v9525_v40 = vpack.c.bf16 %v1100_v36, %v1100_v36  ;;  %v2098_v41 = vsel %vm16934_vm8, %v2095_v60, %v10854_v34  ;;  %v2241_v42 = vrot.slane %v1792_v35, 1  ;;  %v2242_v43 = vrot.slane %v1788_v24, 2 }
 0x12e   :  { %v1101_v44 = vsel %vm959_vm0, %v705_v32, %v1030_v37  ;;  %2161 = vrot.lane.b32.xlu1 %v2098_v41, %s10357_s13  ;;  %v1790_v45 = vrot.slane %v1788_v24, 1  ;;  %v10864_v46 = vsel %vm16934_vm8, %v2529_v26, %v10854_v34  ;;  %v2600_v58 = vrot.slane %v9297_v30, 1 }
 0x12f   :  { %1457 = vst.msk [vmem:[#allocation2 + $0x28] sm:$0xf] %vm1446_vm2, %v9525_v40  ;;  %v9526_v48 = vpack.c.bf16 %v1101_v44, %v1101_v44  ;;  %v2243_v49 = vor.u32 %v2242_v43, %v2241_v42  ;;  %v2618_v5 = vrot.slane %v2616_v51, 1  ;;  %v2621_v6 = vrot.slane %v2619_v52, 2 }
 0x130   :  { %2159 = vrot.lane.b32.xlu0 %v2096_v25, %s10357_s13  ;;  %v10162_v53 = vld [vmem:[#allocation2 + $0x20] sm:$0xff]   ;;  %v1791_v56 = vsel %vm1763_vm9, %v1786_v39, %v1790_v45  ;;  %v1794_v3 = vor.u32 %v1792_v35, %v1790_v45 }
 0x131   :  { %1458 = vst.msk [vmem:[#allocation2 + $0x2c] sm:$0xf] %vm1446_vm2, %v9526_v48  ;;  %v710_v54 = vpop.f32.mrb[24].mxu0  ;;  %v2244_v55 = vsel %vm2224_vm12, %v10841_v19, %v2243_v49  ;;  %v10873_v60 = vsel %vm2224_vm12, %v2551_v47, %v2243_v49  ;;  %v1796_v63 = vshll.u32 %v10162_v53, 16  ;;  %v2099_v1 = vrot.slane %v10162_v53, 1 }
 0x132   :  { %vm960_vm1 = vcmp.gt.f32.partialorder %v710_v54, 0.0  ;;  %v1031_v61 = vmul.f32 0.2, %v710_v54  ;;  %2370 = vrot.lane.b32.xlu1 %v2244_v55, %s10359_s17  ;;  %v712_v62 = vpop.f32.mrb[25].mxu0  ;;  %v1800_v4 = vshrl.u32 %v10162_v53, 16  ;;  %v2622_v22 = vor.u32 %v2621_v6, %v2618_v5 }
 0x133   :  { %v713_v2 = vpop.f32.mrb[26].mxu0  ;;  %v1798_v10 = vrot.slane %v1796_v63, 1  ;;  %v2246_v13 = vrot.slane %v1796_v63, 2  ;;  %v10879_v17 = vsel %vm16934_vm8, %v2600_v58, %v2099_v1  ;;  %v2100_v32 = vsel %vm16934_vm8, %v10854_v34, %v2099_v1 }
 0x134   :  { %v1102_v7 = vsel %vm960_vm1, %v710_v54, %v1031_v61  ;;  %vm961_vm3 = vcmp.gt.f32.partialorder %v713_v2, 0.0  ;;  %v1032_v8 = vmul.f32 0.2, %v713_v2  ;;  %2028 = vrot.lane.b32.xlu0 %v1791_v56, %s10358_s16  ;;  %v715_v9 = vpop.f32.mrb[27].mxu0  ;;  %v2245_v12 = vrot.slane %v1800_v4, 1 }
 0x135   :  { %v9527_v11 = vpack.c.bf16 %v1102_v7, %v1102_v7  ;;  %v1799_v15 = vsel %vm1763_vm9, %v1794_v3, %v1798_v10  ;;  %v1802_v37 = vor.u32 %v1800_v4, %v1798_v10 }
 0x136   :  { %v1103_v14 = vsel %vm961_vm3, %v713_v2, %v1032_v8  ;;  %2030 = vrot.lane.b32.xlu1 %v1799_v15, %s10358_s16  ;;  %v2247_v21 = vor.u32 %v2246_v13, %v2245_v12 }
 0x137   :  { %1459 = vst.msk [vmem:[#allocation2 + $0x30] sm:$0xf] %vm1446_vm2, %v9527_v11  ;;  %v9528_v18 = vpack.c.bf16 %v1103_v14, %v1103_v14 }
 0x138   :  { %2368 = vrot.lane.b32.xlu0 %v2240_v20, %s10359_s17  ;;  %v10163_v25 = vld [vmem:[#allocation2 + $0x28] sm:$0xff]   ;;  %v2248_v27 = vsel %vm2224_vm12, %v2243_v49, %v2247_v21  ;;  %v10890_v28 = vsel %vm2224_vm12, %v2622_v22, %v2247_v21 }
 0x139   :  { %1460 = vst.msk [vmem:[#allocation2 + $0x34] sm:$0xf] %vm1446_vm2, %v9528_v18  ;;  %v718_v26 = vpop.f32.mrb[28].mxu0  ;;  %v2101_v31 = vrot.slane %v10163_v25, 1  ;;  %v1804_v57 = vshll.u32 %v10163_v25, 16  ;;  %v1808_v33 = vshrl.u32 %v10163_v25, 16 }
 0x13a   :  { %vm962_vm4 = vcmp.gt.f32.partialorder %v718_v26, 0.0  ;;  %v1033_v29 = vmul.f32 0.2, %v718_v26  ;;  %v720_v30 = vpop.f32.mrb[29].mxu0  ;;  %2372 = vrot.lane.b32.xlu1 %v2248_v27, %s10359_s17 }
 0x13b   :  { %v721_v19 = vpop.f32.mrb[30].mxu0  ;;  %v1806_v39 = vrot.slane %v1804_v57, 1  ;;  %v2249_v40 = vrot.slane %v1808_v33, 1  ;;  %v2250_v41 = vrot.slane %v1804_v57, 2  ;;  %v2102_v43 = vsel %vm16934_vm8, %v2099_v1, %v2101_v31 }
 0x13c   :  { %v1104_v24 = vsel %vm962_vm4, %v718_v26, %v1033_v29  ;;  %vm963_vm5 = vcmp.gt.f32.partialorder %v721_v19, 0.0  ;;  %v1034_v35 = vmul.f32 0.2, %v721_v19  ;;  %2163 = vrot.lane.b32.xlu0 %v2100_v32, %s10357_s13  ;;  %v723_v36 = vpop.f32.mrb[31].mxu0  ;;  %v870_v29 = vpop.f32.mrb[0].mxu1 }
 0x13d   :  { %v9529_v38 = vpack.c.bf16 %v1104_v24, %v1104_v24  ;;  %v1807_v44 = vsel %vm1763_vm9, %v1802_v37, %v1806_v39  ;;  %v2251_v45 = vor.u32 %v2250_v41, %v2249_v40  ;;  %v1810_v63 = vor.u32 %v1808_v33, %v1806_v39  ;;  %v872_v32 = vpop.f32.mrb[1].mxu1 }
 0x13e   :  { %v1105_v42 = vsel %vm963_vm5, %v721_v19, %v1034_v35  ;;  %2165 = vrot.lane.b32.xlu1 %v2102_v43, %s10357_s13  ;;  %v873_v24 = vpop.f32.mrb[2].mxu1  ;;  %vm1000_vm13 = vcmp.gt.f32.partialorder %v870_v29, 0.0  ;;  %v1071_v41 = vmul.f32 0.2, %v870_v29 }
 0x13f   :  { %1461 = vst.msk [vmem:[#allocation2 + $0x38] sm:$0xf] %vm1446_vm2, %v9529_v38  ;;  %v9530_v34 = vpack.c.bf16 %v1105_v42, %v1105_v42  ;;  %v2252_v54 = vsel %vm2224_vm12, %v2247_v21, %v2251_v45  ;;  %v875_v39 = vpop.f32.mrb[3].mxu1  ;;  %vm1001_vm14 = vcmp.gt.f32.partialorder %v873_v24, 0.0 }
 0x140   :  { %2032 = vrot.lane.b32.xlu0 %v1807_v44, %s10358_s16  ;;  %v10166_v47 = vld [vmem:[#allocation2 + $0x30] sm:$0xff]   ;;  %v878_v44 = vpop.f32.mrb[4].mxu1 }
 0x141   :  { %1462 = vst.msk [vmem:[#allocation2 + $0x3c] sm:$0xf] %vm1446_vm2, %v9530_v34  ;;  %v726_v48 = vpop.f32.mrb[32].mxu0  ;;  %v1812_v52 = vshll.u32 %v10166_v47, 16  ;;  %v2103_v55 = vrot.slane %v10166_v47, 1  ;;  %v1816_v56 = vshrl.u32 %v10166_v47, 16 }
 0x142   :  { %vm964_vm6 = vcmp.gt.f32.partialorder %v726_v48, 0.0  ;;  %v1035_v49 = vmul.f32 0.2, %v726_v48  ;;  %v728_v51 = vpop.f32.mrb[33].mxu0  ;;  %v1072_v34 = vmul.f32 0.2, %v873_v24 }
 0x143   :  { %v729_v53 = vpop.f32.mrb[34].mxu0  ;;  %v1814_v2 = vrot.slane %v1812_v52, 1  ;;  %v2253_v3 = vrot.slane %v1816_v56, 1  ;;  %v2254_v4 = vrot.slane %v1812_v52, 2  ;;  %v2104_v7 = vsel %vm16934_vm8, %v2101_v31, %v2103_v55 }
 0x144   :  { %v1106_v58 = vsel %vm964_vm6, %v726_v48, %v1035_v49  ;;  %vm965_vm7 = vcmp.gt.f32.partialorder %v729_v53, 0.0  ;;  %v1036_v61 = vmul.f32 0.2, %v729_v53  ;;  %2374 = vrot.lane.b32.xlu0 %v2252_v54, %s10359_s17  ;;  %v731_v62 = vpop.f32.mrb[35].mxu0  ;;  %v1142_v54 = vsel %vm1000_vm13, %v870_v29, %v1071_v41 }
 0x145   :  { %v9531_v1 = vpack.c.bf16 %v1106_v58, %v1106_v58  ;;  %v1815_v8 = vsel %vm1763_vm9, %v1810_v63, %v1814_v2  ;;  %v2255_v9 = vor.u32 %v2254_v4, %v2253_v3  ;;  %v1818_v27 = vor.u32 %v1816_v56, %v1814_v2  ;;  %v880_v56 = vpop.f32.mrb[5].mxu1 }
 0x146   :  { %v1107_v5 = vsel %vm965_vm7, %v729_v53, %v1036_v61  ;;  %2034 = vrot.lane.b32.xlu1 %v1815_v8, %s10358_s16  ;;  %vm1002_vm1 = vcmp.gt.f32.partialorder %v878_v44, 0.0  ;;  %v881_v63 = vpop.f32.mrb[6].mxu1 }
 0x147   :  { %1463 = vst.msk [vmem:[#allocation2 + $0x40] sm:$0xf] %vm1446_vm2, %v9531_v1  ;;  %v9532_v6 = vpack.c.bf16 %v1107_v5, %v1107_v5  ;;  %v2256_v18 = vsel %vm2224_vm12, %v2251_v45, %v2255_v9  ;;  %v883_v5 = vpop.f32.mrb[7].mxu1  ;;  %vm1003_vm3 = vcmp.gt.f32.partialorder %v881_v63, 0.0 }
 0x148   :  { %2167 = vrot.lane.b32.xlu0 %v2104_v7, %s10357_s13  ;;  %v10909_v10 = vld [vmem:[#allocation2 + $0x38] sm:$0xff]   ;;  %v9567_v7 = vpack.c.bf16 %v1142_v54, %v1142_v54 }
 0x149   :  { %1464 = vst.msk [vmem:[#allocation2 + $0x44] sm:$0xf] %vm1446_vm2, %v9532_v6  ;;  %v734_v11 = vpop.f32.mrb[36].mxu0  ;;  %v1820_v14 = vshll.u32 %v10909_v10, 16  ;;  %v2105_v20 = vrot.slane %v10909_v10, 1  ;;  %v1824_v21 = vshrl.u32 %v10909_v10, 16 }
 0x14a   :  { %vm966_vm10 = vcmp.gt.f32.partialorder %v734_v11, 0.0  ;;  %v1037_v12 = vmul.f32 0.2, %v734_v11  ;;  %v736_v13 = vpop.f32.mrb[37].mxu0  ;;  %2376 = vrot.lane.b32.xlu1 %v2256_v18, %s10359_s17  ;;  %1499 = vst.msk [vmem:[#allocation2 + $0xd0] sm:$0xf] %vm1446_vm2, %v9567_v7 }
 0x14b   :  { %v737_v15 = vpop.f32.mrb[38].mxu0  ;;  %v1822_v31 = vrot.slane %v1820_v14, 1  ;;  %v2257_v57 = vrot.slane %v1824_v21, 1  ;;  %v2258_v19 = vrot.slane %v1820_v14, 2  ;;  %v2106_v36 = vsel %vm16934_vm8, %v2103_v55, %v2105_v20 }
 0x14c   :  { %v1108_v22 = vsel %vm966_vm10, %v734_v11, %v1037_v12  ;;  %vm967_vm11 = vcmp.gt.f32.partialorder %v737_v15, 0.0  ;;  %v1038_v25 = vmul.f32 0.2, %v737_v15  ;;  %v739_v26 = vpop.f32.mrb[39].mxu0  ;;  %v1143_v55 = vsel %vm1001_vm14, %v873_v24, %v1072_v34  ;;  %v886_v11 = vpop.f32.mrb[8].mxu1 }
 0x14d   :  { %v9533_v30 = vpack.c.bf16 %v1108_v22, %v1108_v22  ;;  %v1823_v37 = vsel %vm1763_vm9, %v1818_v27, %v1822_v31  ;;  %v10922_v38 = vor.u32 %v2258_v19, %v2257_v57  ;;  %v1826_v43 = vor.u32 %v1824_v21, %v1822_v31  ;;  %v888_v18 = vpop.f32.mrb[9].mxu1 }
 0x14e   :  { %v1109_v33 = vsel %vm967_vm11, %v737_v15, %v1038_v25  ;;  %2169 = vrot.lane.b32.xlu1 %v2106_v36, %s10357_s13  ;;  %2036 = vrot.lane.b32.xlu0 %v1823_v37, %s10358_s16  ;;  %v9568_v8 = vpack.c.bf16 %v1143_v55, %v1143_v55  ;;  %v1074_v10 = vmul.f32 0.2, %v881_v63  ;;  %vm1004_vm4 = vcmp.gt.f32.partialorder %v886_v11, 0.0  ;;  %v889_v29 = vpop.f32.mrb[10].mxu1 }
 0x14f   :  { %1465 = vst.msk [vmem:[#allocation2 + $0x48] sm:$0xf] %vm1446_vm2, %v9533_v30  ;;  %v9534_v35 = vpack.c.bf16 %v1109_v33, %v1109_v33  ;;  %v2260_v48 = vsel %vm2224_vm12, %v2255_v9, %v10922_v38  ;;  %v1073_v9 = vmul.f32 0.2, %v878_v44  ;;  %v1075_v27 = vmul.f32 0.2, %v886_v11 }
 0x150   :  { %v10926_v40 = vld [vmem:[#allocation2 + $0x40] sm:$0xff]   ;;  %1500 = vst.msk [vmem:[#allocation2 + $0xd4] sm:$0xf] %vm1446_vm2, %v9568_v8  ;;  %v891_v37 = vpop.f32.mrb[11].mxu1  ;;  %vm1005_vm7 = vcmp.gt.f32.partialorder %v889_v29, 0.0 }
 0x151   :  { %1466 = vst.msk [vmem:[#allocation2 + $0x4c] sm:$0xf] %vm1446_vm2, %v9534_v35  ;;  %v742_v42 = vpop.f32.mrb[40].mxu0  ;;  %v1828_v49 = vshll.u32 %v10926_v40, 16  ;;  %v2107_v52 = vrot.slane %v10926_v40, 1  ;;  %v1832_v53 = vshrl.u32 %v10926_v40, 16  ;;  %v1144_v22 = vsel %vm1002_vm1, %v878_v44, %v1073_v9 }
 0x152   :  { %vm968_vm15 = vcmp.gt.f32.partialorder %v742_v42, 0.0  ;;  %v1039_v45 = vmul.f32 0.2, %v742_v42  ;;  %v744_v47 = vpop.f32.mrb[41].mxu0  ;;  %2378 = vrot.lane.b32.xlu0 %v2260_v48, %s10359_s17  ;;  %v9569_v26 = vpack.c.bf16 %v1144_v22, %v1144_v22  ;;  %v1145_v35 = vsel %vm1003_vm3, %v881_v63, %v1074_v10 }
 0x153   :  { %v745_v51 = vpop.f32.mrb[42].mxu0  ;;  %v1830_v2 = vrot.slane %v1828_v49, 1  ;;  %v2261_v3 = vrot.slane %v1832_v53, 1  ;;  %v2262_v4 = vrot.slane %v1828_v49, 2  ;;  %v2108_v13 = vsel %vm16934_vm8, %v2105_v20, %v2107_v52 }
 0x154   :  { %v1110_v58 = vsel %vm968_vm15, %v742_v42, %v1039_v45  ;;  %vm969_vm0 = vcmp.gt.f32.partialorder %v745_v51, 0.0  ;;  %v1040_v61 = vmul.f32 0.2, %v745_v51  ;;  %v747_v62 = vpop.f32.mrb[43].mxu0  ;;  %1501 = vst.msk [vmem:[#allocation2 + $0xd8] sm:$0xf] %vm1446_vm2, %v9569_v26  ;;  %v1146_v36 = vsel %vm1004_vm4, %v886_v11, %v1075_v27 }
 0x155   :  { %v9535_v1 = vpack.c.bf16 %v1110_v58, %v1110_v58  ;;  %v1831_v14 = vsel %vm1763_vm9, %v1826_v43, %v1830_v2  ;;  %v10943_v15 = vor.u32 %v2262_v4, %v2261_v3  ;;  %v1834_v25 = vor.u32 %v1832_v53, %v1830_v2 }
 0x156   :  { %v1111_v6 = vsel %vm969_vm0, %v745_v51, %v1040_v61  ;;  %2171 = vrot.lane.b32.xlu0 %v2108_v13, %s10357_s13  ;;  %2038 = vrot.lane.b32.xlu1 %v1831_v14, %s10358_s16  ;;  %v9570_v49 = vpack.c.bf16 %v1145_v35, %v1145_v35  ;;  %v9571_v51 = vpack.c.bf16 %v1146_v36, %v1146_v36  ;;  %v1076_v53 = vmul.f32 0.2, %v889_v29 }
 0x157   :  { %1467 = vst.msk [vmem:[#allocation2 + $0x50] sm:$0xf] %vm1446_vm2, %v9535_v1  ;;  %v9536_v12 = vpack.c.bf16 %v1111_v6, %v1111_v6  ;;  %v2264_v57 = vsel %vm2224_vm12, %v10922_v38, %v10943_v15  ;;  %v894_v38 = vpop.f32.mrb[12].mxu1 }
 0x158   :  { %v10947_v21 = vld [vmem:[#allocation2 + $0x48] sm:$0xff]   ;;  %v896_v47 = vpop.f32.mrb[13].mxu1  ;;  %1502 = vst.msk [vmem:[#allocation2 + $0xdc] sm:$0xf] %vm1446_vm2, %v9570_v49  ;;  %1503 = vst.msk [vmem:[#allocation2 + $0xe0] sm:$0xf] %vm1446_vm2, %v9571_v51  ;;  %v1147_v63 = vsel %vm1005_vm7, %v889_v29, %v1076_v53 }
 0x159   :  { %1468 = vst.msk [vmem:[#allocation2 + $0x54] sm:$0xf] %vm1446_vm2, %v9536_v12  ;;  %v750_v20 = vpop.f32.mrb[44].mxu0  ;;  %v1836_v19 = vshll.u32 %v10947_v21, 16  ;;  %v2109_v33 = vrot.slane %v10947_v21, 1  ;;  %v1840_v24 = vshrl.u32 %v10947_v21, 16  ;;  %v9572_v1 = vpack.c.bf16 %v1147_v63, %v1147_v63 }
 0x15a   :  { %vm970_vm5 = vcmp.gt.f32.partialorder %v750_v20, 0.0  ;;  %v1041_v30 = vmul.f32 0.2, %v750_v20  ;;  %v752_v31 = vpop.f32.mrb[45].mxu0  ;;  %2380 = vrot.lane.b32.xlu1 %v2264_v57, %s10359_s17  ;;  %v897_v61 = vpop.f32.mrb[14].mxu1  ;;  %vm1006_vm10 = vcmp.gt.f32.partialorder %v894_v38, 0.0 }
 0x15b   :  { %v753_v32 = vpop.f32.mrb[46].mxu0  ;;  %v1838_v34 = vrot.slane %v1836_v19, 1  ;;  %v2265_v44 = vrot.slane %v1840_v24, 1  ;;  %v2266_v45 = vrot.slane %v1836_v19, 2  ;;  %v2110_v55 = vsel %vm16934_vm8, %v2107_v52, %v2109_v33  ;;  %v899_v3 = vpop.f32.mrb[15].mxu1 }
 0x15c   :  { %v1112_v39 = vsel %vm970_vm5, %v750_v20, %v1041_v30  ;;  %vm971_vm6 = vcmp.gt.f32.partialorder %v753_v32, 0.0  ;;  %v1042_v41 = vmul.f32 0.2, %v753_v32  ;;  %v755_v42 = vpop.f32.mrb[47].mxu0  ;;  %v1077_v40 = vmul.f32 0.2, %v894_v38 }
 0x15d   :  { %v9537_v43 = vpack.c.bf16 %v1112_v39, %v1112_v39  ;;  %v1839_v56 = vsel %vm1763_vm9, %v1834_v25, %v1838_v34  ;;  %v10969_v58 = vor.u32 %v2266_v45, %v2265_v44  ;;  %vm1007_vm11 = vcmp.gt.f32.partialorder %v897_v61, 0.0  ;;  %1504 = vst.msk [vmem:[#allocation2 + $0xe4] sm:$0xf] %vm1446_vm2, %v9572_v1  ;;  %v902_v27 = vpop.f32.mrb[16].mxu1 }
 0x15e   :  { %v1113_v48 = vsel %vm971_vm6, %v753_v32, %v1042_v41  ;;  %2173 = vrot.lane.b32.xlu1 %v2110_v55, %s10357_s13  ;;  %2040 = vrot.lane.b32.xlu0 %v1839_v56, %s10358_s16  ;;  %v1078_v2 = vmul.f32 0.2, %v897_v61  ;;  %v1148_v12 = vsel %vm1006_vm10, %v894_v38, %v1077_v40  ;;  %v1842_v10 = vor.u32 %v1840_v24, %v1838_v34  ;;  %v904_v57 = vpop.f32.mrb[17].mxu1 }
 0x15f   :  { %1469 = vst.msk [vmem:[#allocation2 + $0x58] sm:$0xf] %vm1446_vm2, %v9537_v43  ;;  %v9538_v54 = vpack.c.bf16 %v1113_v48, %v1113_v48  ;;  %v2268_v6 = vsel %vm2224_vm12, %v10943_v15, %v10969_v58  ;;  %v9573_v30 = vpack.c.bf16 %v1148_v12, %v1148_v12  ;;  %v905_v36 = vpop.f32.mrb[18].mxu1  ;;  %vm1008_vm15 = vcmp.gt.f32.partialorder %v902_v27, 0.0 }
 0x160   :  { %v10973_v62 = vld [vmem:[#allocation2 + $0x50] sm:$0xff]   ;;  %v1149_v13 = vsel %vm1007_vm11, %v897_v61, %v1078_v2  ;;  %v1079_v39 = vmul.f32 0.2, %v902_v27  ;;  %vm1009_vm0 = vcmp.gt.f32.partialorder %v905_v36, 0.0  ;;  %v907_v41 = vpop.f32.mrb[19].mxu1 }
 0x161   :  { %1470 = vst.msk [vmem:[#allocation2 + $0x5c] sm:$0xf] %vm1446_vm2, %v9538_v54  ;;  %v758_v52 = vpop.f32.mrb[48].mxu0  ;;  %v1844_v7 = vshll.u32 %v10973_v62, 16  ;;  %v2111_v9 = vrot.slane %v10973_v62, 1  ;;  %v1848_v11 = vshrl.u32 %v10973_v62, 16  ;;  %v9574_v31 = vpack.c.bf16 %v1149_v13, %v1149_v13 }
 0x162   :  { %vm972_vm13 = vcmp.gt.f32.partialorder %v758_v52, 0.0  ;;  %v1043_v4 = vmul.f32 0.2, %v758_v52  ;;  %v760_v5 = vpop.f32.mrb[49].mxu0  ;;  %2382 = vrot.lane.b32.xlu0 %v2268_v6, %s10359_s17  ;;  %1505 = vst.msk [vmem:[#allocation2 + $0xe8] sm:$0xf] %vm1446_vm2, %v9573_v30  ;;  %v1150_v48 = vsel %vm1008_vm15, %v902_v27, %v1079_v39 }
 0x163   :  { %v761_v8 = vpop.f32.mrb[50].mxu0  ;;  %v1846_v20 = vrot.slane %v1844_v7, 1  ;;  %v2269_v25 = vrot.slane %v1848_v11, 1  ;;  %v2270_v26 = vrot.slane %v1844_v7, 2  ;;  %v2112_v32 = vsel %vm16934_vm8, %v2109_v33, %v2111_v9  ;;  %1506 = vst.msk [vmem:[#allocation2 + $0xec] sm:$0xf] %vm1446_vm2, %v9574_v31 }
 0x164   :  { %v1114_v14 = vsel %vm972_vm13, %v758_v52, %v1043_v4  ;;  %vm973_vm14 = vcmp.gt.f32.partialorder %v761_v8, 0.0  ;;  %v1044_v18 = vmul.f32 0.2, %v761_v8  ;;  %v763_v22 = vpop.f32.mrb[51].mxu0  ;;  %v1080_v33 = vmul.f32 0.2, %v905_v36 }
 0x165   :  { %v9539_v15 = vpack.c.bf16 %v1114_v14, %v1114_v14  ;;  %v1847_v24 = vsel %vm1763_vm9, %v1842_v10, %v1846_v20  ;;  %v2271_v35 = vor.u32 %v2270_v26, %v2269_v25  ;;  %v1850_v55 = vor.u32 %v1848_v11, %v1846_v20  ;;  %v910_v40 = vpop.f32.mrb[20].mxu1 }
 0x166   :  { %v1115_v29 = vsel %vm973_vm14, %v761_v8, %v1044_v18  ;;  %2175 = vrot.lane.b32.xlu0 %v2112_v32, %s10357_s13  ;;  %2042 = vrot.lane.b32.xlu1 %v1847_v24, %s10358_s16  ;;  %v1151_v49 = vsel %vm1009_vm0, %v905_v36, %v1080_v33  ;;  %v9575_v1 = vpack.c.bf16 %v1150_v48, %v1150_v48  ;;  %v912_v3 = vpop.f32.mrb[21].mxu1  ;;  %vm1010_vm4 = vcmp.gt.f32.partialorder %v910_v40, 0.0 }
 0x167   :  { %1471 = vst.msk [vmem:[#allocation2 + $0x60] sm:$0xf] %vm1446_vm2, %v9539_v15  ;;  %v9540_v19 = vpack.c.bf16 %v1115_v29, %v1115_v29  ;;  %v2272_v43 = vsel %vm2224_vm12, %v10969_v58, %v2271_v35  ;;  %v9576_v2 = vpack.c.bf16 %v1151_v49, %v1151_v49  ;;  %v913_v8 = vpop.f32.mrb[22].mxu1 }
 0x168   :  { %v10997_v37 = vld [vmem:[#allocation2 + $0x58] sm:$0xff]   ;;  %1507 = vst.msk [vmem:[#allocation2 + $0xf0] sm:$0xf] %vm1446_vm2, %v9575_v1  ;;  %v915_v12 = vpop.f32.mrb[23].mxu1  ;;  %vm1011_vm7 = vcmp.gt.f32.partialorder %v913_v8, 0.0 }
 0x169   :  { %1472 = vst.msk [vmem:[#allocation2 + $0x64] sm:$0xf] %vm1446_vm2, %v9540_v19  ;;  %v766_v21 = vpop.f32.mrb[52].mxu0  ;;  %v1852_v34 = vshll.u32 %v10997_v37, 16  ;;  %v2113_v45 = vrot.slane %v10997_v37, 1  ;;  %v1856_v47 = vshrl.u32 %v10997_v37, 16 }
 0x16a   :  { %vm974_vm1 = vcmp.gt.f32.partialorder %v766_v21, 0.0  ;;  %v1045_v42 = vmul.f32 0.2, %v766_v21  ;;  %v768_v38 = vpop.f32.mrb[53].mxu0  ;;  %2384 = vrot.lane.b32.xlu1 %v2272_v43, %s10359_s17  ;;  %1508 = vst.msk [vmem:[#allocation2 + $0xf4] sm:$0xf] %vm1446_vm2, %v9576_v2 }
 0x16b   :  { %v769_v44 = vpop.f32.mrb[54].mxu0  ;;  %v1854_v61 = vrot.slane %v1852_v34, 1  ;;  %v2273_v63 = vrot.slane %v1856_v47, 1  ;;  %v2274_v58 = vrot.slane %v1852_v34, 2  ;;  %v2114_v5 = vsel %vm16934_vm8, %v2111_v9, %v2113_v45  ;;  %v11022_v13 = vpop.f32.mrb[24].mxu1 }
 0x16c   :  { %v1116_v51 = vsel %vm974_vm1, %v766_v21, %v1045_v42  ;;  %vm975_vm3 = vcmp.gt.f32.partialorder %v769_v44, 0.0  ;;  %v1046_v53 = vmul.f32 0.2, %v769_v44  ;;  %v771_v54 = vpop.f32.mrb[55].mxu0  ;;  %v1081_v9 = vmul.f32 0.2, %v910_v40 }
 0x16d   :  { %v9541_v56 = vpack.c.bf16 %v1116_v51, %v1116_v51  ;;  %v1855_v6 = vsel %vm1763_vm9, %v1850_v55, %v1854_v61  ;;  %v2275_v7 = vor.u32 %v2274_v58, %v2273_v63  ;;  %v920_v27 = vpop.f32.mrb[25].mxu1  ;;  %v1858_v57 = vor.u32 %v1856_v47, %v1854_v61 }
 0x16e   :  { %v1117_v52 = vsel %vm975_vm3, %v769_v44, %v1046_v53  ;;  %2177 = vrot.lane.b32.xlu1 %v2114_v5, %s10357_s13  ;;  %2044 = vrot.lane.b32.xlu0 %v1855_v6, %s10358_s16  ;;  %v1152_v26 = vsel %vm1010_vm4, %v910_v40, %v1081_v9  ;;  %v11029_v19 = vpop.f32.mrb[26].mxu1  ;;  %v1082_v44 = vmul.f32 0.2, %v913_v8  ;;  %vm1012_vm13 = vcmp.gt.f32.partialorder %v11022_v13, 0.0 }
 0x16f   :  { %1473 = vst.msk [vmem:[#allocation2 + $0x68] sm:$0xf] %vm1446_vm2, %v9541_v56  ;;  %v9542_v4 = vpack.c.bf16 %v1117_v52, %v1117_v52  ;;  %v2276_v15 = vsel %vm2224_vm12, %v2271_v35, %v2275_v7  ;;  %v923_v35 = vpop.f32.mrb[27].mxu1  ;;  %v9577_v33 = vpack.c.bf16 %v1152_v26, %v1152_v26  ;;  %vm1013_vm14 = vcmp.gt.f32.partialorder %v11029_v19, 0.0 }
 0x170   :  { %v11017_v11 = vld [vmem:[#allocation2 + $0x60] sm:$0xff]   ;;  %v1153_v55 = vsel %vm1011_vm7, %v913_v8, %v1082_v44  ;;  %v11046_v56 = vpop.f32.mrb[28].mxu1  ;;  %vm2643_vm7 = vcmask 261120  }
 0x171   :  { %1474 = vst.msk [vmem:[#allocation2 + $0x6c] sm:$0xf] %vm1446_vm2, %v9542_v4  ;;  %v774_v62 = vpop.f32.mrb[56].mxu0  ;;  %v1860_v22 = vshll.u32 %v11017_v11, 16  ;;  %v2115_v20 = vrot.slane %v11017_v11, 1  ;;  %v1864_v25 = vshrl.u32 %v11017_v11, 16  ;;  %v9578_v6 = vpack.c.bf16 %v1153_v55, %v1153_v55 }
 0x172   :  { %vm976_vm5 = vcmp.gt.f32.partialorder %v774_v62, 0.0  ;;  %v1047_v14 = vmul.f32 0.2, %v774_v62  ;;  %v776_v18 = vpop.f32.mrb[57].mxu0  ;;  %2386 = vrot.lane.b32.xlu0 %v2276_v15, %s10359_s17  ;;  %1509 = vst.msk [vmem:[#allocation2 + $0xf8] sm:$0xf] %vm1446_vm2, %v9577_v33 }
 0x173   :  { %v777_v10 = vpop.f32.mrb[58].mxu0  ;;  %v1862_v24 = vrot.slane %v1860_v22, 1  ;;  %v2277_v36 = vrot.slane %v1864_v25, 1  ;;  %v2278_v39 = vrot.slane %v1860_v22, 2  ;;  %v2116_v42 = vsel %vm16934_vm8, %v2113_v45, %v2115_v20  ;;  %v928_v52 = vpop.f32.mrb[29].mxu1 }
 0x174   :  { %v1118_v29 = vsel %vm976_vm5, %v774_v62, %v1047_v14  ;;  %vm977_vm6 = vcmp.gt.f32.partialorder %v777_v10, 0.0  ;;  %v1048_v30 = vmul.f32 0.2, %v777_v10  ;;  %v779_v31 = vpop.f32.mrb[59].mxu0  ;;  %v11053_v62 = vpop.f32.mrb[30].mxu1  ;;  %vm1014_vm3 = vcmp.gt.f32.partialorder %v11046_v56, 0.0 }
 0x175   :  { %v9543_v32 = vpack.c.bf16 %v1118_v29, %v1118_v29  ;;  %v1863_v38 = vsel %vm1763_vm9, %v1858_v57, %v1862_v24  ;;  %v2279_v43 = vor.u32 %v2278_v39, %v2277_v36  ;;  %v1866_v40 = vor.u32 %v1864_v25, %v1862_v24  ;;  %1510 = vst.msk [vmem:[#allocation2 + $0xfc] sm:$0xf] %vm1446_vm2, %v9578_v6 }
 0x176   :  { %v1119_v21 = vsel %vm977_vm6, %v777_v10, %v1048_v30  ;;  %2179 = vrot.lane.b32.xlu0 %v2116_v42, %s10357_s13  ;;  %2046 = vrot.lane.b32.xlu1 %v1863_v38, %s10358_s16  ;;  %v1083_v14 = vmul.f32 0.2, %v11022_v13  ;;  %v1084_v22 = vmul.f32 0.2, %v11029_v19  ;;  %v931_v10 = vpop.f32.mrb[31].mxu1 }
 0x177   :  { %1475 = vst.msk [vmem:[#allocation2 + $0x70] sm:$0xf] %vm1446_vm2, %v9543_v32  ;;  %v9544_v41 = vpack.c.bf16 %v1119_v21, %v1119_v21  ;;  %v2280_v51 = vsel %vm2224_vm12, %v2275_v7, %v2279_v43 }
 0x178   :  { %v11038_v34 = vld [vmem:[#allocation2 + $0x68] sm:$0xff]   ;;  %v1154_v31 = vsel %vm1012_vm13, %v11022_v13, %v1083_v14  ;;  %v1155_v57 = vsel %vm1013_vm14, %v11029_v19, %v1084_v22  ;;  %vm2773_vm13 = vcmask 785408  }
 0x179   :  { %1476 = vst.msk [vmem:[#allocation2 + $0x74] sm:$0xf] %vm1446_vm2, %v9544_v41  ;;  %v782_v47 = vpop.f32.mrb[60].mxu0  ;;  %v1868_v45 = vshll.u32 %v11038_v34, 16  ;;  %v2117_v53 = vrot.slane %v11038_v34, 1  ;;  %v1872_v54 = vshrl.u32 %v11038_v34, 16  ;;  %v9579_v38 = vpack.c.bf16 %v1154_v31, %v1154_v31 }
 0x17a   :  { %vm978_vm10 = vcmp.gt.f32.partialorder %v782_v47, 0.0  ;;  %v1049_v37 = vmul.f32 0.2, %v782_v47  ;;  %v784_v48 = vpop.f32.mrb[61].mxu0  ;;  %2388 = vrot.lane.b32.xlu1 %v2280_v51, %s10359_s17 }
 0x17b   :  { %v785_v49 = vpop.f32.mrb[62].mxu0  ;;  %v1870_v2 = vrot.slane %v1868_v45, 1  ;;  %v2281_v3 = vrot.slane %v1872_v54, 1  ;;  %v2282_v4 = vrot.slane %v1868_v45, 2  ;;  %v2118_v8 = vsel %vm16934_vm8, %v2115_v20, %v2117_v53  ;;  %1511 = vst.msk [vmem:[#allocation2 + $0x100] sm:$0xf] %vm1446_vm2, %v9579_v38 }
 0x17c   :  { %v1120_v61 = vsel %vm978_vm10, %v782_v47, %v1049_v37  ;;  %vm979_vm11 = vcmp.gt.f32.partialorder %v785_v49, 0.0  ;;  %v1050_v63 = vmul.f32 0.2, %v785_v49  ;;  %v787_v58 = vpop.f32.mrb[63].mxu0  ;;  %v1085_v48 = vmul.f32 0.2, %v11046_v56 }
 0x17d   :  { %v9545_v1 = vpack.c.bf16 %v1120_v61, %v1120_v61  ;;  %v1871_v11 = vsel %vm1763_vm9, %v1866_v40, %v1870_v2  ;;  %v2283_v12 = vor.u32 %v2282_v4, %v2281_v3  ;;  %v1874_v39 = vor.u32 %v1872_v54, %v1870_v2 }
 0x17e   :  { %v1121_v5 = vsel %vm979_vm11, %v785_v49, %v1050_v63  ;;  %2181 = vrot.lane.b32.xlu1 %v2118_v8, %s10357_s13  ;;  %2048 = vrot.lane.b32.xlu0 %v1871_v11, %s10358_s16  ;;  %v11089_v63 = vpop.f32.mrb[32].mxu1  ;;  %v1156_v11 = vsel %vm1014_vm3, %v11046_v56, %v1085_v48  ;;  %vm1015_vm10 = vcmp.gt.f32.partialorder %v11053_v62, 0.0  ;;  %vm16931_vm11 = vcmask 523264  }
 0x17f   :  { %1477 = vst.msk [vmem:[#allocation2 + $0x78] sm:$0xf] %vm1446_vm2, %v9545_v1  ;;  %v9546_v7 = vpack.c.bf16 %v1121_v5, %v1121_v5  ;;  %v2284_v25 = vsel %vm2224_vm12, %v2279_v43, %v2283_v12  ;;  %v9580_v43 = vpack.c.bf16 %v1155_v57, %v1155_v57  ;;  %v936_v2 = vpop.f32.mrb[33].mxu1 }
 0x180   :  { %v11057_v9 = vld [vmem:[#allocation2 + $0x70] sm:$0xff]  }
 0x181   :  { %1478 = vst.msk [vmem:[#allocation2 + $0x7c] sm:$0xf] %vm1446_vm2, %v9546_v7  ;;  %v790_v18 = vpop.f32.mrb[64].mxu0  ;;  %v1876_v26 = vshll.u32 %v11057_v9, 16  ;;  %v2119_v29 = vrot.slane %v11057_v9, 1  ;;  %v1880_v30 = vshrl.u32 %v11057_v9, 16 }
 0x182   :  { %vm980_vm15 = vcmp.gt.f32.partialorder %v790_v18, 0.0  ;;  %v1051_v15 = vmul.f32 0.2, %v790_v18  ;;  %v792_v20 = vpop.f32.mrb[65].mxu0  ;;  %2390 = vrot.lane.b32.xlu0 %v2284_v25, %s10359_s17  ;;  %1512 = vst.msk [vmem:[#allocation2 + $0x104] sm:$0xf] %vm1446_vm2, %v9580_v43 }
 0x183   :  { %v793_v27 = vpop.f32.mrb[66].mxu0  ;;  %v1878_v21 = vrot.slane %v1876_v26, 1  ;;  %v2285_v33 = vrot.slane %v1880_v30, 1  ;;  %v2286_v41 = vrot.slane %v1876_v26, 2  ;;  %v2120_v13 = vsel %vm16934_vm8, %v2117_v53, %v2119_v29  ;;  %v11092_v7 = vpop.f32.mrb[34].mxu1 }
 0x184   :  { %v1122_v32 = vsel %vm980_vm15, %v790_v18, %v1051_v15  ;;  %vm981_vm0 = vcmp.gt.f32.partialorder %v793_v27, 0.0  ;;  %v1052_v24 = vmul.f32 0.2, %v793_v27  ;;  %v795_v36 = vpop.f32.mrb[67].mxu0  ;;  %v9581_v15 = vpack.c.bf16 %v1156_v11, %v1156_v11 }
 0x185   :  { %v9547_v35 = vpack.c.bf16 %v1122_v32, %v1122_v32  ;;  %v1879_v19 = vsel %vm1763_vm9, %v1874_v39, %v1878_v21  ;;  %v2287_v44 = vor.u32 %v2286_v41, %v2285_v33  ;;  %v1882_v1 = vor.u32 %v1880_v30, %v1878_v21 }
 0x186   :  { %v1123_v42 = vsel %vm981_vm0, %v793_v27, %v1052_v24  ;;  %2183 = vrot.lane.b32.xlu0 %v2120_v13, %s10357_s13  ;;  %2050 = vrot.lane.b32.xlu1 %v1879_v19, %s10358_s16  ;;  %1513 = vst.msk [vmem:[#allocation2 + $0x108] sm:$0xf] %vm1446_vm2, %v9581_v15  ;;  %v1086_v19 = vmul.f32 0.2, %v11053_v62  ;;  %vm1016_vm0 = vcmp.gt.f32.partialorder %v11089_v63, 0.0  ;;  %vm1017_vm3 = vcmp.gt.f32.partialorder %v11092_v7, 0.0 }
 0x187   :  { %1479 = vst.msk [vmem:[#allocation2 + $0x80] sm:$0xf] %vm1446_vm2, %v9547_v35  ;;  %v9548_v34 = vpack.c.bf16 %v1123_v42, %v1123_v42  ;;  %v2288_v54 = vsel %vm2224_vm12, %v2283_v12, %v2287_v44  ;;  %v939_v12 = vpop.f32.mrb[35].mxu1 }
 0x188   :  { %v11078_v47 = vld [vmem:[#allocation2 + $0x78] sm:$0xff]   ;;  %v11145_v15 = vpop.f32.mrb[36].mxu1 }
 0x189   :  { %1480 = vst.msk [vmem:[#allocation2 + $0x84] sm:$0xf] %vm1446_vm2, %v9548_v34  ;;  %v798_v37 = vpop.f32.mrb[68].mxu0  ;;  %v1884_v51 = vshll.u32 %v11078_v47, 16  ;;  %v2121_v55 = vrot.slane %v11078_v47, 1  ;;  %v1888_v61 = vshrl.u32 %v11078_v47, 16 }
 0x18a   :  { %vm982_vm1 = vcmp.gt.f32.partialorder %v798_v37, 0.0  ;;  %v1053_v45 = vmul.f32 0.2, %v798_v37  ;;  %v800_v49 = vpop.f32.mrb[69].mxu0  ;;  %2392 = vrot.lane.b32.xlu1 %v2288_v54, %s10359_s17 }
 0x18b   :  { %v801_v53 = vpop.f32.mrb[70].mxu0  ;;  %v1886_v4 = vrot.slane %v1884_v51, 1  ;;  %v2289_v5 = vrot.slane %v1888_v61, 1  ;;  %v2290_v6 = vrot.slane %v1884_v51, 2  ;;  %v2122_v14 = vsel %vm16934_vm8, %v2119_v29, %v2121_v55 }
 0x18c   :  { %v1124_v58 = vsel %vm982_vm1, %v798_v37, %v1053_v45  ;;  %vm983_vm4 = vcmp.gt.f32.partialorder %v801_v53, 0.0  ;;  %v1054_v40 = vmul.f32 0.2, %v801_v53  ;;  %v803_v52 = vpop.f32.mrb[71].mxu0  ;;  %v1157_v49 = vsel %vm1015_vm10, %v11053_v62, %v1086_v19 }
 0x18d   :  { %v9549_v3 = vpack.c.bf16 %v1124_v58, %v1124_v58  ;;  %v1887_v18 = vsel %vm1763_vm9, %v1882_v1, %v1886_v4  ;;  %v2291_v22 = vor.u32 %v2290_v6, %v2289_v5  ;;  %v1890_v35 = vor.u32 %v1888_v61, %v1886_v4 }
 0x18e   :  { %v1125_v8 = vsel %vm983_vm4, %v801_v53, %v1054_v40  ;;  %2185 = vrot.lane.b32.xlu1 %v2122_v14, %s10357_s13  ;;  %2052 = vrot.lane.b32.xlu0 %v1887_v18, %s10358_s16  ;;  %v9582_v1 = vpack.c.bf16 %v1157_v49, %v1157_v49  ;;  %v10194_v14 = vld [vmem:[%s16857_s2 + $0x80] sm:$0xff]  }
 0x18f   :  { %1481 = vst.msk [vmem:[#allocation2 + $0x88] sm:$0xf] %vm1446_vm2, %v9549_v3  ;;  %v9550_v9 = vpack.c.bf16 %v1125_v8, %v1125_v8  ;;  %v2292_v29 = vsel %vm2224_vm12, %v2287_v44, %v2291_v22 }
 0x190   :  { %v11100_v10 = vld [vmem:[#allocation2 + $0x80] sm:$0xff]   ;;  %v2158_v57 = vpop.permute.xlu1 %2157  ;;  %1514 = vst.msk [vmem:[#allocation2 + $0x10c] sm:$0xf] %vm1446_vm2, %v9582_v1 }
 0x191   :  { %1482 = vst.msk [vmem:[#allocation2 + $0x8c] sm:$0xf] %vm1446_vm2, %v9550_v9  ;;  %v806_v20 = vpop.f32.mrb[72].mxu0  ;;  %v1892_v26 = vshll.u32 %v11100_v10, 16  ;;  %v2123_v30 = vrot.slane %v11100_v10, 1  ;;  %v1896_v31 = vshrl.u32 %v11100_v10, 16 }
 0x192   :  { %vm984_vm5 = vcmp.gt.f32.partialorder %v806_v20, 0.0  ;;  %v1055_v56 = vmul.f32 0.2, %v806_v20  ;;  %v808_v25 = vpop.f32.mrb[73].mxu0  ;;  %2394 = vrot.lane.b32.xlu0 %v2292_v29, %s10359_s17  ;;  %v2025_v41 = vpop.permute.xlu0 %2024 }
 0x193   :  { %v809_v27 = vpop.f32.mrb[74].mxu0  ;;  %v1894_v21 = vrot.slane %v1892_v26, 1  ;;  %v2293_v33 = vrot.slane %v1896_v31, 1  ;;  %v2294_v38 = vrot.slane %v1892_v26, 2  ;;  %v2124_v34 = vsel %vm16934_vm8, %v2121_v55, %v2123_v30 }
 0x194   :  { %v1126_v32 = vsel %vm984_vm5, %v806_v20, %v1055_v56  ;;  %vm985_vm6 = vcmp.gt.f32.partialorder %v809_v27, 0.0  ;;  %v1056_v24 = vmul.f32 0.2, %v809_v27  ;;  %v811_v36 = vpop.f32.mrb[75].mxu0  ;;  %v2645_v48 = vsel %vm2643_vm7, %v10782_v59, %v2025_v41 }
 0x195   :  { %v9551_v39 = vpack.c.bf16 %v1126_v32, %v1126_v32  ;;  %v1895_v13 = vsel %vm1763_vm9, %v1890_v35, %v1894_v21  ;;  %v11118_v47 = vor.u32 %v2294_v38, %v2293_v33  ;;  %v2710_v6 = vsel %vm16931_vm11, %v2645_v48, %v2158_v57 }
 0x196   :  { %v1127_v42 = vsel %vm985_vm6, %v809_v27, %v1056_v24  ;;  %2187 = vrot.lane.b32.xlu0 %v2124_v34, %s10357_s13  ;;  %2054 = vrot.lane.b32.xlu1 %v1895_v13, %s10358_s16  ;;  %v1898_v8 = vor.u32 %v1896_v31, %v1894_v21  ;;  %v944_v27 = vpop.f32.mrb[37].mxu1  ;;  %v1087_v41 = vmul.f32 0.2, %v11089_v63 }
 0x197   :  { %1483 = vst.msk [vmem:[#allocation2 + $0x90] sm:$0xf] %vm1446_vm2, %v9551_v39  ;;  %v9552_v43 = vpack.c.bf16 %v1127_v42, %v1127_v42  ;;  %v2296_v55 = vsel %vm2224_vm12, %v2291_v22, %v11118_v47  ;;  %v945_v24 = vpop.f32.mrb[38].mxu1 }
 0x198   :  { %v2465_v44 = vpop.permute.xlu1 %2464  ;;  %v11120_v37 = vld [vmem:[#allocation2 + $0x88] sm:$0xff]   ;;  %v946_v36 = vpop.f32.mrb[39].mxu1 }
 0x199   :  { %1484 = vst.msk [vmem:[#allocation2 + $0x94] sm:$0xf] %vm1446_vm2, %v9552_v43  ;;  %v814_v45 = vpop.f32.mrb[76].mxu0  ;;  %v2125_v61 = vrot.slane %v11120_v37, 1  ;;  %v1900_v40 = vshll.u32 %v11120_v37, 16  ;;  %v1904_v52 = vshrl.u32 %v11120_v37, 16 }
 0x19a   :  { %vm986_vm14 = vcmp.gt.f32.partialorder %v814_v45, 0.0  ;;  %v1057_v51 = vmul.f32 0.2, %v814_v45  ;;  %v2027_v53 = vpop.permute.xlu0 %2026  ;;  %v816_v54 = vpop.f32.mrb[77].mxu0  ;;  %2396 = vrot.lane.b32.xlu1 %v2296_v55, %s10359_s17 }
 0x19b   :  { %v11133_v59 = vsel %vm2643_vm7, %v10795_v16, %v2027_v53  ;;  %v817_v58 = vpop.f32.mrb[78].mxu0  ;;  %v1902_v11 = vrot.slane %v1900_v40, 1  ;;  %v2297_v18 = vrot.slane %v1904_v52, 1  ;;  %v2298_v22 = vrot.slane %v1900_v40, 2 }
 0x19c   :  { %v1128_v62 = vsel %vm986_vm14, %v814_v45, %v1057_v51  ;;  %vm987_vm15 = vcmp.gt.f32.partialorder %v817_v58, 0.0  ;;  %v1058_v2 = vmul.f32 0.2, %v817_v58  ;;  %v2367_v3 = vpop.permute.xlu1 %2366  ;;  %v819_v4 = vpop.f32.mrb[79].mxu0  ;;  %v2875_v9 = vsel %vm16931_vm11, %v11133_v59, %v2465_v44 }
 0x19d   :  { %v9553_v5 = vpack.c.bf16 %v1128_v62, %v1128_v62  ;;  %v2126_v25 = vsel %vm16934_vm8, %v2123_v30, %v2125_v61  ;;  %v1903_v26 = vsel %vm1763_vm9, %v1898_v8, %v1902_v11  ;;  %v2775_v29 = vsel %vm2773_vm13, %v2710_v6, %v2367_v3  ;;  %v10197_v30 = vld [vmem:[%s16857_s2 + $0x88] sm:$0xff]  }
 0x19e   :  { %v1129_v16 = vsel %vm987_vm15, %v817_v58, %v1058_v2  ;;  %v2496_v12 = vpop.permute.xlu0 %2495  ;;  %2189 = vrot.lane.b32.xlu1 %v2126_v25, %s10357_s13  ;;  %v11157_v57 = vor.u32 %v2298_v22, %v2297_v18  ;;  %2056 = vrot.lane.b32.xlu0 %v1903_v26, %s10358_s16  ;;  %v1906_v33 = vor.u32 %v1904_v52, %v1902_v11  ;;  %v10200_v58 = vld [vmem:[%s16857_s2 + $0x90] sm:$0xff]   ;;  %v1088_v52 = vmul.f32 0.2, %v11092_v7  ;;  %v10203_v18 = vld [vmem:[%s16857_s2 + $0x98] sm:$0xff]  }
 0x19f   :  { %1485 = vst.msk [vmem:[#allocation2 + $0x98] sm:$0xf] %vm1446_vm2, %v9553_v5  ;;  %v9554_v20 = vpack.c.bf16 %v1129_v16, %v1129_v16  ;;  %v2881_v56 = vsel %vm2773_vm13, %v2875_v9, %v2496_v12  ;;  %v1158_v40 = vsel %vm1016_vm0, %v11089_v63, %v1087_v41 }
 0x1a0   :  { %3215 = vmatprep.mubr.bf16.mxu1 %v2881_v56  ;;  %v2162_v31 = vpop.permute.xlu1 %2161  ;;  %v11159_v32 = vld [vmem:[#allocation2 + $0x90] sm:$0xff]   ;;  %v2300_v38 = vsel %vm2224_vm12, %v11118_v47, %v11157_v57  ;;  %v9583_v6 = vpack.c.bf16 %v1158_v40, %v1158_v40 }
 0x1a1   :  { %1486 = vst.msk [vmem:[#allocation2 + $0x9c] sm:$0xf] %vm1446_vm2, %v9554_v20  ;;  %v822_v10 = vpop.f32.mrb[80].mxu0  ;;  %3216 = vmatmul.mubr.bf16.vlgmr.msra.gmra.mrb[40].mxu1 %v2775_v29  ;;  %v1908_v43 = vshll.u32 %v11159_v32, 16  ;;  %v1912_v34 = vshrl.u32 %v11159_v32, 16  ;;  %v2127_v45 = vrot.slane %v11159_v32, 1 }
 0x1a2   :  { %vm988_vm1 = vcmp.gt.f32.partialorder %v822_v10, 0.0  ;;  %v1059_v39 = vmul.f32 0.2, %v822_v10  ;;  %v2160_v35 = vpop.permute.xlu0 %2159  ;;  %v824_v21 = vpop.f32.mrb[81].mxu0  ;;  %3473 = vmatpush1.bf16.msra.mxu1 %v10194_v14  ;;  %2398 = vrot.lane.b32.xlu0 %v2300_v38, %s10359_s17  ;;  %1515 = vst.msk [vmem:[#allocation2 + $0x110] sm:$0xf] %vm1446_vm2, %v9583_v6 }
 0x1a3   :  { %v825_v42 = vpop.f32.mrb[82].mxu0  ;;  %3474 = vmatprep.subr.bf16.mxu1 %v16867_v0  ;;  %v1910_v51 = vrot.slane %v1908_v43, 1  ;;  %v2301_v47 = vrot.slane %v1912_v34, 1  ;;  %v2302_v53 = vrot.slane %v1908_v43, 2  ;;  %v2128_v4 = vsel %vm16934_vm8, %v2125_v61, %v2127_v45  ;;  %v10206_v21 = vld [vmem:[%s16857_s2 + $0xa0] sm:$0xff]  }
 0x1a4   :  { %v1130_v13 = vsel %vm988_vm1, %v822_v10, %v1059_v39  ;;  %vm989_vm4 = vcmp.gt.f32.partialorder %v825_v42, 0.0  ;;  %v1060_v19 = vmul.f32 0.2, %v825_v42  ;;  %v2371_v44 = vpop.permute.xlu1 %2370  ;;  %v827_v48 = vpop.f32.mrb[83].mxu0  ;;  %v2712_v16 = vsel %vm16931_vm11, %v11133_v59, %v2160_v35 }
 0x1a5   :  { %v9555_v49 = vpack.c.bf16 %v1130_v13, %v1130_v13  ;;  %v1911_v2 = vsel %vm1763_vm9, %v1906_v33, %v1910_v51  ;;  %v11190_v3 = vor.u32 %v2302_v53, %v2301_v47 }
 0x1a6   :  { %v1131_v54 = vsel %vm989_vm4, %v825_v42, %v1060_v19  ;;  %v2029_v55 = vpop.permute.xlu0 %2028  ;;  %3475 = vmatpush1.bf16.msra.mxu1 %v10197_v30  ;;  %2058 = vrot.lane.b32.xlu1 %v1911_v2, %s10358_s16 }
 0x1a7   :  { %1487 = vst.msk [vmem:[#allocation2 + $0xa0] sm:$0xf] %vm1446_vm2, %v9555_v49  ;;  %v9556_v1 = vpack.c.bf16 %v1131_v54, %v1131_v54  ;;  %v11187_v62 = vsel %vm2643_vm7, %v10821_v50, %v2029_v55  ;;  %3476 = vmatprep.subr.bf16.mxu1 %v16867_v0  ;;  %v1159_v50 = vsel %vm1017_vm3, %v11092_v7, %v1088_v52  ;;  %v10210_v49 = vld [vmem:[%s16857_s2 + $0xa8] sm:$0xff]  }
 0x1a8   :  { %v2714_v63 = vsel %vm16931_vm11, %v11187_v62, %v2162_v31  ;;  %v11199_v5 = vld [vmem:[#allocation2 + $0x98] sm:$0xff]   ;;  %2191 = vrot.lane.b32.xlu0 %v2128_v4, %s10357_s13  ;;  %v2031_v61 = vpop.permute.xlu1 %2030  ;;  %v9584_v11 = vpack.c.bf16 %v1159_v50, %v1159_v50  ;;  %v2304_v59 = vsel %vm2224_vm12, %v11157_v57, %v11190_v3  ;;  %v1914_v31 = vor.u32 %v1912_v34, %v1910_v51  ;;  %v10323_v51 = vld [vmem:[#allocation2 + $0x20] sm:$0xff]  }
 0x1a9   :  { %1488 = vst.msk [vmem:[#allocation2 + $0xa4] sm:$0xf] %vm1446_vm2, %v9556_v1  ;;  %v830_v8 = vpop.f32.mrb[84].mxu0  ;;  %v11207_v37 = vsel %vm2773_vm13, %v2714_v63, %v2371_v44  ;;  %v2129_v7 = vrot.slane %v11199_v5, 1  ;;  %v1916_v56 = vshll.u32 %v11199_v5, 16  ;;  %v1920_v25 = vshrl.u32 %v11199_v5, 16 }
 0x1aa   :  { %vm990_vm5 = vcmp.gt.f32.partialorder %v830_v8, 0.0  ;;  %v1061_v12 = vmul.f32 0.2, %v830_v8  ;;  %3223 = vmatprep.mubr.bf16.mxu1 %v11207_v37  ;;  %v2369_v9 = vpop.permute.xlu0 %2368  ;;  %v832_v14 = vpop.f32.mrb[85].mxu0  ;;  %3477 = vmatpush1.bf16.msra.mxu1 %v10200_v58  ;;  %1516 = vst.msk [vmem:[#allocation2 + $0x114] sm:$0xf] %vm1446_vm2, %v9584_v11  ;;  %v11229_v30 = vsel %vm2643_vm7, %v10844_v23, %v2031_v61 }
 0x1ab   :  { %v833_v22 = vpop.f32.mrb[86].mxu0  ;;  %v2778_v20 = vsel %vm2773_vm13, %v2712_v16, %v2369_v9  ;;  %3478 = vmatprep.subr.bf16.mxu1 %v16867_v0  ;;  %2400 = vrot.lane.b32.xlu1 %v2304_v59, %s10359_s17  ;;  %v1918_v24 = vrot.slane %v1916_v56, 1  ;;  %v2305_v57 = vrot.slane %v1920_v25, 1  ;;  %v2306_v10 = vrot.slane %v1916_v56, 2  ;;  %v10213_v16 = vld [vmem:[%s16857_s2 + $0xb0] sm:$0xff]  }
 0x1ac   :  { %v1132_v26 = vsel %vm990_vm5, %v830_v8, %v1061_v12  ;;  %vm991_vm6 = vcmp.gt.f32.partialorder %v833_v22, 0.0  ;;  %v1062_v27 = vmul.f32 0.2, %v833_v22  ;;  %3224 = vmatmul.mubr.bf16.gmra.mrb[44].mxu1 %v2778_v20  ;;  %v835_v29 = vpop.f32.mrb[87].mxu0  ;;  %v2130_v35 = vsel %vm16934_vm8, %v2127_v45, %v2129_v7  ;;  %v2373_v42 = vpop.permute.xlu1 %2372 }
 0x1ad   :  { %v9557_v32 = vpack.c.bf16 %v1132_v26, %v1132_v26  ;;  %v1919_v23 = vsel %vm1763_vm9, %v1914_v31, %v1918_v24  ;;  %v11241_v38 = vor.u32 %v2306_v10, %v2305_v57  ;;  %v1922_v63 = vor.u32 %v1920_v25, %v1918_v24  ;;  %v10324_v25 = vld [vmem:[#allocation2 + $0x28] sm:$0xff]  }
 0x1ae   :  { %v1133_v36 = vsel %vm991_vm6, %v833_v22, %v1062_v27  ;;  %v2164_v39 = vpop.permute.xlu0 %2163  ;;  %3479 = vmatpush1.bf16.msra.mxu1 %v10203_v18  ;;  %2060 = vrot.lane.b32.xlu0 %v1919_v23, %s10358_s16  ;;  %vm1018_vm5 = vcmp.gt.f32.partialorder %v11145_v15, 0.0 }
 0x1af   :  { %1489 = vst.msk [vmem:[#allocation2 + $0xa8] sm:$0xf] %vm1446_vm2, %v9557_v32  ;;  %v9558_v33 = vpack.c.bf16 %v1133_v36, %v1133_v36  ;;  %v2716_v41 = vsel %vm16931_vm11, %v11229_v30, %v2164_v39  ;;  %3480 = vmatprep.subr.bf16.mxu1 %v16867_v0  ;;  %2193 = vrot.lane.b32.xlu1 %v2130_v35, %s10357_s13 }
 0x1b0   :  { %v11247_v43 = vsel %vm2773_vm13, %v2716_v41, %v2373_v42  ;;  %v11249_v34 = vld [vmem:[#allocation2 + $0xa0] sm:$0xff]   ;;  %v2308_v54 = vsel %vm2224_vm12, %v11190_v3, %v11241_v38  ;;  %v2166_v4 = vpop.permute.xlu1 %2165 }
 0x1b1   :  { %1490 = vst.msk [vmem:[#allocation2 + $0xac] sm:$0xf] %vm1446_vm2, %v9558_v33  ;;  %v838_v13 = vpop.f32.mrb[88].mxu0  ;;  %3231 = vmatprep.mubr.bf16.mxu1 %v11247_v43  ;;  %v1924_v45 = vshll.u32 %v11249_v34, 16  ;;  %v2131_v55 = vrot.slane %v11249_v34, 1  ;;  %v1928_v58 = vshrl.u32 %v11249_v34, 16 }
 0x1b2   :  { %vm992_vm10 = vcmp.gt.f32.partialorder %v838_v13, 0.0  ;;  %v1063_v19 = vmul.f32 0.2, %v838_v13  ;;  %v2033_v44 = vpop.permute.xlu0 %2032  ;;  %v840_v48 = vpop.f32.mrb[89].mxu0  ;;  %3481 = vmatpush1.bf16.msra.mxu1 %v10206_v21  ;;  %2402 = vrot.lane.b32.xlu0 %v2308_v54, %s10359_s17  ;;  %v10226_v34 = vld [vmem:[%s16857_s2 + $0xc8] sm:$0xff]  }
 0x1b3   :  { %v2653_v47 = vsel %vm2643_vm7, %v10323_v51, %v2033_v44  ;;  %v841_v53 = vpop.f32.mrb[90].mxu0  ;;  %3482 = vmatprep.subr.bf16.mxu1 %v16867_v0  ;;  %v1926_v6 = vrot.slane %v1924_v45, 1  ;;  %v2309_v50 = vrot.slane %v1928_v58, 1  ;;  %v2310_v11 = vrot.slane %v1924_v45, 2 }
 0x1b4   :  { %v1134_v40 = vsel %vm992_vm10, %v838_v13, %v1063_v19  ;;  %vm993_vm14 = vcmp.gt.f32.partialorder %v841_v53, 0.0  ;;  %v1064_v52 = vmul.f32 0.2, %v841_v53  ;;  %3232 = vmatmul.mubr.bf16.gmra.mrb[48].mxu1 %v11207_v37  ;;  %v843_v1 = vpop.f32.mrb[91].mxu0  ;;  %v2718_v8 = vsel %vm16931_vm11, %v2653_v47, %v2166_v4 }
 0x1b5   :  { %v9559_v2 = vpack.c.bf16 %v1134_v40, %v1134_v40  ;;  %v2132_v9 = vsel %vm16934_vm8, %v2129_v7, %v2131_v55  ;;  %v1927_v14 = vsel %vm1763_vm9, %v1922_v63, %v1926_v6  ;;  %v2311_v18 = vor.u32 %v2310_v11, %v2309_v50  ;;  %v10218_v7 = vld [vmem:[%s16857_s2 + $0xb8] sm:$0xff]  }
 0x1b6   :  { %v1135_v3 = vsel %vm993_vm14, %v841_v53, %v1064_v52  ;;  %v2375_v61 = vpop.permute.xlu0 %2374  ;;  %3483 = vmatpush1.bf16.msra.mxu1 %v10210_v49  ;;  %2195 = vrot.lane.b32.xlu0 %v2132_v9, %s10357_s13  ;;  %v1930_v36 = vor.u32 %v1928_v58, %v1926_v6  ;;  %v10325_v52 = vld [vmem:[#allocation2 + $0x30] sm:$0xff]  }
 0x1b7   :  { %1491 = vst.msk [vmem:[#allocation2 + $0xb0] sm:$0xf] %vm1446_vm2, %v9559_v2  ;;  %v9560_v37 = vpack.c.bf16 %v1135_v3, %v1135_v3  ;;  %v11272_v12 = vsel %vm2773_vm13, %v2718_v8, %v2375_v61  ;;  %3484 = vmatprep.subr.bf16.mxu1 %v16867_v0  ;;  %2062 = vrot.lane.b32.xlu1 %v1927_v14, %s10358_s16 }
 0x1b8   :  { %3239 = vmatprep.mubr.bf16.mxu1 %v11272_v12  ;;  %v11283_v22 = vld [vmem:[#allocation2 + $0xa8] sm:$0xff]   ;;  %v2035_v59 = vpop.permute.xlu1 %2034  ;;  %v2312_v57 = vsel %vm2224_vm12, %v11241_v38, %v2311_v18  ;;  %v10221_v38 = vld [vmem:[%s16857_s2 + $0xc0] sm:$0xff]  }
 0x1b9   :  { %1492 = vst.msk [vmem:[#allocation2 + $0xb4] sm:$0xf] %vm1446_vm2, %v9560_v37  ;;  %v846_v20 = vpop.f32.mrb[92].mxu0  ;;  %v2655_v26 = vsel %vm2643_vm7, %v10324_v25, %v2035_v59  ;;  %v1932_v29 = vshll.u32 %v11283_v22, 16  ;;  %v1936_v31 = vshrl.u32 %v11283_v22, 16  ;;  %v2133_v10 = vrot.slane %v11283_v22, 1 }
 0x1ba   :  { %vm994_vm15 = vcmp.gt.f32.partialorder %v846_v20, 0.0  ;;  %v1065_v5 = vmul.f32 0.2, %v846_v20  ;;  %3485 = vmatpush1.bf16.msra.mxu1 %v10213_v16  ;;  %v2168_v56 = vpop.permute.xlu0 %2167  ;;  %v848_v27 = vpop.f32.mrb[93].mxu0 }
 0x1bb   :  { %3486 = vmatprep.subr.bf16.mxu1 %v16867_v0  ;;  %v849_v24 = vpop.f32.mrb[94].mxu0  ;;  %2404 = vrot.lane.b32.xlu1 %v2312_v57, %s10359_s17  ;;  %v1934_v33 = vrot.slane %v1932_v29, 1  ;;  %v2720_v41 = vsel %vm16931_vm11, %v2655_v26, %v2168_v56  ;;  %v2313_v23 = vrot.slane %v1936_v31, 1  ;;  %v2314_v13 = vrot.slane %v1932_v29, 2 }
 0x1bc   :  { %v1136_v32 = vsel %vm994_vm15, %v846_v20, %v1065_v5  ;;  %3240 = vmatmul.mubr.bf16.gmra.mrb[52].mxu1 %v11247_v43  ;;  %vm995_vm0 = vcmp.gt.f32.partialorder %v849_v24, 0.0  ;;  %v1066_v35 = vmul.f32 0.2, %v849_v24  ;;  %v851_v21 = vpop.f32.mrb[95].mxu0  ;;  %v2377_v42 = vpop.permute.xlu1 %2376  ;;  %v2134_v49 = vsel %vm16934_vm8, %v2131_v55, %v2133_v10  ;;  %v10229_v5 = vld [vmem:[%s16857_s2 + $0xd0] sm:$0xff]  }
 0x1bd   :  { %v9561_v39 = vpack.c.bf16 %v1136_v32, %v1136_v32  ;;  %v11305_v44 = vsel %vm2773_vm13, %v2720_v41, %v2377_v42  ;;  %v1935_v48 = vsel %vm1763_vm9, %v1930_v36, %v1934_v33  ;;  %v11314_v51 = vor.u32 %v2314_v13, %v2313_v23  ;;  %v10326_v36 = vld [vmem:[#allocation2 + $0x38] sm:$0xff]  }
 0x1be   :  { %3487 = vmatpush1.bf16.msra.mxu1 %v10218_v7  ;;  %v1137_v19 = vsel %vm995_vm0, %v849_v24, %v1066_v35  ;;  %3247 = vmatprep.mubr.bf16.mxu1 %v11305_v44  ;;  %v1938_v8 = vor.u32 %v1936_v31, %v1934_v33 }
 0x1bf   :  { %1493 = vst.msk [vmem:[#allocation2 + $0xb8] sm:$0xf] %vm1446_vm2, %v9561_v39  ;;  %3488 = vmatprep.subr.bf16.mxu1 %v16867_v0  ;;  %v9562_v45 = vpack.c.bf16 %v1137_v19, %v1137_v19  ;;  %2064 = vrot.lane.b32.xlu0 %v1935_v48, %s10358_s16  ;;  %v2316_v40 = vsel %vm2224_vm12, %v2311_v18, %v11314_v51 }
 0x1c0   :  { %v11316_v47 = vld [vmem:[#allocation2 + $0xb0] sm:$0xff]   ;;  %2197 = vrot.lane.b32.xlu1 %v2134_v49, %s10357_s13  ;;  %v2037_v58 = vpop.permute.xlu0 %2036  ;;  %v2170_v55 = vpop.permute.xlu1 %2169 }
 0x1c1   :  { %v854_v53 = vpop.f32.mrb[96].mxu0  ;;  %1494 = vst.msk [vmem:[#allocation2 + $0xbc] sm:$0xf] %vm1446_vm2, %v9562_v45  ;;  %v2657_v1 = vsel %vm2643_vm7, %v10325_v52, %v2037_v58  ;;  %v2135_v4 = vrot.slane %v11316_v47, 1  ;;  %v1940_v63 = vshll.u32 %v11316_v47, 16  ;;  %v1944_v6 = vshrl.u32 %v11316_v47, 16 }
 0x1c2   :  { %vm996_vm1 = vcmp.gt.f32.partialorder %v854_v53, 0.0  ;;  %v1067_v54 = vmul.f32 0.2, %v854_v53  ;;  %3489 = vmatpush1.bf16.msra.mxu1 %v10221_v38  ;;  %v856_v2 = vpop.f32.mrb[97].mxu0  ;;  %v2722_v9 = vsel %vm16931_vm11, %v2657_v1, %v2170_v55  ;;  %v1089_v38 = vmul.f32 0.2, %v11145_v15 }
 0x1c3   :  { %3490 = vmatprep.subr.bf16.mxu1 %v16867_v0  ;;  %v857_v3 = vpop.f32.mrb[98].mxu0  ;;  %2406 = vrot.lane.b32.xlu0 %v2316_v40, %s10359_s17  ;;  %v1942_v37 = vrot.slane %v1940_v63, 1  ;;  %v2317_v18 = vrot.slane %v1944_v6, 1  ;;  %v2318_v20 = vrot.slane %v1940_v63, 2  ;;  %v2136_v56 = vsel %vm16934_vm8, %v2133_v10, %v2135_v4 }
 0x1c4   :  { %v1138_v50 = vsel %vm996_vm1, %v854_v53, %v1067_v54  ;;  %3248 = vmatmul.mubr.bf16.gmra.mrb[56].mxu1 %v11272_v12  ;;  %vm997_vm3 = vcmp.gt.f32.partialorder %v857_v3, 0.0  ;;  %v1068_v11 = vmul.f32 0.2, %v857_v3  ;;  %v859_v16 = vpop.f32.mrb[99].mxu0  ;;  %v2379_v14 = vpop.permute.xlu0 %2378 }
 0x1c5   :  { %v9563_v61 = vpack.c.bf16 %v1138_v50, %v1138_v50  ;;  %v11338_v7 = vsel %vm2773_vm13, %v2722_v9, %v2379_v14  ;;  %v1943_v25 = vsel %vm1763_vm9, %v1938_v8, %v1942_v37  ;;  %v2319_v27 = vor.u32 %v2318_v20, %v2317_v18  ;;  %v10327_v8 = vld [vmem:[#allocation2 + $0x40] sm:$0xff]   ;;  %v10230_v9 = vld [vmem:[%s16857_s2 + $0xd8] sm:$0xff]  }
 0x1c6   :  { %3491 = vmatpush1.bf16.msra.mxu1 %v10226_v34  ;;  %v1139_v59 = vsel %vm997_vm3, %v857_v3, %v1068_v11  ;;  %3255 = vmatprep.mubr.bf16.mxu1 %v11338_v7  ;;  %v1946_v10 = vor.u32 %v1944_v6, %v1942_v37 }
 0x1c7   :  { %1495 = vst.msk [vmem:[#allocation2 + $0xc0] sm:$0xf] %vm1446_vm2, %v9563_v61  ;;  %3492 = vmatprep.subr.bf16.mxu1 %v16867_v0  ;;  %v9564_v26 = vpack.c.bf16 %v1139_v59, %v1139_v59  ;;  %2199 = vrot.lane.b32.xlu0 %v2136_v56, %s10357_s13  ;;  %v2320_v23 = vsel %vm2224_vm12, %v11314_v51, %v2319_v27 }
 0x1c8   :  { %2066 = vrot.lane.b32.xlu1 %v1943_v25, %s10358_s16  ;;  %v11348_v31 = vld [vmem:[#allocation2 + $0xb8] sm:$0xff]   ;;  %v2172_v24 = vpop.permute.xlu0 %2171  ;;  %v2039_v57 = vpop.permute.xlu1 %2038  ;;  %v1160_v51 = vsel %vm1018_vm5, %v11145_v15, %v1089_v38  ;;  %v11392_v25 = vld [vmem:[#allocation2 + $0xd0] sm:$0xff]  }
 0x1c9   :  { %v862_v29 = vpop.f32.mrb[100].mxu0  ;;  %1496 = vst.msk [vmem:[#allocation2 + $0xc4] sm:$0xf] %vm1446_vm2, %v9564_v26  ;;  %v2659_v39 = vsel %vm2643_vm7, %v10326_v36, %v2039_v57  ;;  %v1948_v21 = vshll.u32 %v11348_v31, 16  ;;  %v1952_v33 = vshrl.u32 %v11348_v31, 16  ;;  %v2137_v13 = vrot.slane %v11348_v31, 1 }
 0x1ca   :  { %vm998_vm4 = vcmp.gt.f32.partialorder %v862_v29, 0.0  ;;  %v1069_v32 = vmul.f32 0.2, %v862_v29  ;;  %3493 = vmatpush1.bf16.msra.mxu1 %v10229_v5  ;;  %v864_v35 = vpop.f32.mrb[101].mxu0  ;;  %v2724_v49 = vsel %vm16931_vm11, %v2659_v39, %v2172_v24  ;;  %v9585_v52 = vpack.c.bf16 %v1160_v51, %v1160_v51 }
 0x1cb   :  { %3494 = vmatprep.subr.bf16.mxu1 %v16867_v0  ;;  %v865_v42 = vpop.f32.mrb[102].mxu0  ;;  %v1950_v54 = vrot.slane %v1948_v21, 1  ;;  %v2321_v58 = vrot.slane %v1952_v33, 1  ;;  %v2322_v40 = vrot.slane %v1948_v21, 2  ;;  %v2138_v2 = vsel %vm16934_vm8, %v2135_v4, %v2137_v13  ;;  %v10328_v21 = vld [vmem:[#allocation2 + $0x48] sm:$0xff]  }
 0x1cc   :  { %v1140_v41 = vsel %vm998_vm4, %v862_v29, %v1069_v32  ;;  %3256 = vmatmul.mubr.bf16.gmra.mrb[60].mxu1 %v11305_v44  ;;  %vm999_vm6 = vcmp.gt.f32.partialorder %v865_v42, 0.0  ;;  %v1070_v48 = vmul.f32 0.2, %v865_v42  ;;  %2408 = vrot.lane.b32.xlu1 %v2320_v23, %s10359_s17  ;;  %v867_v45 = vpop.f32.mrb[103].mxu0  ;;  %v2381_v53 = vpop.permute.xlu1 %2380  ;;  %1517 = vst.msk [vmem:[#allocation2 + $0x118] sm:$0xf] %vm1446_vm2, %v9585_v52 }
 0x1cd   :  { %v9565_v19 = vpack.c.bf16 %v1140_v41, %v1140_v41  ;;  %v11368_v55 = vsel %vm2773_vm13, %v2724_v49, %v2381_v53  ;;  %v1951_v63 = vsel %vm1763_vm9, %v1946_v10, %v1950_v54  ;;  %v2323_v6 = vor.u32 %v2322_v40, %v2321_v58 }
 0x1ce   :  { %v1141_v34 = vsel %vm999_vm6, %v865_v42, %v1070_v48  ;;  %3263 = vmatprep.mubr.bf16.mxu1 %v11368_v55  ;;  %2068 = vrot.lane.b32.xlu0 %v1951_v63, %s10358_s16  ;;  %v1954_v14 = vor.u32 %v1952_v33, %v1950_v54  ;;  %v1972_v36 = vshll.u32 %v11392_v25, 16  ;;  %v1976_v39 = vshrl.u32 %v11392_v25, 16 }
 0x1cf   :  { %1497 = vst.msk [vmem:[#allocation2 + $0xc8] sm:$0xf] %vm1446_vm2, %v9565_v19  ;;  %v9566_v1 = vpack.c.bf16 %v1141_v34, %v1141_v34  ;;  %v2324_v16 = vsel %vm2224_vm12, %v2319_v27, %v2323_v6  ;;  %3495 = vmatpush1.bf16.msra.mxu1 %v10230_v9 }
 0x1d0   :  { %2201 = vrot.lane.b32.xlu1 %v2138_v2, %s10357_s13  ;;  %v11377_v15 = vld [vmem:[#allocation2 + $0xc0] sm:$0xff]   ;;  %v2041_v50 = vpop.permute.xlu0 %2040  ;;  %v2174_v3 = vpop.permute.xlu1 %2173  ;;  %3496 = vmatprep.subr.bf16.mxu1 %v16867_v0  ;;  %v1974_v53 = vrot.slane %v1972_v36, 1  ;;  %v2333_v54 = vrot.slane %v1976_v39, 1  ;;  %v2334_v58 = vrot.slane %v1972_v36, 2  ;;  %v11422_v2 = vld [vmem:[#allocation2 + $0xd8] sm:$0xff]  }
 0x1d1   :  { %1498 = vst.msk [vmem:[#allocation2 + $0xcc] sm:$0xf] %vm1446_vm2, %v9566_v1  ;;  %v2661_v61 = vsel %vm2643_vm7, %v10327_v8, %v2041_v50  ;;  %v1956_v4 = vshll.u32 %v11377_v15, 16  ;;  %v1960_v11 = vshrl.u32 %v11377_v15, 16  ;;  %v2139_v37 = vrot.slane %v11377_v15, 1  ;;  %v10329_v50 = vld [vmem:[#allocation2 + $0x50] sm:$0xff]  }
 0x1d2   :  { %2410 = vrot.lane.b32.xlu0 %v2324_v16, %s10359_s17  ;;  %v2726_v59 = vsel %vm16931_vm11, %v2661_v61, %v2174_v3  ;;  %v2335_v61 = vor.u32 %v2334_v58, %v2333_v54  ;;  %v2143_v16 = vrot.slane %v11392_v25, 1  ;;  %v1984_v9 = vshrl.u32 %v11422_v2, 16 }
 0x1d3   :  { %v1958_v18 = vrot.slane %v1956_v4, 1  ;;  %v2325_v20 = vrot.slane %v1960_v11, 1  ;;  %v2326_v5 = vrot.slane %v1956_v4, 2  ;;  %v2140_v32 = vsel %vm16934_vm8, %v2137_v13, %v2139_v37  ;;  %v11427_v4 = vld [vmem:[#allocation2 + $0xe0] sm:$0xff]  }
 0x1d4   :  { %3264 = vmatmul.mubr.bf16.gmra.mrb[64].mxu1 %v11338_v7  ;;  %v2383_v56 = vpop.permute.xlu0 %2382  ;;  %v2337_v36 = vrot.slane %v1984_v9, 1  ;;  %vm16935_vm2 = vcmask 519168  }
 0x1d5   :  { %v11395_v26 = vsel %vm2773_vm13, %v2726_v59, %v2383_v56  ;;  %v1959_v27 = vsel %vm1763_vm9, %v1954_v14, %v1958_v18  ;;  %v2327_v29 = vor.u32 %v2326_v5, %v2325_v20  ;;  %v1962_v13 = vor.u32 %v1960_v11, %v1958_v18  ;;  %v10231_v14 = vld [vmem:[%s16857_s2 + $0xe0] sm:$0xff]   ;;  %5328 = vst.msk [vmem:[#allocation3 + $0x100] sm:$0xf] %vm16935_vm2, %v16867_v0 }
 0x1d6   :  { %3271 = vmatprep.mubr.bf16.mxu1 %v11395_v26  ;;  %2070 = vrot.lane.b32.xlu1 %v1959_v27, %s10358_s16  ;;  %v2145_v5 = vrot.slane %v11422_v2, 1  ;;  %v1978_v59 = vor.u32 %v1976_v39, %v1974_v53  ;;  %5329 = vst.msk [vmem:[#allocation3 + $0x104] sm:$0xf] %vm16935_vm2, %v16867_v0  ;;  %5330 = vst.msk [vmem:[#allocation3 + $0x108] sm:$0xf] %vm16935_vm2, %v16867_v0 }
 0x1d7   :  { %2203 = vrot.lane.b32.xlu0 %v2140_v32, %s10357_s13  ;;  %v2328_v10 = vsel %vm2224_vm12, %v2323_v6, %v2327_v29  ;;  %3497 = vmatpush1.bf16.msra.mxu1 %v10231_v14  ;;  %v1992_v32 = vshrl.u32 %v11427_v4, 16  ;;  %5331 = vst.msk [vmem:[#allocation3 + $0x10c] sm:$0xf] %vm16935_vm2, %v16867_v0  ;;  %5332 = vst.msk [vmem:[#allocation3 + $0x110] sm:$0xf] %vm16935_vm2, %v16867_v0 }
 0x1d8   :  { %v11403_v24 = vld [vmem:[#allocation2 + $0xc8] sm:$0xff]   ;;  %v2043_v57 = vpop.permute.xlu1 %2042  ;;  %v2176_v35 = vpop.permute.xlu0 %2175  ;;  %3498 = vmatprep.subr.bf16.mxu1 %v16867_v0  ;;  %5333 = vst.msk [vmem:[#allocation3 + $0x114] sm:$0xf] %vm16935_vm2, %v16867_v0  ;;  %5334 = vst.msk [vmem:[#allocation3 + $0x118] sm:$0xf] %vm16935_vm2, %v16867_v0 }
 0x1d9   :  { %v2663_v33 = vsel %vm2643_vm7, %v10328_v21, %v2043_v57  ;;  %v2141_v41 = vrot.slane %v11403_v24, 1  ;;  %v1964_v42 = vshll.u32 %v11403_v24, 16  ;;  %v1968_v23 = vshrl.u32 %v11403_v24, 16  ;;  %5335 = vst.msk [vmem:[#allocation3 + $0x11c] sm:$0xf] %vm16935_vm2, %v16867_v0 }
 0x1da   :  { %2412 = vrot.lane.b32.xlu1 %v2328_v10, %s10359_s17  ;;  %v2728_v45 = vsel %vm16931_vm11, %v2663_v33, %v2176_v35  ;;  %v2146_v21 = vsel %vm16934_vm8, %v2143_v16, %v2145_v5  ;;  %5336 = vst.msk [vmem:[#allocation3 + $0x120] sm:$0xf] %vm16935_vm2, %v16867_v0 }
 0x1db   :  { %v1966_v38 = vrot.slane %v1964_v42, 1  ;;  %v2329_v19 = vrot.slane %v1968_v23, 1  ;;  %v2330_v48 = vrot.slane %v1964_v42, 2  ;;  %v2142_v51 = vsel %vm16934_vm8, %v2139_v37, %v2141_v41 }
 0x1dc   :  { %3272 = vmatmul.mubr.bf16.gmra.mrb[68].mxu1 %v11368_v55  ;;  %v2385_v49 = vpop.permute.xlu1 %2384  ;;  %v1980_v37 = vshll.u32 %v11422_v2, 16  ;;  %v2144_v57 = vsel %vm16934_vm8, %v2141_v41, %v2143_v16 }
 0x1dd   :  { %v11416_v40 = vsel %vm2773_vm13, %v2728_v45, %v2385_v49  ;;  %v1967_v34 = vsel %vm1763_vm9, %v1962_v13, %v1966_v38  ;;  %v1970_v52 = vor.u32 %v1968_v23, %v1966_v38  ;;  %v2331_v1 = vor.u32 %v2330_v48, %v2329_v19  ;;  %v10330_v23 = vld [vmem:[#allocation2 + $0x58] sm:$0xff]   ;;  %v11454_v45 = vld [vmem:[#allocation2 + $0xe8] sm:$0xff]  }
 0x1de   :  { %3279 = vmatprep.mubr.bf16.mxu1 %v11416_v40  ;;  %2205 = vrot.lane.b32.xlu1 %v2142_v51, %s10357_s13  ;;  %v1982_v10 = vrot.slane %v1980_v37, 1  ;;  %v2338_v39 = vrot.slane %v1980_v37, 2  ;;  %v2341_v19 = vrot.slane %v1992_v32, 1  ;;  %v10331_v37 = vld [vmem:[#allocation2 + $0x60] sm:$0xff]  }
 0x1df   :  { %2072 = vrot.lane.b32.xlu0 %v1967_v34, %s10358_s16  ;;  %v1975_v8 = vsel %vm1763_vm9, %v1970_v52, %v1974_v53  ;;  %v2332_v11 = vsel %vm2224_vm12, %v2327_v29, %v2331_v1  ;;  %v2336_v27 = vsel %vm2224_vm12, %v2331_v1, %v2335_v61  ;;  %v1988_v29 = vshll.u32 %v11427_v4, 16  ;;  %v11460_v53 = vld [vmem:[#allocation2 + $0xf0] sm:$0xff]  }
 0x1e0   :  { %v2045_v63 = vpop.permute.xlu0 %2044  ;;  %v2178_v6 = vpop.permute.xlu1 %2177  ;;  %v1986_v33 = vor.u32 %v1984_v9, %v1982_v10  ;;  %v1983_v41 = vsel %vm1763_vm9, %v1978_v59, %v1982_v10  ;;  %v2339_v49 = vor.u32 %v2338_v39, %v2337_v36  ;;  %v1996_v1 = vshll.u32 %v11454_v45, 16 }
 0x1e1   :  { %v2665_v3 = vsel %vm2643_vm7, %v10329_v50, %v2045_v63  ;;  %v1990_v38 = vrot.slane %v1988_v29, 1  ;;  %v2342_v48 = vrot.slane %v1988_v29, 2  ;;  %v2000_v50 = vshrl.u32 %v11454_v45, 16 }
 0x1e2   :  { %2074 = vrot.lane.b32.xlu1 %v1975_v8, %s10358_s16  ;;  %v2730_v18 = vsel %vm16931_vm11, %v2665_v3, %v2178_v6  ;;  %v2340_v63 = vsel %vm2224_vm12, %v2335_v61, %v2339_v49  ;;  %v2147_v6 = vrot.slane %v11427_v4, 1  ;;  %v2004_v3 = vshll.u32 %v11460_v53, 16 }
 0x1e3   :  { %2414 = vrot.lane.b32.xlu0 %v2332_v11, %s10359_s17  ;;  %v1991_v34 = vsel %vm1763_vm9, %v1986_v33, %v1990_v38  ;;  %v2343_v52 = vor.u32 %v2342_v48, %v2341_v19  ;;  %v2008_v8 = vshrl.u32 %v11460_v53, 16  ;;  %v1998_v61 = vrot.slane %v1996_v1, 1 }
 0x1e4   :  { %3280 = vmatmul.mubr.bf16.gmra.mrb[72].mxu1 %v11395_v26  ;;  %v2387_v20 = vpop.permute.xlu0 %2386  ;;  %v1994_v59 = vor.u32 %v1992_v32, %v1990_v38  ;;  %v2346_v29 = vrot.slane %v1996_v1, 2  ;;  %v2006_v36 = vrot.slane %v2004_v3, 1 }
 0x1e5   :  { %v11442_v56 = vsel %vm2773_vm13, %v2730_v18, %v2387_v20  ;;  %v2344_v14 = vsel %vm2224_vm12, %v2339_v49, %v2343_v52  ;;  %v2149_v18 = vrot.slane %v11454_v45, 1  ;;  %v2148_v20 = vsel %vm16934_vm8, %v2145_v5, %v2147_v6 }
 0x1e6   :  { %3287 = vmatprep.mubr.bf16.mxu1 %v11442_v56  ;;  %2416 = vrot.lane.b32.xlu1 %v2336_v27, %s10359_s17  ;;  %v2345_v27 = vrot.slane %v2000_v50, 1  ;;  %v2002_v10 = vor.u32 %v2000_v50, %v1998_v61  ;;  %v2349_v39 = vrot.slane %v2008_v8, 1 }
 0x1e7   :  { %2207 = vrot.lane.b32.xlu0 %v2144_v57, %s10357_s13  ;;  %v10232_v57 = vld [vmem:[%s16857_s2 + $0xe8] sm:$0xff]   ;;  %v2150_v32 = vsel %vm16934_vm8, %v2147_v6, %v2149_v18  ;;  %v2151_v6 = vrot.slane %v11460_v53, 1 }
 0x1e8   :  { %v2047_v35 = vpop.permute.xlu1 %2046  ;;  %v2180_v42 = vpop.permute.xlu0 %2179  ;;  %3499 = vmatpush1.bf16.msra.mxu1 %v10232_v57  ;;  %v2007_v38 = vsel %vm1763_vm9, %v2002_v10, %v2006_v36 }
 0x1e9   :  { %v2667_v13 = vsel %vm2643_vm7, %v10330_v23, %v2047_v35  ;;  %v2350_v35 = vrot.slane %v2004_v3, 2  ;;  %3500 = vmatprep.subr.bf16.mxu1 %v16867_v0  ;;  %v1999_v23 = vsel %vm1763_vm9, %v1994_v59, %v1998_v61  ;;  %v2010_v61 = vor.u32 %v2008_v8, %v2006_v36 }
 0x1ea   :  { %2209 = vrot.lane.b32.xlu1 %v2146_v21, %s10357_s13  ;;  %v2732_v54 = vsel %vm16931_vm11, %v2667_v13, %v2180_v42  ;;  %v11486_v21 = vld [vmem:[#allocation2 + $0xf8] sm:$0xff]   ;;  %v2347_v13 = vor.u32 %v2346_v29, %v2345_v27  ;;  %v2152_v27 = vsel %vm16934_vm8, %v2149_v18, %v2151_v6  ;;  %v10216_v18 = vld [vmem:[#allocation2 + $0x100] ss:$0 sps:$4 sm:$0x11]  }
 0x1eb   :  { %2076 = vrot.lane.b32.xlu0 %v1983_v41, %s10358_s16  ;;  %v2351_v19 = vor.u32 %v2350_v35, %v2349_v39  ;;  %v2012_v48 = vshll.u32 %v11486_v21, 16  ;;  %v11500_v41 = vld [vmem:[#allocation2 + $0x100] sm:$0xff]   ;;  %v11509_v50 = vrot.slane %v11486_v21, 1 }
 0x1ec   :  { %3288 = vmatmul.mubr.bf16.gmra.mrb[76].mxu1 %v11416_v40  ;;  %v2389_v58 = vpop.permute.xlu1 %2388 }
 0x1ed   :  { %v11464_v51 = vsel %vm2773_vm13, %v2732_v54, %v2389_v58  ;;  %v2016_v54 = vshrl.u32 %v11486_v21, 16  ;;  %v2352_v3 = vsel %vm2224_vm12, %v2347_v13, %v2351_v19  ;;  %v2154_v29 = vsel %vm16934_vm8, %v2151_v6, %v11509_v50  ;;  %v10220_v6 = vld [vmem:[#allocation2 + $0x108] ss:$0 sps:$4 sm:$0x33]  }
 0x1ee   :  { %3295 = vmatprep.mubr.bf16.mxu1 %v11464_v51  ;;  %2078 = vrot.lane.b32.xlu1 %v1991_v34, %s10358_s16  ;;  %v10332_v34 = vld [vmem:[#allocation2 + $0x68] sm:$0xff]  }
 0x1ef   :  { %2418 = vrot.lane.b32.xlu0 %v2340_v63, %s10359_s17  ;;  %v2348_v63 = vsel %vm2224_vm12, %v2343_v52, %v2347_v13  ;;  %v2354_v52 = vrot.slane %v2012_v48, 2 }
 0x1f0   :  { %v2049_v11 = vpop.permute.xlu0 %2048  ;;  %v2182_v16 = vpop.permute.xlu1 %2181 }
 0x1f1   :  { %v2669_v9 = vsel %vm2643_vm7, %v10331_v37, %v2049_v11  ;;  %v2014_v11 = vrot.slane %v2012_v48, 1  ;;  %v2443_v37 = vshrl.u32 %v11500_v41, 16 }
 0x1f2   :  { %2420 = vrot.lane.b32.xlu1 %v2344_v14, %s10359_s17  ;;  %v2734_v33 = vsel %vm16931_vm11, %v2669_v9, %v2182_v16  ;;  %v2439_v16 = vshll.u32 %v11500_v41, 16 }
 0x1f3   :  { %2211 = vrot.lane.b32.xlu0 %v2148_v20, %s10357_s13  ;;  %v2353_v20 = vrot.slane %v2016_v54, 1  ;;  %v2018_v57 = vor.u32 %v2016_v54, %v2014_v11  ;;  %v2482_v39 = vrot.slane %v2443_v37, 1  ;;  %v2015_v35 = vsel %vm1763_vm9, %v2010_v61, %v2014_v11 }
 0x1f4   :  { %3296 = vmatmul.mubr.bf16.gmra.mrb[80].mxu1 %v11442_v56  ;;  %v2391_v42 = vpop.permute.xlu0 %2390  ;;  %v2441_v10 = vrot.slane %v2439_v16, 1  ;;  %v2483_v8 = vrot.slane %v2439_v16, 2  ;;  %v11539_v54 = vrot.slane %v11500_v41, 1  ;;  %v2020_v11 = vshll.u32 %v10216_v18, 16 }
 0x1f5   :  { %v11490_v5 = vsel %vm2773_vm13, %v2734_v33, %v2391_v42  ;;  %v11526_v33 = vor.u32 %v2354_v52, %v2353_v20  ;;  %v10217_v42 = vld [vmem:[#allocation2 + $0x108] ss:$0 sps:$4 sm:$0x11]   ;;  %v10219_v16 = vld [vmem:[#allocation2 + $0x100] ss:$0 sps:$4 sm:$0x33]  }
 0x1f6   :  { %3303 = vmatprep.mubr.bf16.mxu1 %v11490_v5  ;;  %2213 = vrot.lane.b32.xlu1 %v2150_v32, %s10357_s13  ;;  %v2442_v48 = vsel %vm1763_vm9, %v2018_v57, %v2441_v10  ;;  %v11557_v61 = vor.u32 %v2443_v37, %v2441_v10  ;;  %v2487_v52 = vshrl.u32 %v10220_v6, 16 }
 0x1f7   :  { %2080 = vrot.lane.b32.xlu0 %v1999_v23, %s10358_s16  ;;  %v10333_v23 = vld [vmem:[#allocation2 + $0x70] sm:$0xff]  }
 0x1f8   :  { %v2051_v49 = vpop.permute.xlu1 %2050  ;;  %v2184_v58 = vpop.permute.xlu0 %2183 }
 0x1f9   :  { %v2671_v1 = vsel %vm2643_vm7, %v10332_v34, %v2051_v49  ;;  %v11536_v49 = vor.u32 %v2483_v8, %v2482_v39  ;;  %v10334_v39 = vld [vmem:[#allocation2 + $0x78] sm:$0xff]  }
 0x1fa   :  { %2082 = vrot.lane.b32.xlu1 %v2007_v38, %s10358_s16  ;;  %v2736_v9 = vsel %vm16931_vm11, %v2671_v1, %v2184_v58  ;;  %v10233_v38 = vld [vmem:[%s16857_s2 + $0xf0] sm:$0xff]   ;;  %v2356_v1 = vsel %vm2224_vm12, %v2351_v19, %v11526_v33 }
 0x1fb   :  { %2422 = vrot.lane.b32.xlu0 %v2348_v63, %s10359_s17  ;;  %v2447_v63 = vshll.u32 %v10217_v42, 16  ;;  %3501 = vmatpush1.bf16.msra.mxu1 %v10233_v38  ;;  %v2485_v19 = vsel %vm2224_vm12, %v11526_v33, %v11536_v49 }
 0x1fc   :  { %3304 = vmatmul.mubr.bf16.gmra.mrb[84].mxu1 %v11464_v51  ;;  %v2393_v14 = vpop.permute.xlu1 %2392  ;;  %3502 = vmatprep.subr.bf16.mxu1 %v16867_v0 }
 0x1fd   :  { %v11517_v59 = vsel %vm2773_vm13, %v2736_v9, %v2393_v14  ;;  %v2461_v9 = vsel %vm16934_vm8, %v11509_v50, %v11539_v54  ;;  %v2449_v20 = vrot.slane %v2447_v63, 1 }
 0x1fe   :  { %3311 = vmatprep.mubr.bf16.mxu1 %v11517_v59  ;;  %2424 = vrot.lane.b32.xlu1 %v2352_v3, %s10359_s17 }
 0x1ff   :  { %2215 = vrot.lane.b32.xlu0 %v2152_v27, %s10357_s13  ;;  %v2490_v27 = vshll.u32 %v10220_v6, 16  ;;  %v2450_v38 = vsel %vm1763_vm9, %v11557_v61, %v2449_v20  ;;  %v10234_v20 = vld [vmem:[%s16857_s2 + $0xf8] sm:$0xff]  }
 0x200   :  { %v2053_v36 = vpop.permute.xlu0 %2052  ;;  %v2186_v32 = vpop.permute.xlu1 %2185  ;;  %3503 = vmatpush1.bf16.msra.mxu1 %v10234_v20 }
 0x201   :  { %v2673_v13 = vsel %vm2643_vm7, %v10333_v23, %v2053_v36  ;;  %v2022_v36 = vrot.slane %v2020_v11, 1  ;;  %v2155_v23 = vrot.slane %v10216_v18, 1 }
 0x202   :  { %2217 = vrot.lane.b32.xlu1 %v2154_v29, %s10357_s13  ;;  %v2738_v58 = vsel %vm16931_vm11, %v2673_v13, %v2186_v32  ;;  %v2361_v32 = vshll.u32 %v10219_v16, 16  ;;  %v2462_v13 = vrot.slane %v10217_v42, 1 }
 0x203   :  { %2084 = vrot.lane.b32.xlu0 %v2015_v35, %s10358_s16  ;;  %v2358_v35 = vshrl.u32 %v10219_v16, 16  ;;  %v2156_v16 = vsel %vm16934_vm8, %v11509_v50, %v2155_v23  ;;  %v10336_v23 = vld [vmem:[#allocation2 + $0x88] sm:$0xff]  }
 0x204   :  { %3312 = vmatmul.mubr.bf16.gmra.mrb[88].mxu1 %v11490_v5  ;;  %v2395_v34 = vpop.permute.xlu0 %2394  ;;  %v2363_v6 = vrot.slane %v2361_v32, 2  ;;  %v2463_v42 = vsel %vm16934_vm8, %v11539_v54, %v2462_v13 }
 0x205   :  { %v11545_v3 = vsel %vm2773_vm13, %v2738_v58, %v2395_v34  ;;  %v2492_v58 = vrot.slane %v2490_v27, 2  ;;  %v2360_v63 = vrot.slane %v2358_v35, 1  ;;  %v11597_v35 = vld [vmem:[#allocation2 + $0x110] sm:$0xff]  }
 0x206   :  { %3319 = vmatprep.mubr.bf16.mxu1 %v11545_v3  ;;  %2451 = vrot.lane.b32.xlu1 %v2442_v48, %s10358_s16  ;;  %v2489_v48 = vrot.slane %v2487_v52, 1 }
 0x207   :  { %2426 = vrot.lane.b32.xlu0 %v2356_v1, %s10359_s17  ;;  %v2023_v1 = vsel %vm1763_vm9, %v2018_v57, %v2022_v36 }
 0x208   :  { %v2055_v14 = vpop.permute.xlu1 %2054  ;;  %v2188_v29 = vpop.permute.xlu0 %2187  ;;  %v2493_v18 = vor.u32 %v2492_v58, %v2489_v48  ;;  %v2581_v58 = vshll.u32 %v11597_v35, 16 }
 0x209   :  { %v2675_v8 = vsel %vm2643_vm7, %v10334_v39, %v2055_v14  ;;  %v10335_v14 = vld [vmem:[#allocation2 + $0x80] sm:$0xff]  }
 0x20a   :  { %2497 = vrot.lane.b32.xlu1 %v2485_v19, %s10359_s17  ;;  %v2740_v37 = vsel %vm16931_vm11, %v2675_v8, %v2188_v29  ;;  %v2364_v19 = vor.u32 %v2363_v6, %v2360_v63  ;;  %v2494_v52 = vsel %vm2224_vm12, %v11536_v49, %v2493_v18  ;;  %v11593_v8 = vld [vmem:[#allocation2 + $0x108] sm:$0xff]  }
 0x20b   :  { %2466 = vrot.lane.b32.xlu0 %v2461_v9, %s10357_s13  ;;  %v11609_v48 = vrot.slane %v11593_v8, 1 }
 0x20c   :  { %3320 = vmatmul.mubr.bf16.gmra.mrb[92].mxu1 %v11517_v59  ;;  %v2397_v10 = vpop.permute.xlu1 %2396  ;;  %v2365_v29 = vsel %vm2224_vm12, %v11526_v33, %v2364_v19  ;;  %v2510_v33 = vshll.u32 %v11593_v8, 16 }
 0x20d   :  { %v11567_v34 = vsel %vm2773_vm13, %v2740_v37, %v2397_v10  ;;  %v2514_v37 = vshrl.u32 %v11593_v8, 16  ;;  %v2532_v18 = vsel %vm16934_vm8, %v11539_v54, %v11609_v48 }
 0x20e   :  { %3327 = vmatprep.mubr.bf16.mxu1 %v11567_v34  ;;  %2086 = vrot.lane.b32.xlu1 %v2023_v1, %s10358_s16  ;;  %v2512_v63 = vrot.slane %v2510_v33, 1  ;;  %v2554_v6 = vrot.slane %v2510_v33, 2 }
 0x20f   :  { %2453 = vrot.lane.b32.xlu0 %v2450_v38, %s10358_s16 }
 0x210   :  { %v2057_v11 = vpop.permute.xlu0 %2056  ;;  %v2190_v9 = vpop.permute.xlu1 %2189 }
 0x211   :  { %v2677_v57 = vsel %vm2643_vm7, %v10335_v14, %v2057_v11  ;;  %v2583_v11 = vrot.slane %v2581_v58, 1 }
 0x212   :  { %2219 = vrot.lane.b32.xlu1 %v2156_v16, %s10357_s13  ;;  %v2742_v50 = vsel %vm16931_vm11, %v2677_v57, %v2190_v9  ;;  %v10225_v16 = vld [vmem:[#allocation2 + $0x118] ss:$0 sps:$4 sm:$0x11]   ;;  %v10337_v9 = vld [vmem:[#allocation2 + $0x90] sm:$0xff]   ;;  %v2516_v57 = vor.u32 %v2514_v37, %v2512_v63 }
 0x213   :  { %2468 = vrot.lane.b32.xlu0 %v2463_v42, %s10357_s13 }
 0x214   :  { %3328 = vmatmul.mubr.bf16.gmra.mrb[96].mxu1 %v11545_v3  ;;  %v2399_v27 = vpop.permute.xlu0 %2398 }
 0x215   :  { %v11590_v39 = vsel %vm2773_vm13, %v2742_v50, %v2399_v27 }
 0x216   :  { %2428 = vrot.lane.b32.xlu1 %v2365_v29, %s10359_s17  ;;  %3335 = vmatprep.mubr.bf16.mxu1 %v11590_v39  ;;  %v2589_v29 = vshll.u32 %v10225_v16, 16 }
 0x217   :  { %2499 = vrot.lane.b32.xlu0 %v2494_v52, %s10359_s17  ;;  %v10224_v52 = vld [vmem:[#allocation2 + $0x110] ss:$0 sps:$4 sm:$0x11]  }
 0x218   :  { %v2059_v36 = vpop.permute.xlu1 %2058  ;;  %v2518_v33 = vshll.u32 %v10224_v52, 16 }
 0x219   :  { %v2679_v13 = vsel %vm2643_vm7, %v10336_v23, %v2059_v36  ;;  %v10228_v36 = vld [vmem:[#allocation2 + $0x118] ss:$0 sps:$4 sm:$0x33]   ;;  %v2584_v23 = vsel %vm1763_vm9, %v2516_v57, %v2583_v11 }
 0x21a   :  { %v2192_v32 = vpop.permute.xlu0 %2191  ;;  %2535 = vrot.lane.b32.xlu1 %v10864_v46, %s10357_s13  ;;  %v2585_v46 = vshrl.u32 %v11597_v35, 16 }
 0x21b   :  { %2606 = vrot.lane.b32.xlu0 %v10879_v17, %s10357_s13  ;;  %v2744_v10 = vsel %vm16931_vm11, %v2679_v13, %v2192_v32  ;;  %v2553_v17 = vrot.slane %v2514_v37, 1  ;;  %v10227_v37 = vld [vmem:[#allocation2 + $0x110] ss:$0 sps:$4 sm:$0x33]  }
 0x21c   :  { %3336 = vmatmul.mubr.bf16.gmra.mrb[100].mxu1 %v11567_v34  ;;  %v2624_v20 = vrot.slane %v2585_v46, 1 }
 0x21d   :  { %v2401_v38 = vpop.permute.xlu1 %2400  ;;  %v2555_v50 = vor.u32 %v2554_v6, %v2553_v17  ;;  %v2632_v17 = vshll.u32 %v10228_v36, 16 }
 0x21e   :  { %v11613_v1 = vsel %vm2773_vm13, %v2744_v10, %v2401_v38  ;;  %2566 = vrot.lane.b32.xlu1 %v10873_v60, %s10359_s17  ;;  %v2625_v60 = vrot.slane %v2581_v58, 2  ;;  %v2602_v10 = vrot.slane %v11597_v35, 1  ;;  %v2587_v38 = vor.u32 %v2585_v46, %v2583_v11 }
 0x21f   :  { %3343 = vmatprep.mubr.bf16.mxu1 %v11613_v1  ;;  %2637 = vrot.lane.b32.xlu0 %v10890_v28, %s10359_s17  ;;  %v2513_v28 = vsel %vm1763_vm9, %v11557_v61, %v2512_v63  ;;  %v2556_v61 = vsel %vm2224_vm12, %v11536_v49, %v2555_v50  ;;  %v2591_v58 = vrot.slane %v2589_v29, 1  ;;  %v2629_v63 = vshrl.u32 %v10228_v36, 16 }
 0x220   :  { %v2061_v42 = vpop.permute.xlu0 %2060  ;;  %v2626_v13 = vor.u32 %v2625_v60, %v2624_v20  ;;  %v10338_v20 = vld [vmem:[#allocation2 + $0x98] sm:$0xff]   ;;  %v2603_v49 = vsel %vm16934_vm8, %v11609_v48, %v2602_v10  ;;  %v2533_v46 = vrot.slane %v10224_v52, 1 }
 0x221   :  { %v2194_v19 = vpop.permute.xlu1 %2193  ;;  %v2681_v14 = vsel %vm2643_vm7, %v10337_v9, %v2061_v42  ;;  %v2561_v9 = vshll.u32 %v10227_v37, 16  ;;  %v2592_v11 = vsel %vm1763_vm9, %v2587_v38, %v2591_v58 }
 0x222   :  { %2537 = vrot.lane.b32.xlu1 %v2532_v18, %s10357_s13  ;;  %v2746_v54 = vsel %vm16931_vm11, %v2681_v14, %v2194_v19  ;;  %v2627_v42 = vsel %vm2224_vm12, %v2555_v50, %v2626_v13  ;;  %v2520_v18 = vrot.slane %v2518_v33, 1  ;;  %v2558_v19 = vshrl.u32 %v10227_v37, 16 }
 0x223   :  { %2522 = vrot.lane.b32.xlu0 %v2513_v28, %s10358_s16  ;;  %v2604_v28 = vrot.slane %v10225_v16, 1  ;;  %v2563_v37 = vrot.slane %v2561_v9, 2 }
 0x224   :  { %3344 = vmatmul.mubr.bf16.gmra.mrb[104].mxu1 %v11590_v39  ;;  %v2403_v27 = vpop.permute.xlu0 %2402  ;;  %v2560_v33 = vrot.slane %v2558_v19, 1 }
 0x225   :  { %v11632_v32 = vsel %vm2773_vm13, %v2746_v54, %v2403_v27  ;;  %v2631_v54 = vrot.slane %v2629_v63, 1  ;;  %v2634_v27 = vrot.slane %v2632_v17, 2  ;;  %v2605_v16 = vsel %vm16934_vm8, %v2602_v10, %v2604_v28  ;;  %v10339_v63 = vld [vmem:[#allocation2 + $0xa0] sm:$0xff]  }
 0x226   :  { %3351 = vmatprep.mubr.bf16.mxu1 %v11632_v32  ;;  %2593 = vrot.lane.b32.xlu1 %v2584_v23, %s10358_s16  ;;  %v2521_v23 = vsel %vm1763_vm9, %v2516_v57, %v2520_v18  ;;  %v2534_v57 = vsel %vm16934_vm8, %v11609_v48, %v2533_v46 }
 0x227   :  { %2568 = vrot.lane.b32.xlu0 %v2556_v61, %s10359_s17  ;;  %v2635_v38 = vor.u32 %v2634_v27, %v2631_v54 }
 0x228   :  { %v2196_v14 = vpop.permute.xlu0 %2195 }
 0x229   :  { %v2063_v6 = vpop.permute.xlu1 %2062  ;;  %v2636_v10 = vsel %vm2224_vm12, %v2626_v13, %v2635_v38 }
 0x22a   :  { %v2683_v60 = vsel %vm2643_vm7, %v10338_v20, %v2063_v6  ;;  %2639 = vrot.lane.b32.xlu1 %v2627_v42, %s10359_s17  ;;  %v2564_v6 = vor.u32 %v2563_v37, %v2560_v33 }
 0x22b   :  { %2608 = vrot.lane.b32.xlu0 %v2603_v49, %s10357_s13  ;;  %v2748_v29 = vsel %vm16931_vm11, %v2683_v60, %v2196_v14 }
 0x22c   :  { %3352 = vmatmul.mubr.bf16.gmra.mrb[108].mxu1 %v11613_v1  ;;  %v2565_v9 = vsel %vm2224_vm12, %v2555_v50, %v2564_v6 }
 0x22d   :  { %v2405_v36 = vpop.permute.xlu1 %2404 }
 0x22e   :  { %v11652_v61 = vsel %vm2773_vm13, %v2748_v29, %v2405_v36  ;;  %2524 = vrot.lane.b32.xlu1 %v2521_v23, %s10358_s16 }
 0x22f   :  { %3359 = vmatprep.mubr.bf16.mxu1 %v11652_v61  ;;  %2595 = vrot.lane.b32.xlu0 %v2592_v11, %s10358_s16 }
 0x231   :  { %v2065_v52 = vpop.permute.xlu0 %2064 }
 0x232   :  { %v2198_v58 = vpop.permute.xlu1 %2197  ;;  %v2685_v17 = vsel %vm2643_vm7, %v10339_v63, %v2065_v52  ;;  %2539 = vrot.lane.b32.xlu1 %v2534_v57, %s10357_s13 }
 0x233   :  { %2610 = vrot.lane.b32.xlu0 %v2605_v16, %s10357_s13  ;;  %v2750_v42 = vsel %vm16931_vm11, %v2685_v17, %v2198_v58 }
 0x234   :  { %3360 = vmatmul.mubr.bf16.gmra.mrb[112].mxu1 %v11632_v32 }
 0x235   :  { %v2407_v18 = vpop.permute.xlu0 %2406 }
 0x236   :  { %v11667_v19 = vsel %vm2773_vm13, %v2750_v42, %v2407_v18  ;;  %2570 = vrot.lane.b32.xlu1 %v2565_v9, %s10359_s17 }
 0x237   :  { %3367 = vmatprep.mubr.bf16.mxu1 %v11667_v19  ;;  %2641 = vrot.lane.b32.xlu0 %v2636_v10, %s10359_s17 }
 0x239   :  { %v2200_v14 = vpop.permute.xlu0 %2199 }
 0x23a   :  { %v2067_v48 = vpop.permute.xlu1 %2066 }
 0x23b   :  { %v2687_v20 = vsel %vm2643_vm7, %v11283_v22, %v2067_v48 }
 0x23c   :  { %3368 = vmatmul.mubr.bf16.gmra.mrb[116].mxu1 %v11652_v61  ;;  %v2752_v13 = vsel %vm16931_vm11, %v2687_v20, %v2200_v14 }
 0x23e   :  { %v2409_v60 = vpop.permute.xlu1 %2408 }
 0x23f   :  { %v11678_v49 = vsel %vm2773_vm13, %v2752_v13, %v2409_v60 }
 0x240   :  { %3375 = vmatprep.mubr.bf16.mxu1 %v11678_v49  ;;  %v2069_v50 = vpop.permute.xlu0 %2068 }
 0x241   :  { %v2689_v11 = vsel %vm2643_vm7, %v11316_v47, %v2069_v50 }
 0x242   :  { %v2202_v46 = vpop.permute.xlu1 %2201 }
 0x243   :  { %v2754_v28 = vsel %vm16931_vm11, %v2689_v11, %v2202_v46 }
 0x244   :  { %3376 = vmatmul.mubr.bf16.gmra.mrb[120].mxu1 %v11667_v19  ;;  %v2411_v22 = vpop.permute.xlu0 %2410 }
 0x245   :  { %v11686_v54 = vsel %vm2773_vm13, %v2754_v28, %v2411_v22 }
 0x246   :  { %3383 = vmatprep.mubr.bf16.mxu1 %v11686_v54 }
 0x248   :  { %v2071_v27 = vpop.permute.xlu1 %2070 }
 0x249   :  { %v2204_v29 = vpop.permute.xlu0 %2203  ;;  %v2691_v36 = vsel %vm2643_vm7, %v11348_v31, %v2071_v27 }
 0x24a   :  { %v2756_v23 = vsel %vm16931_vm11, %v2691_v36, %v2204_v29 }
 0x24c   :  { %3384 = vmatmul.mubr.bf16.gmra.mrb[124].mxu1 %v11678_v49  ;;  %v2413_v47 = vpop.permute.xlu1 %2412 }
 0x24d   :  { %v11694_v33 = vsel %vm2773_vm13, %v2756_v23, %v2413_v47 }
 0x24e   :  { %3391 = vmatprep.mubr.bf16.mxu1 %v11694_v33 }
 0x250   :  { %v2206_v37 = vpop.permute.xlu1 %2205 }
 0x251   :  { %v2073_v52 = vpop.permute.xlu0 %2072 }
 0x252   :  { %v2693_v16 = vsel %vm2643_vm7, %v11377_v15, %v2073_v52  ;;  %v3762_v52 = vld [vmem:[%s16858_s9 + $0x8] sm:$0xff] }
 0x253   :  { %v2758_v31 = vsel %vm16931_vm11, %v2693_v16, %v2206_v37  ;;  %3834 = vperm.xlu1 %10041, %v3762_v52  }
 0x254   :  { %3392 = vmatmul.mubr.bf16.gmra.mrb[128].mxu1 %v11686_v54  ;;  %v2075_v38 = vpop.permute.xlu1 %2074 }
 0x255   :  { %v2415_v58 = vpop.permute.xlu0 %2414  ;;  %v2695_v57 = vsel %vm2643_vm7, %v11403_v24, %v2075_v38 }
 0x256   :  { %v11702_v63 = vsel %vm2773_vm13, %v2758_v31, %v2415_v58  ;;  %v3763_v31 = vld [vmem:[%s16858_s9 + $0x10] sm:$0xff] }
 0x257   :  { %3399 = vmatprep.mubr.bf16.mxu1 %v11702_v63  ;;  %3839 = vperm.xlu1 %10041, %v3763_v31  }
 0x258   :  { %v2417_v17 = vpop.permute.xlu1 %2416 }
 0x259   :  { %v2208_v6 = vpop.permute.xlu0 %2207 }
 0x25a   :  { %v2760_v42 = vsel %vm16931_vm11, %v2695_v57, %v2208_v6 }
 0x25b   :  { %v11710_v15 = vsel %vm2773_vm13, %v2760_v42, %v2417_v17  ;;  %v3765_v42 = vld [vmem:[%s16858_s9 + $0x20] sm:$0xff] }
 0x25c   :  { %3400 = vmatmul.mubr.bf16.gmra.mrb[132].mxu1 %v11694_v33  ;;  %v2210_v18 = vpop.permute.xlu1 %2209  ;;  %3849 = vperm.xlu1 %10041, %v3765_v42   ;;  %v3777_v42 = vld [vmem:[%s16858_s9 + $0x80] sm:$0xff] }
 0x25d   :  { %3407 = vmatprep.mubr.bf16.mxu1 %v11710_v15  ;;  %v2077_v10 = vpop.permute.xlu0 %2076 }
 0x25e   :  { %v2697_v9 = vsel %vm2643_vm7, %v11392_v25, %v2077_v10  ;;  %v3766_v10 = vld [vmem:[%s16858_s9 + $0x28] sm:$0xff] }
 0x25f   :  { %v2762_v14 = vsel %vm16931_vm11, %v2697_v9, %v2210_v18 }
 0x260   :  { %v2079_v48 = vpop.permute.xlu1 %2078 }
 0x261   :  { %v2419_v20 = vpop.permute.xlu0 %2418  ;;  %v2699_v50 = vsel %vm2643_vm7, %v11422_v2, %v2079_v48  ;;  %v3767_v48 = vld [vmem:[%s16858_s9 + $0x30] sm:$0xff] }
 0x262   :  { %v11717_v24 = vsel %vm2773_vm13, %v2762_v14, %v2419_v20  ;;  %3859 = vperm.xlu1 %10041, %v3767_v48  }
 0x264   :  { %3408 = vmatmul.mubr.bf16.gmra.mrb[136].mxu1 %v11702_v63  ;;  %v2421_v13 = vpop.permute.xlu1 %2420 }
 0x265   :  { %3415 = vmatprep.mubr.bf16.mxu1 %v11717_v24  ;;  %v2212_v60 = vpop.permute.xlu0 %2211 }
 0x266   :  { %v2764_v46 = vsel %vm16931_vm11, %v2699_v50, %v2212_v60  ;;  %v3769_v50 = vld [vmem:[%s16858_s9 + $0x40] sm:$0xff] }
 0x267   :  { %v11726_v28 = vsel %vm2773_vm13, %v2764_v46, %v2421_v13  ;;  %3869 = vperm.xlu1 %10041, %v3769_v50   ;;  %v3780_v50 = vld [vmem:[%s16858_s9 + $0x98] sm:$0xff] }
 0x268   :  { %v2214_v11 = vpop.permute.xlu1 %2213 }
 0x269   :  { %v2081_v25 = vpop.permute.xlu0 %2080 }
 0x26a   :  { %v2701_v29 = vsel %vm2643_vm7, %v11427_v4, %v2081_v25  ;;  %v3761_v4 = vld [vmem:[%s16858_s9] sm:$0xff] }
 0x26b   :  { %v2766_v23 = vsel %vm16931_vm11, %v2701_v29, %v2214_v11  ;;  %3829 = vperm.xlu0 %10040, %v3761_v4   ;;  %v3770_v11 = vld [vmem:[%s16858_s9 + $0x48] sm:$0xff] }
 0x26c   :  { %3416 = vmatmul.mubr.bf16.gmra.mrb[140].mxu1 %v11710_v15  ;;  %v2083_v22 = vpop.permute.xlu1 %2082  ;;  %v3774_v4 = vld [vmem:[%s16858_s9 + $0x68] sm:$0xff] }
 0x26d   :  { %3423 = vmatprep.mubr.bf16.mxu1 %v11726_v28  ;;  %v2423_v27 = vpop.permute.xlu0 %2422  ;;  %v2703_v38 = vsel %vm2643_vm7, %v11454_v45, %v2083_v22  ;;  %v3764_v45 = vld [vmem:[%s16858_s9 + $0x18] sm:$0xff] }
 0x26e   :  { %v11733_v47 = vsel %vm2773_vm13, %v2766_v23, %v2423_v27  ;;  %v3771_v27 = vld [vmem:[%s16858_s9 + $0x50] sm:$0xff] }
 0x26f   :  { %3844 = vperm.xlu0 %10040, %v3764_v45   ;;  %3879 = vperm.xlu1 %10041, %v3771_v27   ;;  %v3776_v45 = vld [vmem:[%s16858_s9 + $0x78] sm:$0xff] }
 0x270   :  { %v2425_v36 = vpop.permute.xlu1 %2424  ;;  %v3784_v27 = vld [vmem:[%s16858_s9 + $0xb8] sm:$0xff] }
 0x271   :  { %v2216_v2 = vpop.permute.xlu0 %2215 }
 0x272   :  { %v2768_v58 = vsel %vm16931_vm11, %v2703_v38, %v2216_v2  ;;  %v3772_v2 = vld [vmem:[%s16858_s9 + $0x58] sm:$0xff] }
 0x273   :  { %v11751_v6 = vsel %vm2773_vm13, %v2768_v58, %v2425_v36  ;;  %3854 = vperm.xlu0 %10040, %v3766_v10  }
 0x274   :  { %3424 = vmatmul.mubr.bf16.gmra.mrb[144].mxu1 %v11717_v24  ;;  %v2218_v37 = vpop.permute.xlu1 %2217 }
 0x275   :  { %3431 = vmatprep.mubr.bf16.mxu1 %v11733_v47  ;;  %v2085_v16 = vpop.permute.xlu0 %2084 }
 0x276   :  { %v2705_v9 = vsel %vm2643_vm7, %v11460_v53, %v2085_v16  ;;  %v3768_v53 = vld [vmem:[%s16858_s9 + $0x38] sm:$0xff]  ;;  %v3775_v16 = vld [vmem:[%s16858_s9 + $0x70] sm:$0xff] }
 0x277   :  { %v2770_v20 = vsel %vm16931_vm11, %v2705_v9, %v2218_v37  ;;  %3864 = vperm.xlu0 %10040, %v3768_v53   ;;  %v3773_v37 = vld [vmem:[%s16858_s9 + $0x60] sm:$0xff] }
 0x278   :  { %v2452_v57 = vpop.permute.xlu1 %2451  ;;  %3889 = vperm.xlu1 %10041, %v3773_v37   ;;  %v3789_v37 = vld [vmem:[%s16858_s9 + $0xe0] sm:$0xff] }
 0x279   :  { %v2427_v17 = vpop.permute.xlu0 %2426  ;;  %v2871_v25 = vsel %vm2643_vm7, %v11486_v21, %v2452_v57 }
 0x27a   :  { %v11770_v60 = vsel %vm2773_vm13, %v2770_v20, %v2427_v17 }
 0x27b   :  { %3874 = vperm.xlu0 %10040, %v3770_v11   ;;  %v3783_v11 = vld [vmem:[%s16858_s9 + $0xb0] sm:$0xff] }
 0x27c   :  { %3432 = vmatmul.mubr.bf16.gmra.mrb[148].mxu1 %v11726_v28  ;;  %v2498_v14 = vpop.permute.xlu1 %2497  ;;  %3899 = vperm.xlu1 %10041, %v3775_v16   ;;  %v3793_v16 = vld [vmem:[%s16858_s9 + $0x100] sm:$0xff] }
 0x27d   :  { %3439 = vmatprep.mubr.bf16.mxu1 %v11751_v6  ;;  %v2467_v18 = vpop.permute.xlu0 %2466 }
 0x27e   :  { %v2877_v29 = vsel %vm16931_vm11, %v2871_v25, %v2467_v18  ;;  %v3779_v18 = vld [vmem:[%s16858_s9 + $0x90] sm:$0xff] }
 0x27f   :  { %v11791_v36 = vsel %vm2773_vm13, %v2877_v29, %v2498_v14  ;;  %3884 = vperm.xlu0 %10040, %v3772_v2   ;;  %v3785_v29 = vld [vmem:[%s16858_s9 + $0xc0] sm:$0xff]  ;;  %v3788_v2 = vld [vmem:[%s16858_s9 + $0xd8] sm:$0xff] }
 0x280   :  { %v2087_v22 = vpop.permute.xlu1 %2086  ;;  %3909 = vperm.xlu1 %10041, %v3777_v42   ;;  %v3802_v42 = vld [vmem:[%s16858_s9 + $0x148] sm:$0xff] }
 0x281   :  { %v2454_v13 = vpop.permute.xlu0 %2453  ;;  %v2707_v10 = vsel %vm2643_vm7, %v11486_v21, %v2087_v22  ;;  %v3781_v21 = vld [vmem:[%s16858_s9 + $0xa0] sm:$0xff] }
 0x282   :  { %v2873_v38 = vsel %vm2643_vm7, %v11500_v41, %v2454_v13  ;;  %v3778_v41 = vld [vmem:[%s16858_s9 + $0x88] sm:$0xff] }
 0x283   :  { %3894 = vperm.xlu0 %10040, %v3774_v4   ;;  %v3792_v4 = vld [vmem:[%s16858_s9 + $0xf8] sm:$0xff] }
 0x284   :  { %3440 = vmatmul.mubr.bf16.gmra.mrb[152].mxu1 %v11733_v47  ;;  %v2220_v52 = vpop.permute.xlu1 %2219  ;;  %3919 = vperm.xlu1 %10041, %v3779_v18   ;;  %v3805_v18 = vld [vmem:[%s16858_s9 + $0x160] sm:$0xff] }
 0x285   :  { %3447 = vmatprep.mubr.bf16.mxu1 %v11770_v60  ;;  %v2469_v46 = vpop.permute.xlu0 %2468  ;;  %v2772_v48 = vsel %vm16931_vm11, %v2707_v10, %v2220_v52  ;;  %v3790_v52 = vld [vmem:[%s16858_s9 + $0xe8] sm:$0xff] }
 0x286   :  { %v2879_v31 = vsel %vm16931_vm11, %v2873_v38, %v2469_v46  ;;  %v3794_v38 = vld [vmem:[%s16858_s9 + $0x108] sm:$0xff] }
 0x287   :  { %3904 = vperm.xlu0 %10040, %v3776_v45   ;;  %v3801_v45 = vld [vmem:[%s16858_s9 + $0x140] sm:$0xff]  ;;  %v3806_v10 = vld [vmem:[%s16858_s9 + $0x168] sm:$0xff] }
 0x288   :  { %v2429_v17 = vpop.permute.xlu1 %2428  ;;  %3929 = vperm.xlu1 %10041, %v3781_v21   ;;  %v3817_v21 = vld [vmem:[%s16858_s9 + $0x1c0] sm:$0xff] }
 0x289   :  { %v2500_v23 = vpop.permute.xlu0 %2499  ;;  %v2868_v13 = vsel %vm2773_vm13, %v2772_v48, %v2429_v17  ;;  %v3798_v17 = vld [vmem:[%s16858_s9 + $0x128] sm:$0xff]  ;;  %v3809_v48 = vld [vmem:[%s16858_s9 + $0x180] sm:$0xff] }
 0x28a   :  { %v2887_v57 = vsel %vm2773_vm13, %v2879_v31, %v2500_v23  ;;  %v3787_v23 = vld [vmem:[%s16858_s9 + $0xd0] sm:$0xff]  ;;  %v3796_v31 = vld [vmem:[%s16858_s9 + $0x118] sm:$0xff] }
 0x28b   :  { %3914 = vperm.xlu0 %10040, %v3778_v41   ;;  %v3804_v41 = vld [vmem:[%s16858_s9 + $0x158] sm:$0xff] }
 0x28c   :  { %3448 = vmatmul.mubr.bf16.gmra.mrb[156].mxu1 %v11751_v6  ;;  %v2536_v14 = vpop.permute.xlu1 %2535  ;;  %3939 = vperm.xlu1 %10041, %v3783_v11   ;;  %v3821_v11 = vld [vmem:[%s16858_s9 + $0x1e0] sm:$0xff] }
 0x28d   :  { %3455 = vmatprep.mubr.bf16.mxu1 %v11791_v36  ;;  %v2607_v58 = vpop.permute.xlu0 %2606  ;;  %v2894_v25 = vsel %vm16931_vm11, %v11187_v62, %v2536_v14  ;;  %v3786_v62 = vld [vmem:[%s16858_s9 + $0xc8] sm:$0xff] }
 0x28e   :  { %v2913_v20 = vsel %vm16931_vm11, %v11229_v30, %v2607_v58  ;;  %v3782_v30 = vld [vmem:[%s16858_s9 + $0xa8] sm:$0xff]  ;;  %v3797_v58 = vld [vmem:[%s16858_s9 + $0x120] sm:$0xff] }
 0x28f   :  { %3924 = vperm.xlu0 %10040, %v3780_v50   ;;  %v3810_v14 = vld [vmem:[%s16858_s9 + $0x188] sm:$0xff]  ;;  %v3816_v50 = vld [vmem:[%s16858_s9 + $0x1b8] sm:$0xff] }
 0x290   :  { %v2567_v46 = vpop.permute.xlu1 %2566  ;;  %3949 = vperm.xlu1 %10041, %v3785_v29  }
 0x291   :  { %v2638_v9 = vpop.permute.xlu0 %2637  ;;  %v2900_v22 = vsel %vm2773_vm13, %v2894_v25, %v2567_v46  ;;  %v3820_v46 = vld [vmem:[%s16858_s9 + $0x1d8] sm:$0xff]  ;;  %v3822_v25 = vld [vmem:[%s16858_s9 + $0x1e8] sm:$0xff] }
 0x292   :  { %v2919_v53 = vsel %vm2773_vm13, %v2913_v20, %v2638_v9  ;;  %v3808_v9 = vld [vmem:[%s16858_s9 + $0x178] sm:$0xff] }
 0x293   :  { %3934 = vperm.xlu0 %10040, %v3782_v30   ;;  %v3812_v20 = vld [vmem:[%s16858_s9 + $0x198] sm:$0xff]  ;;  %v3818_v30 = vld [vmem:[%s16858_s9 + $0x1c8] sm:$0xff] }
 0x294   :  { %3456 = vmatmul.mubr.bf16.gmra.mrb[160].mxu1 %v11770_v60  ;;  %3959 = vperm.xlu1 %10041, %v3787_v23  }
 0x295   :  { %3463 = vmatprep.mubr.bf16.mxu1 %v2887_v57  ;;  %v3800_v57 = vld [vmem:[%s16858_s9 + $0x138] sm:$0xff] }
 0x297   :  { %3944 = vperm.xlu0 %10040, %v3784_v27  }
 0x298   :  { %3969 = vperm.xlu1 %10041, %v3789_v37  }
 0x29b   :  { %3954 = vperm.xlu0 %10040, %v3786_v62  }
 0x29c   :  { %3464 = vmatmul.mubr.bf16.gmra.mrb[164].mxu1 %v2868_v13  ;;  %v3813_v13 = vld [vmem:[%s16858_s9 + $0x1a0] sm:$0xff] }
 0x29d   :  { %3504 = vmatprep.mubr.bf16.mxu1 %v2919_v53  ;;  %v3814_v53 = vld [vmem:[%s16858_s9 + $0x1a8] sm:$0xff] }
 0x29f   :  { %3964 = vperm.xlu0 %10040, %v3788_v2  }
 0x2a3   :  { %3974 = vperm.xlu0 %10040, %v3790_v52  }
 0x2a4   :  { %3505 = vmatmul.mubr.bf16.vlgmr.msra.gmra.mrb[40].mxu1 %v2900_v22  ;;  %v3824_v22 = vld [vmem:[%s16858_s9 + $0x1f8] sm:$0xff] }
 0x2a5   :  { %3512 = vmatprep.mubr.bf16.mxu1 %v11272_v12 }
 0x2a7   :  { %3984 = vperm.xlu0 %10040, %v3792_v4  }
 0x2ab   :  { %3994 = vperm.xlu0 %10040, %v3794_v38  }
 0x2ac   :  { %3513 = vmatmul.mubr.bf16.gmra.mrb[44].mxu1 %v11247_v43  ;;  %v3791_v43 = vld [vmem:[%s16858_s9 + $0xf0] sm:$0xff] }
 0x2ad   :  { %3520 = vmatprep.mubr.bf16.mxu1 %v11305_v44  ;;  %3979 = vperm.xlu1 %10041, %v3791_v43  }
 0x2af   :  { %4004 = vperm.xlu0 %10040, %v3796_v31  }
 0x2b1   :  { %3989 = vperm.xlu1 %10041, %v3793_v16  }
 0x2b3   :  { %4014 = vperm.xlu0 %10040, %v3798_v17  }
 0x2b4   :  { %3521 = vmatmul.mubr.bf16.gmra.mrb[48].mxu1 %v11272_v12  ;;  %v3795_v12 = vld [vmem:[%s16858_s9 + $0x110] sm:$0xff] }
 0x2b5   :  { %3528 = vmatprep.mubr.bf16.mxu1 %v11338_v7  ;;  %3999 = vperm.xlu1 %10041, %v3795_v12  }
 0x2b7   :  { %4024 = vperm.xlu0 %10040, %v3800_v57  }
 0x2b9   :  { %4009 = vperm.xlu1 %10041, %v3797_v58   ;;  %v10340_v58 = vld [vmem:[#allocation2 + $0x100] sm:$0xff]  }
 0x2bb   :  { %4034 = vperm.xlu0 %10040, %v3802_v42  }
 0x2bc   :  { %3529 = vmatmul.mubr.bf16.gmra.mrb[52].mxu1 %v11305_v44  ;;  %v3799_v44 = vld [vmem:[%s16858_s9 + $0x130] sm:$0xff] }
 0x2bd   :  { %3536 = vmatprep.mubr.bf16.mxu1 %v11368_v55  ;;  %4019 = vperm.xlu1 %10041, %v3799_v44  }
 0x2bf   :  { %4044 = vperm.xlu0 %10040, %v3804_v41  }
 0x2c1   :  { %4029 = vperm.xlu1 %10041, %v3801_v45  }
 0x2c3   :  { %4054 = vperm.xlu0 %10040, %v3806_v10  }
 0x2c4   :  { %3537 = vmatmul.mubr.bf16.gmra.mrb[56].mxu1 %v11338_v7  ;;  %v3803_v7 = vld [vmem:[%s16858_s9 + $0x150] sm:$0xff] }
 0x2c5   :  { %3544 = vmatprep.mubr.bf16.mxu1 %v11395_v26  ;;  %4039 = vperm.xlu1 %10041, %v3803_v7  }
 0x2c7   :  { %4064 = vperm.xlu0 %10040, %v3808_v9  }
 0x2c9   :  { %4049 = vperm.xlu1 %10041, %v3805_v18  }
 0x2cb   :  { %4074 = vperm.xlu0 %10040, %v3810_v14  }
 0x2cc   :  { %3545 = vmatmul.mubr.bf16.gmra.mrb[60].mxu1 %v11368_v55  ;;  %v3807_v55 = vld [vmem:[%s16858_s9 + $0x170] sm:$0xff] }
 0x2cd   :  { %3552 = vmatprep.mubr.bf16.mxu1 %v11416_v40  ;;  %4059 = vperm.xlu1 %10041, %v3807_v55  }
 0x2cf   :  { %4084 = vperm.xlu0 %10040, %v3812_v20  }
 0x2d1   :  { %4069 = vperm.xlu1 %10041, %v3809_v48  }
 0x2d3   :  { %4094 = vperm.xlu0 %10040, %v3814_v53  }
 0x2d4   :  { %3553 = vmatmul.mubr.bf16.gmra.mrb[64].mxu1 %v11395_v26  ;;  %v3811_v26 = vld [vmem:[%s16858_s9 + $0x190] sm:$0xff] }
 0x2d5   :  { %3560 = vmatprep.mubr.bf16.mxu1 %v11442_v56  ;;  %4079 = vperm.xlu1 %10041, %v3811_v26  }
 0x2d7   :  { %4104 = vperm.xlu0 %10040, %v3816_v50  }
 0x2d9   :  { %4089 = vperm.xlu1 %10041, %v3813_v13  }
 0x2db   :  { %4114 = vperm.xlu0 %10040, %v3818_v30  }
 0x2dc   :  { %3561 = vmatmul.mubr.bf16.gmra.mrb[68].mxu1 %v11416_v40  ;;  %v3815_v40 = vld [vmem:[%s16858_s9 + $0x1b0] sm:$0xff] }
 0x2dd   :  { %3568 = vmatprep.mubr.bf16.mxu1 %v11464_v51  ;;  %4099 = vperm.xlu1 %10041, %v3815_v40  }
 0x2df   :  { %4124 = vperm.xlu0 %10040, %v3820_v46  }
 0x2e1   :  { %4109 = vperm.xlu1 %10041, %v3817_v21  }
 0x2e3   :  { %4134 = vperm.xlu0 %10040, %v3822_v25  }
 0x2e4   :  { %3569 = vmatmul.mubr.bf16.gmra.mrb[72].mxu1 %v11442_v56  ;;  %v3819_v56 = vld [vmem:[%s16858_s9 + $0x1d0] sm:$0xff] }
 0x2e5   :  { %3576 = vmatprep.mubr.bf16.mxu1 %v11490_v5  ;;  %4119 = vperm.xlu1 %10041, %v3819_v56  }
 0x2e7   :  { %4144 = vperm.xlu0 %10040, %v3824_v22  }
 0x2e9   :  { %4129 = vperm.xlu1 %10041, %v3821_v11  }
 0x2ec   :  { %3577 = vmatmul.mubr.bf16.gmra.mrb[76].mxu1 %v11464_v51  ;;  %v3823_v51 = vld [vmem:[%s16858_s9 + $0x1f0] sm:$0xff] }
 0x2ed   :  { %3584 = vmatprep.mubr.bf16.mxu1 %v11517_v59  ;;  %4139 = vperm.xlu1 %10041, %v3823_v51  }
 0x2f4   :  { %3585 = vmatmul.mubr.bf16.gmra.mrb[80].mxu1 %v11490_v5  ;;  %v2523_v5 = vpop.permute.xlu0 %2522 }
 0x2f5   :  { %3592 = vmatprep.mubr.bf16.mxu1 %v11545_v3  ;;  %v2890_v17 = vsel %vm2643_vm7, %v10340_v58, %v2523_v5 }
 0x2fc   :  { %3593 = vmatmul.mubr.bf16.gmra.mrb[84].mxu1 %v11517_v59  ;;  %v2538_v59 = vpop.permute.xlu1 %2537 }
 0x2fd   :  { %3600 = vmatprep.mubr.bf16.mxu1 %v11567_v34  ;;  %v2896_v55 = vsel %vm16931_vm11, %v2890_v17, %v2538_v59 }
 0x304   :  { %3601 = vmatmul.mubr.bf16.gmra.mrb[88].mxu1 %v11545_v3  ;;  %v2569_v3 = vpop.permute.xlu0 %2568 }
 0x305   :  { %3608 = vmatprep.mubr.bf16.mxu1 %v11590_v39  ;;  %v2903_v26 = vsel %vm2773_vm13, %v2896_v55, %v2569_v3  ;;  %v10341_v55 = vld [vmem:[#allocation2 + $0x108] sm:$0xff]  }
 0x30c   :  { %3609 = vmatmul.mubr.bf16.gmra.mrb[92].mxu1 %v11567_v34  ;;  %v2594_v34 = vpop.permute.xlu1 %2593 }
 0x30d   :  { %3616 = vmatprep.mubr.bf16.mxu1 %v11613_v1  ;;  %v2909_v30 = vsel %vm2643_vm7, %v11593_v8, %v2594_v34 }
 0x314   :  { %3617 = vmatmul.mubr.bf16.gmra.mrb[96].mxu1 %v11590_v39  ;;  %v2609_v39 = vpop.permute.xlu0 %2608 }
 0x315   :  { %3624 = vmatprep.mubr.bf16.mxu1 %v11632_v32  ;;  %v2915_v11 = vsel %vm16931_vm11, %v2909_v30, %v2609_v39 }
 0x31c   :  { %3625 = vmatmul.mubr.bf16.gmra.mrb[100].mxu1 %v11613_v1  ;;  %v12033_v1 = vpop.permute.xlu1 %2639 }
 0x31d   :  { %3632 = vmatprep.mubr.bf16.mxu1 %v11652_v61  ;;  %v2922_v34 = vsel %vm2773_vm13, %v2915_v11, %v12033_v1 }
 0x324   :  { %3633 = vmatmul.mubr.bf16.gmra.mrb[104].mxu1 %v11632_v32  ;;  %v12036_v32 = vpop.permute.xlu0 %2595 }
 0x325   :  { %3640 = vmatprep.mubr.bf16.mxu1 %v11667_v19 }
 0x32c   :  { %3641 = vmatmul.mubr.bf16.gmra.mrb[108].mxu1 %v11652_v61  ;;  %v12039_v61 = vpop.permute.xlu1 %2524 }
 0x32d   :  { %3648 = vmatprep.mubr.bf16.mxu1 %v11678_v49 }
 0x334   :  { %3649 = vmatmul.mubr.bf16.gmra.mrb[112].mxu1 %v11667_v19  ;;  %v12041_v19 = vpop.permute.xlu0 %2610 }
 0x335   :  { %3656 = vmatprep.mubr.bf16.mxu1 %v11686_v54 }
 0x33c   :  { %3657 = vmatmul.mubr.bf16.gmra.mrb[116].mxu1 %v11678_v49  ;;  %v12045_v49 = vpop.permute.xlu1 %2539 }
 0x33d   :  { %3664 = vmatprep.mubr.bf16.mxu1 %v11694_v33 }
 0x344   :  { %3665 = vmatmul.mubr.bf16.gmra.mrb[120].mxu1 %v11686_v54  ;;  %v12047_v54 = vpop.permute.xlu0 %2641 }
 0x345   :  { %3672 = vmatprep.mubr.bf16.mxu1 %v11702_v63 }
 0x34c   :  { %3673 = vmatmul.mubr.bf16.gmra.mrb[124].mxu1 %v11694_v33  ;;  %v12050_v33 = vpop.permute.xlu1 %2570 }
 0x34d   :  { %3680 = vmatprep.mubr.bf16.mxu1 %v11710_v15 }
 0x350   :  { %v3835_v29 = vpop.permute.xlu1 %3834 }
 0x354   :  { %3681 = vmatmul.mubr.bf16.gmra.mrb[128].mxu1 %v11702_v63  ;;  %v3830_v63 = vpop.permute.xlu0 %3829  ;;  %v3840_v12 = vpop.permute.xlu1 %3839 }
 0x355   :  { %3688 = vmatprep.mubr.bf16.mxu1 %v11717_v24 }
 0x358   :  { %v3845_v45 = vpop.permute.xlu0 %3844  ;;  %v3850_v40 = vpop.permute.xlu1 %3849 }
 0x35c   :  { %3689 = vmatmul.mubr.bf16.gmra.mrb[132].mxu1 %v11710_v15 }
 0x35d   :  { %3696 = vmatprep.mubr.bf16.mxu1 %v11726_v28 }
 0x364   :  { %3697 = vmatmul.mubr.bf16.gmra.mrb[136].mxu1 %v11717_v24 }
 0x365   :  { %3704 = vmatprep.mubr.bf16.mxu1 %v11733_v47 }
 0x36c   :  { %3705 = vmatmul.mubr.bf16.gmra.mrb[140].mxu1 %v11726_v28 }
 0x36d   :  { %3712 = vmatprep.mubr.bf16.mxu1 %v11751_v6 }
 0x374   :  { %3713 = vmatmul.mubr.bf16.gmra.mrb[144].mxu1 %v11733_v47 }
 0x375   :  { %3720 = vmatprep.mubr.bf16.mxu1 %v11770_v60 }
 0x377   :  { %v12053_v15 = vpop.f32.mrb[40].mxu1 }
 0x378   :  { %v4147_v24 = vmul.f32 %v3830_v63, %v12053_v15  ;;  %v3508_v27 = vpop.f32.mrb[41].mxu1 }
 0x379   :  { %v12056_v28 = vpop.f32.mrb[42].mxu1 }
 0x37a   :  { %v4345_v62 = vmul.f32 %v4147_v24, %v4147_v24  ;;  %v4148_v23 = vmul.f32 %v3835_v29, %v12056_v28  ;;  %v3511_v2 = vpop.f32.mrb[43].mxu1  ;;  %v4211_v37 = vsel %vm16931_vm11, %v4147_v24, 0.0 }
 0x37c   :  { %v4212_v47 = vsel %vm16931_vm11, %v4148_v23, 0.0  ;;  %v4346_v52 = vmul.f32 %v4148_v23, %v4148_v23  ;;  %3721 = vmatmul.mubr.bf16.gmra.mrb[148].mxu1 %v11751_v6  ;;  %v4409_v4 = vsel %vm16931_vm11, %v4345_v62, 0.0  ;;  %v3860_v62 = vpop.permute.xlu1 %3859 }
 0x37d   :  { %v4213_v43 = vadd.f32 %v4212_v47, %v4211_v37  ;;  %3728 = vmatprep.mubr.bf16.mxu1 %v11791_v36 }
 0x37e   :  { %v4410_v16 = vsel %vm16931_vm11, %v4346_v52, 0.0 }
 0x37f   :  { %v4411_v38 = vadd.f32 %v4410_v16, %v4409_v4  ;;  %v12065_v31 = vpop.f32.mrb[44].mxu1 }
 0x380   :  { %v4149_v44 = vmul.f32 %v3840_v12, %v12065_v31  ;;  %v3516_v57 = vpop.f32.mrb[45].mxu1 }
 0x381   :  { %v12069_v42 = vpop.f32.mrb[46].mxu1 }
 0x382   :  { %v4214_v6 = vsel %vm16931_vm11, %v4149_v44, 0.0  ;;  %v4347_v7 = vmul.f32 %v4149_v44, %v4149_v44  ;;  %v4150_v41 = vmul.f32 %v3845_v45, %v12069_v42  ;;  %v3519_v18 = vpop.f32.mrb[47].mxu1 }
 0x383   :  { %v4215_v10 = vadd.f32 %v4214_v6, %v4213_v43 }
 0x384   :  { %v4412_v9 = vsel %vm16931_vm11, %v4347_v7, 0.0  ;;  %v4216_v48 = vsel %vm16931_vm11, %v4150_v41, 0.0  ;;  %v4348_v14 = vmul.f32 %v4150_v41, %v4150_v41  ;;  %3729 = vmatmul.mubr.bf16.gmra.mrb[152].mxu1 %v11770_v60  ;;  %v3855_v60 = vpop.permute.xlu0 %3854  ;;  %v3870_v7 = vpop.permute.xlu1 %3869 }
 0x385   :  { %v4413_v20 = vadd.f32 %v4412_v9, %v4411_v38  ;;  %v4217_v13 = vadd.f32 %v4216_v48, %v4215_v10  ;;  %3736 = vmatprep.mubr.bf16.mxu1 %v2903_v26  ;;  %v2892_v9 = vsel %vm2643_vm7, %v10341_v55, %v12039_v61 }
 0x386   :  { %v4414_v53 = vsel %vm16931_vm11, %v4348_v14, 0.0 }
 0x387   :  { %v4415_v50 = vadd.f32 %v4414_v53, %v4413_v20  ;;  %v12079_v21 = vpop.f32.mrb[48].mxu1 }
 0x388   :  { %v4151_v56 = vmul.f32 %v3850_v40, %v12079_v21  ;;  %v3524_v46 = vpop.f32.mrb[49].mxu1  ;;  %v3865_v52 = vpop.permute.xlu0 %3864 }
 0x389   :  { %v12085_v25 = vpop.f32.mrb[50].mxu1 }
 0x38a   :  { %v4218_v51 = vsel %vm16931_vm11, %v4151_v56, 0.0  ;;  %v4349_v22 = vmul.f32 %v4151_v56, %v4151_v56  ;;  %v4152_v5 = vmul.f32 %v3855_v60, %v12085_v25  ;;  %v3527_v59 = vpop.f32.mrb[51].mxu1  ;;  %v3880_v60 = vpop.permute.xlu1 %3879 }
 0x38b   :  { %v4219_v3 = vadd.f32 %v4218_v51, %v4217_v13 }
 0x38c   :  { %v4416_v63 = vsel %vm16931_vm11, %v4349_v22, 0.0  ;;  %v4220_v24 = vsel %vm16931_vm11, %v4152_v5, 0.0  ;;  %v4350_v8 = vmul.f32 %v4152_v5, %v4152_v5  ;;  %3737 = vmatmul.mubr.bf16.gmra.mrb[156].mxu1 %v11791_v36  ;;  %v2911_v36 = vsel %vm2643_vm7, %v11597_v35, %v12036_v32  ;;  %v3875_v48 = vpop.permute.xlu0 %3874 }
 0x38d   :  { %v4417_v39 = vadd.f32 %v4416_v63, %v4415_v50  ;;  %v4221_v27 = vadd.f32 %v4220_v24, %v4219_v3  ;;  %3744 = vmatprep.mubr.bf16.mxu1 %v2922_v34  ;;  %v2917_v12 = vsel %vm16931_vm11, %v2911_v36, %v12041_v19 }
 0x38e   :  { %v4418_v29 = vsel %vm16931_vm11, %v4350_v8, 0.0  ;;  %v2925_v45 = vsel %vm2773_vm13, %v2917_v12, %v12047_v54  ;;  %v2898_v54 = vsel %vm16931_vm11, %v2892_v9, %v12045_v49 }
 0x38f   :  { %v4419_v23 = vadd.f32 %v4418_v29, %v4417_v39  ;;  %v12095_v2 = vpop.f32.mrb[52].mxu1  ;;  %v2906_v50 = vsel %vm2773_vm13, %v2898_v54, %v12050_v33 }
 0x390   :  { %v4153_v37 = vmul.f32 %v3860_v62, %v12095_v2  ;;  %v3532_v47 = vpop.f32.mrb[53].mxu1  ;;  %v3885_v3 = vpop.permute.xlu0 %3884 }
 0x391   :  { %v12098_v43 = vpop.f32.mrb[54].mxu1 }
 0x392   :  { %v4222_v1 = vsel %vm16931_vm11, %v4153_v37, 0.0  ;;  %v4351_v4 = vmul.f32 %v4153_v37, %v4153_v37  ;;  %v4154_v16 = vmul.f32 %v3865_v52, %v12098_v43  ;;  %v3535_v38 = vpop.f32.mrb[55].mxu1  ;;  %v3890_v52 = vpop.permute.xlu1 %3889 }
 0x393   :  { %v4223_v58 = vadd.f32 %v4222_v1, %v4221_v27 }
 0x394   :  { %v4420_v17 = vsel %vm16931_vm11, %v4351_v4, 0.0  ;;  %v4224_v44 = vsel %vm16931_vm11, %v4154_v16, 0.0  ;;  %v4352_v57 = vmul.f32 %v4154_v16, %v4154_v16  ;;  %3745 = vmatmul.mubr.bf16.gmra.mrb[160].mxu1 %v2903_v26  ;;  %v3895_v38 = vpop.permute.xlu0 %3894 }
 0x395   :  { %v4421_v35 = vadd.f32 %v4420_v17, %v4419_v23  ;;  %v4225_v32 = vadd.f32 %v4224_v44, %v4223_v58  ;;  %3752 = vmatprep.mubr.bf16.mxu1 %v2925_v45 }
 0x396   :  { %v4422_v6 = vsel %vm16931_vm11, %v4352_v57, 0.0 }
 0x397   :  { %v4423_v41 = vadd.f32 %v4422_v6, %v4421_v35  ;;  %v12112_v18 = vpop.f32.mrb[56].mxu1 }
 0x398   :  { %v4155_v19 = vmul.f32 %v3870_v7, %v12112_v18  ;;  %v3540_v10 = vpop.f32.mrb[57].mxu1 }
 0x399   :  { %v12117_v14 = vpop.f32.mrb[58].mxu1  ;;  %v3900_v10 = vpop.permute.xlu1 %3899 }
 0x39a   :  { %v4226_v26 = vsel %vm16931_vm11, %v4155_v19, 0.0  ;;  %v4353_v20 = vmul.f32 %v4155_v19, %v4155_v19  ;;  %v4156_v13 = vmul.f32 %v3875_v48, %v12117_v14  ;;  %v3543_v53 = vpop.f32.mrb[59].mxu1 }
 0x39b   :  { %v4227_v40 = vadd.f32 %v4226_v26, %v4225_v32  ;;  %v3905_v26 = vpop.permute.xlu0 %3904 }
 0x39c   :  { %v4424_v30 = vsel %vm16931_vm11, %v4353_v20, 0.0  ;;  %v4228_v61 = vsel %vm16931_vm11, %v4156_v13, 0.0  ;;  %v4354_v56 = vmul.f32 %v4156_v13, %v4156_v13  ;;  %3753 = vmatmul.mubr.bf16.gmra.mrb[164].mxu1 %v2906_v50 }
 0x39d   :  { %v4425_v46 = vadd.f32 %v4424_v30, %v4423_v41  ;;  %v4229_v11 = vadd.f32 %v4228_v61, %v4227_v40 }
 0x39e   :  { %v4426_v49 = vsel %vm16931_vm11, %v4354_v56, 0.0 }
 0x39f   :  { %v4427_v51 = vadd.f32 %v4426_v49, %v4425_v46  ;;  %v12128_v22 = vpop.f32.mrb[60].mxu1 }
 0x3a0   :  { %v4157_v5 = vmul.f32 %v3880_v60, %v12128_v22  ;;  %v3548_v59 = vpop.f32.mrb[61].mxu1 }
 0x3a1   :  { %v12131_v63 = vpop.f32.mrb[62].mxu1 }
 0x3a2   :  { %v4230_v33 = vsel %vm16931_vm11, %v4157_v5, 0.0  ;;  %v4355_v24 = vmul.f32 %v4157_v5, %v4157_v5  ;;  %v4158_v8 = vmul.f32 %v3885_v3, %v12131_v63  ;;  %v3551_v34 = vpop.f32.mrb[63].mxu1 }
 0x3a3   :  { %v4231_v39 = vadd.f32 %v4230_v33, %v4229_v11 }
 0x3a4   :  { %v4428_v27 = vsel %vm16931_vm11, %v4355_v24, 0.0  ;;  %v4232_v29 = vsel %vm16931_vm11, %v4158_v8, 0.0  ;;  %v4356_v62 = vmul.f32 %v4158_v8, %v4158_v8  ;;  %v3915_v24 = vpop.permute.xlu0 %3914 }
 0x3a5   :  { %v4429_v23 = vadd.f32 %v4428_v27, %v4427_v51  ;;  %v4233_v37 = vadd.f32 %v4232_v29, %v4231_v39  ;;  %v3910_v51 = vpop.permute.xlu1 %3909 }
 0x3a6   :  { %v4430_v47 = vsel %vm16931_vm11, %v4356_v62, 0.0 }
 0x3a7   :  { %v4431_v36 = vadd.f32 %v4430_v47, %v4429_v23  ;;  %v12138_v1 = vpop.f32.mrb[64].mxu1 }
 0x3a8   :  { %v4159_v4 = vmul.f32 %v3890_v52, %v12138_v1  ;;  %v3556_v16 = vpop.f32.mrb[65].mxu1 }
 0x3a9   :  { %v12141_v12 = vpop.f32.mrb[66].mxu1  ;;  %v3920_v16 = vpop.permute.xlu1 %3919 }
 0x3aa   :  { %v4234_v58 = vsel %vm16931_vm11, %v4159_v4, 0.0  ;;  %v4357_v17 = vmul.f32 %v4159_v4, %v4159_v4  ;;  %v4160_v44 = vmul.f32 %v3895_v38, %v12141_v12  ;;  %v3559_v57 = vpop.f32.mrb[67].mxu1 }
 0x3ab   :  { %v4235_v45 = vadd.f32 %v4234_v58, %v4233_v37  ;;  %v3925_v57 = vpop.permute.xlu0 %3924 }
 0x3ac   :  { %v4432_v35 = vsel %vm16931_vm11, %v4357_v17, 0.0  ;;  %v4236_v32 = vsel %vm16931_vm11, %v4160_v44, 0.0  ;;  %v4358_v6 = vmul.f32 %v4160_v44, %v4160_v44 }
 0x3ad   :  { %v4433_v7 = vadd.f32 %v4432_v35, %v4431_v36  ;;  %v4237_v41 = vadd.f32 %v4236_v32, %v4235_v45 }
 0x3ae   :  { %v4434_v19 = vsel %vm16931_vm11, %v4358_v6, 0.0 }
 0x3af   :  { %v4435_v55 = vadd.f32 %v4434_v19, %v4433_v7  ;;  %v12148_v9 = vpop.f32.mrb[68].mxu1 }
 0x3b0   :  { %v4161_v48 = vmul.f32 %v3900_v10, %v12148_v9  ;;  %v3564_v54 = vpop.f32.mrb[69].mxu1 }
 0x3b1   :  { %v12151_v20 = vpop.f32.mrb[70].mxu1 }
 0x3b2   :  { %v4238_v13 = vsel %vm16931_vm11, %v4161_v48, 0.0  ;;  %v4359_v53 = vmul.f32 %v4161_v48, %v4161_v48  ;;  %v4162_v40 = vmul.f32 %v3905_v26, %v12151_v20  ;;  %v3567_v50 = vpop.f32.mrb[71].mxu1 }
 0x3b3   :  { %v4239_v30 = vadd.f32 %v4238_v13, %v4237_v41  ;;  %v3930_v13 = vpop.permute.xlu1 %3929 }
 0x3b4   :  { %v4436_v61 = vsel %vm16931_vm11, %v4359_v53, 0.0  ;;  %v4240_v56 = vsel %vm16931_vm11, %v4162_v40, 0.0  ;;  %v4360_v46 = vmul.f32 %v4162_v40, %v4162_v40 }
 0x3b5   :  { %v4437_v11 = vadd.f32 %v4436_v61, %v4435_v55  ;;  %v4241_v49 = vadd.f32 %v4240_v56, %v4239_v30  ;;  %v3935_v61 = vpop.permute.xlu0 %3934 }
 0x3b6   :  { %v4438_v60 = vsel %vm16931_vm11, %v4360_v46, 0.0 }
 0x3b7   :  { %v4439_v5 = vadd.f32 %v4438_v60, %v4437_v11  ;;  %v12158_v59 = vpop.f32.mrb[72].mxu1 }
 0x3b8   :  { %v4163_v3 = vmul.f32 %v3910_v51, %v12158_v59  ;;  %v3572_v33 = vpop.f32.mrb[73].mxu1 }
 0x3b9   :  { %v12161_v8 = vpop.f32.mrb[74].mxu1 }
 0x3ba   :  { %v4242_v34 = vsel %vm16931_vm11, %v4163_v3, 0.0  ;;  %v4361_v39 = vmul.f32 %v4163_v3, %v4163_v3  ;;  %v4164_v27 = vmul.f32 %v3915_v24, %v12161_v8  ;;  %v3575_v29 = vpop.f32.mrb[75].mxu1 }
 0x3bb   :  { %v4243_v62 = vadd.f32 %v4242_v34, %v4241_v49 }
 0x3bc   :  { %v4440_v23 = vsel %vm16931_vm11, %v4361_v39, 0.0  ;;  %v4244_v37 = vsel %vm16931_vm11, %v4164_v27, 0.0  ;;  %v4362_v47 = vmul.f32 %v4164_v27, %v4164_v27  ;;  %v3940_v27 = vpop.permute.xlu1 %3939 }
 0x3bd   :  { %v4441_v52 = vadd.f32 %v4440_v23, %v4439_v5  ;;  %v4245_v36 = vadd.f32 %v4244_v37, %v4243_v62 }
 0x3be   :  { %v4442_v4 = vsel %vm16931_vm11, %v4362_v47, 0.0  ;;  %v3945_v47 = vpop.permute.xlu0 %3944 }
 0x3bf   :  { %v4443_v38 = vadd.f32 %v4442_v4, %v4441_v52  ;;  %v12168_v58 = vpop.f32.mrb[76].mxu1 }
 0x3c0   :  { %v4165_v17 = vmul.f32 %v3920_v16, %v12168_v58  ;;  %v3580_v44 = vpop.f32.mrb[77].mxu1 }
 0x3c1   :  { %v12171_v45 = vpop.f32.mrb[78].mxu1 }
 0x3c2   :  { %v4246_v35 = vsel %vm16931_vm11, %v4165_v17, 0.0  ;;  %v4363_v32 = vmul.f32 %v4165_v17, %v4165_v17  ;;  %v4166_v6 = vmul.f32 %v3925_v57, %v12171_v45  ;;  %v3583_v7 = vpop.f32.mrb[79].mxu1 }
 0x3c3   :  { %v4247_v41 = vadd.f32 %v4246_v35, %v4245_v36 }
 0x3c4   :  { %v4444_v19 = vsel %vm16931_vm11, %v4363_v32, 0.0  ;;  %v4248_v10 = vsel %vm16931_vm11, %v4166_v6, 0.0  ;;  %v4364_v55 = vmul.f32 %v4166_v6, %v4166_v6 }
 0x3c5   :  { %v4445_v48 = vadd.f32 %v4444_v19, %v4443_v38  ;;  %v4249_v54 = vadd.f32 %v4248_v10, %v4247_v41  ;;  %v3950_v41 = vpop.permute.xlu1 %3949 }
 0x3c6   :  { %v4446_v26 = vsel %vm16931_vm11, %v4364_v55, 0.0 }
 0x3c7   :  { %v4447_v53 = vadd.f32 %v4446_v26, %v4445_v48  ;;  %v12178_v40 = vpop.f32.mrb[80].mxu1  ;;  %v3955_v26 = vpop.permute.xlu0 %3954 }
 0x3c8   :  { %v4167_v50 = vmul.f32 %v3930_v13, %v12178_v40  ;;  %v3588_v30 = vpop.f32.mrb[81].mxu1 }
 0x3c9   :  { %v12181_v56 = vpop.f32.mrb[82].mxu1 }
 0x3ca   :  { %v4250_v46 = vsel %vm16931_vm11, %v4167_v50, 0.0  ;;  %v4365_v11 = vmul.f32 %v4167_v50, %v4167_v50  ;;  %v4168_v49 = vmul.f32 %v3935_v61, %v12181_v56  ;;  %v3591_v60 = vpop.f32.mrb[83].mxu1 }
 0x3cb   :  { %v4251_v51 = vadd.f32 %v4250_v46, %v4249_v54  ;;  %v10235_v54 = vld [vmem:[%s16859_s5] sm:$0xff]  }
 0x3cc   :  { %v4448_v5 = vsel %vm16931_vm11, %v4365_v11, 0.0  ;;  %v4252_v3 = vsel %vm16931_vm11, %v4168_v49, 0.0  ;;  %v4366_v33 = vmul.f32 %v4168_v49, %v4168_v49  ;;  %6769 = vmatpush1.bf16.msra.mxu0 %v10235_v54 }
 0x3cd   :  { %v4449_v24 = vadd.f32 %v4448_v5, %v4447_v53  ;;  %v4253_v34 = vadd.f32 %v4252_v3, %v4251_v51  ;;  %6770 = vmatprep.subr.bf16.mxu0 %v16867_v0 }
 0x3ce   :  { %v4450_v39 = vsel %vm16931_vm11, %v4366_v33, 0.0  ;;  %v3960_v33 = vpop.permute.xlu1 %3959 }
 0x3cf   :  { %v4451_v29 = vadd.f32 %v4450_v39, %v4449_v24  ;;  %v12188_v62 = vpop.f32.mrb[84].mxu1 }
 0x3d0   :  { %v4169_v23 = vmul.f32 %v3940_v27, %v12188_v62  ;;  %v3596_v37 = vpop.f32.mrb[85].mxu1 }
 0x3d1   :  { %v12191_v52 = vpop.f32.mrb[86].mxu1 }
 0x3d2   :  { %v4254_v36 = vsel %vm16931_vm11, %v4169_v23, 0.0  ;;  %v4367_v4 = vmul.f32 %v4169_v23, %v4169_v23  ;;  %v4170_v16 = vmul.f32 %v3945_v47, %v12191_v52  ;;  %v3599_v38 = vpop.f32.mrb[87].mxu1 }
 0x3d3   :  { %v4255_v17 = vadd.f32 %v4254_v36, %v4253_v34 }
 0x3d4   :  { %v4452_v44 = vsel %vm16931_vm11, %v4367_v4, 0.0  ;;  %v4256_v57 = vsel %vm16931_vm11, %v4170_v16, 0.0  ;;  %v4368_v35 = vmul.f32 %v4170_v16, %v4170_v16 }
 0x3d5   :  { %v4453_v32 = vadd.f32 %v4452_v44, %v4451_v29  ;;  %v4257_v6 = vadd.f32 %v4256_v57, %v4255_v17  ;;  %v3965_v29 = vpop.permute.xlu0 %3964 }
 0x3d6   :  { %v4454_v7 = vsel %vm16931_vm11, %v4368_v35, 0.0 }
 0x3d7   :  { %v4455_v19 = vadd.f32 %v4454_v7, %v4453_v32  ;;  %v12198_v10 = vpop.f32.mrb[88].mxu1  ;;  %v10236_v32 = vld [vmem:[%s16859_s5 + $0x8] sm:$0xff]   ;;  %v3970_v7 = vpop.permute.xlu1 %3969 }
 0x3d8   :  { %v4171_v55 = vmul.f32 %v3950_v41, %v12198_v10  ;;  %v3604_v48 = vpop.f32.mrb[89].mxu1  ;;  %6771 = vmatpush1.bf16.msra.mxu0 %v10236_v32 }
 0x3d9   :  { %v12204_v13 = vpop.f32.mrb[90].mxu1  ;;  %6772 = vmatprep.subr.bf16.mxu0 %v16867_v0  ;;  %v3975_v54 = vpop.permute.xlu0 %3974 }
 0x3da   :  { %v4258_v53 = vsel %vm16931_vm11, %v4171_v55, 0.0  ;;  %v4369_v50 = vmul.f32 %v4171_v55, %v4171_v55  ;;  %v4172_v30 = vmul.f32 %v3955_v26, %v12204_v13  ;;  %v3607_v61 = vpop.f32.mrb[91].mxu1 }
 0x3db   :  { %v4259_v46 = vadd.f32 %v4258_v53, %v4257_v6 }
 0x3dc   :  { %v4456_v11 = vsel %vm16931_vm11, %v4369_v50, 0.0  ;;  %v4260_v49 = vsel %vm16931_vm11, %v4172_v30, 0.0  ;;  %v4370_v60 = vmul.f32 %v4172_v30, %v4172_v30 }
 0x3dd   :  { %v4457_v51 = vadd.f32 %v4456_v11, %v4455_v19  ;;  %v4261_v5 = vadd.f32 %v4260_v49, %v4259_v46 }
 0x3de   :  { %v4458_v3 = vsel %vm16931_vm11, %v4370_v60, 0.0 }
 0x3df   :  { %v4459_v24 = vadd.f32 %v4458_v3, %v4457_v51  ;;  %v12212_v34 = vpop.f32.mrb[92].mxu1 }
 0x3e0   :  { %v4173_v39 = vmul.f32 %v3960_v33, %v12212_v34  ;;  %v3612_v27 = vpop.f32.mrb[93].mxu1  ;;  %v3980_v33 = vpop.permute.xlu1 %3979 }
 0x3e1   :  { %v12215_v23 = vpop.f32.mrb[94].mxu1  ;;  %v10237_v27 = vld [vmem:[%s16859_s5 + $0x10] sm:$0xff]  }
 0x3e2   :  { %v4262_v37 = vsel %vm16931_vm11, %v4173_v39, 0.0  ;;  %v4371_v47 = vmul.f32 %v4173_v39, %v4173_v39  ;;  %v4174_v36 = vmul.f32 %v3965_v29, %v12215_v23  ;;  %v3615_v4 = vpop.f32.mrb[95].mxu1  ;;  %6773 = vmatpush1.bf16.msra.mxu0 %v10237_v27 }
 0x3e3   :  { %v4263_v16 = vadd.f32 %v4262_v37, %v4261_v5  ;;  %6774 = vmatprep.subr.bf16.mxu0 %v16867_v0 }
 0x3e4   :  { %v4460_v38 = vsel %vm16931_vm11, %v4371_v47, 0.0  ;;  %v4264_v17 = vsel %vm16931_vm11, %v4174_v36, 0.0  ;;  %v4372_v44 = vmul.f32 %v4174_v36, %v4174_v36  ;;  %v3985_v47 = vpop.permute.xlu0 %3984 }
 0x3e5   :  { %v4461_v57 = vadd.f32 %v4460_v38, %v4459_v24  ;;  %v4265_v35 = vadd.f32 %v4264_v17, %v4263_v16 }
 0x3e6   :  { %v4462_v6 = vsel %vm16931_vm11, %v4372_v44, 0.0 }
 0x3e7   :  { %v4463_v41 = vadd.f32 %v4462_v6, %v4461_v57  ;;  %v12225_v19 = vpop.f32.mrb[96].mxu1 }
 0x3e8   :  { %v4175_v55 = vmul.f32 %v3970_v7, %v12225_v19  ;;  %v3620_v48 = vpop.f32.mrb[97].mxu1 }
 0x3e9   :  { %v12229_v26 = vpop.f32.mrb[98].mxu1 }
 0x3ea   :  { %v4266_v53 = vsel %vm16931_vm11, %v4175_v55, 0.0  ;;  %v4373_v50 = vmul.f32 %v4175_v55, %v4175_v55  ;;  %v4176_v30 = vmul.f32 %v3975_v54, %v12229_v26  ;;  %v3623_v61 = vpop.f32.mrb[99].mxu1  ;;  %v3990_v55 = vpop.permute.xlu1 %3989 }
 0x3eb   :  { %v4267_v46 = vadd.f32 %v4266_v53, %v4265_v35 }
 0x3ec   :  { %v4464_v11 = vsel %vm16931_vm11, %v4373_v50, 0.0  ;;  %v4268_v49 = vsel %vm16931_vm11, %v4176_v30, 0.0  ;;  %v4374_v60 = vmul.f32 %v4176_v30, %v4176_v30  ;;  %v3995_v30 = vpop.permute.xlu0 %3994 }
 0x3ed   :  { %v4465_v51 = vadd.f32 %v4464_v11, %v4463_v41  ;;  %v4269_v5 = vadd.f32 %v4268_v49, %v4267_v46 }
 0x3ee   :  { %v4466_v3 = vsel %vm16931_vm11, %v4374_v60, 0.0 }
 0x3ef   :  { %v4467_v24 = vadd.f32 %v4466_v3, %v4465_v51  ;;  %v12236_v39 = vpop.f32.mrb[100].mxu1 }
 0x3f0   :  { %v4177_v29 = vmul.f32 %v3980_v33, %v12236_v39  ;;  %v3628_v37 = vpop.f32.mrb[101].mxu1 }
 0x3f1   :  { %v12242_v36 = vpop.f32.mrb[102].mxu1  ;;  %v4000_v37 = vpop.permute.xlu1 %3999 }
 0x3f2   :  { %v4270_v4 = vsel %vm16931_vm11, %v4177_v29, 0.0  ;;  %v4375_v16 = vmul.f32 %v4177_v29, %v4177_v29  ;;  %v4178_v38 = vmul.f32 %v3985_v47, %v12242_v36  ;;  %v3631_v17 = vpop.f32.mrb[103].mxu1 }
 0x3f3   :  { %v4271_v44 = vadd.f32 %v4270_v4, %v4269_v5  ;;  %v4005_v17 = vpop.permute.xlu0 %4004 }
 0x3f4   :  { %v4468_v57 = vsel %vm16931_vm11, %v4375_v16, 0.0  ;;  %v4272_v35 = vsel %vm16931_vm11, %v4178_v38, 0.0  ;;  %v4376_v32 = vmul.f32 %v4178_v38, %v4178_v38 }
 0x3f5   :  { %v4469_v6 = vadd.f32 %v4468_v57, %v4467_v24  ;;  %v4273_v7 = vadd.f32 %v4272_v35, %v4271_v44 }
 0x3f6   :  { %v4470_v41 = vsel %vm16931_vm11, %v4376_v32, 0.0 }
 0x3f7   :  { %v4471_v48 = vadd.f32 %v4470_v41, %v4469_v6  ;;  %v12250_v54 = vpop.f32.mrb[104].mxu1 }
 0x3f8   :  { %v4179_v53 = vmul.f32 %v3990_v55, %v12250_v54  ;;  %v3636_v50 = vpop.f32.mrb[105].mxu1 }
 0x3f9   :  { %v12253_v61 = vpop.f32.mrb[106].mxu1 }
 0x3fa   :  { %v4274_v46 = vsel %vm16931_vm11, %v4179_v53, 0.0  ;;  %v4377_v11 = vmul.f32 %v4179_v53, %v4179_v53  ;;  %v4180_v49 = vmul.f32 %v3995_v30, %v12253_v61  ;;  %v3639_v60 = vpop.f32.mrb[107].mxu1 }
 0x3fb   :  { %v4275_v51 = vadd.f32 %v4274_v46, %v4273_v7  ;;  %v4010_v46 = vpop.permute.xlu1 %4009 }
 0x3fc   :  { %v4472_v5 = vsel %vm16931_vm11, %v4377_v11, 0.0  ;;  %v4276_v3 = vsel %vm16931_vm11, %v4180_v49, 0.0  ;;  %v4378_v33 = vmul.f32 %v4180_v49, %v4180_v49 }
 0x3fd   :  { %v4473_v24 = vadd.f32 %v4472_v5, %v4471_v48  ;;  %v4277_v27 = vadd.f32 %v4276_v3, %v4275_v51  ;;  %v4015_v5 = vpop.permute.xlu0 %4014 }
 0x3fe   :  { %v4474_v29 = vsel %vm16931_vm11, %v4378_v33, 0.0 }
 0x3ff   :  { %v4475_v47 = vadd.f32 %v4474_v29, %v4473_v24  ;;  %v12260_v4 = vpop.f32.mrb[108].mxu1 }
 0x400   :  { %v4181_v16 = vmul.f32 %v4000_v37, %v12260_v4  ;;  %v3644_v38 = vpop.f32.mrb[109].mxu1 }
 0x401   :  { %v12263_v44 = vpop.f32.mrb[110].mxu1 }
 0x402   :  { %v4278_v57 = vsel %vm16931_vm11, %v4181_v16, 0.0  ;;  %v4379_v35 = vmul.f32 %v4181_v16, %v4181_v16  ;;  %v4182_v32 = vmul.f32 %v4005_v17, %v12263_v44  ;;  %v3647_v6 = vpop.f32.mrb[111].mxu1 }
 0x403   :  { %v4279_v7 = vadd.f32 %v4278_v57, %v4277_v27 }
 0x404   :  { %v4476_v41 = vsel %vm16931_vm11, %v4379_v35, 0.0  ;;  %v4280_v55 = vsel %vm16931_vm11, %v4182_v32, 0.0  ;;  %v4380_v48 = vmul.f32 %v4182_v32, %v4182_v32  ;;  %v4020_v32 = vpop.permute.xlu1 %4019 }
 0x405   :  { %v4477_v53 = vadd.f32 %v4476_v41, %v4475_v47  ;;  %v4281_v50 = vadd.f32 %v4280_v55, %v4279_v7 }
 0x406   :  { %v4478_v30 = vsel %vm16931_vm11, %v4380_v48, 0.0  ;;  %v4025_v48 = vpop.permute.xlu0 %4024 }
 0x407   :  { %v4479_v11 = vadd.f32 %v4478_v30, %v4477_v53  ;;  %v12270_v49 = vpop.f32.mrb[112].mxu1 }
 0x408   :  { %v4183_v60 = vmul.f32 %v4010_v46, %v12270_v49  ;;  %v3652_v51 = vpop.f32.mrb[113].mxu1 }
 0x409   :  { %v12273_v3 = vpop.f32.mrb[114].mxu1 }
 0x40a   :  { %v4282_v33 = vsel %vm16931_vm11, %v4183_v60, 0.0  ;;  %v4381_v24 = vmul.f32 %v4183_v60, %v4183_v60  ;;  %v4184_v27 = vmul.f32 %v4015_v5, %v12273_v3  ;;  %v3655_v29 = vpop.f32.mrb[115].mxu1 }
 0x40b   :  { %v4283_v37 = vadd.f32 %v4282_v33, %v4281_v50 }
 0x40c   :  { %v4480_v47 = vsel %vm16931_vm11, %v4381_v24, 0.0  ;;  %v4284_v16 = vsel %vm16931_vm11, %v4184_v27, 0.0  ;;  %v4382_v38 = vmul.f32 %v4184_v27, %v4184_v27 }
 0x40d   :  { %v4481_v17 = vadd.f32 %v4480_v47, %v4479_v11  ;;  %v4285_v57 = vadd.f32 %v4284_v16, %v4283_v37  ;;  %v4030_v37 = vpop.permute.xlu1 %4029 }
 0x40e   :  { %v4482_v35 = vsel %vm16931_vm11, %v4382_v38, 0.0 }
 0x40f   :  { %v4483_v6 = vadd.f32 %v4482_v35, %v4481_v17  ;;  %v12280_v7 = vpop.f32.mrb[116].mxu1  ;;  %v4035_v35 = vpop.permute.xlu0 %4034 }
 0x410   :  { %v4185_v41 = vmul.f32 %v4020_v32, %v12280_v7  ;;  %v3660_v55 = vpop.f32.mrb[117].mxu1 }
 0x411   :  { %v12283_v53 = vpop.f32.mrb[118].mxu1 }
 0x412   :  { %v4286_v50 = vsel %vm16931_vm11, %v4185_v41, 0.0  ;;  %v4383_v30 = vmul.f32 %v4185_v41, %v4185_v41  ;;  %v4186_v46 = vmul.f32 %v4025_v48, %v12283_v53  ;;  %v3663_v60 = vpop.f32.mrb[119].mxu1 }
 0x413   :  { %v4287_v11 = vadd.f32 %v4286_v50, %v4285_v57 }
 0x414   :  { %v4484_v51 = vsel %vm16931_vm11, %v4383_v30, 0.0  ;;  %v4288_v5 = vsel %vm16931_vm11, %v4186_v46, 0.0  ;;  %v4384_v33 = vmul.f32 %v4186_v46, %v4186_v46 }
 0x415   :  { %v4485_v24 = vadd.f32 %v4484_v51, %v4483_v6  ;;  %v4289_v27 = vadd.f32 %v4288_v5, %v4287_v11  ;;  %v4040_v5 = vpop.permute.xlu1 %4039 }
 0x416   :  { %v4486_v29 = vsel %vm16931_vm11, %v4384_v33, 0.0 }
 0x417   :  { %v4487_v47 = vadd.f32 %v4486_v29, %v4485_v24  ;;  %v12290_v16 = vpop.f32.mrb[120].mxu1 }
 0x418   :  { %17042 = vst [vmem:[#allocation4_spill] sm:$0xff] %v12290_v16  ;;  %v4187_v38 = vmul.f32 %v4030_v37, %v12290_v16  ;;  %v3668_v17 = vpop.f32.mrb[121].mxu1 }
 0x419   :  { %v12293_v32 = vpop.f32.mrb[122].mxu1 }
 0x41a   :  { %17043 = vst [vmem:[#allocation5_spill] sm:$0xff] %v12293_v32  ;;  %v4290_v57 = vsel %vm16931_vm11, %v4187_v38, 0.0  ;;  %v4385_v41 = vmul.f32 %v4187_v38, %v4187_v38  ;;  %v4188_v55 = vmul.f32 %v4035_v35, %v12293_v32  ;;  %v3671_v48 = vpop.f32.mrb[123].mxu1  ;;  %v4045_v38 = vpop.permute.xlu0 %4044 }
 0x41b   :  { %v4291_v6 = vadd.f32 %v4290_v57, %v4289_v27 }
 0x41c   :  { %v4488_v50 = vsel %vm16931_vm11, %v4385_v41, 0.0  ;;  %v4292_v30 = vsel %vm16931_vm11, %v4188_v55, 0.0  ;;  %v4386_v46 = vmul.f32 %v4188_v55, %v4188_v55 }
 0x41d   :  { %v4489_v60 = vadd.f32 %v4488_v50, %v4487_v47  ;;  %v4293_v11 = vadd.f32 %v4292_v30, %v4291_v6 }
 0x41e   :  { %v4490_v51 = vsel %vm16931_vm11, %v4386_v46, 0.0  ;;  %v4055_v0 = vpop.permute.xlu0 %4054 }
 0x41f   :  { %v4491_v33 = vadd.f32 %v4490_v51, %v4489_v60  ;;  %v12300_v24 = vpop.f32.mrb[124].mxu1  ;;  %v4050_v60 = vpop.permute.xlu1 %4049 }
 0x420   :  { %17044 = vst [vmem:[#allocation6_spill] sm:$0xff] %v12300_v24  ;;  %v4189_v29 = vmul.f32 %v4040_v5, %v12300_v24  ;;  %v3676_v37 = vpop.f32.mrb[125].mxu1 }
 0x421   :  { %v12303_v17 = vpop.f32.mrb[126].mxu1 }
 0x422   :  { %17045 = vst [vmem:[#allocation7_spill] sm:$0xff] %v12303_v17  ;;  %v4294_v27 = vsel %vm16931_vm11, %v4189_v29, 0.0  ;;  %v4387_v35 = vmul.f32 %v4189_v29, %v4189_v29  ;;  %v4190_v57 = vmul.f32 %v4045_v38, %v12303_v17  ;;  %v3679_v41 = vpop.f32.mrb[127].mxu1  ;;  %v4065_v17 = vpop.permute.xlu0 %4064 }
 0x423   :  { %v4295_v47 = vadd.f32 %v4294_v27, %v4293_v11 }
 0x424   :  { %v4492_v55 = vsel %vm16931_vm11, %v4387_v35, 0.0  ;;  %v4296_v48 = vsel %vm16931_vm11, %v4190_v57, 0.0  ;;  %v4388_v6 = vmul.f32 %v4190_v57, %v4190_v57 }
 0x425   :  { %v4493_v50 = vadd.f32 %v4492_v55, %v4491_v33  ;;  %v4297_v30 = vadd.f32 %v4296_v48, %v4295_v47 }
 0x426   :  { %v4494_v46 = vsel %vm16931_vm11, %v4388_v6, 0.0 }
 0x427   :  { %v4495_v51 = vadd.f32 %v4494_v46, %v4493_v50  ;;  %v12310_v5 = vpop.f32.mrb[128].mxu1  ;;  %v4060_v46 = vpop.permute.xlu1 %4059 }
 0x428   :  { %17046 = vst [vmem:[#allocation8_spill] sm:$0xff] %v12310_v5  ;;  %v4191_v37 = vmul.f32 %v4050_v60, %v12310_v5  ;;  %v3684_v29 = vpop.f32.mrb[129].mxu1 }
 0x429   :  { %v12313_v38 = vpop.f32.mrb[130].mxu1 }
 0x42a   :  { %17047 = vst [vmem:[#allocation9_spill] sm:$0xff] %v12313_v38  ;;  %v4298_v11 = vsel %vm16931_vm11, %v4191_v37, 0.0  ;;  %v4389_v27 = vmul.f32 %v4191_v37, %v4191_v37  ;;  %v4192_v35 = vmul.f32 %v4055_v0, %v12313_v38  ;;  %v3687_v57 = vpop.f32.mrb[131].mxu1  ;;  %v4075_v38 = vpop.permute.xlu0 %4074 }
 0x42b   :  { %v4299_v33 = vadd.f32 %v4298_v11, %v4297_v30 }
 0x42c   :  { %v4496_v41 = vsel %vm16931_vm11, %v4389_v27, 0.0  ;;  %v4300_v47 = vsel %vm16931_vm11, %v4192_v35, 0.0  ;;  %v4390_v55 = vmul.f32 %v4192_v35, %v4192_v35 }
 0x42d   :  { %v4497_v48 = vadd.f32 %v4496_v41, %v4495_v51  ;;  %v4301_v6 = vadd.f32 %v4300_v47, %v4299_v33 }
 0x42e   :  { %v4498_v50 = vsel %vm16931_vm11, %v4390_v55, 0.0 }
 0x42f   :  { %v4499_v60 = vadd.f32 %v4498_v50, %v4497_v48  ;;  %v12320_v29 = vpop.f32.mrb[132].mxu1  ;;  %v4070_v50 = vpop.permute.xlu1 %4069 }
 0x430   :  { %17048 = vst [vmem:[#allocation10_spill] sm:$0xff] %v12320_v29  ;;  %v4193_v5 = vmul.f32 %v4060_v46, %v12320_v29  ;;  %v3692_v37 = vpop.f32.mrb[133].mxu1 }
 0x431   :  { %v12323_v0 = vpop.f32.mrb[134].mxu1 }
 0x432   :  { %17049 = vst [vmem:[#allocation11_spill] sm:$0xff] %v12323_v0  ;;  %v4302_v30 = vsel %vm16931_vm11, %v4193_v5, 0.0  ;;  %v4391_v11 = vmul.f32 %v4193_v5, %v4193_v5  ;;  %v4194_v27 = vmul.f32 %v4065_v17, %v12323_v0  ;;  %v3695_v35 = vpop.f32.mrb[135].mxu1  ;;  %v4085_v0 = vpop.permute.xlu0 %4084 }
 0x433   :  { %v4303_v51 = vadd.f32 %v4302_v30, %v4301_v6 }
 0x434   :  { %v4500_v57 = vsel %vm16931_vm11, %v4391_v11, 0.0  ;;  %v4304_v33 = vsel %vm16931_vm11, %v4194_v27, 0.0  ;;  %v4392_v41 = vmul.f32 %v4194_v27, %v4194_v27 }
 0x435   :  { %v4501_v47 = vadd.f32 %v4500_v57, %v4499_v60  ;;  %v4305_v55 = vadd.f32 %v4304_v33, %v4303_v51 }
 0x436   :  { %v4502_v48 = vsel %vm16931_vm11, %v4392_v41, 0.0 }
 0x437   :  { %v4503_v46 = vadd.f32 %v4502_v48, %v4501_v47  ;;  %v12330_v37 = vpop.f32.mrb[136].mxu1  ;;  %v4080_v48 = vpop.permute.xlu1 %4079 }
 0x438   :  { %17050 = vst [vmem:[#allocation12_spill] sm:$0xff] %v12330_v37  ;;  %v4195_v29 = vmul.f32 %v4070_v50, %v12330_v37  ;;  %v3700_v5 = vpop.f32.mrb[137].mxu1 }
 0x439   :  { %v12333_v17 = vpop.f32.mrb[138].mxu1 }
 0x43a   :  { %17051 = vst [vmem:[#allocation13_spill] sm:$0xff] %v12333_v17  ;;  %v4306_v6 = vsel %vm16931_vm11, %v4195_v29, 0.0  ;;  %v4393_v30 = vmul.f32 %v4195_v29, %v4195_v29  ;;  %v4196_v11 = vmul.f32 %v4075_v38, %v12333_v17  ;;  %v3703_v27 = vpop.f32.mrb[139].mxu1  ;;  %v4095_v17 = vpop.permute.xlu0 %4094 }
 0x43b   :  { %v4307_v60 = vadd.f32 %v4306_v6, %v4305_v55 }
 0x43c   :  { %v4504_v35 = vsel %vm16931_vm11, %v4393_v30, 0.0  ;;  %v4308_v51 = vsel %vm16931_vm11, %v4196_v11, 0.0  ;;  %v4394_v57 = vmul.f32 %v4196_v11, %v4196_v11 }
 0x43d   :  { %v4505_v33 = vadd.f32 %v4504_v35, %v4503_v46  ;;  %v4309_v41 = vadd.f32 %v4308_v51, %v4307_v60 }
 0x43e   :  { %v4506_v47 = vsel %vm16931_vm11, %v4394_v57, 0.0 }
 0x43f   :  { %v4507_v50 = vadd.f32 %v4506_v47, %v4505_v33  ;;  %v12340_v5 = vpop.f32.mrb[140].mxu1  ;;  %v4090_v47 = vpop.permute.xlu1 %4089 }
 0x440   :  { %17052 = vst [vmem:[#allocation14_spill] sm:$0xff] %v12340_v5  ;;  %v4197_v37 = vmul.f32 %v4080_v48, %v12340_v5  ;;  %v3708_v29 = vpop.f32.mrb[141].mxu1 }
 0x441   :  { %v12343_v38 = vpop.f32.mrb[142].mxu1 }
 0x442   :  { %17053 = vst [vmem:[#allocation15_spill] sm:$0xff] %v12343_v38  ;;  %v4310_v55 = vsel %vm16931_vm11, %v4197_v37, 0.0  ;;  %v4395_v6 = vmul.f32 %v4197_v37, %v4197_v37  ;;  %v4198_v30 = vmul.f32 %v4085_v0, %v12343_v38  ;;  %v3711_v11 = vpop.f32.mrb[143].mxu1  ;;  %v4105_v38 = vpop.permute.xlu0 %4104 }
 0x443   :  { %v4311_v46 = vadd.f32 %v4310_v55, %v4309_v41 }
 0x444   :  { %v4508_v27 = vsel %vm16931_vm11, %v4395_v6, 0.0  ;;  %v4312_v60 = vsel %vm16931_vm11, %v4198_v30, 0.0  ;;  %v4396_v35 = vmul.f32 %v4198_v30, %v4198_v30 }
 0x445   :  { %v4509_v51 = vadd.f32 %v4508_v27, %v4507_v50  ;;  %v4313_v57 = vadd.f32 %v4312_v60, %v4311_v46 }
 0x446   :  { %v4510_v33 = vsel %vm16931_vm11, %v4396_v35, 0.0 }
 0x447   :  { %v4511_v48 = vadd.f32 %v4510_v33, %v4509_v51  ;;  %v12350_v29 = vpop.f32.mrb[144].mxu1  ;;  %v4100_v33 = vpop.permute.xlu1 %4099 }
 0x448   :  { %17054 = vst [vmem:[#allocation16_spill] sm:$0xff] %v12350_v29  ;;  %v4199_v5 = vmul.f32 %v4090_v47, %v12350_v29  ;;  %v3716_v37 = vpop.f32.mrb[145].mxu1 }
 0x449   :  { %v12353_v0 = vpop.f32.mrb[146].mxu1 }
 0x44a   :  { %17055 = vst [vmem:[#allocation17_spill] sm:$0xff] %v12353_v0  ;;  %v4314_v41 = vsel %vm16931_vm11, %v4199_v5, 0.0  ;;  %v4397_v55 = vmul.f32 %v4199_v5, %v4199_v5  ;;  %v4200_v6 = vmul.f32 %v4095_v17, %v12353_v0  ;;  %v3719_v30 = vpop.f32.mrb[147].mxu1  ;;  %v4115_v0 = vpop.permute.xlu0 %4114 }
 0x44b   :  { %v4315_v50 = vadd.f32 %v4314_v41, %v4313_v57 }
 0x44c   :  { %v4512_v11 = vsel %vm16931_vm11, %v4397_v55, 0.0  ;;  %v4316_v46 = vsel %vm16931_vm11, %v4200_v6, 0.0  ;;  %v4398_v27 = vmul.f32 %v4200_v6, %v4200_v6 }
 0x44d   :  { %v4513_v60 = vadd.f32 %v4512_v11, %v4511_v48  ;;  %v4317_v35 = vadd.f32 %v4316_v46, %v4315_v50 }
 0x44e   :  { %v4514_v51 = vsel %vm16931_vm11, %v4398_v27, 0.0 }
 0x44f   :  { %v4515_v47 = vadd.f32 %v4514_v51, %v4513_v60  ;;  %v12360_v37 = vpop.f32.mrb[148].mxu1  ;;  %v4110_v51 = vpop.permute.xlu1 %4109 }
 0x450   :  { %17056 = vst [vmem:[#allocation18_spill] sm:$0xff] %v12360_v37  ;;  %v4201_v29 = vmul.f32 %v4100_v33, %v12360_v37  ;;  %v3724_v5 = vpop.f32.mrb[149].mxu1 }
 0x451   :  { %v12363_v17 = vpop.f32.mrb[150].mxu1 }
 0x452   :  { %17057 = vst [vmem:[#allocation19_spill] sm:$0xff] %v12363_v17  ;;  %v4318_v57 = vsel %vm16931_vm11, %v4201_v29, 0.0  ;;  %v4399_v41 = vmul.f32 %v4201_v29, %v4201_v29  ;;  %v4202_v55 = vmul.f32 %v4105_v38, %v12363_v17  ;;  %v3727_v6 = vpop.f32.mrb[151].mxu1  ;;  %v4125_v17 = vpop.permute.xlu0 %4124 }
 0x453   :  { %v4319_v48 = vadd.f32 %v4318_v57, %v4317_v35 }
 0x454   :  { %v4516_v30 = vsel %vm16931_vm11, %v4399_v41, 0.0  ;;  %v4320_v50 = vsel %vm16931_vm11, %v4202_v55, 0.0  ;;  %v4400_v11 = vmul.f32 %v4202_v55, %v4202_v55 }
 0x455   :  { %v4517_v46 = vadd.f32 %v4516_v30, %v4515_v47  ;;  %v4321_v27 = vadd.f32 %v4320_v50, %v4319_v48 }
 0x456   :  { %v4518_v60 = vsel %vm16931_vm11, %v4400_v11, 0.0 }
 0x457   :  { %v4519_v33 = vadd.f32 %v4518_v60, %v4517_v46  ;;  %v12370_v5 = vpop.f32.mrb[152].mxu1  ;;  %v4120_v60 = vpop.permute.xlu1 %4119 }
 0x458   :  { %17058 = vst [vmem:[#allocation20_spill] sm:$0xff] %v12370_v5  ;;  %v4203_v37 = vmul.f32 %v4110_v51, %v12370_v5  ;;  %v3732_v29 = vpop.f32.mrb[153].mxu1 }
 0x459   :  { %v12373_v38 = vpop.f32.mrb[154].mxu1 }
 0x45a   :  { %17059 = vst [vmem:[#allocation21_spill] sm:$0xff] %v12373_v38  ;;  %v4322_v35 = vsel %vm16931_vm11, %v4203_v37, 0.0  ;;  %v4401_v57 = vmul.f32 %v4203_v37, %v4203_v37  ;;  %v4204_v41 = vmul.f32 %v4115_v0, %v12373_v38  ;;  %v3735_v55 = vpop.f32.mrb[155].mxu1  ;;  %v4135_v38 = vpop.permute.xlu0 %4134 }
 0x45b   :  { %v4323_v47 = vadd.f32 %v4322_v35, %v4321_v27 }
 0x45c   :  { %v4520_v6 = vsel %vm16931_vm11, %v4401_v57, 0.0  ;;  %v4324_v48 = vsel %vm16931_vm11, %v4204_v41, 0.0  ;;  %v4402_v30 = vmul.f32 %v4204_v41, %v4204_v41 }
 0x45d   :  { %v4521_v50 = vadd.f32 %v4520_v6, %v4519_v33  ;;  %v4325_v11 = vadd.f32 %v4324_v48, %v4323_v47 }
 0x45e   :  { %v4522_v46 = vsel %vm16931_vm11, %v4402_v30, 0.0 }
 0x45f   :  { %v4523_v51 = vadd.f32 %v4522_v46, %v4521_v50  ;;  %v12380_v29 = vpop.f32.mrb[156].mxu1  ;;  %v4130_v46 = vpop.permute.xlu1 %4129 }
 0x460   :  { %17060 = vst [vmem:[#allocation22_spill] sm:$0xff] %v12380_v29  ;;  %v4205_v5 = vmul.f32 %v4120_v60, %v12380_v29  ;;  %v3740_v37 = vpop.f32.mrb[157].mxu1 }
 0x461   :  { %v12383_v0 = vpop.f32.mrb[158].mxu1 }
 0x462   :  { %17061 = vst [vmem:[#allocation23_spill] sm:$0xff] %v12383_v0  ;;  %v4326_v27 = vsel %vm16931_vm11, %v4205_v5, 0.0  ;;  %v4403_v35 = vmul.f32 %v4205_v5, %v4205_v5  ;;  %v4206_v57 = vmul.f32 %v4125_v17, %v12383_v0  ;;  %v3743_v41 = vpop.f32.mrb[159].mxu1  ;;  %v4145_v0 = vpop.permute.xlu0 %4144 }
 0x463   :  { %v4327_v33 = vadd.f32 %v4326_v27, %v4325_v11 }
 0x464   :  { %v4524_v55 = vsel %vm16931_vm11, %v4403_v35, 0.0  ;;  %v4328_v47 = vsel %vm16931_vm11, %v4206_v57, 0.0  ;;  %v4404_v6 = vmul.f32 %v4206_v57, %v4206_v57 }
 0x465   :  { %v4525_v48 = vadd.f32 %v4524_v55, %v4523_v51  ;;  %v4329_v30 = vadd.f32 %v4328_v47, %v4327_v33 }
 0x466   :  { %v4526_v50 = vsel %vm16931_vm11, %v4404_v6, 0.0 }
 0x467   :  { %v4527_v60 = vadd.f32 %v4526_v50, %v4525_v48  ;;  %v12390_v37 = vpop.f32.mrb[160].mxu1  ;;  %v4140_v50 = vpop.permute.xlu1 %4139 }
 0x468   :  { %17062 = vst [vmem:[#allocation24_spill] sm:$0xff] %v12390_v37  ;;  %v4207_v29 = vmul.f32 %v4130_v46, %v12390_v37  ;;  %v3748_v5 = vpop.f32.mrb[161].mxu1 }
 0x469   :  { %v12393_v17 = vpop.f32.mrb[162].mxu1 }
 0x46a   :  { %17063 = vst [vmem:[#allocation25_spill] sm:$0xff] %v12393_v17  ;;  %v4330_v11 = vsel %vm16931_vm11, %v4207_v29, 0.0  ;;  %v4405_v27 = vmul.f32 %v4207_v29, %v4207_v29  ;;  %v4208_v35 = vmul.f32 %v4135_v38, %v12393_v17  ;;  %v3751_v57 = vpop.f32.mrb[163].mxu1 }
 0x46b   :  { %v4331_v51 = vadd.f32 %v4330_v11, %v4329_v30 }
 0x46c   :  { %v4528_v41 = vsel %vm16931_vm11, %v4405_v27, 0.0  ;;  %v4332_v33 = vsel %vm16931_vm11, %v4208_v35, 0.0  ;;  %v4406_v55 = vmul.f32 %v4208_v35, %v4208_v35 }
 0x46d   :  { %v4529_v47 = vadd.f32 %v4528_v41, %v4527_v60  ;;  %v4333_v6 = vadd.f32 %v4332_v33, %v4331_v51 }
 0x46e   :  { %v4530_v48 = vsel %vm16931_vm11, %v4406_v55, 0.0 }
 0x46f   :  { %v4531_v46 = vadd.f32 %v4530_v48, %v4529_v47  ;;  %v12400_v5 = vpop.f32.mrb[164].mxu1 }
 0x470   :  { %17064 = vst [vmem:[#allocation26_spill] sm:$0xff] %v12400_v5  ;;  %v4209_v37 = vmul.f32 %v4140_v50, %v12400_v5  ;;  %v3756_v29 = vpop.f32.mrb[165].mxu1 }
 0x471   :  { %v12403_v38 = vpop.f32.mrb[166].mxu1 }
 0x472   :  { %v4334_v30 = vsel %vm16931_vm11, %v4209_v37, 0.0  ;;  %v4407_v11 = vmul.f32 %v4209_v37, %v4209_v37  ;;  %v4210_v27 = vmul.f32 %v4145_v0, %v12403_v38  ;;  %v3759_v35 = vpop.f32.mrb[167].mxu1 }
 0x473   :  { %v4335_v60 = vadd.f32 %v4334_v30, %v4333_v6 }
 0x474   :  { %v4532_v57 = vsel %vm16931_vm11, %v4407_v11, 0.0  ;;  %v4336_v51 = vsel %vm16931_vm11, %v4210_v27, 0.0  ;;  %v4408_v41 = vmul.f32 %v4210_v27, %v4210_v27 }
 0x475   :  { %v4533_v33 = vadd.f32 %v4532_v57, %v4531_v46  ;;  %v4337_v55 = vadd.f32 %v4336_v51, %v4335_v60  ;;  %v10241_v46 = vld [vmem:[%s16859_s5 + $0x100] sm:$0xff]  }
 0x476   :  { %v4534_v47 = vsel %vm16931_vm11, %v4408_v41, 0.0  ;;  %9686 = vmatprep.subr.bf16.mxu1 %v10241_v46  ;;  %v10242_v41 = vld [vmem:[%s16859_s5 + $0x30] sm:$0xff]  }
 0x477   :  { %v4338_v48 = vrot.slane %v4337_v55, 4  ;;  %v4535_v50 = vadd.f32 %v4534_v47, %v4533_v33  ;;  %9687 = vmatpush3.bf16.msra.mxu1 %v10241_v46  ;;  %v10243_v46 = vld [vmem:[%s16859_s5 + $0x108] sm:$0xff]   ;;  %v17070_v33 = vld [vmem:[#allocation8_spill] sm:$0xff]  ;;  %v17089_v57 = vld [vmem:[#allocation26_spill] sm:$0xff] }
 0x478   :  { %9688 = vmatprep.subr.bf16.mxu1 %v10243_v46  ;;  %v17086_v47 = vld [vmem:[#allocation24_spill] sm:$0xff] }
 0x479   :  { %v4339_v29 = vadd.f32 %v4338_v48, %v4337_v55  ;;  %v4536_v5 = vrot.slane %v4535_v50, 4  ;;  %v17067_v48 = vld [vmem:[#allocation5_spill] sm:$0xff] }
 0x47b   :  { %v4340_v17 = vrot.slane %v4339_v29, 2  ;;  %v4537_v24 = vadd.f32 %v4536_v5, %v4535_v50  ;;  %v17065_v50 = vmov 0   ;;  %9689 = vmatpush3.bf16.msra.mxu1 %v10243_v46 }
 0x47d   :  { %v4341_v37 = vadd.f32 %v4340_v17, %v4339_v29  ;;  %v4538_v32 = vrot.slane %v4537_v24, 2 }
 0x47f   :  { %v4342_v0 = vrot.slane %v4341_v37, 1  ;;  %v4539_v35 = vadd.f32 %v4538_v32, %v4537_v24  ;;  %v12564_v24 = vld [vmem:[%s16860_s3] ss:$0 sm:$0xff] }
 0x481   :  { %v4343_v6 = vadd.f32 %v4342_v0, %v4341_v37  ;;  %v4540_v30 = vrot.slane %v4539_v35, 1  ;;  %v10238_v37 = vld [vmem:[%s16859_s5 + $0x18] sm:$0xff]  }
 0x482   :  { %6775 = vmatpush1.bf16.msra.mxu0 %v10238_v37  ;;  %v10240_v37 = vld [vmem:[%s16859_s5 + $0x28] sm:$0xff]  }
 0x483   :  { %v12410_v11 = vmul.f32 0.010204081, %v4343_v6  ;;  %v4541_v16 = vadd.f32 %v4540_v30, %v4539_v35  ;;  %v10239_v35 = vld [vmem:[%s16859_s5 + $0x20] sm:$0xff]   ;;  %6776 = vmatprep.subr.bf16.mxu0 %v17065_v50  ;;  %v17087_v6 = vld [vmem:[#allocation25_spill] sm:$0xff] }
 0x484   :  { %v17066_v30 = vld [vmem:[#allocation4_spill] sm:$0xff] }
 0x485   :  { %v4542_v27 = vmul.f32 0.010204081, %v4541_v16  ;;  %v4543_v60 = vmul.f32 %v12410_v11, %v12410_v11  ;;  %v17090_v32 = vsub.f32 %v12053_v15, %v12410_v11  ;;  %v17091_v55 = vsub.f32 %v12056_v28, %v12410_v11 }
 0x486   :  { %6777 = vmatpush1.bf16.msra.mxu0 %v10239_v35  ;;  %v17071_v35 = vld [vmem:[#allocation9_spill] sm:$0xff]  ;;  %v17093_v15 = vsub.f32 %v12065_v31, %v12410_v11  ;;  %v17094_v28 = vsub.f32 %v12069_v42, %v12410_v11  ;;  %v17096_v29 = vsub.f32 %v12085_v25, %v12410_v11  ;;  %v17097_v42 = vsub.f32 %v12095_v2, %v12410_v11 }
 0x487   :  { %v4544_v51 = vsub.f32 %v4542_v27, %v4543_v60  ;;  %v10244_v27 = vld [vmem:[%s16859_s5 + $0x110] sm:$0xff]   ;;  %6778 = vmatprep.subr.bf16.mxu0 %v17065_v50  ;;  %v17099_v25 = vsub.f32 %v12112_v18, %v12410_v11 }
 0x488   :  { %9690 = vmatprep.subr.bf16.mxu1 %v10244_v27  ;;  %v17068_v60 = vld [vmem:[#allocation6_spill] sm:$0xff] }
 0x489   :  { %v4609_v0 = vadd.f32 1e-05, %v4544_v51  ;;  %9691 = vmatpush3.bf16.msra.mxu1 %v10244_v27  ;;  %v17069_v51 = vld [vmem:[#allocation7_spill] sm:$0xff] }
 0x48a   :  { %6779 = vmatpush1.bf16.msra.mxu0 %v10240_v37  ;;  %v17085_v37 = vld [vmem:[#allocation23_spill] sm:$0xff] }
 0x48b   :  { %10319 = vrsqrt.f32 %v4609_v0  ;;  %v10245_v0 = vld [vmem:[%s16859_s5 + $0x118] sm:$0xff]   ;;  %6780 = vmatprep.subr.bf16.mxu0 %v17065_v50 }
 0x48c   :  { %9692 = vmatprep.subr.bf16.mxu1 %v10245_v0 }
 0x48d   :  { %9693 = vmatpush3.bf16.msra.mxu1 %v10245_v0  ;;  %v17088_v0 = vsub.f32 %v12403_v38, %v12410_v11  ;;  %v10247_v38 = vld [vmem:[%s16859_s5 + $0x38] sm:$0xff]  }
 0x48e   :  { %6781 = vmatpush1.bf16.msra.mxu0 %v10242_v41 }
 0x48f   :  { %6782 = vmatprep.subr.bf16.mxu0 %v17065_v50 }
 0x492   :  { %6783 = vmatpush1.bf16.msra.mxu0 %v10247_v38 }
 0x493   :  { %6784 = vmatprep.subr.bf16.mxu0 %v17065_v50 }
 0x495   :  { %v12559_v17 = vpop.eup %10319 }
 0x496   :  { %v4674_v16 = vmul.f32 %v12559_v17, %v17088_v0  ;;  %v12584_v46 = vmul.f32 %v12559_v17, %v17090_v32  ;;  %v12590_v27 = vmul.f32 %v12559_v17, %v17091_v55  ;;  %v12598_v0 = vld [vmem:[%s16861_s4] ss:$0 sm:$0xff]  ;;  %v12604_v32 = vmul.f32 %v12559_v17, %v17093_v15 }
 0x497   :  { %17092 = vst [vmem:[#allocation4_spill] sm:$0xff] %v12598_v0  ;;  %v12610_v41 = vmul.f32 %v12559_v17, %v17094_v28  ;;  %v17095_v55 = vsub.f32 %v12079_v21, %v12410_v11  ;;  %v12622_v31 = vmul.f32 %v12559_v17, %v17096_v29  ;;  %v12630_v28 = vmul.f32 %v12559_v17, %v17097_v42 }
 0x498   :  { %v4744_v15 = vmul.f32 %v12564_v24, %v4674_v16  ;;  %v17098_v21 = vsub.f32 %v12098_v43, %v12410_v11  ;;  %v12642_v29 = vmul.f32 %v12559_v17, %v17099_v25  ;;  %v17100_v16 = vsub.f32 %v12117_v14, %v12410_v11 }
 0x499   :  { %v12616_v5 = vmul.f32 %v12559_v17, %v17095_v55  ;;  %v17101_v42 = vsub.f32 %v12128_v22, %v12410_v11  ;;  %v17103_v25 = vsub.f32 %v12138_v1, %v12410_v11  ;;  %v17104_v22 = vsub.f32 %v12141_v12, %v12410_v11  ;;  %v10258_v12 = vld [vmem:[%s16859_s5 + $0x40] sm:$0xff]  }
 0x49a   :  { %v12636_v55 = vmul.f32 %v12559_v17, %v17098_v21  ;;  %v12648_v2 = vmul.f32 %v12559_v17, %v17100_v16  ;;  %v17102_v21 = vsub.f32 %v12131_v63, %v12410_v11  ;;  %v4814_v16 = vadd.f32 %v12598_v0, %v4744_v15  ;;  %6785 = vmatpush1.bf16.msra.mxu0 %v10258_v12 }
 0x49b   :  { %v12654_v43 = vmul.f32 %v12559_v17, %v17101_v42  ;;  %v12666_v14 = vmul.f32 %v12559_v17, %v17103_v25  ;;  %v12673_v42 = vmul.f32 %v12559_v17, %v17104_v22  ;;  %v17105_v63 = vsub.f32 %v12148_v9, %v12410_v11  ;;  %6786 = vmatprep.subr.bf16.mxu0 %v17065_v50 }
 0x49c   :  { %v12660_v18 = vmul.f32 %v12559_v17, %v17102_v21  ;;  %v17106_v1 = vsub.f32 %v12151_v20, %v12410_v11  ;;  %v17107_v15 = vsub.f32 %v12158_v59, %v12410_v11  ;;  %v17108_v9 = vsub.f32 %v12161_v8, %v12410_v11 }
 0x49d   :  { %v12679_v21 = vmul.f32 %v12559_v17, %v17105_v63  ;;  %v17109_v20 = vsub.f32 %v12168_v58, %v12410_v11  ;;  %vm4878_vm9 = vcmp.gt.f32.partialorder %v4814_v16, 0.0  ;;  %v17111_v8 = vsub.f32 %v12178_v40, %v12410_v11 }
 0x49e   :  { %v12685_v25 = vmul.f32 %v12559_v17, %v17106_v1  ;;  %v12694_v22 = vmul.f32 %v12559_v17, %v17107_v15  ;;  %v12700_v63 = vmul.f32 %v12559_v17, %v17108_v9  ;;  %v17110_v1 = vsub.f32 %v12171_v45, %v12410_v11 }
 0x49f   :  { %v12706_v38 = vmul.f32 %v12559_v17, %v17109_v20  ;;  %v4942_v15 = vmul.f32 0.2, %v4814_v16  ;;  %v12719_v9 = vmul.f32 %v12559_v17, %v17111_v8  ;;  %v17112_v58 = vsub.f32 %v12181_v56, %v12410_v11 }
 0x4a0   :  { %v12712_v59 = vmul.f32 %v12559_v17, %v17110_v1  ;;  %v17113_v45 = vsub.f32 %v12188_v62, %v12410_v11  ;;  %v17115_v0 = vsub.f32 %v12191_v52, %v12410_v11  ;;  %v17116_v8 = vsub.f32 %v12198_v10, %v12410_v11 }
 0x4a1   :  { %v12725_v20 = vmul.f32 %v12559_v17, %v17112_v58  ;;  %v17117_v58 = vsub.f32 %v12204_v13, %v12410_v11 }
 0x4a2   :  { %v12731_v1 = vmul.f32 %v12559_v17, %v17113_v45  ;;  %v12737_v40 = vmul.f32 %v12559_v17, %v17115_v0  ;;  %v12743_v56 = vmul.f32 %v12559_v17, %v17116_v8  ;;  %v5006_v45 = vsel %vm4878_vm9, %v4814_v16, %v4942_v15 }
 0x4a3   :  { %v12749_v62 = vmul.f32 %v12559_v17, %v17117_v58  ;;  %v17119_v0 = vsub.f32 %v12215_v23, %v12410_v11  ;;  %v17120_v8 = vsub.f32 %v12225_v19, %v12410_v11  ;;  %v9649_v16 = vpack.c.bf16 %v5006_v45, %v5006_v45 }
 0x4a4   :  { %17114 = vst [vmem:[#allocation5_spill] sm:$0xff] %v12731_v1  ;;  %v17118_v1 = vsub.f32 %v12212_v34, %v12410_v11  ;;  %v17121_v34 = vsub.f32 %v12229_v26, %v12410_v11  ;;  %v17122_v23 = vsub.f32 %v12236_v39, %v12410_v11  ;;  %v17123_v19 = vsub.f32 %v12242_v36, %v12410_v11 }
 0x4a5   :  { %v12761_v10 = vmul.f32 %v12559_v17, %v17119_v0  ;;  %v12767_v13 = vmul.f32 %v12559_v17, %v17120_v8  ;;  %v17124_v26 = vsub.f32 %v12250_v54, %v12410_v11  ;;  %v17125_v39 = vsub.f32 %v12253_v61, %v12410_v11  ;;  %5327 = vst.msk [vmem:[#allocation3 + $0xfc] sm:$0xf] %vm16935_vm2, %v9649_v16 }
 0x4a6   :  { %v12755_v52 = vmul.f32 %v12559_v17, %v17118_v1  ;;  %v12773_v15 = vmul.f32 %v12559_v17, %v17121_v34  ;;  %v12779_v1 = vmul.f32 %v12559_v17, %v17122_v23  ;;  %v12785_v58 = vmul.f32 %v12559_v17, %v17123_v19 }
 0x4a7   :  { %v12792_v12 = vmul.f32 %v12559_v17, %v17124_v26  ;;  %v12798_v45 = vmul.f32 %v12559_v17, %v17125_v39  ;;  %v17126_v36 = vsub.f32 %v12260_v4, %v12410_v11  ;;  %v17127_v8 = vsub.f32 %v12263_v44, %v12410_v11 }
 0x4a8   :  { %v17128_v61 = vsub.f32 %v12270_v49, %v12410_v11  ;;  %v17129_v4 = vsub.f32 %v12273_v3, %v12410_v11  ;;  %v17130_v44 = vsub.f32 %v12280_v7, %v12410_v11  ;;  %v17131_v16 = vsub.f32 %v12283_v53, %v12410_v11 }
 0x4a9   :  { %v12804_v0 = vmul.f32 %v12559_v17, %v17126_v36  ;;  %v12810_v54 = vmul.f32 %v12559_v17, %v17127_v8  ;;  %v17132_v26 = vsub.f32 %v17066_v30, %v12410_v11  ;;  %v17133_v39 = vsub.f32 %v17067_v48, %v12410_v11 }
 0x4aa   :  { %v12817_v34 = vmul.f32 %v12559_v17, %v17128_v61  ;;  %v12823_v23 = vmul.f32 %v12559_v17, %v17129_v4  ;;  %v12829_v19 = vmul.f32 %v12559_v17, %v17130_v44  ;;  %v12835_v49 = vmul.f32 %v12559_v17, %v17131_v16  ;;  %v17139_v44 = vld [vmem:[#allocation10_spill] sm:$0xff] }
 0x4ab   :  { %v12841_v3 = vmul.f32 %v12559_v17, %v17132_v26  ;;  %v12847_v7 = vmul.f32 %v12559_v17, %v17133_v39  ;;  %v17134_v36 = vsub.f32 %v17068_v60, %v12410_v11  ;;  %v17135_v8 = vsub.f32 %v17069_v51, %v12410_v11  ;;  %v17142_v26 = vld [vmem:[#allocation11_spill] sm:$0xff] }
 0x4ac   :  { %v17136_v61 = vsub.f32 %v17070_v33, %v12410_v11  ;;  %v17137_v4 = vsub.f32 %v17071_v35, %v12410_v11  ;;  %v17140_v16 = vsub.f32 %v17139_v44, %v12410_v11  ;;  %v17143_v39 = vsub.f32 %v17142_v26, %v12410_v11 }
 0x4ad   :  { %v12853_v53 = vmul.f32 %v12559_v17, %v17134_v36  ;;  %v12859_v30 = vmul.f32 %v12559_v17, %v17135_v8  ;;  %v17145_v36 = vld [vmem:[#allocation12_spill] sm:$0xff] }
 0x4ae   :  { %v12865_v48 = vmul.f32 %v12559_v17, %v17136_v61  ;;  %v12871_v60 = vmul.f32 %v12559_v17, %v17137_v4  ;;  %v12877_v51 = vmul.f32 %v12559_v17, %v17140_v16  ;;  %v12883_v33 = vmul.f32 %v12559_v17, %v17143_v39  ;;  %v17148_v61 = vld [vmem:[#allocation13_spill] sm:$0xff]  ;;  %v17151_v16 = vld [vmem:[#allocation14_spill] sm:$0xff]  ;;  %v17154_v39 = vld [vmem:[#allocation15_spill] sm:$0xff] }
 0x4af   :  { %v17146_v8 = vsub.f32 %v17145_v36, %v12410_v11  ;;  %v17149_v4 = vsub.f32 %v17148_v61, %v12410_v11  ;;  %v17157_v61 = vld [vmem:[#allocation16_spill] sm:$0xff] }
 0x4b0   :  { %17138 = vst [vmem:[#allocation6_spill] sm:$0xff] %v12871_v60  ;;  %17141 = vst [vmem:[#allocation7_spill] sm:$0xff] %v12877_v51  ;;  %v17152_v51 = vsub.f32 %v17151_v16, %v12410_v11  ;;  %v17160_v16 = vld [vmem:[#allocation17_spill] sm:$0xff] }
 0x4b1   :  { %17144 = vst [vmem:[#allocation8_spill] sm:$0xff] %v12883_v33  ;;  %v12889_v35 = vmul.f32 %v12559_v17, %v17146_v8  ;;  %v12895_v44 = vmul.f32 %v12559_v17, %v17149_v4  ;;  %v17155_v33 = vsub.f32 %v17154_v39, %v12410_v11  ;;  %v10261_v8 = vld [vmem:[%s16859_s5 + $0x48] sm:$0xff]   ;;  %v17158_v4 = vsub.f32 %v17157_v61, %v12410_v11  ;;  %v17163_v39 = vld [vmem:[#allocation18_spill] sm:$0xff] }
 0x4b2   :  { %v12901_v26 = vmul.f32 %v12559_v17, %v17152_v51  ;;  %v17161_v51 = vsub.f32 %v17160_v16, %v12410_v11  ;;  %6787 = vmatpush1.bf16.msra.mxu0 %v10261_v8  ;;  %v12980_v8 = vmul.f32 %v12564_v24, %v12584_v46  ;;  %v13005_v46 = vmul.f32 %v12564_v24, %v12630_v28 }
 0x4b3   :  { %17147 = vst [vmem:[#allocation9_spill] sm:$0xff] %v12889_v35  ;;  %17150 = vst [vmem:[#allocation23_spill] sm:$0xff] %v12895_v44  ;;  %v12907_v36 = vmul.f32 %v12559_v17, %v17155_v33  ;;  %v12916_v44 = vmul.f32 %v12559_v17, %v17158_v4  ;;  %v17164_v33 = vsub.f32 %v17163_v39, %v12410_v11  ;;  %v17166_v35 = vld [vmem:[#allocation19_spill] sm:$0xff]  ;;  %v17168_v4 = vld [vmem:[#allocation20_spill] sm:$0xff]  ;;  %6788 = vmatprep.subr.bf16.mxu0 %v17065_v50 }
 0x4b4   :  { %17153 = vst [vmem:[#allocation24_spill] sm:$0xff] %v12901_v26  ;;  %v12922_v26 = vmul.f32 %v12559_v17, %v17161_v51  ;;  %v17167_v60 = vsub.f32 %v17166_v35, %v12410_v11  ;;  %v17170_v51 = vld [vmem:[#allocation21_spill] sm:$0xff]  ;;  %v13029_v28 = vmul.f32 %v12564_v24, %v12666_v14  ;;  %v13053_v14 = vmul.f32 %v12564_v24, %v12706_v38 }
 0x4b5   :  { %17156 = vst [vmem:[#allocation25_spill] sm:$0xff] %v12907_v36  ;;  %17159 = vst [vmem:[#allocation26_spill] sm:$0xff] %v12916_v44  ;;  %v12928_v36 = vmul.f32 %v12559_v17, %v17164_v33  ;;  %v17169_v44 = vsub.f32 %v17168_v4, %v12410_v11  ;;  %v17172_v33 = vld [vmem:[#allocation22_spill] sm:$0xff]  ;;  %v13073_v38 = vmul.f32 %v12564_v24, %v12737_v40 }
 0x4b6   :  { %17162 = vst [vmem:[#allocation10_spill] sm:$0xff] %v12922_v26  ;;  %v12934_v61 = vmul.f32 %v12559_v17, %v17167_v60  ;;  %v17171_v26 = vsub.f32 %v17170_v51, %v12410_v11  ;;  %v17174_v60 = vsub.f32 %v17085_v37, %v12410_v11  ;;  %v13093_v40 = vmul.f32 %v12564_v24, %v12767_v13 }
 0x4b7   :  { %17165 = vst [vmem:[#allocation11_spill] sm:$0xff] %v12928_v36  ;;  %v12940_v16 = vmul.f32 %v12559_v17, %v17169_v44  ;;  %v17173_v36 = vsub.f32 %v17172_v33, %v12410_v11  ;;  %v17175_v44 = vsub.f32 %v17086_v47, %v12410_v11  ;;  %v12985_v47 = vmul.f32 %v12564_v24, %v12590_v27 }
 0x4b8   :  { %v12946_v39 = vmul.f32 %v12559_v17, %v17171_v26  ;;  %v12958_v4 = vmul.f32 %v12559_v17, %v17174_v60  ;;  %v17176_v26 = vsub.f32 %v17087_v6, %v12410_v11  ;;  %v12989_v6 = vmul.f32 %v12564_v24, %v12604_v32 }
 0x4b9   :  { %v12952_v35 = vmul.f32 %v12559_v17, %v17173_v36  ;;  %v12964_v51 = vmul.f32 %v12559_v17, %v17175_v44  ;;  %v17177_v36 = vsub.f32 %v17089_v57, %v12410_v11  ;;  %v12993_v11 = vmul.f32 %v12564_v24, %v12610_v41  ;;  %v17182_v44 = vld [vmem:[#allocation6_spill] sm:$0xff] }
 0x4ba   :  { %v12970_v33 = vmul.f32 %v12559_v17, %v17176_v26  ;;  %v13001_v57 = vmul.f32 %v12564_v24, %v12622_v31  ;;  %v13009_v27 = vmul.f32 %v12564_v24, %v12636_v55  ;;  %v13013_v32 = vmul.f32 %v12564_v24, %v12642_v29 }
 0x4bb   :  { %v12976_v37 = vmul.f32 %v12559_v17, %v17177_v36  ;;  %v12997_v17 = vmul.f32 %v12564_v24, %v12616_v5  ;;  %v13017_v5 = vmul.f32 %v12564_v24, %v12648_v2  ;;  %v13021_v41 = vmul.f32 %v12564_v24, %v12654_v43  ;;  %v17184_v36 = vld [vmem:[#allocation7_spill] sm:$0xff] }
 0x4bc   :  { %v13025_v31 = vmul.f32 %v12564_v24, %v12660_v18  ;;  %v13033_v55 = vmul.f32 %v12564_v24, %v12673_v42  ;;  %v13037_v29 = vmul.f32 %v12564_v24, %v12679_v21  ;;  %v13041_v2 = vmul.f32 %v12564_v24, %v12685_v25 }
 0x4bd   :  { %v13045_v43 = vmul.f32 %v12564_v24, %v12694_v22  ;;  %v13049_v18 = vmul.f32 %v12564_v24, %v12700_v63  ;;  %v13057_v42 = vmul.f32 %v12564_v24, %v12712_v59  ;;  %v13061_v21 = vmul.f32 %v12564_v24, %v12719_v9  ;;  %v17178_v22 = vld [vmem:[#allocation5_spill] sm:$0xff] }
 0x4be   :  { %v13065_v25 = vmul.f32 %v12564_v24, %v12725_v20  ;;  %v13069_v63 = vmul.f32 %v12564_v24, %v17178_v22  ;;  %v13077_v59 = vmul.f32 %v12564_v24, %v12743_v56  ;;  %v13081_v9 = vmul.f32 %v12564_v24, %v12749_v62  ;;  %v17186_v22 = vld [vmem:[#allocation8_spill] sm:$0xff] }
 0x4bf   :  { %v13085_v20 = vmul.f32 %v12564_v24, %v12755_v52  ;;  %v13089_v60 = vmul.f32 %v12564_v24, %v12761_v10  ;;  %v13097_v56 = vmul.f32 %v12564_v24, %v12773_v15  ;;  %v13101_v62 = vmul.f32 %v12564_v24, %v12779_v1 }
 0x4c0   :  { %v13105_v52 = vmul.f32 %v12564_v24, %v12785_v58  ;;  %v13109_v10 = vmul.f32 %v12564_v24, %v12792_v12  ;;  %v13113_v13 = vmul.f32 %v12564_v24, %v12798_v45  ;;  %v13117_v15 = vmul.f32 %v12564_v24, %v12804_v0 }
 0x4c1   :  { %v13121_v1 = vmul.f32 %v12564_v24, %v12810_v54  ;;  %v13125_v58 = vmul.f32 %v12564_v24, %v12817_v34  ;;  %v13129_v12 = vmul.f32 %v12564_v24, %v12823_v23  ;;  %v13133_v45 = vmul.f32 %v12564_v24, %v12829_v19  ;;  %v10266_v34 = vld [vmem:[%s16859_s5 + $0x50] sm:$0xff]  }
 0x4c2   :  { %v13137_v0 = vmul.f32 %v12564_v24, %v12835_v49  ;;  %v13141_v54 = vmul.f32 %v12564_v24, %v12841_v3  ;;  %v13148_v23 = vmul.f32 %v12564_v24, %v12847_v7  ;;  %v13152_v19 = vmul.f32 %v12564_v24, %v12853_v53  ;;  %6789 = vmatpush1.bf16.msra.mxu0 %v10266_v34 }
 0x4c3   :  { %v13156_v49 = vmul.f32 %v12564_v24, %v12859_v30  ;;  %v13160_v3 = vmul.f32 %v12564_v24, %v12865_v48  ;;  %v13164_v26 = vmul.f32 %v12564_v24, %v17182_v44  ;;  %v13168_v7 = vmul.f32 %v12564_v24, %v17184_v36  ;;  %6790 = vmatprep.subr.bf16.mxu0 %v17065_v50 }
 0x4c4   :  { %17179 = vst [vmem:[#allocation12_spill] sm:$0xff] %v13152_v19  ;;  %v13172_v53 = vmul.f32 %v12564_v24, %v17186_v22  ;;  %v17187_v19 = vld [vmem:[#allocation9_spill] sm:$0xff] }
 0x4c5   :  { %17180 = vst [vmem:[#allocation13_spill] sm:$0xff] %v13156_v49  ;;  %17181 = vst [vmem:[#allocation14_spill] sm:$0xff] %v13160_v3  ;;  %v13176_v30 = vmul.f32 %v12564_v24, %v17187_v19  ;;  %v17188_v49 = vld [vmem:[#allocation23_spill] sm:$0xff]  ;;  %v17190_v3 = vld [vmem:[#allocation24_spill] sm:$0xff] }
 0x4c6   :  { %17183 = vst [vmem:[#allocation15_spill] sm:$0xff] %v13164_v26  ;;  %17185 = vst [vmem:[#allocation16_spill] sm:$0xff] %v13168_v7  ;;  %v13180_v48 = vmul.f32 %v12564_v24, %v17188_v49  ;;  %v13184_v44 = vmul.f32 %v12564_v24, %v17190_v3  ;;  %v17191_v26 = vld [vmem:[#allocation25_spill] sm:$0xff]  ;;  %v17192_v7 = vld [vmem:[#allocation26_spill] sm:$0xff]  ;;  %v13205_v3 = vmul.f32 %v12564_v24, %v12934_v61 }
 0x4c7   :  { %v13188_v36 = vmul.f32 %v12564_v24, %v17191_v26  ;;  %v13192_v22 = vmul.f32 %v12564_v24, %v17192_v7  ;;  %v17193_v19 = vld [vmem:[#allocation10_spill] sm:$0xff]  ;;  %v17194_v49 = vld [vmem:[#allocation11_spill] sm:$0xff]  ;;  %v13209_v26 = vmul.f32 %v12564_v24, %v12940_v16  ;;  %v13213_v7 = vmul.f32 %v12564_v24, %v12946_v39 }
 0x4c8   :  { %17189 = vst [vmem:[#allocation17_spill] sm:$0xff] %v13180_v48  ;;  %v13197_v34 = vmul.f32 %v12564_v24, %v17193_v19  ;;  %v13201_v48 = vmul.f32 %v12564_v24, %v17194_v49  ;;  %v13217_v19 = vmul.f32 %v12564_v24, %v12952_v35  ;;  %v13221_v49 = vmul.f32 %v12564_v24, %v12958_v4 }
 0x4c9   :  { %17195 = vst [vmem:[#allocation18_spill] sm:$0xff] %v13213_v7  ;;  %v13225_v61 = vmul.f32 %v12564_v24, %v12964_v51  ;;  %v13229_v16 = vmul.f32 %v12564_v24, %v12970_v33  ;;  %v13233_v39 = vmul.f32 %v12564_v24, %v12976_v37  ;;  %v17196_v7 = vld [vmem:[#allocation4_spill] sm:$0xff] }
 0x4ca   :  { %v13237_v35 = vadd.f32 %v17196_v7, %v12980_v8  ;;  %v13241_v4 = vadd.f32 %v17196_v7, %v12985_v47  ;;  %v13245_v51 = vadd.f32 %v17196_v7, %v12989_v6  ;;  %v13249_v33 = vadd.f32 %v17196_v7, %v12993_v11 }
 0x4cb   :  { %v13253_v24 = vadd.f32 %v17196_v7, %v12997_v17  ;;  %v13257_v37 = vadd.f32 %v17196_v7, %v13001_v57  ;;  %v13261_v8 = vadd.f32 %v17196_v7, %v13005_v46  ;;  %v13265_v47 = vadd.f32 %v17196_v7, %v13009_v27 }
 0x4cc   :  { %v13269_v6 = vadd.f32 %v17196_v7, %v13013_v32  ;;  %v13273_v11 = vadd.f32 %v17196_v7, %v13017_v5  ;;  %v13277_v17 = vadd.f32 %v17196_v7, %v13021_v41  ;;  %v13281_v57 = vadd.f32 %v17196_v7, %v13025_v31 }
 0x4cd   :  { %v13285_v46 = vadd.f32 %v17196_v7, %v13029_v28  ;;  %v13289_v27 = vadd.f32 %v17196_v7, %v13033_v55  ;;  %v13293_v32 = vadd.f32 %v17196_v7, %v13037_v29  ;;  %v13297_v5 = vadd.f32 %v17196_v7, %v13041_v2 }
 0x4ce   :  { %v13301_v41 = vadd.f32 %v17196_v7, %v13045_v43  ;;  %v13305_v31 = vadd.f32 %v17196_v7, %v13049_v18  ;;  %v13309_v28 = vadd.f32 %v17196_v7, %v13053_v14  ;;  %v13313_v55 = vadd.f32 %v17196_v7, %v13057_v42 }
 0x4cf   :  { %v13317_v29 = vadd.f32 %v17196_v7, %v13061_v21  ;;  %v13321_v2 = vadd.f32 %v17196_v7, %v13065_v25  ;;  %v13325_v43 = vadd.f32 %v17196_v7, %v13069_v63  ;;  %v13329_v18 = vadd.f32 %v17196_v7, %v13073_v38 }
 0x4d0   :  { %v13333_v14 = vadd.f32 %v17196_v7, %v13077_v59  ;;  %v13337_v42 = vadd.f32 %v17196_v7, %v13081_v9  ;;  %v13341_v21 = vadd.f32 %v17196_v7, %v13085_v20  ;;  %v13345_v25 = vadd.f32 %v17196_v7, %v13089_v60  ;;  %v10271_v59 = vld [vmem:[%s16859_s5 + $0x58] sm:$0xff]  }
 0x4d1   :  { %v13349_v63 = vadd.f32 %v17196_v7, %v13093_v40  ;;  %v13353_v38 = vadd.f32 %v17196_v7, %v13097_v56  ;;  %v13360_v9 = vadd.f32 %v17196_v7, %v13101_v62  ;;  %v13364_v20 = vadd.f32 %v17196_v7, %v13105_v52  ;;  %6791 = vmatpush1.bf16.msra.mxu0 %v10271_v59 }
 0x4d2   :  { %v13368_v60 = vadd.f32 %v17196_v7, %v13109_v10  ;;  %v13372_v40 = vadd.f32 %v17196_v7, %v13113_v13  ;;  %v13376_v56 = vadd.f32 %v17196_v7, %v13117_v15  ;;  %v13380_v62 = vadd.f32 %v17196_v7, %v13121_v1  ;;  %6792 = vmatprep.subr.bf16.mxu0 %v17065_v50 }
 0x4d3   :  { %v13384_v52 = vadd.f32 %v17196_v7, %v13125_v58  ;;  %v13388_v10 = vadd.f32 %v17196_v7, %v13129_v12  ;;  %v13392_v13 = vadd.f32 %v17196_v7, %v13133_v45  ;;  %v13396_v15 = vadd.f32 %v17196_v7, %v13137_v0  ;;  %v17201_v12 = vld [vmem:[#allocation12_spill] sm:$0xff]  ;;  %v17202_v45 = vld [vmem:[#allocation13_spill] sm:$0xff]  ;;  %v17204_v0 = vld [vmem:[#allocation14_spill] sm:$0xff] }
 0x4d4   :  { %v13400_v1 = vadd.f32 %v17196_v7, %v13141_v54  ;;  %v13404_v58 = vadd.f32 %v17196_v7, %v13148_v23  ;;  %v13409_v59 = vadd.f32 %v17196_v7, %v17201_v12  ;;  %v17205_v54 = vld [vmem:[#allocation15_spill] sm:$0xff]  ;;  %v17206_v23 = vld [vmem:[#allocation16_spill] sm:$0xff]  ;;  %v13429_v12 = vadd.f32 %v17196_v7, %v13172_v53 }
 0x4d5   :  { %17197 = vst [vmem:[#allocation19_spill] sm:$0xff] %v13392_v13  ;;  %17198 = vst [vmem:[#allocation20_spill] sm:$0xff] %v13396_v15  ;;  %v13413_v13 = vadd.f32 %v17196_v7, %v17202_v45  ;;  %v13417_v15 = vadd.f32 %v17196_v7, %v17204_v0  ;;  %v13433_v45 = vadd.f32 %v17196_v7, %v13176_v30  ;;  %vm4815_vm12 = vcmp.gt.f32.partialorder %v13237_v35, 0.0 }
 0x4d6   :  { %17199 = vst [vmem:[#allocation21_spill] sm:$0xff] %v13400_v1  ;;  %17200 = vst [vmem:[#allocation22_spill] sm:$0xff] %v13404_v58  ;;  %v13421_v1 = vadd.f32 %v17196_v7, %v17205_v54  ;;  %v13425_v58 = vadd.f32 %v17196_v7, %v17206_v23  ;;  %v13441_v54 = vadd.f32 %v17196_v7, %v13184_v44  ;;  %vm4816_vm7 = vcmp.gt.f32.partialorder %v13241_v4, 0.0 }
 0x4d7   :  { %17203 = vst [vmem:[#allocation5_spill] sm:$0xff] %v13413_v13  ;;  %v17207_v13 = vld [vmem:[#allocation17_spill] sm:$0xff]  ;;  %v13445_v23 = vadd.f32 %v17196_v7, %v13188_v36  ;;  %v13449_v53 = vadd.f32 %v17196_v7, %v13192_v22  ;;  %v13453_v30 = vadd.f32 %v17196_v7, %v13197_v34  ;;  %v13461_v44 = vadd.f32 %v17196_v7, %v13205_v3 }
 0x4d8   :  { %v13437_v0 = vadd.f32 %v17196_v7, %v17207_v13  ;;  %17208 = vst [vmem:[#allocation6_spill] sm:$0xff] %v13441_v54  ;;  %v13457_v13 = vadd.f32 %v17196_v7, %v13201_v48  ;;  %v13465_v36 = vadd.f32 %v17196_v7, %v13209_v26  ;;  %v13473_v34 = vadd.f32 %v17196_v7, %v13217_v19  ;;  %v10274_v19 = vld [vmem:[%s16859_s5 + $0x60] sm:$0xff]  }
 0x4d9   :  { %17209 = vst [vmem:[#allocation7_spill] sm:$0xff] %v13445_v23  ;;  %17210 = vst [vmem:[#allocation8_spill] sm:$0xff] %v13453_v30  ;;  %v17214_v23 = vld [vmem:[#allocation18_spill] sm:$0xff]  ;;  %v13477_v48 = vadd.f32 %v17196_v7, %v13221_v49  ;;  %v13481_v3 = vadd.f32 %v17196_v7, %v13225_v61  ;;  %v13485_v26 = vadd.f32 %v17196_v7, %v13229_v16  ;;  %6793 = vmatpush1.bf16.msra.mxu0 %v10274_v19 }
 0x4da   :  { %17211 = vst [vmem:[#allocation9_spill] sm:$0xff] %v13457_v13  ;;  %17212 = vst [vmem:[#allocation23_spill] sm:$0xff] %v13461_v44  ;;  %v13469_v22 = vadd.f32 %v17196_v7, %v17214_v23  ;;  %v13489_v23 = vadd.f32 %v17196_v7, %v13233_v39  ;;  %6794 = vmatprep.subr.bf16.mxu0 %v17065_v50  ;;  %vm4817_vm13 = vcmp.gt.f32.partialorder %v13245_v51, 0.0  ;;  %vm4818_vm10 = vcmp.gt.f32.partialorder %v13249_v33, 0.0 }
 0x4db   :  { %17213 = vst [vmem:[#allocation24_spill] sm:$0xff] %v13465_v36  ;;  %17216 = vst [vmem:[#allocation26_spill] sm:$0xff] %v13473_v34  ;;  %vm4819_vm14 = vcmp.gt.f32.partialorder %v13253_v24, 0.0  ;;  %vm4820_vm15 = vcmp.gt.f32.partialorder %v13257_v37, 0.0  ;;  %vm4821_vm0 = vcmp.gt.f32.partialorder %v13261_v8, 0.0  ;;  %vm4822_vm1 = vcmp.gt.f32.partialorder %v13265_v47, 0.0 }
 0x4dc   :  { %17215 = vst [vmem:[#allocation25_spill] sm:$0xff] %v13469_v22  ;;  %17217 = vst [vmem:[#allocation10_spill] sm:$0xff] %v13477_v48  ;;  %vm4823_vm3 = vcmp.gt.f32.partialorder %v13269_v6, 0.0  ;;  %vm4824_vm4 = vcmp.gt.f32.partialorder %v13273_v11, 0.0  ;;  %v4879_v7 = vmul.f32 0.2, %v13237_v35 }
 0x4dd   :  { %17218 = vst [vmem:[#allocation11_spill] sm:$0xff] %v13481_v3  ;;  %17219 = vst [vmem:[#allocation4_spill] sm:$0xff] %v13485_v26  ;;  %v4880_v49 = vmul.f32 0.2, %v13241_v4  ;;  %v4881_v61 = vmul.f32 0.2, %v13245_v51 }
 0x4de   :  { %17220 = vst [vmem:[#allocation12_spill] sm:$0xff] %v13489_v23  ;;  %vm4825_vm5 = vcmp.gt.f32.partialorder %v13277_v17, 0.0  ;;  %v4882_v16 = vmul.f32 0.2, %v13249_v33  ;;  %v4883_v39 = vmul.f32 0.2, %v13253_v24  ;;  %v13519_v3 = vsel %vm4815_vm12, %v13237_v35, %v4879_v7 }
 0x4df   :  { %v4884_v19 = vmul.f32 0.2, %v13257_v37  ;;  %vm4826_vm6 = vcmp.gt.f32.partialorder %v13281_v57, 0.0  ;;  %v4885_v50 = vmul.f32 0.2, %v13261_v8  ;;  %17221 = vst [vmem:[#allocation13_spill] sm:$0xff] %v13519_v3  ;;  %v13530_v36 = vsel %vm4816_vm7, %v13241_v4, %v4880_v49 }
 0x4e0   :  { %v4886_v23 = vmul.f32 0.2, %v13265_v47  ;;  %v4887_v26 = vmul.f32 0.2, %v13269_v6  ;;  %vm4827_vm9 = vcmp.gt.f32.partialorder %v13285_v46, 0.0  ;;  %17222 = vst [vmem:[#allocation14_spill] sm:$0xff] %v13530_v36  ;;  %v13545_v3 = vsel %vm4817_vm13, %v13245_v51, %v4881_v61 }
 0x4e1   :  { %v4888_v48 = vmul.f32 0.2, %v13273_v11  ;;  %v4889_v34 = vmul.f32 0.2, %v13277_v17  ;;  %v13525_v22 = vmul.f32 0.2, %v13281_v57  ;;  %v13560_v13 = vsel %vm4818_vm10, %v13249_v33, %v4882_v16 }
 0x4e2   :  { %vm4828_vm11 = vcmp.gt.f32.partialorder %v13289_v27, 0.0  ;;  %v13534_v44 = vmul.f32 0.2, %v13285_v46  ;;  %v13537_v35 = vmul.f32 0.2, %v13289_v27  ;;  %17223 = vst [vmem:[#allocation15_spill] sm:$0xff] %v13545_v3 }
 0x4e3   :  { %v13540_v7 = vmul.f32 0.2, %v13293_v32  ;;  %vm4829_vm12 = vcmp.gt.f32.partialorder %v13293_v32, 0.0  ;;  %v13549_v4 = vmul.f32 0.2, %v13297_v5  ;;  %17225 = vst [vmem:[#allocation17_spill] sm:$0xff] %v13560_v13 }
 0x4e4   :  { %v13552_v49 = vmul.f32 0.2, %v13301_v41  ;;  %v13555_v36 = vmul.f32 0.2, %v13305_v31  ;;  %vm4830_vm7 = vcmp.gt.f32.partialorder %v13297_v5, 0.0  ;;  %vm4831_vm13 = vcmp.gt.f32.partialorder %v13301_v41, 0.0 }
 0x4e5   :  { %v13564_v51 = vmul.f32 0.2, %v13309_v28  ;;  %v13567_v61 = vmul.f32 0.2, %v13313_v55  ;;  %v13570_v3 = vmul.f32 0.2, %v13317_v29 }
 0x4e6   :  { %17224 = vst [vmem:[#allocation16_spill] sm:$0xff] %v13555_v36  ;;  %v13575_v36 = vsel %vm4819_vm14, %v13253_v24, %v4883_v39  ;;  %v13579_v33 = vmul.f32 0.2, %v13321_v2  ;;  %v13582_v16 = vmul.f32 0.2, %v13325_v43  ;;  %vm4832_vm10 = vcmp.gt.f32.partialorder %v13305_v31, 0.0 }
 0x4e7   :  { %17226 = vst [vmem:[#allocation18_spill] sm:$0xff] %v13570_v3  ;;  %17227 = vst [vmem:[#allocation27_spill] sm:$0xff] %v13575_v36  ;;  %v13585_v13 = vmul.f32 0.2, %v13329_v18  ;;  %v13590_v3 = vsel %vm4820_vm15, %v13257_v37, %v4884_v19  ;;  %v13594_v24 = vmul.f32 0.2, %v13333_v14 }
 0x4e8   :  { %17229 = vst [vmem:[#allocation29_spill] sm:$0xff] %v13590_v3  ;;  %v13597_v39 = vmul.f32 0.2, %v13337_v42  ;;  %v13600_v36 = vmul.f32 0.2, %v13341_v21  ;;  %vm4833_vm14 = vcmp.gt.f32.partialorder %v13309_v28, 0.0 }
 0x4e9   :  { %17228 = vst [vmem:[#allocation28_spill] sm:$0xff] %v13585_v13  ;;  %v13605_v13 = vsel %vm4821_vm0, %v13261_v8, %v4885_v50  ;;  %v13609_v37 = vmul.f32 0.2, %v13345_v25  ;;  %v13612_v19 = vmul.f32 0.2, %v13349_v63  ;;  %vm4834_vm15 = vcmp.gt.f32.partialorder %v13313_v55, 0.0 }
 0x4ea   :  { %17230 = vst [vmem:[#allocation30_spill] sm:$0xff] %v13600_v36  ;;  %17231 = vst [vmem:[#allocation31_spill] sm:$0xff] %v13605_v13  ;;  %v13615_v3 = vmul.f32 0.2, %v13353_v38  ;;  %v13620_v36 = vsel %vm4822_vm1, %v13265_v47, %v4886_v23  ;;  %v13627_v50 = vmul.f32 0.2, %v13360_v9  ;;  %v13638_v47 = vsel %vm4823_vm3, %v13269_v6, %v4887_v26 }
 0x4eb   :  { %17232 = vst [vmem:[#allocation32_spill] sm:$0xff] %v13620_v36  ;;  %v13630_v8 = vmul.f32 0.2, %v13364_v20  ;;  %v13633_v13 = vmul.f32 0.2, %v13368_v60  ;;  %17234 = vst [vmem:[#allocation34_spill] sm:$0xff] %v13638_v47  ;;  %v13656_v6 = vsel %vm4824_vm4, %v13273_v11, %v4888_v48  ;;  %v13674_v11 = vsel %vm4825_vm5, %v13277_v17, %v4889_v34 }
 0x4ec   :  { %vm4838_vm1 = vcmp.gt.f32.partialorder %v13329_v18, 0.0  ;;  %v13645_v23 = vmul.f32 0.2, %v13372_v40  ;;  %v13648_v36 = vmul.f32 0.2, %v13376_v56  ;;  %17238 = vst [vmem:[#allocation38_spill] sm:$0xff] %v13656_v6  ;;  %v13693_v17 = vsel %vm4826_vm6, %v13281_v57, %v13525_v22 }
 0x4ed   :  { %17233 = vst [vmem:[#allocation33_spill] sm:$0xff] %v13633_v13  ;;  %v13651_v13 = vmul.f32 0.2, %v13380_v62  ;;  %vm4842_vm3 = vcmp.gt.f32.partialorder %v13345_v25, 0.0  ;;  %v13663_v26 = vmul.f32 0.2, %v13384_v52  ;;  %v13712_v57 = vsel %vm4827_vm9, %v13285_v46, %v13534_v44 }
 0x4ee   :  { %17235 = vst [vmem:[#allocation35_spill] sm:$0xff] %v13645_v23  ;;  %17236 = vst [vmem:[#allocation36_spill] sm:$0xff] %v13648_v36  ;;  %v13666_v47 = vmul.f32 0.2, %v13388_v10  ;;  %vm4846_vm4 = vcmp.gt.f32.partialorder %v13364_v20, 0.0  ;;  %v17244_v48 = vld [vmem:[#allocation20_spill] sm:$0xff]  ;;  %v13731_v46 = vsel %vm4828_vm11, %v13289_v27, %v13537_v35  ;;  %v13750_v27 = vsel %vm4829_vm12, %v13293_v32, %v13540_v7 }
 0x4ef   :  { %17237 = vst [vmem:[#allocation37_spill] sm:$0xff] %v13651_v13  ;;  %17239 = vst [vmem:[#allocation39_spill] sm:$0xff] %v13663_v26  ;;  %v17241_v13 = vld [vmem:[#allocation19_spill] sm:$0xff]  ;;  %v13681_v6 = vmul.f32 0.2, %v17244_v48  ;;  %vm4850_vm5 = vcmp.gt.f32.partialorder %v13380_v62, 0.0  ;;  %v13769_v32 = vsel %vm4830_vm7, %v13297_v5, %v13549_v4  ;;  %v13788_v5 = vsel %vm4831_vm13, %v13301_v41, %v13552_v49 }
 0x4f0   :  { %17240 = vst [vmem:[#allocation40_spill] sm:$0xff] %v13666_v47  ;;  %v13669_v36 = vmul.f32 0.2, %v17241_v13  ;;  %17243 = vst [vmem:[#allocation41_spill] sm:$0xff] %v13674_v11  ;;  %v17245_v47 = vld [vmem:[#allocation21_spill] sm:$0xff]  ;;  %vm4854_vm6 = vcmp.gt.f32.partialorder %v17244_v48, 0.0 }
 0x4f1   :  { %v13684_v26 = vmul.f32 0.2, %v17245_v47  ;;  %v13700_v34 = vmul.f32 0.2, %v13409_v59  ;;  %v17250_v11 = vld [vmem:[#allocation5_spill] sm:$0xff]  ;;  %17252 = vst [vmem:[#allocation42_spill] sm:$0xff] %v13712_v57 }
 0x4f2   :  { %17242 = vst [vmem:[#allocation19_spill] sm:$0xff] %v13669_v36  ;;  %v17247_v36 = vld [vmem:[#allocation22_spill] sm:$0xff]  ;;  %v13719_v22 = vmul.f32 0.2, %v13421_v1  ;;  %17254 = vst [vmem:[#allocation44_spill] sm:$0xff] %v13731_v46  ;;  %vm4858_vm9 = vcmp.gt.f32.partialorder %v17250_v11, 0.0 }
 0x4f3   :  { %17246 = vst [vmem:[#allocation20_spill] sm:$0xff] %v13684_v26  ;;  %v13687_v23 = vmul.f32 0.2, %v17247_v36  ;;  %17249 = vst [vmem:[#allocation22_spill] sm:$0xff] %v13693_v17  ;;  %v13703_v26 = vmul.f32 0.2, %v17250_v11 }
 0x4f4   :  { %v13722_v17 = vmul.f32 0.2, %v13425_v58  ;;  %v13738_v44 = vmul.f32 0.2, %v13433_v45  ;;  %v13741_v57 = vmul.f32 0.2, %v13437_v0 }
 0x4f5   :  { %17248 = vst [vmem:[#allocation21_spill] sm:$0xff] %v13687_v23  ;;  %v13706_v23 = vmul.f32 0.2, %v13417_v15  ;;  %17257 = vst [vmem:[#allocation47_spill] sm:$0xff] %v13750_v27  ;;  %vm4862_vm11 = vcmp.gt.f32.partialorder %v13429_v12, 0.0  ;;  %v17258_v35 = vld [vmem:[#allocation7_spill] sm:$0xff] }
 0x4f6   :  { %17255 = vst [vmem:[#allocation45_spill] sm:$0xff] %v13741_v57  ;;  %v13757_v46 = vmul.f32 0.2, %v17258_v35  ;;  %v13760_v57 = vmul.f32 0.2, %v13449_v53  ;;  %17262 = vst [vmem:[#allocation50_spill] sm:$0xff] %v13769_v32 }
 0x4f7   :  { %17251 = vst [vmem:[#allocation5_spill] sm:$0xff] %v13706_v23  ;;  %v13725_v23 = vmul.f32 0.2, %v13429_v12  ;;  %vm4866_vm12 = vcmp.gt.f32.partialorder %v17258_v35, 0.0  ;;  %v17263_v7 = vld [vmem:[#allocation9_spill] sm:$0xff]  ;;  %17269 = vst [vmem:[#allocation54_spill] sm:$0xff] %v13788_v5 }
 0x4f8   :  { %17259 = vst [vmem:[#allocation7_spill] sm:$0xff] %v13757_v46  ;;  %17260 = vst [vmem:[#allocation48_spill] sm:$0xff] %v13760_v57  ;;  %v13776_v27 = vmul.f32 0.2, %v17263_v7  ;;  %v17265_v57 = vld [vmem:[#allocation23_spill] sm:$0xff]  ;;  %v17270_v4 = vld [vmem:[#allocation25_spill] sm:$0xff] }
 0x4f9   :  { %17253 = vst [vmem:[#allocation43_spill] sm:$0xff] %v13725_v23  ;;  %v13744_v23 = vmul.f32 0.2, %v13441_v54  ;;  %v13779_v46 = vmul.f32 0.2, %v17265_v57  ;;  %vm4870_vm7 = vcmp.gt.f32.partialorder %v17265_v57, 0.0 }
 0x4fa   :  { %17264 = vst [vmem:[#allocation51_spill] sm:$0xff] %v13776_v27  ;;  %v17271_v32 = vld [vmem:[#allocation26_spill] sm:$0xff]  ;;  %v4936_v7 = vmul.f32 0.2, %v17270_v4  ;;  %v17275_v49 = vld [vmem:[#allocation11_spill] sm:$0xff]  ;;  %v17276_v5 = vld [vmem:[#allocation4_spill] sm:$0xff] }
 0x4fb   :  { %17256 = vst [vmem:[#allocation46_spill] sm:$0xff] %v13744_v23  ;;  %v13763_v23 = vmul.f32 0.2, %v13453_v30  ;;  %17266 = vst [vmem:[#allocation52_spill] sm:$0xff] %v13779_v46  ;;  %v4937_v46 = vmul.f32 0.2, %v17271_v32 }
 0x4fc   :  { %v17272_v27 = vld [vmem:[#allocation10_spill] sm:$0xff]  ;;  %v17273_v30 = vld [vmem:[#allocation16_spill] sm:$0xff]  ;;  %vm4875_vm0 = vcmp.gt.f32.partialorder %v17275_v49, 0.0  ;;  %vm4876_vm8 = vcmp.gt.f32.partialorder %v17276_v5, 0.0  ;;  %v4939_v4 = vmul.f32 0.2, %v17275_v49 }
 0x4fd   :  { %17261 = vst [vmem:[#allocation49_spill] sm:$0xff] %v13763_v23  ;;  %v17267_v23 = vld [vmem:[#allocation24_spill] sm:$0xff]  ;;  %v13801_v41 = vsel %vm4832_vm10, %v13305_v31, %v17273_v30  ;;  %vm4874_vm13 = vcmp.gt.f32.partialorder %v17272_v27, 0.0  ;;  %v4940_v32 = vmul.f32 0.2, %v17276_v5  ;;  %v13814_v31 = vsel %vm4833_vm14, %v13309_v28, %v13564_v51 }
 0x4fe   :  { %v13782_v54 = vmul.f32 0.2, %v17267_v23  ;;  %17274 = vst [vmem:[#allocation10_spill] sm:$0xff] %v13801_v41  ;;  %v17277_v23 = vld [vmem:[#allocation12_spill] sm:$0xff]  ;;  %v13820_v30 = vsel %vm4834_vm15, %v13313_v55, %v13567_v61  ;;  %v17278_v41 = vld [vmem:[#allocation18_spill] sm:$0xff]  ;;  %vm17279_vm10 = vcmp.gt.f32.partialorder %v13317_v29, 0.0 }
 0x4ff   :  { %v4941_v57 = vmul.f32 0.2, %v17277_v23  ;;  %v13826_v49 = vsel %vm17279_vm10, %v13317_v29, %v17278_v41  ;;  %vm17280_vm2 = vcmp.gt.f32.partialorder %v13321_v2, 0.0  ;;  %vm17281_vm14 = vcmp.gt.f32.partialorder %v13325_v43, 0.0  ;;  %v10279_v55 = vld [vmem:[%s16859_s5 + $0x68] sm:$0xff]   ;;  %v17282_v51 = vld [vmem:[#allocation28_spill] sm:$0xff] }
 0x500   :  { %17268 = vst [vmem:[#allocation53_spill] sm:$0xff] %v13782_v54  ;;  %v4938_v54 = vmul.f32 0.2, %v17272_v27  ;;  %v13832_v23 = vsel %vm17280_vm2, %v13321_v2, %v13579_v33  ;;  %v13838_v28 = vsel %vm17281_vm14, %v13325_v43, %v13582_v16  ;;  %v13847_v29 = vsel %vm4838_vm1, %v13329_v18, %v17282_v51  ;;  %v17285_v61 = vld [vmem:[#allocation30_spill] sm:$0xff]  ;;  %6795 = vmatpush1.bf16.msra.mxu0 %v10279_v55  ;;  %v17290_v16 = vld [vmem:[#allocation33_spill] sm:$0xff] }
 0x501   :  { %vm17283_vm2 = vcmp.gt.f32.partialorder %v13333_v14, 0.0  ;;  %vm17284_vm15 = vcmp.gt.f32.partialorder %v13337_v42, 0.0  ;;  %vm17286_vm10 = vcmp.gt.f32.partialorder %v13341_v21, 0.0  ;;  %v13871_v18 = vsel %vm4842_vm3, %v13345_v25, %v13609_v37  ;;  %v10283_v25 = vld [vmem:[%s16859_s5 + $0x70] sm:$0xff]   ;;  %v17297_v37 = vld [vmem:[#allocation37_spill] sm:$0xff] }
 0x502   :  { %v13853_v2 = vsel %vm17283_vm2, %v13333_v14, %v13594_v24  ;;  %v13859_v43 = vsel %vm17284_vm15, %v13337_v42, %v13597_v39  ;;  %v13865_v33 = vsel %vm17286_vm10, %v13341_v21, %v17285_v61  ;;  %vm17287_vm1 = vcmp.gt.f32.partialorder %v13349_v63, 0.0  ;;  %v17294_v24 = vld [vmem:[#allocation36_spill] sm:$0xff] }
 0x503   :  { %v13877_v14 = vsel %vm17287_vm1, %v13349_v63, %v13612_v19  ;;  %vm17288_vm14 = vcmp.gt.f32.partialorder %v13353_v38, 0.0  ;;  %vm17289_vm2 = vcmp.gt.f32.partialorder %v13360_v9, 0.0  ;;  %v13898_v63 = vsel %vm4846_vm4, %v13364_v20, %v13630_v8  ;;  %v17298_v19 = vld [vmem:[#allocation39_spill] sm:$0xff] }
 0x504   :  { %v13883_v42 = vsel %vm17288_vm14, %v13353_v38, %v13615_v3  ;;  %v13889_v21 = vsel %vm17289_vm2, %v13360_v9, %v13627_v50  ;;  %vm17291_vm3 = vcmp.gt.f32.partialorder %v13368_v60, 0.0  ;;  %v17292_v3 = vld [vmem:[#allocation35_spill] sm:$0xff]  ;;  %vm17293_vm15 = vcmp.gt.f32.partialorder %v13372_v40, 0.0  ;;  %v17300_v50 = vld [vmem:[#allocation40_spill] sm:$0xff] }
 0x505   :  { %v13904_v38 = vsel %vm17291_vm3, %v13368_v60, %v17290_v16  ;;  %v13910_v9 = vsel %vm17293_vm15, %v13372_v40, %v17292_v3  ;;  %vm17295_vm10 = vcmp.gt.f32.partialorder %v13376_v56, 0.0  ;;  %v17296_v20 = vmov 0   ;;  %v17302_v8 = vld [vmem:[#allocation19_spill] sm:$0xff]  ;;  %v17324_v16 = vld [vmem:[#allocation8_spill] sm:$0xff] }
 0x506   :  { %v13916_v39 = vsel %vm17295_vm10, %v13376_v56, %v17294_v24  ;;  %6796 = vmatprep.subr.bf16.mxu0 %v17296_v20  ;;  %v13923_v60 = vsel %vm4850_vm5, %v13380_v62, %v17297_v37  ;;  %vm17299_vm4 = vcmp.gt.f32.partialorder %v13384_v52, 0.0  ;;  %vm17301_vm1 = vcmp.gt.f32.partialorder %v13388_v10, 0.0  ;;  %v17326_v24 = vld [vmem:[#allocation51_spill] sm:$0xff]  ;;  %v17327_v37 = vld [vmem:[#allocation9_spill] sm:$0xff] }
 0x507   :  { %v13929_v40 = vsel %vm17299_vm4, %v13384_v52, %v17298_v19  ;;  %v13935_v56 = vsel %vm17301_vm1, %v13388_v10, %v17300_v50  ;;  %vm17303_vm14 = vcmp.gt.f32.partialorder %v17241_v13, 0.0  ;;  %v13947_v62 = vsel %vm4854_vm6, %v17244_v48, %v13681_v6  ;;  %v17304_v52 = vld [vmem:[#allocation20_spill] sm:$0xff]  ;;  %v17306_v10 = vld [vmem:[#allocation21_spill] sm:$0xff]  ;;  %6797 = vmatpush1.bf16.msra.mxu0 %v10283_v25  ;;  %v17330_v50 = vld [vmem:[#allocation23_spill] sm:$0xff] }
 0x508   :  { %v13941_v41 = vsel %vm17303_vm14, %v17241_v13, %v17302_v8  ;;  %vm17305_vm5 = vcmp.gt.f32.partialorder %v17245_v47, 0.0  ;;  %vm17307_vm2 = vcmp.gt.f32.partialorder %v17247_v36, 0.0  ;;  %vm17308_vm3 = vcmp.gt.f32.partialorder %v13409_v59, 0.0  ;;  %6798 = vmatprep.subr.bf16.mxu0 %v17296_v20  ;;  %v17323_v25 = vld [vmem:[#allocation49_spill] sm:$0xff] }
 0x509   :  { %v13953_v55 = vsel %vm17305_vm5, %v17245_v47, %v17304_v52  ;;  %v13959_v51 = vsel %vm17307_vm2, %v17247_v36, %v17306_v10  ;;  %v13965_v13 = vsel %vm17308_vm3, %v13409_v59, %v13700_v34  ;;  %v13971_v6 = vsel %vm4858_vm9, %v17250_v11, %v13703_v26  ;;  %v17309_v47 = vld [vmem:[#allocation5_spill] sm:$0xff]  ;;  %v10287_v26 = vld [vmem:[%s16859_s5 + $0x78] sm:$0xff]   ;;  %v17332_v52 = vld [vmem:[#allocation24_spill] sm:$0xff] }
 0x50a   :  { %vm17310_vm6 = vcmp.gt.f32.partialorder %v13417_v15, 0.0  ;;  %vm17311_vm15 = vcmp.gt.f32.partialorder %v13421_v1, 0.0  ;;  %vm17312_vm10 = vcmp.gt.f32.partialorder %v13425_v58, 0.0  ;;  %v17313_v11 = vld [vmem:[#allocation43_spill] sm:$0xff]  ;;  %vm17314_vm9 = vcmp.gt.f32.partialorder %v13433_v45, 0.0  ;;  %v17315_v34 = vld [vmem:[#allocation45_spill] sm:$0xff] }
 0x50b   :  { %v13977_v48 = vsel %vm17310_vm6, %v13417_v15, %v17309_v47  ;;  %v13983_v36 = vsel %vm17311_vm15, %v13421_v1, %v13719_v22  ;;  %v13989_v59 = vsel %vm17312_vm10, %v13425_v58, %v13722_v17  ;;  %v13998_v15 = vsel %vm4862_vm11, %v13429_v12, %v17313_v11  ;;  %v17317_v17 = vld [vmem:[#allocation46_spill] sm:$0xff]  ;;  %v17320_v12 = vld [vmem:[#allocation7_spill] sm:$0xff]  ;;  %v17334_v47 = vld [vmem:[#allocation25_spill] sm:$0xff]  ;;  %6799 = vmatpush1.bf16.msra.mxu0 %v10287_v26 }
 0x50c   :  { %v14004_v1 = vsel %vm17314_vm9, %v13433_v45, %v13738_v44  ;;  %vm17316_vm4 = vcmp.gt.f32.partialorder %v13437_v0, 0.0  ;;  %v17318_v22 = vld [vmem:[#allocation6_spill] sm:$0xff]  ;;  %v14023_v45 = vsel %vm4866_vm12, %v17258_v35, %v17320_v12  ;;  %v17321_v44 = vld [vmem:[#allocation48_spill] sm:$0xff]  ;;  %vm17322_vm11 = vcmp.gt.f32.partialorder %v13449_v53, 0.0  ;;  %v17338_v12 = vld [vmem:[#allocation11_spill] sm:$0xff]  ;;  %7057 = vmatprep.subr.bf16.mxu0 %v17296_v20 }
 0x50d   :  { %v14010_v58 = vsel %vm17316_vm4, %v13437_v0, %v17315_v34  ;;  %vm17319_vm1 = vcmp.gt.f32.partialorder %v17318_v22, 0.0  ;;  %v14029_v0 = vsel %vm17322_vm11, %v13449_v53, %v17321_v44  ;;  %vm17325_vm14 = vcmp.gt.f32.partialorder %v17324_v16, 0.0  ;;  %v17329_v35 = vld [vmem:[#allocation52_spill] sm:$0xff]  ;;  %v17331_v53 = vld [vmem:[#allocation53_spill] sm:$0xff]  ;;  %v17336_v34 = vld [vmem:[#allocation26_spill] sm:$0xff] }
 0x50e   :  { %v14016_v61 = vsel %vm17319_vm1, %v17318_v22, %v17317_v17  ;;  %v14035_v3 = vsel %vm17325_vm14, %v17324_v16, %v17323_v25  ;;  %vm17328_vm5 = vcmp.gt.f32.partialorder %v17327_v37, 0.0  ;;  %v14047_v8 = vsel %vm4870_vm7, %v17330_v50, %v17329_v35  ;;  %v17339_v25 = vld [vmem:[#allocation12_spill] sm:$0xff]  ;;  %v17342_v16 = vld [vmem:[#allocation13_spill] sm:$0xff]  ;;  %v17353_v20 = vld [vmem:[#allocation22_spill] sm:$0xff] }
 0x50f   :  { %v14041_v19 = vsel %vm17328_vm5, %v17327_v37, %v17326_v24  ;;  %vm17333_vm12 = vcmp.gt.f32.partialorder %v17332_v52, 0.0  ;;  %vm17335_vm2 = vcmp.gt.f32.partialorder %v17334_v47, 0.0  ;;  %vm17337_vm3 = vcmp.gt.f32.partialorder %v17336_v34, 0.0  ;;  %v17344_v37 = vld [vmem:[#allocation15_spill] sm:$0xff]  ;;  %v17345_v35 = vld [vmem:[#allocation17_spill] sm:$0xff] }
 0x510   :  { %v14053_v10 = vsel %vm17333_vm12, %v17332_v52, %v17331_v53  ;;  %v14058_v11 = vsel %vm17335_vm2, %v17334_v47, %v4936_v7  ;;  %v14063_v17 = vsel %vm17337_vm3, %v17336_v34, %v4937_v46  ;;  %v14068_v22 = vsel %vm4874_vm13, %v17272_v27, %v4938_v54  ;;  %v17343_v27 = vld [vmem:[#allocation14_spill] sm:$0xff]  ;;  %v17348_v53 = vld [vmem:[#allocation31_spill] sm:$0xff]  ;;  %v17349_v47 = vld [vmem:[#allocation32_spill] sm:$0xff] }
 0x511   :  { %v14073_v44 = vsel %vm4875_vm0, %v17338_v12, %v4939_v4  ;;  %v14078_v7 = vsel %vm4876_vm8, %v17276_v5, %v4940_v32  ;;  %vm17340_vm7 = vcmp.gt.f32.partialorder %v17339_v25, 0.0  ;;  %v9586_v54 = vpack.c.bf16 %v17342_v16, %v17342_v16  ;;  %v17346_v32 = vld [vmem:[#allocation27_spill] sm:$0xff]  ;;  %v17350_v12 = vld [vmem:[#allocation34_spill] sm:$0xff] }
 0x512   :  { %v14083_v46 = vsel %vm17340_vm7, %v17339_v25, %v4941_v57  ;;  %v9587_v24 = vpack.c.bf16 %v17343_v27, %v17343_v27  ;;  %v9588_v4 = vpack.c.bf16 %v17344_v37, %v17344_v37  ;;  %v9589_v50 = vpack.c.bf16 %v17345_v35, %v17345_v35  ;;  %v17347_v57 = vld [vmem:[#allocation29_spill] sm:$0xff]  ;;  %v17351_v16 = vld [vmem:[#allocation38_spill] sm:$0xff] }
 0x513   :  { %17341 = vst [vmem:[#allocation16_spill] sm:$0xff] %v14083_v46  ;;  %v9590_v5 = vpack.c.bf16 %v17346_v32, %v17346_v32  ;;  %v9591_v26 = vpack.c.bf16 %v17347_v57, %v17347_v57  ;;  %v9592_v52 = vpack.c.bf16 %v17348_v53, %v17348_v53  ;;  %v9593_v34 = vpack.c.bf16 %v17349_v47, %v17349_v47  ;;  %v17352_v37 = vld [vmem:[#allocation41_spill] sm:$0xff]  ;;  %v17358_v57 = vld [vmem:[#allocation42_spill] sm:$0xff]  ;;  %v17359_v47 = vld [vmem:[#allocation44_spill] sm:$0xff] }
 0x514   :  { %v9594_v25 = vpack.c.bf16 %v17350_v12, %v17350_v12  ;;  %v9595_v27 = vpack.c.bf16 %v17351_v16, %v17351_v16  ;;  %v9596_v35 = vpack.c.bf16 %v17352_v37, %v17352_v37  ;;  %v9597_v32 = vpack.c.bf16 %v17353_v20, %v17353_v20  ;;  %v17360_v16 = vld [vmem:[#allocation47_spill] sm:$0xff]  ;;  %v17361_v46 = vld [vmem:[#allocation50_spill] sm:$0xff] }
 0x515   :  { %vm17354_vm8 = vcmask 519168   ;;  %v9598_v53 = vpack.c.bf16 %v17358_v57, %v17358_v57  ;;  %v9599_v12 = vpack.c.bf16 %v17359_v47, %v17359_v47  ;;  %v9600_v37 = vpack.c.bf16 %v17360_v16, %v17360_v16 }
 0x516   :  { %5264 = vst.msk [vmem:[#allocation3] sm:$0xf] %vm17354_vm8, %v9586_v54  ;;  %vm17355_vm0 = vmmov %vm17354_vm8  ;;  %v9601_v20 = vpack.c.bf16 %v17361_v46, %v17361_v46  ;;  %v17366_v54 = vld [vmem:[#allocation54_spill] sm:$0xff]  ;;  %v9604_v57 = vpack.c.bf16 %v13814_v31, %v13814_v31  ;;  %v9605_v46 = vpack.c.bf16 %v13820_v30, %v13820_v30  ;;  %v9608_v31 = vpack.c.bf16 %v13838_v28, %v13838_v28 }
 0x517   :  { %5265 = vst.msk [vmem:[#allocation3 + $0x4] sm:$0xf] %vm17355_vm0, %v9587_v24  ;;  %vm17356_vm13 = vmmov %vm17355_vm0  ;;  %v9602_v24 = vpack.c.bf16 %v17366_v54, %v17366_v54  ;;  %v9609_v30 = vpack.c.bf16 %v13847_v29, %v13847_v29  ;;  %v9612_v28 = vpack.c.bf16 %v13865_v33, %v13865_v33  ;;  %v9613_v29 = vpack.c.bf16 %v13871_v18, %v13871_v18 }
 0x518   :  { %5266 = vst.msk [vmem:[#allocation3 + $0x8] sm:$0xf] %vm17356_vm13, %v9588_v4  ;;  %vm17357_vm6 = vmmov %vm17355_vm0  ;;  %v17367_v4 = vld [vmem:[#allocation10_spill] sm:$0xff]  ;;  %v9616_v33 = vpack.c.bf16 %v13889_v21, %v13889_v21  ;;  %v9617_v18 = vpack.c.bf16 %v13898_v63, %v13898_v63  ;;  %v9620_v21 = vpack.c.bf16 %v13916_v39, %v13916_v39  ;;  %v9621_v63 = vpack.c.bf16 %v13923_v60, %v13923_v60 }
 0x519   :  { %5267 = vst.msk [vmem:[#allocation3 + $0xc] sm:$0xf] %vm17357_vm6, %v9589_v50  ;;  %vm17362_vm15 = vmmov %vm17355_vm0  ;;  %v9603_v50 = vpack.c.bf16 %v17367_v4, %v17367_v4  ;;  %v9624_v39 = vpack.c.bf16 %v13941_v41, %v13941_v41  ;;  %v9625_v60 = vpack.c.bf16 %v13947_v62, %v13947_v62  ;;  %v9628_v41 = vpack.c.bf16 %v13965_v13, %v13965_v13 }
 0x51a   :  { %5268 = vst.msk [vmem:[#allocation3 + $0x10] sm:$0xf] %vm17362_vm15, %v9590_v5  ;;  %vm17363_vm10 = vmmov %vm17355_vm0  ;;  %v9606_v5 = vpack.c.bf16 %v13826_v49, %v13826_v49  ;;  %v9610_v49 = vpack.c.bf16 %v13853_v2, %v13853_v2  ;;  %v9614_v2 = vpack.c.bf16 %v13877_v14, %v13877_v14  ;;  %v9618_v14 = vpack.c.bf16 %v13904_v38, %v13904_v38  ;;  %v17409_v16 = vld [vmem:[#allocation16_spill] sm:$0xff] }
 0x51b   :  { %5269 = vst.msk [vmem:[#allocation3 + $0x14] sm:$0xf] %vm17363_vm10, %v9591_v26  ;;  %vm17364_vm9 = vmmov %vm17355_vm0  ;;  %v9607_v26 = vpack.c.bf16 %v13832_v23, %v13832_v23  ;;  %v9611_v23 = vpack.c.bf16 %v13859_v43, %v13859_v43  ;;  %v9615_v43 = vpack.c.bf16 %v13883_v42, %v13883_v42  ;;  %v9619_v42 = vpack.c.bf16 %v13910_v9, %v13910_v9 }
 0x51c   :  { %5270 = vst.msk [vmem:[#allocation3 + $0x18] sm:$0xf] %vm17364_vm9, %v9592_v52  ;;  %vm17365_vm4 = vmmov %vm17355_vm0  ;;  %v9622_v38 = vpack.c.bf16 %v13929_v40, %v13929_v40  ;;  %v9623_v9 = vpack.c.bf16 %v13935_v56, %v13935_v56  ;;  %v9626_v40 = vpack.c.bf16 %v13953_v55, %v13953_v55  ;;  %v9627_v56 = vpack.c.bf16 %v13959_v51, %v13959_v51 }
 0x51d   :  { %5271 = vst.msk [vmem:[#allocation3 + $0x1c] sm:$0xf] %vm17365_vm4, %v9593_v34  ;;  %vm17368_vm1 = vmmov %vm17355_vm0  ;;  %v9629_v62 = vpack.c.bf16 %v13971_v6, %v13971_v6  ;;  %v9630_v55 = vpack.c.bf16 %v13977_v48, %v13977_v48  ;;  %v9631_v51 = vpack.c.bf16 %v13983_v36, %v13983_v36  ;;  %v9632_v13 = vpack.c.bf16 %v13989_v59, %v13989_v59 }
 0x51e   :  { %5272 = vst.msk [vmem:[#allocation3 + $0x20] sm:$0xf] %vm17368_vm1, %v9594_v25  ;;  %vm17369_vm11 = vmmov %vm17355_vm0  ;;  %v9633_v6 = vpack.c.bf16 %v13998_v15, %v13998_v15  ;;  %v14226_v48 = vld [vmem:[#allocation3 + $0x4] sm:$0xf]  ;;  %v9634_v36 = vpack.c.bf16 %v14004_v1, %v14004_v1  ;;  %v9635_v59 = vpack.c.bf16 %v14010_v58, %v14010_v58  ;;  %v9636_v15 = vpack.c.bf16 %v14016_v61, %v14016_v61 }
 0x51f   :  { %5273 = vst.msk [vmem:[#allocation3 + $0x24] sm:$0xf] %vm17369_vm11, %v9595_v27  ;;  %vm17370_vm14 = vmmov %vm17355_vm0  ;;  %v5401_v27 = vld [vmem:[#allocation3] sm:$0xe]  ;;  %v9638_v58 = vpack.c.bf16 %v14029_v0, %v14029_v0  ;;  %v9639_v61 = vpack.c.bf16 %v14035_v3, %v14035_v3  ;;  %v9641_v47 = vpack.c.bf16 %v14047_v8, %v14047_v8  ;;  %v9642_v0 = vpack.c.bf16 %v14053_v10, %v14053_v10 }
 0x520   :  { %5274 = vst.msk [vmem:[#allocation3 + $0x28] sm:$0xf] %vm17370_vm14, %v9596_v35  ;;  %vm17371_vm5 = vmmov %vm17355_vm0  ;;  %v9637_v35 = vpack.c.bf16 %v14023_v45, %v14023_v45  ;;  %v14242_v1 = vld [vmem:[#allocation3 + $0x8] sm:$0xff]   ;;  %v9640_v45 = vpack.c.bf16 %v14041_v19, %v14041_v19  ;;  %v9643_v3 = vpack.c.bf16 %v14058_v11, %v14058_v11  ;;  %v9644_v19 = vpack.c.bf16 %v14063_v17, %v14063_v17 }
 0x521   :  { %5275 = vst.msk [vmem:[#allocation3 + $0x2c] sm:$0xf] %vm17371_vm5, %v9597_v32  ;;  %vm17372_vm12 = vmmov %vm17355_vm0  ;;  %v5341_v52 = vld [vmem:[#allocation3 + $0x10] sm:$0xf]  ;;  %v9645_v8 = vpack.c.bf16 %v14068_v22, %v14068_v22  ;;  %v9646_v10 = vpack.c.bf16 %v14073_v44, %v14073_v44  ;;  %v9647_v11 = vpack.c.bf16 %v14078_v7, %v14078_v7  ;;  %v9648_v17 = vpack.c.bf16 %v17409_v16, %v17409_v16 }
 0x522   :  { %5276 = vst.msk [vmem:[#allocation3 + $0x30] sm:$0xf] %vm17372_vm12, %v9598_v53  ;;  %vm17373_vm2 = vmmov %vm17355_vm0  ;;  %v14210_v34 = vld [vmem:[#allocation3 + $0x14] sm:$0xf]  ;;  %v5588_v54 = vrot.slane %v14242_v1, 1 }
 0x523   :  { %5277 = vst.msk [vmem:[#allocation3 + $0x34] sm:$0xf] %vm17373_vm2, %v9599_v12  ;;  %vm17374_vm3 = vmmov %vm17355_vm0  ;;  %v14281_v22 = vcombine.low %v5341_v52, %v14210_v34  ;;  %v5409_v16 = vld [vmem:[#allocation3 + $0x10] sm:$0xe] }
 0x524   :  { %5278 = vst.msk [vmem:[#allocation3 + $0x38] sm:$0xf] %vm17374_vm3, %v9600_v37  ;;  %vm17375_vm7 = vmmov %vm17355_vm0 }
 0x525   :  { %5279 = vst.msk [vmem:[#allocation3 + $0x3c] sm:$0xf] %vm17375_vm7, %v9601_v20  ;;  %vm17376_vm8 = vmmov %vm17355_vm0  ;;  %v5419_v32 = vld [vmem:[#allocation3 + $0x20] sm:$0xc]  ;;  %v9429_v20 = vcombine.low %v5401_v27, %v14226_v48  ;;  %5798 = vrot.lane.b32.xlu1 %v14281_v22, %s10357_s13 }
 0x526   :  { %5280 = vst.msk [vmem:[#allocation3 + $0x40] sm:$0xf] %vm17376_vm8, %v9602_v24  ;;  %vm17377_vm13 = vmmov %vm17355_vm0  ;;  %v14224_v25 = vld [vmem:[#allocation3 + $0x24] sm:$0xf] }
 0x527   :  { %5281 = vst.msk [vmem:[#allocation3 + $0x44] sm:$0xf] %vm17355_vm0, %v9603_v50  ;;  %vm17378_vm6 = vmmov %vm17355_vm0  ;;  %v9443_v7 = vcombine.low %v5419_v32, %v14224_v25  ;;  %v5587_v50 = vrot.slane %v9429_v20, 1 }
 0x528   :  { %5282 = vst.msk [vmem:[#allocation3 + $0x48] sm:$0xf] %vm17377_vm13, %v9604_v57  ;;  %vm17379_vm15 = vmmov %vm17355_vm0  ;;  %v14240_v53 = vld [vmem:[#allocation3 + $0x28] sm:$0xff]  }
 0x529   :  { %5283 = vst.msk [vmem:[#allocation3 + $0x4c] sm:$0xf] %vm17378_vm6, %v9605_v46  ;;  %vm17380_vm10 = vmmov %vm17355_vm0  ;;  %v14290_v44 = vrot.slane %v14240_v53, 2  ;;  %v5996_v4 = vrot.slane %v9443_v7, 2 }
 0x52a   :  { %5284 = vst.msk [vmem:[#allocation3 + $0x50] sm:$0xf] %vm17379_vm15, %v9606_v5  ;;  %vm17381_vm9 = vmmov %vm17355_vm0  ;;  %v14256_v12 = vld [vmem:[#allocation3 + $0x30] sm:$0xff]  }
 0x52b   :  { %5285 = vst.msk [vmem:[#allocation3 + $0x54] sm:$0xf] %vm17380_vm10, %v9607_v26  ;;  %vm17382_vm4 = vmmov %vm17355_vm0  ;;  %v5734_v24 = vrot.slane %v14256_v12, 2  ;;  %v14305_v26 = vld [vmem:[#allocation3 + $0x18] sm:$0xff]   ;;  %v5598_v52 = vrot.slane %v14256_v12, 1 }
 0x52c   :  { %5286 = vst.msk [vmem:[#allocation3 + $0x58] sm:$0xf] %vm17381_vm9, %v9608_v31  ;;  %vm17383_vm1 = vmmov %vm17355_vm0  ;;  %v14283_v37 = vld [vmem:[#allocation3 + $0x38] sm:$0xff]   ;;  %v5590_v31 = vrot.slane %v14281_v22, 1  ;;  %5800 = vrot.lane.b32.xlu1 %v14305_v26, %s10357_s13 }
 0x52d   :  { %5287 = vst.msk [vmem:[#allocation3 + $0x5c] sm:$0xf] %vm17382_vm4, %v9609_v30  ;;  %vm17384_vm11 = vmmov %vm17355_vm0  ;;  %v5736_v57 = vrot.slane %v14283_v37, 2 }
 0x52e   :  { %5288 = vst.msk [vmem:[#allocation3 + $0x60] sm:$0xf] %vm17383_vm1, %v9610_v49  ;;  %vm17385_vm14 = vmmov %vm17355_vm0  ;;  %v5345_v49 = vld [vmem:[#allocation3 + $0x20] sm:$0xf] }
 0x52f   :  { %5289 = vst.msk [vmem:[#allocation3 + $0x64] sm:$0xf] %vm17384_vm11, %v9611_v23  ;;  %vm17386_vm5 = vmmov %vm17355_vm0  ;;  %v14314_v23 = vld [vmem:[#allocation3 + $0x40] sm:$0xff]  }
 0x530   :  { %5290 = vst.msk [vmem:[#allocation3 + $0x68] sm:$0xf] %vm17385_vm14, %v9612_v28  ;;  %vm17387_vm12 = vmmov %vm17355_vm0  ;;  %v5602_v32 = vrot.slane %v14314_v23, 1 }
 0x531   :  { %5291 = vst.msk [vmem:[#allocation3 + $0x6c] sm:$0xf] %vm17386_vm5, %v9613_v29  ;;  %vm17388_vm2 = vmmov %vm17355_vm0  ;;  %v14323_v29 = vld [vmem:[#allocation3 + $0x48] sm:$0xff]  }
 0x532   :  { %5292 = vst.msk [vmem:[#allocation3 + $0x70] sm:$0xf] %vm17387_vm12, %v9614_v2  ;;  %vm17389_vm3 = vmmov %vm17355_vm0 }
 0x533   :  { %5293 = vst.msk [vmem:[#allocation3 + $0x74] sm:$0xf] %vm17388_vm2, %v9615_v43  ;;  %vm17390_vm7 = vmmov %vm17355_vm0  ;;  %v14329_v43 = vcombine.low %v5345_v49, %v14224_v25 }
 0x534   :  { %5294 = vst.msk [vmem:[#allocation3 + $0x78] sm:$0xf] %vm17389_vm3, %v9616_v33  ;;  %vm17391_vm8 = vmmov %vm17355_vm0  ;;  %v14332_v33 = vrot.slane %v14305_v26, 1 }
 0x535   :  { %5295 = vst.msk [vmem:[#allocation3 + $0x7c] sm:$0xf] %vm17390_vm7, %v9617_v18  ;;  %vm17392_vm13 = vmmov %vm17355_vm0  ;;  %v5738_v18 = vrot.slane %v14314_v23, 2  ;;  %5802 = vrot.lane.b32.xlu1 %v14329_v43, %s10357_s13 }
 0x536   :  { %5296 = vst.msk [vmem:[#allocation3 + $0x80] sm:$0xf] %vm17391_vm8, %v9618_v14  ;;  %vm17393_vm6 = vmmov %vm17355_vm0  ;;  %v5740_v14 = vrot.slane %v14323_v29, 2 }
 0x537   :  { %5297 = vst.msk [vmem:[#allocation3 + $0x84] sm:$0xf] %vm17355_vm0, %v9619_v42  ;;  %vm17394_vm15 = vmmov %vm17355_vm0 }
 0x538   :  { %5298 = vst.msk [vmem:[#allocation3 + $0x88] sm:$0xf] %vm17392_vm13, %v9620_v21  ;;  %vm17395_vm10 = vmmov %vm17355_vm0  ;;  %v5594_v21 = vrot.slane %v14329_v43, 1 }
 0x539   :  { %5299 = vst.msk [vmem:[#allocation3 + $0x8c] sm:$0xf] %vm17393_vm6, %v9621_v63  ;;  %vm17396_vm9 = vmmov %vm17355_vm0  ;;  %5804 = vrot.lane.b32.xlu1 %v14240_v53, %s10357_s13 }
 0x53a   :  { %5300 = vst.msk [vmem:[#allocation3 + $0x90] sm:$0xf] %vm17394_vm15, %v9622_v38  ;;  %vm17397_vm4 = vmmov %vm17355_vm0  ;;  %v14346_v38 = vld [vmem:[#allocation3 + $0x50] sm:$0xff]  }
 0x53b   :  { %5301 = vst.msk [vmem:[#allocation3 + $0x94] sm:$0xf] %vm17395_vm10, %v9623_v9  ;;  %vm17398_vm1 = vmmov %vm17355_vm0  ;;  %v5606_v7 = vrot.slane %v14346_v38, 1 }
 0x53c   :  { %5302 = vst.msk [vmem:[#allocation3 + $0x98] sm:$0xf] %vm17396_vm9, %v9624_v39  ;;  %vm17399_vm11 = vmmov %vm17355_vm0  ;;  %v14355_v39 = vld [vmem:[#allocation3 + $0x58] sm:$0xff]  }
 0x53d   :  { %5303 = vst.msk [vmem:[#allocation3 + $0x9c] sm:$0xf] %vm17397_vm4, %v9625_v60  ;;  %vm17400_vm14 = vmmov %vm17355_vm0  ;;  %5806 = vrot.lane.b32.xlu1 %v14256_v12, %s10357_s13 }
 0x53e   :  { %5304 = vst.msk [vmem:[#allocation3 + $0xa0] sm:$0xf] %vm17398_vm1, %v9626_v40  ;;  %vm17401_vm5 = vmmov %vm17355_vm0  ;;  %v5596_v40 = vrot.slane %v14240_v53, 1 }
 0x53f   :  { %5305 = vst.msk [vmem:[#allocation3 + $0xa4] sm:$0xf] %vm17399_vm11, %v9627_v56  ;;  %vm17402_vm12 = vmmov %vm17355_vm0  ;;  %v5742_v56 = vrot.slane %v14346_v38, 2 }
 0x540   :  { %5306 = vst.msk [vmem:[#allocation3 + $0xa8] sm:$0xf] %vm17400_vm14, %v9628_v41  ;;  %vm17403_vm2 = vmmov %vm17355_vm0  ;;  %v5744_v41 = vrot.slane %v14355_v39, 2 }
 0x541   :  { %5307 = vst.msk [vmem:[#allocation3 + $0xac] sm:$0xf] %vm17401_vm5, %v9629_v62  ;;  %vm17404_vm3 = vmmov %vm17355_vm0  ;;  %5808 = vrot.lane.b32.xlu1 %v14283_v37, %s10357_s13 }
 0x542   :  { %5308 = vst.msk [vmem:[#allocation3 + $0xb0] sm:$0xf] %vm17402_vm12, %v9630_v55  ;;  %vm17405_vm7 = vmmov %vm17355_vm0 }
 0x543   :  { %5309 = vst.msk [vmem:[#allocation3 + $0xb4] sm:$0xf] %vm17403_vm2, %v9631_v51  ;;  %vm17406_vm8 = vmmov %vm17355_vm0  ;;  %v14379_v51 = vld [vmem:[#allocation3 + $0x60] sm:$0xff]  }
 0x544   :  { %5310 = vst.msk [vmem:[#allocation3 + $0xb8] sm:$0xf] %vm17404_vm3, %v9632_v13  ;;  %vm17407_vm13 = vmmov %vm17355_vm0 }
 0x545   :  { %5311 = vst.msk [vmem:[#allocation3 + $0xbc] sm:$0xf] %vm17405_vm7, %v9633_v6  ;;  %vm17408_vm6 = vmmov %vm17355_vm0  ;;  %vm5722_vm7 = vcmask 1045504   ;;  %v14388_v6 = vld [vmem:[#allocation3 + $0x68] sm:$0xff]   ;;  %5810 = vrot.lane.b32.xlu1 %v14314_v23, %s10357_s13 }
 0x546   :  { %5312 = vst.msk [vmem:[#allocation3 + $0xc0] sm:$0xf] %vm17406_vm8, %v9634_v36  ;;  %vm17410_vm15 = vmmov %vm17355_vm0  ;;  %v5997_v46 = vsel %vm5722_vm7, %v5996_v4, %v14290_v44  ;;  %vm17421_vm8 = vcmask 1046528   ;;  %v14312_v30 = vsel %vm5722_vm7, %v14290_v44, %v5734_v24  ;;  %v14321_v28 = vsel %vm5722_vm7, %v5734_v24, %v5736_v57  ;;  %v14453_v4 = vld [vmem:[#allocation3 + $0x88] sm:$0xff]  }
 0x547   :  { %5313 = vst.msk [vmem:[#allocation3 + $0xc4] sm:$0xf] %vm17355_vm0, %v9635_v59  ;;  %vm17411_vm10 = vmmov %vm17355_vm0  ;;  %v5589_v5 = vsel %vm17421_vm8, %v5587_v50, %v5588_v54  ;;  %v14344_v63 = vsel %vm5722_vm7, %v5736_v57, %v5738_v18  ;;  %v14353_v9 = vsel %vm5722_vm7, %v5738_v18, %v5740_v14  ;;  %v14377_v55 = vsel %vm5722_vm7, %v5740_v14, %v5742_v56 }
 0x548   :  { %5314 = vst.msk [vmem:[#allocation3 + $0xc8] sm:$0xf] %vm17407_vm13, %v9636_v15  ;;  %vm17412_vm9 = vmmov %vm17355_vm0  ;;  %5652 = vrot.lane.b32.xlu0 %v5589_v5, %s10357_s13  ;;  %v14386_v13 = vsel %vm5722_vm7, %v5742_v56, %v5744_v41  ;;  %v5600_v36 = vrot.slane %v14283_v37, 1  ;;  %v5746_v59 = vrot.slane %v14379_v51, 2  ;;  %v5748_v15 = vrot.slane %v14388_v6, 2  ;;  %v14493_v56 = vld [vmem:[#allocation3 + $0x98] sm:$0xff]  }
 0x549   :  { %5315 = vst.msk [vmem:[#allocation3 + $0xcc] sm:$0xf] %vm17408_vm6, %v9637_v35  ;;  %vm17413_vm4 = vmmov %vm17355_vm0  ;;  %5812 = vrot.lane.b32.xlu1 %v14323_v29, %s10357_s13  ;;  %v9435_v50 = vcombine.low %v5409_v16, %v14210_v34  ;;  %v5608_v5 = vrot.slane %v14355_v39, 1 }
 0x54a   :  { %5316 = vst.msk [vmem:[#allocation3 + $0xd0] sm:$0xf] %vm17410_vm15, %v9638_v58  ;;  %vm17414_vm1 = vmmov %vm17355_vm0  ;;  %v14409_v58 = vsel %vm5722_vm7, %v5744_v41, %v5746_v59 }
 0x54b   :  { %5317 = vst.msk [vmem:[#allocation3 + $0xd4] sm:$0xf] %vm17411_vm10, %v9639_v61  ;;  %vm17415_vm11 = vmmov %vm17355_vm0  ;;  %v14411_v61 = vld [vmem:[#allocation3 + $0x70] sm:$0xff]  }
 0x54c   :  { %5318 = vst.msk [vmem:[#allocation3 + $0xd8] sm:$0xf] %vm17412_vm9, %v9640_v45  ;;  %vm17416_vm14 = vmmov %vm17355_vm0  ;;  %v14418_v45 = vsel %vm5722_vm7, %v5746_v59, %v5748_v15  ;;  %v5760_v59 = vrot.slane %v14493_v56, 2 }
 0x54d   :  { %5319 = vst.msk [vmem:[#allocation3 + $0xdc] sm:$0xf] %vm17413_vm4, %v9641_v47  ;;  %vm17417_vm5 = vmmov %vm17355_vm0  ;;  %v14420_v47 = vld [vmem:[#allocation3 + $0x78] sm:$0xff]   ;;  %5814 = vrot.lane.b32.xlu1 %v14346_v38, %s10357_s13 }
 0x54e   :  { %5320 = vst.msk [vmem:[#allocation3 + $0xe0] sm:$0xf] %vm17414_vm1, %v9642_v0  ;;  %vm17418_vm12 = vmmov %vm17355_vm0  ;;  %v5616_v16 = vrot.slane %v14420_v47, 1 }
 0x54f   :  { %5321 = vst.msk [vmem:[#allocation3 + $0xe4] sm:$0xf] %vm17415_vm11, %v9643_v3  ;;  %vm17419_vm2 = vmmov %vm17355_vm0  ;;  %v5604_v3 = vrot.slane %v14323_v29, 1 }
 0x550   :  { %5322 = vst.msk [vmem:[#allocation3 + $0xe8] sm:$0xf] %vm17416_vm14, %v9644_v19  ;;  %vm17420_vm3 = vmmov %vm17355_vm0  ;;  %vm17422_vm0 = vcmask 523264   ;;  %v5417_v19 = vld [vmem:[#allocation3 + $0x20] sm:$0xe] }
 0x551   :  { %5323 = vst.msk [vmem:[#allocation3 + $0xec] sm:$0xf] %vm17417_vm5, %v9645_v8  ;;  %9694 = vmatprep.mubr.msk.bf16.mxu1 %vm17422_vm0, %v5997_v46  ;;  %vm17423_vm13 = vmmov %vm17422_vm0  ;;  %v5750_v8 = vrot.slane %v14411_v61, 2  ;;  %5816 = vrot.lane.b32.xlu1 %v14355_v39, %s10357_s13 }
 0x552   :  { %5324 = vst.msk [vmem:[#allocation3 + $0xf0] sm:$0xf] %vm17418_vm12, %v9646_v10  ;;  %9695 = vmatmul.mubr.msk.bf16.vlgmr.msra.gmra.mrb[168].mxu1 %vm17423_vm13, %v14312_v30  ;;  %vm17424_vm6 = vmmov %vm17422_vm0  ;;  %v5752_v10 = vrot.slane %v14420_v47, 2 }
 0x553   :  { %5325 = vst.msk [vmem:[#allocation3 + $0xf4] sm:$0xf] %vm17419_vm2, %v9647_v11  ;;  %9698 = vmatprep.mubr.msk.bf16.mxu1 %vm17424_vm6, %v14321_v28  ;;  %vm17425_vm15 = vmmov %vm17421_vm8  ;;  %v9441_v11 = vcombine.low %v5417_v19, %v14224_v25  ;;  %v14442_v20 = vsel %vm5722_vm7, %v5748_v15, %v5750_v8  ;;  %v14516_v19 = vld [vmem:[#allocation3 + $0xa0] sm:$0xff]  }
 0x554   :  { %5326 = vst.msk [vmem:[#allocation3 + $0xf8] sm:$0xf] %vm17420_vm3, %v9648_v17  ;;  %v5591_v2 = vsel %vm17425_vm15, %v5588_v54, %v5590_v31  ;;  %vm17426_vm10 = vmmov %vm17421_vm8  ;;  %v14444_v54 = vld [vmem:[#allocation3 + $0x80] sm:$0xff]   ;;  %v14451_v25 = vsel %vm5722_vm7, %v5750_v8, %v5752_v10 }
 0x555   :  { %5654 = vrot.lane.b32.xlu0 %v5591_v2, %s10357_s13  ;;  %v5593_v42 = vsel %vm17426_vm10, %v5590_v31, %v14332_v33  ;;  %vm17427_vm9 = vmmov %vm17422_vm0  ;;  %17439 = vst [vmem:[#allocation33_spill] sm:$0xff] %v14411_v61  ;;  %v5970_v24 = vrot.slane %v9441_v11, 1  ;;  %v5868_v31 = vrot.slane %v9435_v50, 1  ;;  %v5754_v49 = vrot.slane %v14444_v54, 2  ;;  %5818 = vrot.lane.b32.xlu1 %v14379_v51, %s10357_s13 }
 0x556   :  { %vm17428_vm4 = vmmov %vm17422_vm0  ;;  %17441 = vst [vmem:[#allocation35_spill] sm:$0xff] %v14420_v47  ;;  %v5756_v2 = vrot.slane %v14453_v4, 2 }
 0x557   :  { %vm17429_vm1 = vmmov %vm17421_vm8  ;;  %17447 = vst [vmem:[#allocation39_spill] sm:$0xff] %v14444_v54 }
 0x558   :  { %v14361_v60 = vsel %vm17429_vm1, %v14332_v33, %v5594_v21  ;;  %vm17431_vm11 = vmmov %vm17429_vm1  ;;  %17449 = vst [vmem:[#allocation40_spill] sm:$0xff] %v14453_v4 }
 0x559   :  { %5656 = vrot.lane.b32.xlu0 %v5593_v42, %s10357_s13  ;;  %17430 = vst [vmem:[#allocation4_spill] sm:$0xff] %v14361_v60  ;;  %v14371_v62 = vsel %vm17431_vm11, %v5594_v21, %v5596_v40  ;;  %vm17433_vm14 = vmmov %vm17422_vm0  ;;  %v5610_v42 = vrot.slane %v14379_v51, 1  ;;  %v14482_v21 = vsel %vm5722_vm7, %v5752_v10, %v5754_v49  ;;  %5820 = vrot.lane.b32.xlu1 %v14388_v6, %s10357_s13  ;;  %v14525_v10 = vld [vmem:[#allocation3 + $0xa8] sm:$0xff]  }
 0x55a   :  { %9699 = vmatmul.mubr.msk.bf16.gmra.mrb[172].mxu1 %vm17427_vm9, %v14344_v63  ;;  %17432 = vst [vmem:[#allocation18_spill] sm:$0xff] %v14371_v62  ;;  %vm17434_vm5 = vmmov %vm17422_vm0 }
 0x55b   :  { %9702 = vmatprep.mubr.msk.bf16.mxu1 %vm17428_vm4, %v14353_v9  ;;  %vm17435_vm12 = vmmov %vm17429_vm1  ;;  %17460 = vst [vmem:[#allocation43_spill] sm:$0xff] %v14493_v56 }
 0x55c   :  { %v14393_v27 = vsel %vm17435_vm12, %v5596_v40, %v5598_v52  ;;  %vm17437_vm2 = vmmov %vm17429_vm1  ;;  %17466 = vst [vmem:[#allocation6_spill] sm:$0xff] %v14516_v19 }
 0x55d   :  { %5658 = vrot.lane.b32.xlu0 %v14361_v60, %s10357_s13  ;;  %17436 = vst [vmem:[#allocation28_spill] sm:$0xff] %v14393_v27  ;;  %v14403_v35 = vsel %vm17437_vm2, %v5598_v52, %v5600_v36  ;;  %vm17440_vm3 = vmmov %vm17422_vm0  ;;  %v5612_v52 = vrot.slane %v14388_v6, 1  ;;  %5822 = vrot.lane.b32.xlu1 %v14411_v61, %s10357_s13 }
 0x55e   :  { %17438 = vst [vmem:[#allocation30_spill] sm:$0xff] %v14403_v35  ;;  %vm17442_vm8 = vmmov %vm17422_vm0 }
 0x55f   :  { %vm17443_vm0 = vmmov %vm17429_vm1  ;;  %17468 = vst [vmem:[#allocation7_spill] sm:$0xff] %v14525_v10 }
 0x560   :  { %v14425_v0 = vsel %vm17443_vm0, %v5600_v36, %v5602_v32  ;;  %vm17445_vm13 = vmmov %vm17443_vm0 }
 0x561   :  { %5660 = vrot.lane.b32.xlu0 %v14371_v62, %s10357_s13  ;;  %17444 = vst [vmem:[#allocation36_spill] sm:$0xff] %v14425_v0  ;;  %v14436_v17 = vsel %vm17445_vm13, %v5602_v32, %v5604_v3  ;;  %vm17448_vm6 = vmmov %vm17440_vm3  ;;  %v5614_v32 = vrot.slane %v14411_v61, 1  ;;  %5824 = vrot.lane.b32.xlu1 %v14420_v47, %s10357_s13  ;;  %v5726_v47 = vrot.slane %v14281_v22, 2 }
 0x562   :  { %9703 = vmatmul.mubr.msk.bf16.gmra.mrb[176].mxu1 %vm17433_vm14, %v14377_v55  ;;  %17446 = vst [vmem:[#allocation37_spill] sm:$0xff] %v14436_v17  ;;  %vm17450_vm15 = vmmov %vm17440_vm3 }
 0x563   :  { %9706 = vmatprep.mubr.msk.bf16.mxu1 %vm17434_vm5, %v14386_v13  ;;  %vm17451_vm10 = vmmov %vm17443_vm0  ;;  %v14540_v50 = vsel %vm17443_vm0, %v5614_v32, %v5616_v16 }
 0x564   :  { %v14459_v57 = vsel %vm17451_vm10, %v5970_v24, %v5596_v40  ;;  %vm17452_vm9 = vmmov %vm17443_vm0  ;;  %v14484_v40 = vld [vmem:[#allocation3 + $0x90] sm:$0xff]   ;;  %v5764_v24 = vrot.slane %v14525_v10, 2  ;;  %17472 = vst [vmem:[#allocation49_spill] sm:$0xff] %v14540_v50 }
 0x565   :  { %5662 = vrot.lane.b32.xlu0 %v14393_v27, %s10357_s13  ;;  %v14462_v46 = vsel %vm17452_vm9, %v5604_v3, %v5606_v7  ;;  %vm17454_vm4 = vmmov %vm17443_vm0  ;;  %17458 = vst [vmem:[#allocation5_spill] sm:$0xff] %v14484_v40  ;;  %v5758_v36 = vrot.slane %v14484_v40, 2  ;;  %5826 = vrot.lane.b32.xlu1 %v14444_v54, %s10357_s13  ;;  %v14636_v27 = vld [vmem:[#allocation3 + $0xe0] sm:$0xff]  }
 0x566   :  { %17453 = vst [vmem:[#allocation19_spill] sm:$0xff] %v14462_v46  ;;  %v14473_v18 = vsel %vm17454_vm4, %v5868_v31, %v14332_v33  ;;  %vm17456_vm1 = vmmov %vm17443_vm0  ;;  %v14491_v33 = vsel %vm5722_vm7, %v5754_v49, %v5756_v2  ;;  %v10275_v49 = vld [vmem:[#allocation3 + $0xb0] sm:$0xff]  }
 0x567   :  { %17455 = vst [vmem:[#allocation20_spill] sm:$0xff] %v14473_v18  ;;  %v14476_v14 = vsel %vm17456_vm1, %v5606_v7, %v5608_v5  ;;  %vm17459_vm11 = vmmov %vm17440_vm3  ;;  %v14514_v3 = vsel %vm5722_vm7, %v5756_v2, %v5758_v36  ;;  %v14523_v8 = vsel %vm5722_vm7, %v5758_v36, %v5760_v59  ;;  %v5762_v7 = vrot.slane %v14516_v19, 2 }
 0x568   :  { %17457 = vst [vmem:[#allocation21_spill] sm:$0xff] %v14476_v14  ;;  %vm17461_vm14 = vmmov %vm17440_vm3  ;;  %v5620_v36 = vrot.slane %v14453_v4, 1 }
 0x569   :  { %5664 = vrot.lane.b32.xlu0 %v14403_v35, %s10357_s13  ;;  %vm17462_vm5 = vmmov %vm17443_vm0  ;;  %v14546_v31 = vsel %vm5722_vm7, %v5760_v59, %v5762_v7  ;;  %5828 = vrot.lane.b32.xlu1 %v14453_v4, %s10357_s13  ;;  %v14553_v2 = vsel %vm5722_vm7, %v5762_v7, %v5764_v24  ;;  %v5766_v59 = vrot.slane %v10275_v49, 2  ;;  %v5630_v35 = vrot.slane %v10275_v49, 1 }
 0x56a   :  { %9707 = vmatmul.mubr.msk.bf16.gmra.mrb[180].mxu1 %vm17440_vm3, %v14409_v58  ;;  %v14498_v41 = vsel %vm17462_vm5, %v5608_v5, %v5610_v42  ;;  %vm17464_vm12 = vmmov %vm17443_vm0  ;;  %v5618_v5 = vrot.slane %v14444_v54, 1 }
 0x56b   :  { %9710 = vmatprep.mubr.msk.bf16.mxu1 %vm17442_vm8, %v14418_v45  ;;  %17463 = vst [vmem:[#allocation45_spill] sm:$0xff] %v14498_v41  ;;  %v14508_v15 = vsel %vm17464_vm12, %v5610_v42, %v5612_v52  ;;  %vm17467_vm2 = vmmov %vm17440_vm3  ;;  %v14555_v42 = vld [vmem:[#allocation3 + $0xb8] sm:$0xff]  }
 0x56c   :  { %17465 = vst [vmem:[#allocation46_spill] sm:$0xff] %v14508_v15  ;;  %vm17469_vm3 = vmmov %vm17467_vm2 }
 0x56d   :  { %5666 = vrot.lane.b32.xlu0 %v14425_v0, %s10357_s13  ;;  %vm17470_vm8 = vmmov %vm17443_vm0  ;;  %5830 = vrot.lane.b32.xlu1 %v14484_v40, %s10357_s13 }
 0x56e   :  { %v14530_v11 = vsel %vm17470_vm8, %v5612_v52, %v5614_v32  ;;  %vm17473_vm13 = vmmov %vm17467_vm2  ;;  %v5768_v32 = vrot.slane %v14555_v42, 2 }
 0x56f   :  { %17471 = vst [vmem:[#allocation48_spill] sm:$0xff] %v14530_v11  ;;  %vm17477_vm10 = vmmov %vm17443_vm0 }
 0x570   :  { %v14569_v7 = vsel %vm17477_vm10, %v5618_v5, %v5620_v36  ;;  %vm17479_vm9 = vmmov %vm17467_vm2 }
 0x571   :  { %5668 = vrot.lane.b32.xlu0 %v14436_v17, %s10357_s13  ;;  %17478 = vst [vmem:[#allocation51_spill] sm:$0xff] %v14569_v7  ;;  %5832 = vrot.lane.b32.xlu1 %v14493_v56, %s10357_s13  ;;  %vm17480_vm4 = vmmov %vm17467_vm2 }
 0x572   :  { %9711 = vmatmul.mubr.msk.bf16.gmra.mrb[184].mxu1 %vm17448_vm6, %v14442_v20  ;;  %vm17474_vm6 = vmmov %vm17467_vm2 }
 0x573   :  { %9714 = vmatprep.mubr.msk.bf16.mxu1 %vm17450_vm15, %v14451_v25  ;;  %vm17475_vm15 = vmmov %vm17443_vm0 }
 0x574   :  { %v14560_v52 = vsel %vm17475_vm15, %v5616_v16, %v5618_v5  ;;  %v14575_v16 = vsel %vm5722_vm7, %v5764_v24, %v5766_v59  ;;  %v14584_v5 = vld [vmem:[#allocation3 + $0xc8] sm:$0xff]   ;;  %vm17481_vm1 = vmmov %vm17443_vm0  ;;  %v5624_v24 = vrot.slane %v14493_v56, 1 }
 0x575   :  { %5670 = vrot.lane.b32.xlu0 %v14462_v46, %s10357_s13  ;;  %17476 = vst [vmem:[#allocation8_spill] sm:$0xff] %v14560_v52  ;;  %5834 = vrot.lane.b32.xlu1 %v14516_v19, %s10357_s13  ;;  %v14606_v46 = vld [vmem:[#allocation3 + $0xd0] sm:$0xff]   ;;  %vm17486_vm5 = vmmov %vm17467_vm2 }
 0x576   :  { %vm17487_vm12 = vmmov %vm17443_vm0  ;;  %v5774_v17 = vrot.slane %v14606_v46, 2 }
 0x577   :  { %vm17491_vm8 = vmmov %vm17469_vm3 }
 0x578   :  { %vm17496_vm15 = vmmov %vm17469_vm3 }
 0x579   :  { %5672 = vrot.lane.b32.xlu0 %v14476_v14, %s10357_s13  ;;  %v5626_v14 = vrot.slane %v14516_v19, 1  ;;  %5836 = vrot.lane.b32.xlu1 %v14525_v10, %s10357_s13  ;;  %vm17497_vm10 = vmmov %vm17443_vm0 }
 0x57a   :  { %9715 = vmatmul.mubr.msk.bf16.gmra.mrb[188].mxu1 %vm17459_vm11, %v14482_v21  ;;  %vm17483_vm11 = vmmov %vm17443_vm0 }
 0x57b   :  { %9718 = vmatprep.mubr.msk.bf16.mxu1 %vm17461_vm14, %v14491_v33  ;;  %vm17485_vm14 = vmmov %vm17467_vm2 }
 0x57d   :  { %5674 = vrot.lane.b32.xlu0 %v14498_v41, %s10357_s13  ;;  %5838 = vrot.lane.b32.xlu1 %v10275_v49, %s10357_s13 }
 0x581   :  { %5676 = vrot.lane.b32.xlu0 %v14508_v15, %s10357_s13  ;;  %5840 = vrot.lane.b32.xlu1 %v14555_v42, %s10357_s13 }
 0x582   :  { %9719 = vmatmul.mubr.msk.bf16.gmra.mrb[192].mxu1 %vm17467_vm2, %v14514_v3  ;;  %vm17489_vm2 = vmmov %vm17443_vm0 }
 0x583   :  { %9722 = vmatprep.mubr.msk.bf16.mxu1 %vm17469_vm3, %v14523_v8 }
 0x585   :  { %5678 = vrot.lane.b32.xlu0 %v14530_v11, %s10357_s13  ;;  %v10277_v11 = vld [vmem:[#allocation3 + $0xc0] sm:$0xff]  }
 0x586   :  { %v5770_v15 = vrot.slane %v10277_v11, 2  ;;  %5842 = vrot.lane.b32.xlu1 %v10277_v11, %s10357_s13  ;;  %v5634_v60 = vrot.slane %v10277_v11, 1 }
 0x589   :  { %5680 = vrot.lane.b32.xlu0 %v14540_v50, %s10357_s13  ;;  %v5622_v50 = vrot.slane %v14484_v40, 1 }
 0x58a   :  { %9723 = vmatmul.mubr.msk.bf16.gmra.mrb[196].mxu1 %vm17473_vm13, %v14546_v31  ;;  %vm17493_vm13 = vmmov %vm17443_vm0  ;;  %5844 = vrot.lane.b32.xlu1 %v14584_v5, %s10357_s13 }
 0x58b   :  { %9726 = vmatprep.mubr.msk.bf16.mxu1 %vm17474_vm6, %v14553_v2  ;;  %v14598_v41 = vsel %vm17483_vm11, %v5622_v50, %v5624_v24  ;;  %vm17495_vm6 = vmmov %vm17469_vm3 }
 0x58c   :  { %17484 = vst [vmem:[#allocation52_spill] sm:$0xff] %v14598_v41  ;;  %vm17504_vm11 = vmmov %vm17443_vm0 }
 0x58d   :  { %5682 = vrot.lane.b32.xlu0 %v14560_v52, %s10357_s13  ;;  %v14582_v52 = vsel %vm5722_vm7, %v5766_v59, %v5768_v32  ;;  %v5772_v59 = vrot.slane %v14584_v5, 2 }
 0x58e   :  { %5846 = vrot.lane.b32.xlu1 %v14606_v46, %s10357_s13 }
 0x591   :  { %5684 = vrot.lane.b32.xlu0 %v14569_v7, %s10357_s13  ;;  %v14589_v7 = vsel %vm17481_vm1, %v5620_v36, %v5622_v50  ;;  %v14604_v36 = vsel %vm5722_vm7, %v5768_v32, %v5770_v15  ;;  %v14615_v50 = vld [vmem:[#allocation3 + $0xd8] sm:$0xff]   ;;  %v5628_v32 = vrot.slane %v14525_v10, 1  ;;  %v5638_v10 = vrot.slane %v14606_v46, 1  ;;  %vm17503_vm1 = vmmov %vm17469_vm3 }
 0x592   :  { %9727 = vmatmul.mubr.msk.bf16.gmra.mrb[200].mxu1 %vm17479_vm9, %v14575_v16  ;;  %17482 = vst [vmem:[#allocation9_spill] sm:$0xff] %v14589_v7  ;;  %vm17500_vm9 = vmmov %vm17443_vm0  ;;  %5848 = vrot.lane.b32.xlu1 %v14615_v50, %s10357_s13 }
 0x593   :  { %9730 = vmatprep.mubr.msk.bf16.mxu1 %vm17480_vm4, %v14582_v52  ;;  %v14629_v0 = vsel %vm17489_vm2, %v5626_v14, %v5628_v32  ;;  %v14650_v49 = vsel %vm17443_vm0, %v5628_v32, %v5630_v35  ;;  %vm17502_vm4 = vmmov %vm17469_vm3 }
 0x594   :  { %17490 = vst [vmem:[#allocation53_spill] sm:$0xff] %v14629_v0  ;;  %17492 = vst [vmem:[#allocation24_spill] sm:$0xff] %v14650_v49 }
 0x595   :  { %5686 = vrot.lane.b32.xlu0 %v14589_v7, %s10357_s13  ;;  %v14613_v7 = vsel %vm5722_vm7, %v5770_v15, %v5772_v59  ;;  %v5776_v15 = vrot.slane %v14615_v50, 2  ;;  %vm17510_vm2 = vmmov %vm17443_vm0 }
 0x596   :  { %5850 = vrot.lane.b32.xlu1 %v14636_v27, %s10357_s13 }
 0x597   :  { %v5799_v40 = vpop.permute.xlu1 %5798 }
 0x599   :  { %5688 = vrot.lane.b32.xlu0 %v14598_v41, %s10357_s13  ;;  %v14620_v41 = vsel %vm17487_vm12, %v5624_v24, %v5626_v14  ;;  %v14634_v24 = vsel %vm5722_vm7, %v5772_v59, %v5774_v17  ;;  %v14645_v14 = vld [vmem:[#allocation3 + $0xe8] sm:$0xff]   ;;  %v5632_v59 = vrot.slane %v14555_v42, 1  ;;  %v14666_v42 = vld [vmem:[#allocation3 + $0xf0] sm:$0xff]   ;;  %vm17509_vm12 = vmmov %vm17503_vm1 }
 0x59a   :  { %9731 = vmatmul.mubr.msk.bf16.gmra.mrb[204].mxu1 %vm17485_vm14, %v14604_v36  ;;  %17488 = vst [vmem:[#allocation23_spill] sm:$0xff] %v14620_v41  ;;  %vm17506_vm14 = vmmov %vm17443_vm0  ;;  %5852 = vrot.lane.b32.xlu1 %v14645_v14, %s10357_s13 }
 0x59b   :  { %9734 = vmatprep.mubr.msk.bf16.mxu1 %vm17486_vm5, %v14613_v7  ;;  %v14659_v62 = vsel %vm17493_vm13, %v5630_v35, %v5632_v59  ;;  %v10286_v35 = vld [vmem:[#allocation3 + $0xf8] sm:$0xff]   ;;  %v14678_v11 = vsel %vm17497_vm10, %v5632_v59, %v5634_v60  ;;  %v14697_v59 = vld [vmem:[#allocation3 + $0x100] sm:$0xff]   ;;  %vm17508_vm5 = vmmov %vm17503_vm1 }
 0x59c   :  { %17494 = vst [vmem:[#allocation25_spill] sm:$0xff] %v14659_v62  ;;  %17498 = vst [vmem:[#allocation26_spill] sm:$0xff] %v14678_v11  ;;  %v14686_v18 = vrot.slane %v10286_v35, 2  ;;  %v5884_v19 = vrot.slane %v14697_v59, 2  ;;  %v14772_v61 = vrot.slane %v10286_v35, 1 }
 0x59d   :  { %5690 = vrot.lane.b32.xlu0 %v14620_v41, %s10357_s13  ;;  %v14643_v41 = vsel %vm5722_vm7, %v5774_v17, %v5776_v15  ;;  %v5780_v17 = vrot.slane %v14645_v14, 2  ;;  %vm17515_vm13 = vmmov %vm17510_vm2 }
 0x59e   :  { %17499 = vst [vmem:[#allocation11_spill] sm:$0xff] %v14686_v18  ;;  %5854 = vrot.lane.b32.xlu1 %v14666_v42, %s10357_s13  ;;  %vm17519_vm10 = vmmov %vm17510_vm2 }
 0x5a1   :  { %5692 = vrot.lane.b32.xlu0 %v14629_v0, %s10357_s13  ;;  %v5778_v0 = vrot.slane %v14636_v27, 2 }
 0x5a2   :  { %9735 = vmatmul.mubr.msk.bf16.gmra.mrb[208].mxu1 %vm17469_vm3, %v14634_v24  ;;  %vm17512_vm3 = vmmov %vm17443_vm0  ;;  %5856 = vrot.lane.b32.xlu1 %v10286_v35, %s10357_s13 }
 0x5a3   :  { %9738 = vmatprep.mubr.msk.bf16.mxu1 %vm17491_vm8, %v14643_v41  ;;  %v14664_v32 = vsel %vm5722_vm7, %v5776_v15, %v5778_v0  ;;  %v5636_v15 = vrot.slane %v14584_v5, 1  ;;  %vm17513_vm8 = vmmov %vm17503_vm1 }
 0x5a4   :  { %vm17514_vm0 = vmmov %vm17503_vm1 }
 0x5a5   :  { %5694 = vrot.lane.b32.xlu0 %v14650_v49, %s10357_s13  ;;  %v14673_v49 = vsel %vm5722_vm7, %v5778_v0, %v5780_v17  ;;  %v14689_v0 = vsel %vm17500_vm9, %v5634_v60, %v5636_v15  ;;  %v14710_v46 = vsel %vm17504_vm11, %v5636_v15, %v5638_v10  ;;  %vm17520_vm9 = vmmov %vm17514_vm0 }
 0x5a6   :  { %17501 = vst [vmem:[#allocation12_spill] sm:$0xff] %v14689_v0  ;;  %17505 = vst [vmem:[#allocation13_spill] sm:$0xff] %v14710_v46  ;;  %5858 = vrot.lane.b32.xlu1 %v14697_v59, %s10357_s13 }
 0x5a7   :  { %vm17523_vm11 = vmmov %vm17514_vm0 }
 0x5a9   :  { %5696 = vrot.lane.b32.xlu0 %v14659_v62, %s10357_s13  ;;  %v5782_v62 = vrot.slane %v14666_v42, 2 }
 0x5aa   :  { %9739 = vmatmul.mubr.msk.bf16.gmra.mrb[212].mxu1 %vm17495_vm6, %v14664_v32  ;;  %vm17516_vm6 = vmmov %vm17514_vm0 }
 0x5ab   :  { %9742 = vmatprep.mubr.msk.bf16.mxu1 %vm17496_vm15, %v14673_v49  ;;  %v14695_v5 = vsel %vm5722_vm7, %v5780_v17, %v5782_v62  ;;  %v14705_v60 = vsel %vm5722_vm7, %v5782_v62, %v14686_v18  ;;  %v5640_v17 = vrot.slane %v14615_v50, 1  ;;  %v5642_v50 = vrot.slane %v14636_v27, 1  ;;  %vm17518_vm15 = vmmov %vm17510_vm2 }
 0x5ac   :  { %v5724_v27 = vrot.slane %v14242_v1, 2 }
 0x5ad   :  { %5698 = vrot.lane.b32.xlu0 %v14678_v11, %s10357_s13  ;;  %v14713_v11 = vld [vmem:[#allocation3 + $0x108] sm:$0xff]   ;;  %v14725_v15 = vsel %vm17506_vm14, %v5638_v10, %v5640_v17  ;;  %vm17524_vm14 = vmmov %vm17514_vm0 }
 0x5ae   :  { %v14721_v62 = vrot.slane %v14713_v11, 2  ;;  %17507 = vst [vmem:[#allocation14_spill] sm:$0xff] %v14725_v15  ;;  %5860 = vrot.lane.b32.xlu1 %v14713_v11, %s10357_s13 }
 0x5b1   :  { %5700 = vrot.lane.b32.xlu0 %v14689_v0, %s10357_s13  ;;  %v5403_v0 = vld [vmem:[#allocation3] sm:$0xc] }
 0x5b2   :  { %9743 = vmatmul.mubr.msk.bf16.gmra.mrb[216].mxu1 %vm17502_vm4, %v14695_v5  ;;  %v9431_v56 = vcombine.low %v5403_v0, %v14226_v48  ;;  %v14740_v0 = vsel %vm5722_vm7, %v5884_v19, %v14721_v62  ;;  %vm17521_vm4 = vmmov %vm17514_vm0  ;;  %5978 = vrot.lane.b32.xlu1 %v14459_v57, %s10357_s13  ;;  %v10299_v57 = vld [vmem:[%s16859_s5 + $0xa0] sm:$0xff]  }
 0x5b3   :  { %9746 = vmatprep.mubr.msk.bf16.mxu1 %vm17503_vm1, %v14705_v60  ;;  %vm17522_vm1 = vmmov %vm17514_vm0 }
 0x5b4   :  { %v5723_v10 = vrot.slane %v9431_v56, 2  ;;  %v5337_v56 = vld [vmem:[#allocation3] sm:$0xf] }
 0x5b5   :  { %5702 = vrot.lane.b32.xlu0 %v14710_v46, %s10357_s13  ;;  %v14732_v46 = vsel %vm5722_vm7, %v14686_v18, %v5884_v19  ;;  %v5644_v18 = vrot.slane %v14645_v14, 1  ;;  %v9397_v14 = vcombine.low %v5337_v56, %v14226_v48  ;;  %v5411_v56 = vld [vmem:[#allocation3 + $0x10] sm:$0xc] }
 0x5b6   :  { %v5725_v19 = vsel %vm5722_vm7, %v5723_v10, %v5724_v27  ;;  %v10291_v10 = vld [vmem:[%s16859_s5 + $0x80] sm:$0xff]  }
 0x5b7   :  { %v14755_v4 = vsel %vm17512_vm3, %v5642_v50, %v5644_v18  ;;  %v6134_v54 = vsel %vm17513_vm8, %v5725_v19, %v5799_v40  ;;  %v5801_v40 = vpop.permute.xlu1 %5800  ;;  %v5727_v19 = vsel %vm5722_vm7, %v5724_v27, %v5726_v47  ;;  %v17517_v27 = vmov 0   ;;  %vm17528_vm3 = vmmov %vm17514_vm0 }
 0x5b8   :  { %6800 = vmatprep.mubr.bf16.mxu0 %v6134_v54  ;;  %v10293_v54 = vld [vmem:[#allocation3 + $0x100] ss:$0 sps:$4 sm:$0x11]   ;;  %v6138_v48 = vsel %vm17516_vm6, %v5727_v19, %v5801_v40  ;;  %vm17529_vm8 = vmmov %vm17514_vm0 }
 0x5b9   :  { %5704 = vrot.lane.b32.xlu0 %v14725_v15, %s10357_s13  ;;  %v14746_v15 = vsel %vm17510_vm2, %v5640_v17, %v5642_v50  ;;  %v5646_v17 = vrot.slane %v14666_v42, 1  ;;  %vm17527_vm2 = vmmov %vm17514_vm0 }
 0x5ba   :  { %9747 = vmatmul.mubr.msk.bf16.gmra.mrb[220].mxu1 %vm17508_vm5, %v14732_v46  ;;  %17511 = vst [vmem:[#allocation15_spill] sm:$0xff] %v14746_v15  ;;  %v5653_v50 = vpop.permute.xlu0 %5652  ;;  %vm17525_vm5 = vmmov %vm17514_vm0 }
 0x5bb   :  { %9750 = vmatprep.mubr.msk.bf16.mxu1 %vm17509_vm12, %v14740_v0  ;;  %v14769_v42 = vsel %vm17515_vm13, %v5644_v18, %v5646_v17  ;;  %v10296_v18 = vld [vmem:[%s16859_s5 + $0x88] sm:$0xff]   ;;  %v14785_v35 = vsel %vm17518_vm15, %v5646_v17, %v14772_v61  ;;  %v5803_v40 = vpop.permute.xlu1 %5802  ;;  %v10297_v17 = vld [vmem:[%s16859_s5 + $0x90] sm:$0xff]   ;;  %vm17526_vm12 = vmmov %vm17514_vm0 }
 0x5bc   :  { %vm17530_vm13 = vmmov %vm17514_vm0 }
 0x5bd   :  { %5706 = vrot.lane.b32.xlu0 %v14746_v15, %s10357_s13  ;;  %v6006_v15 = vsel %vm17514_vm0, %v9397_v14, %v5653_v50  ;;  %v5650_v14 = vrot.slane %v10293_v54, 1  ;;  %v9437_v50 = vcombine.low %v5411_v56, %v14210_v34  ;;  %vm17531_vm6 = vmmov %vm17514_vm0 }
 0x5be   :  { %6801 = vmatmul.mubr.bf16.vlgmr.msra.gmra.mrb[104].mxu0 %v6006_v15  ;;  %v5728_v15 = vrot.slane %v14305_v26, 2  ;;  %vm17532_vm15 = vmmov %vm17514_vm0 }
 0x5bf   :  { %7058 = vmatpush1.bf16.msra.mxu0 %v10291_v10  ;;  %6808 = vmatprep.mubr.bf16.mxu0 %v6138_v48  ;;  %v5651_v19 = vsel %vm17519_vm10, %v14772_v61, %v5650_v14  ;;  %v5882_v48 = vrot.slane %v9437_v50, 2  ;;  %v10298_v14 = vld [vmem:[%s16859_s5 + $0x98] sm:$0xff]   ;;  %vm17534_vm10 = vmmov %vm17514_vm0 }
 0x5c0   :  { %7059 = vmatprep.subr.bf16.mxu0 %v17517_v27  ;;  %v5729_v54 = vsel %vm5722_vm7, %v5726_v47, %v5728_v15 }
 0x5c1   :  { %5708 = vrot.lane.b32.xlu0 %v14755_v4, %s10357_s13  ;;  %v6142_v56 = vsel %vm17521_vm4, %v5729_v54, %v5803_v40  ;;  %vm17536_vm4 = vmmov %vm17514_vm0 }
 0x5c3   :  { %7060 = vmatpush1.bf16.msra.mxu0 %v10296_v18  ;;  %v5730_v18 = vrot.slane %v14329_v43, 2 }
 0x5c4   :  { %7061 = vmatprep.subr.bf16.mxu0 %v17517_v27 }
 0x5c5   :  { %5710 = vrot.lane.b32.xlu0 %v14769_v42, %s10357_s13  ;;  %v5731_v50 = vsel %vm5722_vm7, %v5728_v15, %v5730_v18  ;;  %v5733_v40 = vsel %vm5722_vm7, %v5730_v18, %v14290_v44 }
 0x5c6   :  { %5892 = vrot.lane.b32.xlu1 %v5731_v50, %s10357_s13 }
 0x5c7   :  { %v5655_v10 = vpop.permute.xlu0 %5654  ;;  %7062 = vmatpush1.bf16.msra.mxu0 %v10297_v17 }
 0x5c8   :  { %v6010_v34 = vsel %vm17520_vm9, %v14242_v1, %v5655_v10  ;;  %v5883_v1 = vsel %vm5722_vm7, %v5882_v48, %v5728_v15  ;;  %7063 = vmatprep.subr.bf16.mxu0 %v17517_v27  ;;  %v5805_v10 = vpop.permute.xlu1 %5804  ;;  %vm17535_vm9 = vcmask 1046528  }
 0x5c9   :  { %5712 = vrot.lane.b32.xlu0 %v14785_v35, %s10357_s13  ;;  %6809 = vmatmul.mubr.bf16.gmra.mrb[108].mxu0 %v6010_v34  ;;  %v6146_v15 = vsel %vm17523_vm11, %v5731_v50, %v5805_v10  ;;  %v10305_v34 = vld [vmem:[%s16859_s5 + $0xb0] sm:$0xff]   ;;  %v10309_v50 = vld [vmem:[%s16859_s5 + $0xc8] sm:$0xff]  }
 0x5ca   :  { %6816 = vmatprep.mubr.bf16.mxu0 %v6142_v56  ;;  %5896 = vrot.lane.b32.xlu1 %v14312_v30, %s10357_s13  ;;  %v10306_v56 = vld [vmem:[%s16859_s5 + $0xb8] sm:$0xff]  }
 0x5cb   :  { %v5657_v47 = vpop.permute.xlu0 %5656  ;;  %7064 = vmatpush1.bf16.msra.mxu0 %v10298_v14  ;;  %v10308_v14 = vld [vmem:[%s16859_s5 + $0xc0] sm:$0xff]  }
 0x5cc   :  { %v6014_v17 = vsel %vm17522_vm1, %v14281_v22, %v5657_v47  ;;  %7065 = vmatprep.subr.bf16.mxu0 %v17517_v27  ;;  %v5807_v22 = vpop.permute.xlu1 %5806  ;;  %vm17537_vm1 = vmmov %vm17535_vm9 }
 0x5cd   :  { %5714 = vrot.lane.b32.xlu0 %v5651_v19, %s10357_s13  ;;  %v10302_v19 = vld [vmem:[%s16859_s5 + $0xa8] sm:$0xff]   ;;  %v6150_v48 = vsel %vm17525_vm5, %v5733_v40, %v5807_v22  ;;  %vm17538_vm11 = vmmov %vm17537_vm1 }
 0x5ce   :  { %5900 = vrot.lane.b32.xlu1 %v14344_v63, %s10357_s13  ;;  %vm17540_vm5 = vmmov %vm17514_vm0 }
 0x5cf   :  { %7066 = vmatpush1.bf16.msra.mxu0 %v10299_v57  ;;  %v5659_v44 = vpop.permute.xlu0 %5658 }
 0x5d0   :  { %7067 = vmatprep.subr.bf16.mxu0 %v17517_v27  ;;  %v6018_v54 = vsel %vm17524_vm14, %v14305_v26, %v5659_v44  ;;  %v5809_v18 = vpop.permute.xlu1 %5808  ;;  %v10311_v44 = vld [vmem:[%s16859_s5 + $0xd8] sm:$0xff]   ;;  %vm17539_vm14 = vmmov %vm17514_vm0 }
 0x5d1   :  { %5890 = vrot.lane.b32.xlu0 %v5883_v1, %s10357_s13  ;;  %6817 = vmatmul.mubr.bf16.gmra.mrb[112].mxu0 %v6014_v17  ;;  %v6154_v47 = vsel %vm17527_vm2, %v14312_v30, %v5809_v18  ;;  %v10310_v30 = vld [vmem:[%s16859_s5 + $0xd0] sm:$0xff]   ;;  %vm17542_vm2 = vmmov %vm17537_vm1 }
 0x5d2   :  { %6824 = vmatprep.mubr.bf16.mxu0 %v6146_v15  ;;  %5904 = vrot.lane.b32.xlu1 %v14377_v55, %s10357_s13 }
 0x5d3   :  { %7068 = vmatpush1.bf16.msra.mxu0 %v10302_v19  ;;  %v5661_v26 = vpop.permute.xlu0 %5660 }
 0x5d4   :  { %7069 = vmatprep.subr.bf16.mxu0 %v17517_v27  ;;  %v6022_v1 = vsel %vm17526_vm12, %v14329_v43, %v5661_v26  ;;  %v5811_v57 = vpop.permute.xlu1 %5810  ;;  %v14932_v26 = vld [vmem:[#allocation3 + $0x110] sm:$0xff]   ;;  %vm17541_vm12 = vmmov %vm17537_vm1 }
 0x5d5   :  { %5894 = vrot.lane.b32.xlu0 %v5733_v40, %s10357_s13  ;;  %v6158_v17 = vsel %vm17529_vm8, %v14321_v28, %v5811_v57  ;;  %vm17544_vm8 = vmmov %vm17514_vm0 }
 0x5d6   :  { %5908 = vrot.lane.b32.xlu1 %v14409_v58, %s10357_s13 }
 0x5d7   :  { %7070 = vmatpush1.bf16.msra.mxu0 %v10305_v34  ;;  %v5663_v10 = vpop.permute.xlu0 %5662 }
 0x5d8   :  { %7071 = vmatprep.subr.bf16.mxu0 %v17517_v27  ;;  %v14879_v40 = vsel %vm17528_vm3, %v14240_v53, %v5663_v10  ;;  %v5813_v53 = vpop.permute.xlu1 %5812  ;;  %v10303_v10 = vld [vmem:[#allocation3 + $0x120] ss:$0 sps:$4 sm:$0x11]   ;;  %vm17543_vm3 = vmmov %vm17514_vm0 }
 0x5d9   :  { %5898 = vrot.lane.b32.xlu0 %v14321_v28, %s10357_s13  ;;  %6825 = vmatmul.mubr.bf16.gmra.mrb[116].mxu0 %v6018_v54  ;;  %v6162_v28 = vsel %vm17530_vm13, %v14344_v63, %v5813_v53  ;;  %vm17545_vm13 = vmmov %vm17514_vm0 }
 0x5da   :  { %6832 = vmatprep.mubr.bf16.mxu0 %v6150_v48  ;;  %5912 = vrot.lane.b32.xlu1 %v14442_v20, %s10357_s13  ;;  %v5870_v48 = vrot.slane %v14697_v59, 1 }
 0x5db   :  { %7072 = vmatpush1.bf16.msra.mxu0 %v10306_v56  ;;  %v5665_v15 = vpop.permute.xlu0 %5664  ;;  %v14930_v56 = vrot.slane %v14713_v11, 1  ;;  %v10312_v11 = vld [vmem:[%s16859_s5 + $0xe0] sm:$0xff]  }
 0x5dc   :  { %7073 = vmatprep.subr.bf16.mxu0 %v17517_v27  ;;  %v14896_v19 = vsel %vm17514_vm0, %v14256_v12, %v5665_v15  ;;  %v5815_v22 = vpop.permute.xlu1 %5814  ;;  %v14943_v59 = vsel %vm17535_vm9, %v14772_v61, %v5870_v48  ;;  %vm17549_vm9 = vmmov %vm17514_vm0 }
 0x5dd   :  { %5902 = vrot.lane.b32.xlu0 %v14353_v9, %s10357_s13  ;;  %v6166_v34 = vsel %vm17532_vm15, %v14353_v9, %v5815_v22  ;;  %17533 = vst [vmem:[#allocation17_spill] sm:$0xff] %v14930_v56  ;;  %vm17547_vm15 = vmmov %vm17514_vm0 }
 0x5de   :  { %5916 = vrot.lane.b32.xlu1 %v14482_v21, %s10357_s13 }
 0x5df   :  { %7074 = vmatpush1.bf16.msra.mxu0 %v10308_v14  ;;  %v5667_v12 = vpop.permute.xlu0 %5666  ;;  %v5972_v14 = vrot.slane %v14932_v26, 1 }
 0x5e0   :  { %7075 = vmatprep.subr.bf16.mxu0 %v17517_v27  ;;  %v14915_v63 = vsel %vm17531_vm6, %v14283_v37, %v5667_v12  ;;  %v5817_v37 = vpop.permute.xlu1 %5816  ;;  %vm17546_vm6 = vmmov %vm17514_vm0 }
 0x5e1   :  { %5906 = vrot.lane.b32.xlu0 %v14386_v13, %s10357_s13  ;;  %6833 = vmatmul.mubr.bf16.gmra.mrb[120].mxu0 %v6022_v1  ;;  %v6170_v18 = vsel %vm17536_vm4, %v14377_v55, %v5817_v37  ;;  %v14957_v1 = vld [vmem:[#allocation3 + $0x118] sm:$0xff]   ;;  %vm17551_vm4 = vmmov %vm17514_vm0 }
 0x5e2   :  { %6840 = vmatprep.mubr.bf16.mxu0 %v6154_v47  ;;  %5920 = vrot.lane.b32.xlu1 %v14514_v3, %s10357_s13  ;;  %v5973_v47 = vsel %vm17538_vm11, %v14930_v56, %v5972_v14  ;;  %v7637_v37 = vld [vmem:[%s16862_s10 + $0x10] sm:$0xff]  ;;  %vm17558_vm11 = vmmov %vm17514_vm0 }
 0x5e3   :  { %7076 = vmatpush1.bf16.msra.mxu0 %v10309_v50  ;;  %v5669_v54 = vpop.permute.xlu0 %5668  ;;  %v5974_v50 = vrot.slane %v14957_v1, 1 }
 0x5e4   :  { %7077 = vmatprep.subr.bf16.mxu0 %v17517_v27  ;;  %v14936_v9 = vsel %vm17534_vm10, %v14314_v23, %v5669_v54  ;;  %v14954_v23 = vsel %vm17537_vm1, %v5870_v48, %v14930_v56  ;;  %v5819_v61 = vpop.permute.xlu1 %5818  ;;  %v7635_v54 = vld [vmem:[%s16862_s10] sm:$0xff]  ;;  %vm17548_vm10 = vmmov %vm17514_vm0  ;;  %v10347_v56 = vld [vmem:[#allocation3 + $0xd8] sm:$0xff]  }
 0x5e5   :  { %5910 = vrot.lane.b32.xlu0 %v14418_v45, %s10357_s13  ;;  %v5975_v53 = vsel %vm17541_vm12, %v5972_v14, %v5974_v50  ;;  %vm17553_vm1 = vmmov %vm17514_vm0 }
 0x5e6   :  { %5924 = vrot.lane.b32.xlu1 %v14546_v31, %s10357_s13  ;;  %vm17567_vm12 = vmmov %vm17514_vm0 }
 0x5e7   :  { %7078 = vmatpush1.bf16.msra.mxu0 %v10310_v30  ;;  %v5671_v55 = vpop.permute.xlu0 %5670  ;;  %v6174_v30 = vsel %vm17540_vm5, %v14386_v13, %v5819_v61  ;;  %v7639_v61 = vld [vmem:[%s16862_s10 + $0x20] sm:$0xff]  ;;  %vm17565_vm5 = vmmov %vm17514_vm0 }
 0x5e8   :  { %7079 = vmatprep.subr.bf16.mxu0 %v17517_v27  ;;  %v14969_v57 = vsel %vm17539_vm14, %v14323_v29, %v5671_v55  ;;  %v5821_v29 = vpop.permute.xlu1 %5820  ;;  %v7638_v55 = vld [vmem:[%s16862_s10 + $0x18] sm:$0xff]  ;;  %vm17560_vm14 = vmmov %vm17514_vm0 }
 0x5e9   :  { %5914 = vrot.lane.b32.xlu0 %v14451_v25, %s10357_s13  ;;  %6841 = vmatmul.mubr.bf16.gmra.mrb[124].mxu0 %v14879_v40 }
 0x5ea   :  { %6848 = vmatprep.mubr.bf16.mxu0 %v6158_v17  ;;  %5928 = vrot.lane.b32.xlu1 %v14575_v16, %s10357_s13  ;;  %v10304_v17 = vld [vmem:[#allocation3 + $0x110] ss:$0 sps:$4 sm:$0x33]  }
 0x5eb   :  { %7080 = vmatpush1.bf16.msra.mxu0 %v10311_v44  ;;  %v5673_v15 = vpop.permute.xlu0 %5672  ;;  %v5888_v44 = vrot.slane %v10304_v17, 2 }
 0x5ec   :  { %7081 = vmatprep.subr.bf16.mxu0 %v17517_v27  ;;  %v14984_v13 = vsel %vm17543_vm3, %v14346_v38, %v5673_v15  ;;  %v10314_v15 = vld [vmem:[%s16859_s5 + $0xf0] sm:$0xff]   ;;  %vm17574_vm3 = vmmov %vm17514_vm0 }
 0x5ed   :  { %5918 = vrot.lane.b32.xlu0 %v14491_v33, %s10357_s13  ;;  %v5889_v38 = vsel %vm5722_vm7, %v14721_v62, %v5888_v44  ;;  %v7643_v44 = vld [vmem:[%s16862_s10 + $0x40] sm:$0xff] }
 0x5ee   :  { %5932 = vrot.lane.b32.xlu1 %v14604_v36, %s10357_s13 }
 0x5ef   :  { %7082 = vmatpush1.bf16.msra.mxu0 %v10312_v11  ;;  %v5675_v22 = vpop.permute.xlu0 %5674 }
 0x5f0   :  { %7083 = vmatprep.subr.bf16.mxu0 %v17517_v27 }
 0x5f1   :  { %5922 = vrot.lane.b32.xlu0 %v14523_v8, %s10357_s13  ;;  %6849 = vmatmul.mubr.bf16.gmra.mrb[128].mxu0 %v14896_v19 }
 0x5f2   :  { %6856 = vmatprep.mubr.bf16.mxu0 %v6162_v28  ;;  %5936 = vrot.lane.b32.xlu1 %v14634_v24, %s10357_s13  ;;  %v5976_v28 = vrot.slane %v10303_v10, 1 }
 0x5f3   :  { %v5677_v48 = vpop.permute.xlu0 %5676 }
 0x5f4   :  { %v5977_v12 = vsel %vm17542_vm2, %v5974_v50, %v5976_v28  ;;  %v15029_v10 = vsel %vm17546_vm6, %v14379_v51, %v5677_v48  ;;  %v7642_v51 = vld [vmem:[%s16862_s10 + $0x38] sm:$0xff]  ;;  %vm17572_vm2 = vmmov %vm17514_vm0 }
 0x5f5   :  { %5926 = vrot.lane.b32.xlu0 %v14553_v2, %s10357_s13  ;;  %vm17587_vm6 = vmmov %vm17514_vm0 }
 0x5f6   :  { %5940 = vrot.lane.b32.xlu1 %v14664_v32, %s10357_s13 }
 0x5f9   :  { %5930 = vrot.lane.b32.xlu0 %v14582_v52, %s10357_s13  ;;  %6857 = vmatmul.mubr.bf16.gmra.mrb[132].mxu0 %v14915_v63 }
 0x5fa   :  { %6864 = vmatprep.mubr.bf16.mxu0 %v6166_v34  ;;  %5980 = vrot.lane.b32.xlu1 %v14943_v59, %s10357_s13  ;;  %v6178_v34 = vsel %vm17544_vm8, %v14409_v58, %v5821_v29  ;;  %v7636_v58 = vld [vmem:[%s16862_s10 + $0x8] sm:$0xff]  ;;  %vm17579_vm8 = vmmov %vm17514_vm0 }
 0x5fd   :  { %5934 = vrot.lane.b32.xlu0 %v14613_v7, %s10357_s13 }
 0x5fe   :  { %5982 = vrot.lane.b32.xlu1 %v14954_v23, %s10357_s13 }
 0x601   :  { %5938 = vrot.lane.b32.xlu0 %v14643_v41, %s10357_s13  ;;  %6865 = vmatmul.mubr.bf16.gmra.mrb[136].mxu0 %v14936_v9 }
 0x602   :  { %6872 = vmatprep.mubr.bf16.mxu0 %v6170_v18  ;;  %5984 = vrot.lane.b32.xlu1 %v5973_v47, %s10357_s13  ;;  %v15010_v18 = vsel %vm17514_vm0, %v14355_v39, %v5675_v22  ;;  %v5679_v47 = vpop.permute.xlu0 %5678  ;;  %v7640_v39 = vld [vmem:[%s16862_s10 + $0x28] sm:$0xff] }
 0x603   :  { %v7644_v22 = vld [vmem:[%s16862_s10 + $0x48] sm:$0xff] }
 0x605   :  { %5942 = vrot.lane.b32.xlu0 %v14673_v49, %s10357_s13 }
 0x606   :  { %5986 = vrot.lane.b32.xlu1 %v5975_v53, %s10357_s13  ;;  %v5681_v28 = vpop.permute.xlu0 %5680 }
 0x609   :  { %5944 = vrot.lane.b32.xlu0 %v14695_v5, %s10357_s13  ;;  %6873 = vmatmul.mubr.bf16.gmra.mrb[140].mxu0 %v14969_v57 }
 0x60a   :  { %6880 = vmatprep.mubr.bf16.mxu0 %v6174_v30  ;;  %5988 = vrot.lane.b32.xlu1 %v5977_v12, %s10357_s13 }
 0x60d   :  { %5946 = vrot.lane.b32.xlu0 %v14705_v60, %s10357_s13 }
 0x60e   :  { %7703 = vperm.xlu1 %10041, %v7635_v54  }
 0x611   :  { %5948 = vrot.lane.b32.xlu0 %v14732_v46, %s10357_s13  ;;  %6881 = vmatmul.mubr.bf16.gmra.mrb[144].mxu0 %v14984_v13  ;;  %v10313_v46 = vld [vmem:[%s16859_s5 + $0xe8] sm:$0xff]  }
 0x612   :  { %6888 = vmatprep.mubr.bf16.mxu0 %v6178_v34  ;;  %7084 = vmatpush1.bf16.msra.mxu0 %v10313_v46  ;;  %v7645_v34 = vld [vmem:[%s16862_s10 + $0x50] sm:$0xff]  ;;  %v15060_v46 = vsel %vm17548_vm10, %v14388_v6, %v5679_v47  ;;  %v7647_v6 = vld [vmem:[%s16862_s10 + $0x60] sm:$0xff]  ;;  %vm17594_vm10 = vmmov %vm17514_vm0 }
 0x613   :  { %7085 = vmatprep.subr.bf16.mxu0 %v17517_v27  ;;  %7713 = vperm.xlu1 %10041, %v7637_v37  }
 0x615   :  { %5950 = vrot.lane.b32.xlu0 %v14740_v0, %s10357_s13  ;;  %v5823_v0 = vpop.permute.xlu1 %5822 }
 0x616   :  { %v6182_v11 = vsel %vm17545_vm13, %v14418_v45, %v5823_v0  ;;  %v7641_v45 = vld [vmem:[%s16862_s10 + $0x30] sm:$0xff]  ;;  %7086 = vmatpush1.bf16.msra.mxu0 %v10314_v15  ;;  %vm17585_vm13 = vmmov %vm17514_vm0 }
 0x617   :  { %7723 = vperm.xlu1 %10041, %v7639_v61   ;;  %7087 = vmatprep.subr.bf16.mxu0 %v17517_v27  ;;  %v17550_v61 = vld [vmem:[#allocation33_spill] sm:$0xff] }
 0x618   :  { %v15087_v47 = vsel %vm17551_vm4, %v17550_v61, %v5681_v28  ;;  %vm17601_vm4 = vmmov %vm17514_vm0 }
 0x619   :  { %5952 = vrot.lane.b32.xlu0 %v5889_v38, %s10357_s13  ;;  %6889 = vmatmul.mubr.bf16.gmra.mrb[148].mxu0 %v15010_v18  ;;  %v5825_v14 = vpop.permute.xlu1 %5824  ;;  %v5683_v38 = vpop.permute.xlu0 %5682 }
 0x61a   :  { %6896 = vmatprep.mubr.bf16.mxu0 %v6182_v11  ;;  %v6186_v17 = vsel %vm17547_vm15, %v14442_v20, %v5825_v14  ;;  %vm17592_vm15 = vmmov %vm17514_vm0 }
 0x61b   :  { %7733 = vperm.xlu1 %10041, %v7641_v45  }
 0x61d   :  { %7708 = vperm.xlu0 %10040, %v7636_v58   ;;  %v5827_v50 = vpop.permute.xlu1 %5826  ;;  %v7646_v58 = vld [vmem:[%s16862_s10 + $0x58] sm:$0xff]  ;;  %v5685_v14 = vpop.permute.xlu0 %5684 }
 0x61e   :  { %v6190_v27 = vsel %vm17549_vm9, %v14451_v25, %v5827_v50  ;;  %v7648_v25 = vld [vmem:[%s16862_s10 + $0x68] sm:$0xff]  ;;  %v10315_v50 = vld [vmem:[%s16859_s5 + $0xf8] sm:$0xff]   ;;  %vm17599_vm9 = vmmov %vm17514_vm0 }
 0x61f   :  { %7743 = vperm.xlu1 %10041, %v7643_v44   ;;  %v7651_v44 = vld [vmem:[%s16862_s10 + $0x80] sm:$0xff]  ;;  %7088 = vmatpush1.bf16.msra.mxu0 %v10315_v50 }
 0x621   :  { %7718 = vperm.xlu0 %10040, %v7638_v55   ;;  %6897 = vmatmul.mubr.bf16.gmra.mrb[152].mxu0 %v15029_v10  ;;  %v5829_v12 = vpop.permute.xlu1 %5828  ;;  %v7649_v55 = vld [vmem:[%s16862_s10 + $0x70] sm:$0xff] }
 0x622   :  { %6904 = vmatprep.mubr.bf16.mxu0 %v6186_v17  ;;  %v6194_v45 = vsel %vm17553_vm1, %v14482_v21, %v5829_v12  ;;  %v5687_v12 = vpop.permute.xlu0 %5686  ;;  %vm17605_vm1 = vmmov %vm17514_vm0 }
 0x623   :  { %7753 = vperm.xlu1 %10041, %v7645_v34   ;;  %v7653_v34 = vld [vmem:[%s16862_s10 + $0x90] sm:$0xff] }
 0x625   :  { %v15031_v30 = vpop.f32.mrb[168].mxu1  ;;  %7728 = vperm.xlu0 %10040, %v7640_v39   ;;  %v5831_v37 = vpop.permute.xlu1 %5830 }
 0x626   :  { %v15039_v53 = vpop.f32.mrb[169].mxu1  ;;  %v5689_v50 = vpop.permute.xlu0 %5688 }
 0x627   :  { %v15044_v29 = vpop.f32.mrb[170].mxu1  ;;  %7763 = vperm.xlu1 %10041, %v7647_v6  }
 0x628   :  { %v15049_v20 = vpop.f32.mrb[171].mxu1 }
 0x629   :  { %7738 = vperm.xlu0 %10040, %v7642_v51   ;;  %6905 = vmatmul.mubr.bf16.gmra.mrb[156].mxu0 %v15060_v46  ;;  %v5833_v17 = vpop.permute.xlu1 %5832  ;;  %v7650_v51 = vld [vmem:[%s16862_s10 + $0x78] sm:$0xff] }
 0x62a   :  { %6912 = vmatprep.mubr.bf16.mxu0 %v6190_v27 }
 0x62b   :  { %7773 = vperm.xlu1 %10041, %v7649_v55   ;;  %v6198_v55 = vsel %vm17560_vm14, %v14491_v33, %v5831_v37  ;;  %v7656_v33 = vld [vmem:[%s16862_s10 + $0xa8] sm:$0xff]  ;;  %v7657_v37 = vld [vmem:[%s16862_s10 + $0xb0] sm:$0xff]  ;;  %vm17611_vm14 = vmmov %vm17514_vm0 }
 0x62d   :  { %v15062_v54 = vpop.f32.mrb[172].mxu1  ;;  %7748 = vperm.xlu0 %10040, %v7644_v22   ;;  %v7652_v22 = vld [vmem:[%s16862_s10 + $0x88] sm:$0xff]  ;;  %v5835_v27 = vpop.permute.xlu1 %5834 }
 0x62e   :  { %v15067_v0 = vpop.f32.mrb[173].mxu1 }
 0x62f   :  { %v15072_v48 = vpop.f32.mrb[174].mxu1  ;;  %7783 = vperm.xlu1 %10041, %v7651_v44  }
 0x630   :  { %v15077_v11 = vpop.f32.mrb[175].mxu1 }
 0x631   :  { %7758 = vperm.xlu0 %10040, %v7646_v58   ;;  %6913 = vmatmul.mubr.bf16.gmra.mrb[160].mxu0 %v15087_v47  ;;  %v17557_v58 = vld [vmem:[#allocation35_spill] sm:$0xff] }
 0x632   :  { %6920 = vmatprep.mubr.bf16.mxu0 %v6194_v45  ;;  %v15117_v6 = vsel %vm17558_vm11, %v17557_v58, %v5683_v38  ;;  %v7654_v45 = vld [vmem:[%s16862_s10 + $0x98] sm:$0xff]  ;;  %v7655_v38 = vld [vmem:[%s16862_s10 + $0xa0] sm:$0xff]  ;;  %vm17607_vm11 = vmmov %vm17514_vm0 }
 0x633   :  { %7793 = vperm.xlu1 %10041, %v7653_v34   ;;  %v17564_v34 = vld [vmem:[#allocation39_spill] sm:$0xff] }
 0x634   :  { %v15144_v58 = vsel %vm17565_vm5, %v17564_v34, %v5685_v14  ;;  %v7659_v14 = vld [vmem:[%s16862_s10 + $0xc0] sm:$0xff]  ;;  %vm17613_vm5 = vmmov %vm17514_vm0 }
 0x635   :  { %v15089_v39 = vpop.f32.mrb[176].mxu1  ;;  %7768 = vperm.xlu0 %10040, %v7648_v25  }
 0x636   :  { %17552 = vst [vmem:[#allocation27_spill] sm:$0xff] %v15089_v39  ;;  %v15097_v15 = vpop.f32.mrb[177].mxu1 }
 0x637   :  { %17554 = vst [vmem:[#allocation29_spill] sm:$0xff] %v15097_v15  ;;  %v15102_v28 = vpop.f32.mrb[178].mxu1  ;;  %7803 = vperm.xlu1 %10041, %v7655_v38  }
 0x638   :  { %17555 = vst [vmem:[#allocation31_spill] sm:$0xff] %v15102_v28  ;;  %v15107_v21 = vpop.f32.mrb[179].mxu1  ;;  %v7674_v28 = vld [vmem:[%s16862_s10 + $0x138] sm:$0xff] }
 0x639   :  { %17556 = vst [vmem:[#allocation32_spill] sm:$0xff] %v15107_v21  ;;  %7778 = vperm.xlu0 %10040, %v7650_v51   ;;  %6921 = vmatmul.mubr.bf16.gmra.mrb[164].mxu0 %v15117_v6 }
 0x63a   :  { %6928 = vmatprep.mubr.bf16.mxu0 %v6198_v55  ;;  %v5691_v55 = vpop.permute.xlu0 %5690 }
 0x63b   :  { %7813 = vperm.xlu1 %10041, %v7657_v37   ;;  %v7661_v37 = vld [vmem:[%s16862_s10 + $0xd0] sm:$0xff] }
 0x63d   :  { %v15119_v25 = vpop.f32.mrb[180].mxu1  ;;  %7788 = vperm.xlu0 %10040, %v7652_v22   ;;  %v5837_v22 = vpop.permute.xlu1 %5836 }
 0x63e   :  { %17559 = vst [vmem:[#allocation34_spill] sm:$0xff] %v15119_v25  ;;  %v15124_v61 = vpop.f32.mrb[181].mxu1  ;;  %v7658_v25 = vld [vmem:[%s16862_s10 + $0xb8] sm:$0xff] }
 0x63f   :  { %17561 = vst [vmem:[#allocation38_spill] sm:$0xff] %v15124_v61  ;;  %v15129_v51 = vpop.f32.mrb[182].mxu1  ;;  %7823 = vperm.xlu1 %10041, %v7659_v14  }
 0x640   :  { %17562 = vst [vmem:[#allocation41_spill] sm:$0xff] %v15129_v51  ;;  %v15134_v44 = vpop.f32.mrb[183].mxu1 }
 0x641   :  { %17563 = vst [vmem:[#allocation22_spill] sm:$0xff] %v15134_v44  ;;  %7798 = vperm.xlu0 %10040, %v7654_v45   ;;  %6929 = vmatmul.mubr.bf16.gmra.mrb[168].mxu0 %v15144_v58  ;;  %v6202_v45 = vsel %vm17567_vm12, %v14514_v3, %v5833_v17  ;;  %v7660_v3 = vld [vmem:[%s16862_s10 + $0xc8] sm:$0xff]  ;;  %v5693_v17 = vpop.permute.xlu0 %5692  ;;  %vm17617_vm12 = vmmov %vm17514_vm0 }
 0x642   :  { %6936 = vmatprep.mubr.bf16.mxu0 %v6202_v45  ;;  %v17571_v45 = vld [vmem:[#allocation40_spill] sm:$0xff] }
 0x643   :  { %7833 = vperm.xlu1 %10041, %v7661_v37  }
 0x645   :  { %v15146_v51 = vpop.f32.mrb[184].mxu1  ;;  %7808 = vperm.xlu0 %10040, %v7656_v33   ;;  %v5839_v33 = vpop.permute.xlu1 %5838 }
 0x646   :  { %17566 = vst [vmem:[#allocation42_spill] sm:$0xff] %v15146_v51  ;;  %v15151_v38 = vpop.f32.mrb[185].mxu1 }
 0x647   :  { %17568 = vst [vmem:[#allocation44_spill] sm:$0xff] %v15151_v38  ;;  %v15156_v44 = vpop.f32.mrb[186].mxu1  ;;  %v7662_v38 = vld [vmem:[%s16862_s10 + $0xd8] sm:$0xff] }
 0x648   :  { %17569 = vst [vmem:[#allocation47_spill] sm:$0xff] %v15156_v44  ;;  %v15161_v34 = vpop.f32.mrb[187].mxu1  ;;  %v15171_v44 = vsel %vm17572_vm2, %v17571_v45, %v5687_v12  ;;  %v7663_v12 = vld [vmem:[%s16862_s10 + $0xe0] sm:$0xff]  ;;  %v15190_v45 = vpop.permute.xlu0 %5694  ;;  %vm17619_vm2 = vmmov %vm17514_vm0 }
 0x649   :  { %17570 = vst [vmem:[#allocation50_spill] sm:$0xff] %v15161_v34  ;;  %7818 = vperm.xlu0 %10040, %v7658_v25   ;;  %6937 = vmatmul.mubr.bf16.gmra.mrb[172].mxu0 %v15171_v44  ;;  %v6206_v25 = vsel %vm17574_vm3, %v14523_v8, %v5835_v27  ;;  %v5841_v14 = vpop.permute.xlu1 %5840  ;;  %v7664_v8 = vld [vmem:[%s16862_s10 + $0xe8] sm:$0xff]  ;;  %v7665_v27 = vld [vmem:[%s16862_s10 + $0xf0] sm:$0xff]  ;;  %vm17623_vm3 = vmmov %vm17514_vm0 }
 0x64a   :  { %6944 = vmatprep.mubr.bf16.mxu0 %v6206_v25  ;;  %7843 = vperm.xlu1 %10041, %v7663_v12   ;;  %v17578_v25 = vld [vmem:[#allocation5_spill] sm:$0xff] }
 0x64d   :  { %v15173_v51 = vpop.f32.mrb[188].mxu1  ;;  %7828 = vperm.xlu0 %10040, %v7660_v3   ;;  %v5843_v37 = vpop.permute.xlu1 %5842 }
 0x64e   :  { %17573 = vst [vmem:[#allocation54_spill] sm:$0xff] %v15173_v51  ;;  %v15178_v34 = vpop.f32.mrb[189].mxu1  ;;  %7853 = vperm.xlu1 %10041, %v7665_v27   ;;  %v7669_v27 = vld [vmem:[%s16862_s10 + $0x110] sm:$0xff] }
 0x64f   :  { %17575 = vst [vmem:[#allocation10_spill] sm:$0xff] %v15178_v34  ;;  %v15183_v61 = vpop.f32.mrb[190].mxu1  ;;  %v15212_v34 = vpop.permute.xlu0 %5696 }
 0x650   :  { %17576 = vst [vmem:[#allocation16_spill] sm:$0xff] %v15183_v61  ;;  %v15188_v3 = vpop.f32.mrb[191].mxu1  ;;  %v15200_v61 = vsel %vm17579_vm8, %v17578_v25, %v5689_v50  ;;  %vm17625_vm8 = vmmov %vm17514_vm0 }
 0x651   :  { %17577 = vst [vmem:[#allocation33_spill] sm:$0xff] %v15188_v3  ;;  %7838 = vperm.xlu0 %10040, %v7662_v38   ;;  %6945 = vmatmul.mubr.bf16.gmra.mrb[176].mxu0 %v15200_v61  ;;  %v6210_v38 = vsel %vm17514_vm0, %v14546_v31, %v5837_v22  ;;  %v7666_v3 = vld [vmem:[%s16862_s10 + $0xf8] sm:$0xff]  ;;  %v15221_v31 = vpop.permute.xlu1 %5844  ;;  %v7668_v22 = vld [vmem:[%s16862_s10 + $0x108] sm:$0xff] }
 0x652   :  { %6952 = vmatprep.mubr.bf16.mxu0 %v6210_v38  ;;  %v17584_v38 = vld [vmem:[#allocation43_spill] sm:$0xff] }
 0x655   :  { %v15202_v51 = vpop.f32.mrb[192].mxu1  ;;  %7848 = vperm.xlu0 %10040, %v7664_v8   ;;  %v7667_v8 = vld [vmem:[%s16862_s10 + $0x100] sm:$0xff] }
 0x656   :  { %17580 = vst [vmem:[#allocation35_spill] sm:$0xff] %v15202_v51  ;;  %v15207_v12 = vpop.f32.mrb[193].mxu1  ;;  %7863 = vperm.xlu1 %10041, %v7667_v8   ;;  %v15233_v51 = vpop.permute.xlu0 %5698 }
 0x657   :  { %17581 = vst [vmem:[#allocation39_spill] sm:$0xff] %v15207_v12  ;;  %v15214_v50 = vpop.f32.mrb[194].mxu1 }
 0x658   :  { %17582 = vst [vmem:[#allocation40_spill] sm:$0xff] %v15214_v50  ;;  %v15219_v25 = vpop.f32.mrb[195].mxu1  ;;  %v15231_v50 = vsel %vm17585_vm13, %v17584_v38, %v5691_v55  ;;  %v7671_v38 = vld [vmem:[%s16862_s10 + $0x120] sm:$0xff]  ;;  %vm17629_vm13 = vmmov %vm17514_vm0 }
 0x659   :  { %17583 = vst [vmem:[#allocation5_spill] sm:$0xff] %v15219_v25  ;;  %7858 = vperm.xlu0 %10040, %v7666_v3   ;;  %6953 = vmatmul.mubr.bf16.gmra.mrb[180].mxu0 %v15231_v50  ;;  %v6214_v3 = vsel %vm17587_vm6, %v14553_v2, %v5839_v33  ;;  %v7670_v25 = vld [vmem:[%s16862_s10 + $0x118] sm:$0xff]  ;;  %v7672_v2 = vld [vmem:[%s16862_s10 + $0x128] sm:$0xff]  ;;  %vm17630_vm6 = vmmov %vm17514_vm0 }
 0x65a   :  { %7873 = vperm.xlu1 %10041, %v7669_v27   ;;  %6960 = vmatprep.mubr.bf16.mxu0 %v6214_v3  ;;  %v15257_v33 = vpop.permute.xlu0 %5700  ;;  %v7673_v27 = vld [vmem:[%s16862_s10 + $0x130] sm:$0xff] }
 0x65b   :  { %v17591_v3 = vld [vmem:[#allocation6_spill] sm:$0xff] }
 0x65d   :  { %v15235_v12 = vpop.f32.mrb[196].mxu1  ;;  %7868 = vperm.xlu0 %10040, %v7668_v22   ;;  %v15250_v22 = vpop.permute.xlu1 %5846 }
 0x65e   :  { %17586 = vst [vmem:[#allocation43_spill] sm:$0xff] %v15235_v12  ;;  %v15240_v8 = vpop.f32.mrb[197].mxu1  ;;  %7883 = vperm.xlu1 %10041, %v7671_v38  }
 0x65f   :  { %17588 = vst [vmem:[#allocation55_spill] sm:$0xff] %v15240_v8  ;;  %v15245_v55 = vpop.f32.mrb[198].mxu1 }
 0x660   :  { %17589 = vst [vmem:[#allocation56_spill] sm:$0xff] %v15245_v55  ;;  %v15252_v12 = vpop.f32.mrb[199].mxu1  ;;  %v15264_v55 = vsel %vm17592_vm15, %v17591_v3, %v5693_v17  ;;  %vm17631_vm15 = vmmov %vm17514_vm0 }
 0x661   :  { %17590 = vst [vmem:[#allocation57_spill] sm:$0xff] %v15252_v12  ;;  %7878 = vperm.xlu0 %10040, %v7670_v25   ;;  %6961 = vmatmul.mubr.bf16.gmra.mrb[184].mxu0 %v15264_v55  ;;  %v6218_v25 = vsel %vm17594_vm10, %v14575_v16, %v5841_v14  ;;  %v15271_v38 = vpop.permute.xlu1 %5848  ;;  %v7676_v16 = vld [vmem:[%s16862_s10 + $0x148] sm:$0xff]  ;;  %v7677_v14 = vld [vmem:[%s16862_s10 + $0x150] sm:$0xff]  ;;  %vm17632_vm10 = vmmov %vm17514_vm0 }
 0x662   :  { %7893 = vperm.xlu1 %10041, %v7673_v27   ;;  %6968 = vmatprep.mubr.bf16.mxu0 %v6218_v25  ;;  %v17598_v25 = vld [vmem:[#allocation7_spill] sm:$0xff] }
 0x665   :  { %v15266_v8 = vpop.f32.mrb[200].mxu1  ;;  %7888 = vperm.xlu0 %10040, %v7672_v2   ;;  %v7675_v2 = vld [vmem:[%s16862_s10 + $0x140] sm:$0xff]  ;;  %v15293_v27 = vpop.permute.xlu1 %5850 }
 0x666   :  { %17593 = vst [vmem:[#allocation6_spill] sm:$0xff] %v15266_v8  ;;  %v15273_v12 = vpop.f32.mrb[201].mxu1  ;;  %v15285_v8 = vpop.permute.xlu0 %5702  ;;  %7903 = vperm.xlu1 %10041, %v7675_v2  }
 0x667   :  { %17595 = vst [vmem:[#allocation58_spill] sm:$0xff] %v15273_v12  ;;  %v15278_v17 = vpop.f32.mrb[202].mxu1  ;;  %v7678_v12 = vld [vmem:[%s16862_s10 + $0x158] sm:$0xff] }
 0x668   :  { %17596 = vst [vmem:[#allocation59_spill] sm:$0xff] %v15278_v17  ;;  %v15283_v3 = vpop.f32.mrb[203].mxu1  ;;  %v15298_v17 = vsel %vm17599_vm9, %v17598_v25, %v15190_v45  ;;  %vm17633_vm9 = vmmov %vm17514_vm0 }
 0x669   :  { %17597 = vst [vmem:[#allocation60_spill] sm:$0xff] %v15283_v3  ;;  %7898 = vperm.xlu0 %10040, %v7674_v28   ;;  %6969 = vmatmul.mubr.bf16.gmra.mrb[188].mxu0 %v15298_v17  ;;  %v6222_v28 = vsel %vm17601_vm4, %v14582_v52, %v5843_v37  ;;  %v15319_v52 = vpop.permute.xlu1 %5852  ;;  %v7680_v37 = vld [vmem:[%s16862_s10 + $0x168] sm:$0xff]  ;;  %vm17634_vm4 = vmmov %vm17514_vm0 }
 0x66a   :  { %7913 = vperm.xlu1 %10041, %v7677_v14   ;;  %6976 = vmatprep.mubr.bf16.mxu0 %v6222_v28  ;;  %v15310_v39 = vpop.permute.xlu0 %5704  ;;  %v7681_v14 = vld [vmem:[%s16862_s10 + $0x170] sm:$0xff] }
 0x66b   :  { %v10342_v28 = vld [vmem:[#allocation3 + $0xb0] sm:$0xff]  }
 0x66d   :  { %v15300_v3 = vpop.f32.mrb[204].mxu1  ;;  %7908 = vperm.xlu0 %10040, %v7676_v16   ;;  %v7679_v16 = vld [vmem:[%s16862_s10 + $0x160] sm:$0xff] }
 0x66e   :  { %17600 = vst [vmem:[#allocation7_spill] sm:$0xff] %v15300_v3  ;;  %v15305_v2 = vpop.f32.mrb[205].mxu1  ;;  %7923 = vperm.xlu1 %10041, %v7679_v16   ;;  %v15331_v3 = vpop.permute.xlu0 %5706 }
 0x66f   :  { %17602 = vst [vmem:[#allocation61_spill] sm:$0xff] %v15305_v2  ;;  %v15312_v45 = vpop.f32.mrb[206].mxu1 }
 0x670   :  { %17603 = vst [vmem:[#allocation62_spill] sm:$0xff] %v15312_v45  ;;  %v15317_v25 = vpop.f32.mrb[207].mxu1  ;;  %v15329_v45 = vsel %vm17605_vm1, %v10342_v28, %v15212_v34  ;;  %v7682_v34 = vld [vmem:[%s16862_s10 + $0x178] sm:$0xff]  ;;  %vm17635_vm1 = vmmov %vm17514_vm0 }
 0x671   :  { %17604 = vst [vmem:[#allocation63_spill] sm:$0xff] %v15317_v25  ;;  %7918 = vperm.xlu0 %10040, %v7678_v12   ;;  %6977 = vmatmul.mubr.bf16.gmra.mrb[192].mxu0 %v15329_v45  ;;  %v6226_v12 = vsel %vm17607_vm11, %v14604_v36, %v15221_v31  ;;  %v7684_v36 = vld [vmem:[%s16862_s10 + $0x188] sm:$0xff]  ;;  %vm17636_vm11 = vmmov %vm17514_vm0 }
 0x672   :  { %7933 = vperm.xlu1 %10041, %v7681_v14   ;;  %6984 = vmatprep.mubr.bf16.mxu0 %v6226_v12  ;;  %v15356_v31 = vpop.permute.xlu0 %5708  ;;  %v7685_v14 = vld [vmem:[%s16862_s10 + $0x190] sm:$0xff] }
 0x673   :  { %v10343_v12 = vld [vmem:[#allocation3 + $0xb8] sm:$0xff]  }
 0x675   :  { %v15333_v25 = vpop.f32.mrb[208].mxu1  ;;  %7928 = vperm.xlu0 %10040, %v7680_v37   ;;  %v7683_v37 = vld [vmem:[%s16862_s10 + $0x180] sm:$0xff] }
 0x676   :  { %17606 = vst [vmem:[#allocation64_spill] sm:$0xff] %v15333_v25  ;;  %v15339_v16 = vpop.f32.mrb[209].mxu1  ;;  %v15349_v25 = vpop.permute.xlu1 %5854  ;;  %7943 = vperm.xlu1 %10041, %v7683_v37  }
 0x677   :  { %17608 = vst [vmem:[#allocation65_spill] sm:$0xff] %v15339_v16  ;;  %v15344_v28 = vpop.f32.mrb[210].mxu1  ;;  %v15385_v21 = vpop.permute.xlu0 %5710 }
 0x678   :  { %17609 = vst [vmem:[#allocation66_spill] sm:$0xff] %v15344_v28  ;;  %v15351_v2 = vpop.f32.mrb[211].mxu1  ;;  %v15363_v28 = vsel %vm17611_vm14, %v10343_v12, %v15233_v51  ;;  %v7686_v51 = vld [vmem:[%s16862_s10 + $0x198] sm:$0xff]  ;;  %vm17638_vm14 = vmmov %vm17514_vm0 }
 0x679   :  { %17610 = vst [vmem:[#allocation67_spill] sm:$0xff] %v15351_v2  ;;  %7938 = vperm.xlu0 %10040, %v7682_v34   ;;  %6985 = vmatmul.mubr.bf16.gmra.mrb[196].mxu0 %v15363_v28  ;;  %v6230_v34 = vsel %vm17613_vm5, %v14613_v7, %v15250_v22  ;;  %v7688_v7 = vld [vmem:[%s16862_s10 + $0x1a8] sm:$0xff]  ;;  %v7689_v22 = vld [vmem:[%s16862_s10 + $0x1b0] sm:$0xff]  ;;  %vm17639_vm5 = vmmov %vm17514_vm0 }
 0x67a   :  { %v15371_v37 = vpop.permute.xlu1 %5856  ;;  %7953 = vperm.xlu1 %10041, %v7685_v14   ;;  %6992 = vmatprep.mubr.bf16.mxu0 %v6230_v34  ;;  %v10344_v34 = vld [vmem:[#allocation3 + $0xc0] sm:$0xff]  }
 0x67b   :  { %v5713_v15 = vpop.permute.xlu0 %5712 }
 0x67d   :  { %v15365_v16 = vpop.f32.mrb[212].mxu1  ;;  %7948 = vperm.xlu0 %10040, %v7684_v36   ;;  %v7687_v36 = vld [vmem:[%s16862_s10 + $0x1a0] sm:$0xff] }
 0x67e   :  { %17612 = vst [vmem:[#allocation68_spill] sm:$0xff] %v15365_v16  ;;  %v15373_v2 = vpop.f32.mrb[213].mxu1  ;;  %7963 = vperm.xlu1 %10041, %v7687_v36   ;;  %v15393_v14 = vpop.permute.xlu1 %5858 }
 0x67f   :  { %17614 = vst [vmem:[#allocation69_spill] sm:$0xff] %v15373_v2  ;;  %v15378_v12 = vpop.f32.mrb[214].mxu1  ;;  %v7690_v2 = vld [vmem:[%s16862_s10 + $0x1b8] sm:$0xff] }
 0x680   :  { %17615 = vst [vmem:[#allocation70_spill] sm:$0xff] %v15378_v12  ;;  %v15383_v16 = vpop.f32.mrb[215].mxu1  ;;  %v15397_v12 = vsel %vm17617_vm12, %v10344_v34, %v15257_v33  ;;  %vm17640_vm12 = vmmov %vm17514_vm0 }
 0x681   :  { %17616 = vst [vmem:[#allocation71_spill] sm:$0xff] %v15383_v16  ;;  %7958 = vperm.xlu0 %10040, %v7686_v51   ;;  %6993 = vmatmul.mubr.bf16.gmra.mrb[200].mxu0 %v15397_v12  ;;  %v6234_v51 = vsel %vm17619_vm2, %v14634_v24, %v15271_v38  ;;  %v7692_v24 = vld [vmem:[%s16862_s10 + $0x1c8] sm:$0xff]  ;;  %v7693_v38 = vld [vmem:[%s16862_s10 + $0x1d0] sm:$0xff]  ;;  %vm17642_vm2 = vmmov %vm17514_vm0 }
 0x682   :  { %7973 = vperm.xlu1 %10041, %v7689_v22   ;;  %7000 = vmatprep.mubr.bf16.mxu0 %v6234_v51  ;;  %v10345_v22 = vld [vmem:[#allocation3 + $0xc8] sm:$0xff]  }
 0x683   :  { %v15425_v51 = vsel %vm17623_vm3, %v10345_v22, %v15285_v8  ;;  %vm17644_vm3 = vmmov %vm17514_vm0 }
 0x685   :  { %v15399_v16 = vpop.f32.mrb[216].mxu1  ;;  %7968 = vperm.xlu0 %10040, %v7688_v7   ;;  %v7691_v7 = vld [vmem:[%s16862_s10 + $0x1c0] sm:$0xff] }
 0x686   :  { %17618 = vst [vmem:[#allocation72_spill] sm:$0xff] %v15399_v16  ;;  %v15405_v36 = vpop.f32.mrb[217].mxu1  ;;  %v5861_v16 = vpop.permute.xlu1 %5860  ;;  %7983 = vperm.xlu1 %10041, %v7691_v7  }
 0x687   :  { %17620 = vst [vmem:[#allocation73_spill] sm:$0xff] %v15405_v36  ;;  %v15410_v33 = vpop.f32.mrb[218].mxu1 }
 0x688   :  { %17621 = vst [vmem:[#allocation74_spill] sm:$0xff] %v15410_v33  ;;  %v15415_v34 = vpop.f32.mrb[219].mxu1  ;;  %v5715_v33 = vpop.permute.xlu0 %5714 }
 0x689   :  { %17622 = vst [vmem:[#allocation75_spill] sm:$0xff] %v15415_v34  ;;  %7978 = vperm.xlu0 %10040, %v7690_v2   ;;  %7001 = vmatmul.mubr.bf16.gmra.mrb[204].mxu0 %v15425_v51  ;;  %v6238_v2 = vsel %vm17625_vm8, %v14643_v41, %v15293_v27  ;;  %v7694_v34 = vld [vmem:[%s16862_s10 + $0x1d8] sm:$0xff]  ;;  %v7696_v41 = vld [vmem:[%s16862_s10 + $0x1e8] sm:$0xff]  ;;  %vm17646_vm8 = vmmov %vm17514_vm0 }
 0x68a   :  { %7993 = vperm.xlu1 %10041, %v7693_v38   ;;  %7008 = vmatprep.mubr.bf16.mxu0 %v6238_v2  ;;  %v5979_v22 = vpop.permute.xlu1 %5978  ;;  %v7697_v38 = vld [vmem:[%s16862_s10 + $0x1f0] sm:$0xff] }
 0x68b   :  { %v10346_v2 = vld [vmem:[#allocation3 + $0xd0] sm:$0xff]  }
 0x68c   :  { %v5891_v27 = vpop.permute.xlu0 %5890 }
 0x68d   :  { %v15427_v36 = vpop.f32.mrb[220].mxu1  ;;  %7988 = vperm.xlu0 %10040, %v7692_v24   ;;  %v7695_v24 = vld [vmem:[%s16862_s10 + $0x1e0] sm:$0xff] }
 0x68e   :  { %17624 = vst [vmem:[#allocation76_spill] sm:$0xff] %v15427_v36  ;;  %v15433_v7 = vpop.f32.mrb[221].mxu1  ;;  %8003 = vperm.xlu1 %10041, %v7695_v24   ;;  %v5893_v24 = vpop.permute.xlu1 %5892 }
 0x68f   :  { %17626 = vst [vmem:[#allocation77_spill] sm:$0xff] %v15433_v7  ;;  %v15438_v8 = vpop.f32.mrb[222].mxu1 }
 0x690   :  { %17627 = vst [vmem:[#allocation78_spill] sm:$0xff] %v15438_v8  ;;  %v15443_v36 = vpop.f32.mrb[223].mxu1  ;;  %v15453_v8 = vsel %vm17514_vm0, %v10346_v2, %v15310_v39  ;;  %v5895_v7 = vpop.permute.xlu0 %5894  ;;  %v15464_v39 = vsel %vm17630_vm6, %v10347_v56, %v15331_v3  ;;  %v10349_v56 = vld [vmem:[#allocation3 + $0xe8] sm:$0xff]   ;;  %vm17651_vm6 = vmmov %vm17514_vm0 }
 0x691   :  { %17628 = vst [vmem:[#allocation79_spill] sm:$0xff] %v15443_v36  ;;  %7998 = vperm.xlu0 %10040, %v7694_v34   ;;  %7009 = vmatmul.mubr.bf16.gmra.mrb[208].mxu0 %v15453_v8  ;;  %v6242_v34 = vsel %vm17629_vm13, %v14664_v32, %v15319_v52  ;;  %v7698_v36 = vld [vmem:[%s16862_s10 + $0x1f8] sm:$0xff]  ;;  %v6246_v32 = vsel %vm17631_vm15, %v14673_v49, %v15349_v25  ;;  %vm17649_vm13 = vmmov %vm17514_vm0 }
 0x692   :  { %8013 = vperm.xlu1 %10041, %v7697_v38   ;;  %7016 = vmatprep.mubr.bf16.mxu0 %v6242_v34  ;;  %v10348_v52 = vld [vmem:[#allocation3 + $0xe0] sm:$0xff]   ;;  %v15480_v3 = vsel %vm17634_vm4, %v10349_v56, %v15385_v21  ;;  %v6254_v49 = vsel %vm17635_vm1, %v14705_v60, %v15393_v14  ;;  %v15493_v34 = vld [vmem:[#allocation3 + $0xf8] sm:$0xff]   ;;  %v6389_v60 = vsel %vm17640_vm12, %v14329_v43, %v5979_v22  ;;  %v5897_v43 = vpop.permute.xlu1 %5896  ;;  %vm17653_vm15 = vmmov %vm17514_vm0 }
 0x693   :  { %v10316_v38 = vld [vmem:[#allocation3 + $0x100] ss:$0 sps:$4 sm:$0x33]   ;;  %v17647_v22 = vld [vmem:[#allocation28_spill] sm:$0xff]  ;;  %vm17659_vm4 = vmmov %vm17514_vm0 }
 0x694   :  { %v5786_v25 = vrot.slane %v10316_v38, 2  ;;  %v6274_v56 = vsel %vm17514_vm0, %v17647_v22, %v5897_v43  ;;  %v17650_v38 = vld [vmem:[#allocation36_spill] sm:$0xff]  ;;  %vm17661_vm1 = vmmov %vm17514_vm0  ;;  %v5998_v43 = vrot.slane %v14932_v26, 2  ;;  %v6000_v26 = vrot.slane %v14957_v1, 2 }
 0x695   :  { %8008 = vperm.xlu0 %10040, %v7696_v41   ;;  %v15472_v41 = vsel %vm17632_vm10, %v10348_v52, %v15356_v31  ;;  %v10350_v31 = vld [vmem:[#allocation3 + $0xf0] sm:$0xff]   ;;  %v17643_v52 = vld [vmem:[#allocation4_spill] sm:$0xff]  ;;  %vm17655_vm10 = vmmov %vm17514_vm0 }
 0x696   :  { %v15487_v2 = vsel %vm17636_vm11, %v10350_v31, %v5713_v15  ;;  %v17641_v15 = vld [vmem:[#allocation20_spill] sm:$0xff]  ;;  %v17654_v31 = vld [vmem:[#allocation19_spill] sm:$0xff]  ;;  %vm17663_vm11 = vmmov %vm17514_vm0 }
 0x697   :  { %v6262_v14 = vsel %vm17642_vm2, %v17641_v15, %v5891_v27  ;;  %v17648_v27 = vld [vmem:[#allocation30_spill] sm:$0xff]  ;;  %v17666_v22 = vld [vmem:[#allocation8_spill] sm:$0xff]  ;;  %vm17668_vm12 = vmmov %vm17514_vm0 }
 0x698   :  { %v17660_v15 = vld [vmem:[#allocation46_spill] sm:$0xff]  ;;  %vm17670_vm2 = vmmov %vm17514_vm0 }
 0x699   :  { %8018 = vperm.xlu0 %10040, %v7698_v36   ;;  %7017 = vmatmul.mubr.bf16.gmra.mrb[212].mxu0 %v15464_v39  ;;  %v6250_v36 = vsel %vm17633_vm9, %v14695_v5, %v15371_v37  ;;  %v17637_v5 = vld [vmem:[#allocation11_spill] sm:$0xff]  ;;  %vm17657_vm9 = vmmov %vm17514_vm0 }
 0x69a   :  { %7024 = vmatprep.mubr.bf16.mxu0 %v6246_v32  ;;  %v5787_v37 = vsel %vm5722_vm7, %v17637_v5, %v5786_v25  ;;  %v6130_v32 = vsel %vm17639_vm5, %v15493_v34, %v5715_v33  ;;  %vm17667_vm5 = vmmov %vm17514_vm0 }
 0x69b   :  { %v6258_v21 = vsel %vm17638_vm14, %v5787_v37, %v5861_v16  ;;  %v6266_v16 = vsel %vm17644_vm3, %v17643_v52, %v5893_v24  ;;  %v17656_v37 = vld [vmem:[#allocation21_spill] sm:$0xff]  ;;  %v17662_v52 = vld [vmem:[#allocation48_spill] sm:$0xff]  ;;  %vm17665_vm14 = vmmov %vm17514_vm0 }
 0x69c   :  { %vm17672_vm3 = vmmov %vm17514_vm0 }
 0x6a1   :  { %7025 = vmatmul.mubr.bf16.gmra.mrb[216].mxu0 %v15472_v41 }
 0x6a2   :  { %7032 = vmatprep.mubr.bf16.mxu0 %v6250_v36  ;;  %v17645_v36 = vld [vmem:[#allocation18_spill] sm:$0xff] }
 0x6a3   :  { %v6270_v33 = vsel %vm17646_vm8, %v17645_v36, %v5895_v7  ;;  %v17664_v36 = vld [vmem:[#allocation49_spill] sm:$0xff]  ;;  %vm17673_vm8 = vmmov %vm17514_vm0 }
 0x6a9   :  { %7033 = vmatmul.mubr.bf16.gmra.mrb[220].mxu0 %v15480_v3 }
 0x6aa   :  { %7040 = vmatprep.mubr.bf16.mxu0 %v6254_v49  ;;  %v17652_v49 = vld [vmem:[#allocation37_spill] sm:$0xff] }
 0x6b1   :  { %7041 = vmatmul.mubr.bf16.gmra.mrb[224].mxu0 %v15487_v2 }
 0x6b2   :  { %7048 = vmatprep.mubr.bf16.mxu0 %v6258_v21 }
 0x6b9   :  { %7049 = vmatmul.mubr.bf16.gmra.mrb[228].mxu0 %v6130_v32  ;;  %v17658_v32 = vld [vmem:[#allocation45_spill] sm:$0xff] }
 0x6ba   :  { %7089 = vmatprep.mubr.bf16.mxu0 %v6389_v60 }
 0x6c1   :  { %7090 = vmatmul.mubr.bf16.vlgmr.msra.gmra.mrb[104].mxu0 %v6262_v14 }
 0x6c2   :  { %7097 = vmatprep.mubr.bf16.mxu0 %v14879_v40  ;;  %v5899_v40 = vpop.permute.xlu0 %5898 }
 0x6c3   :  { %v6278_v24 = vsel %vm17649_vm13, %v17648_v27, %v5899_v40  ;;  %v17669_v40 = vld [vmem:[#allocation51_spill] sm:$0xff]  ;;  %vm17675_vm13 = vmmov %vm17514_vm0 }
 0x6c9   :  { %7098 = vmatmul.mubr.bf16.gmra.mrb[108].mxu0 %v6266_v16 }
 0x6ca   :  { %7105 = vmatprep.mubr.bf16.mxu0 %v14896_v19  ;;  %v5901_v19 = vpop.permute.xlu1 %5900 }
 0x6cb   :  { %v6282_v7 = vsel %vm17651_vm6, %v17650_v38, %v5901_v19  ;;  %v17671_v38 = vld [vmem:[#allocation9_spill] sm:$0xff]  ;;  %vm17677_vm6 = vmmov %vm17514_vm0 }
 0x6d1   :  { %7106 = vmatmul.mubr.bf16.gmra.mrb[112].mxu0 %v6270_v33 }
 0x6d2   :  { %7113 = vmatprep.mubr.bf16.mxu0 %v14915_v63  ;;  %v5903_v63 = vpop.permute.xlu0 %5902 }
 0x6d3   :  { %v6286_v25 = vsel %vm17653_vm15, %v17652_v49, %v5903_v63  ;;  %v17674_v63 = vld [vmem:[#allocation52_spill] sm:$0xff]  ;;  %vm17681_vm15 = vmmov %vm17514_vm0 }
 0x6d9   :  { %7114 = vmatmul.mubr.bf16.gmra.mrb[116].mxu0 %v6274_v56 }
 0x6da   :  { %7121 = vmatprep.mubr.bf16.mxu0 %v14936_v9  ;;  %v5905_v9 = vpop.permute.xlu1 %5904 }
 0x6db   :  { %v6290_v5 = vsel %vm17655_vm10, %v17654_v31, %v5905_v9  ;;  %vm17683_vm10 = vmmov %vm17514_vm0 }
 0x6e1   :  { %7122 = vmatmul.mubr.bf16.gmra.mrb[120].mxu0 %v6278_v24  ;;  %v10317_v24 = vld [vmem:[#allocation3 + $0x120] ss:$0 sps:$4 sm:$0x33]  }
 0x6e2   :  { %7129 = vmatprep.mubr.bf16.mxu0 %v14969_v57  ;;  %v5907_v57 = vpop.permute.xlu0 %5906  ;;  %v6002_v19 = vrot.slane %v10317_v24, 2 }
 0x6e3   :  { %v6294_v21 = vsel %vm17657_vm9, %v17656_v37, %v5907_v57  ;;  %v17680_v37 = vld [vmem:[#allocation24_spill] sm:$0xff]  ;;  %vm17685_vm9 = vmmov %vm17514_vm0 }
 0x6e9   :  { %7130 = vmatmul.mubr.bf16.gmra.mrb[124].mxu0 %v6282_v7 }
 0x6ea   :  { %7137 = vmatprep.mubr.bf16.mxu0 %v14984_v13  ;;  %v5909_v13 = vpop.permute.xlu1 %5908 }
 0x6eb   :  { %v6298_v60 = vsel %vm17659_vm4, %v17658_v32, %v5909_v13  ;;  %v17682_v13 = vld [vmem:[#allocation25_spill] sm:$0xff]  ;;  %vm17687_vm4 = vmmov %vm17514_vm0 }
 0x6f1   :  { %7138 = vmatmul.mubr.bf16.gmra.mrb[128].mxu0 %v6286_v25  ;;  %v17676_v25 = vld [vmem:[#allocation23_spill] sm:$0xff] }
 0x6f2   :  { %7145 = vmatprep.mubr.bf16.mxu0 %v15010_v18  ;;  %v5911_v18 = vpop.permute.xlu0 %5910 }
 0x6f3   :  { %v6302_v14 = vsel %vm17661_vm1, %v17660_v15, %v5911_v18  ;;  %v17686_v15 = vld [vmem:[#allocation12_spill] sm:$0xff]  ;;  %vm17689_vm1 = vmmov %vm17514_vm0 }
 0x6f9   :  { %7146 = vmatmul.mubr.bf16.gmra.mrb[132].mxu0 %v6290_v5  ;;  %v17678_v5 = vld [vmem:[#allocation53_spill] sm:$0xff] }
 0x6fa   :  { %7153 = vmatprep.mubr.bf16.mxu0 %v15029_v10  ;;  %v5913_v10 = vpop.permute.xlu1 %5912 }
 0x6fb   :  { %v6306_v16 = vsel %vm17663_vm11, %v17662_v52, %v5913_v10  ;;  %v17688_v10 = vld [vmem:[#allocation13_spill] sm:$0xff]  ;;  %vm17691_vm11 = vmmov %vm17514_vm0 }
 0x701   :  { %7154 = vmatmul.mubr.bf16.gmra.mrb[136].mxu0 %v6294_v21 }
 0x702   :  { %7161 = vmatprep.mubr.bf16.mxu0 %v15060_v46  ;;  %v5915_v46 = vpop.permute.xlu0 %5914 }
 0x703   :  { %v6310_v33 = vsel %vm17665_vm14, %v17664_v36, %v5915_v46  ;;  %v17692_v36 = vld [vmem:[#allocation15_spill] sm:$0xff]  ;;  %vm17693_vm14 = vmmov %vm17514_vm0 }
 0x709   :  { %7162 = vmatmul.mubr.bf16.gmra.mrb[140].mxu0 %v6298_v60  ;;  %v17684_v60 = vld [vmem:[#allocation26_spill] sm:$0xff] }
 0x70a   :  { %7169 = vmatprep.mubr.bf16.mxu0 %v15087_v47  ;;  %v5917_v47 = vpop.permute.xlu1 %5916 }
 0x70b   :  { %v6314_v56 = vsel %vm17667_vm5, %v17666_v22, %v5917_v47  ;;  %vm17694_vm5 = vmmov %vm17514_vm0 }
 0x711   :  { %7170 = vmatmul.mubr.bf16.gmra.mrb[144].mxu0 %v6302_v14 }
 0x712   :  { %7177 = vmatprep.mubr.bf16.mxu0 %v15117_v6  ;;  %v5999_v6 = vsel %vm5722_vm7, %v14721_v62, %v5998_v43  ;;  %v6001_v62 = vsel %vm5722_vm7, %v5998_v43, %v6000_v26 }
 0x713   :  { %9751 = vmatmul.mubr.msk.bf16.gmra.mrb[224].mxu1 %vm17668_vm12, %v5999_v6  ;;  %vm17695_vm12 = vmmov %vm17514_vm0 }
 0x714   :  { %9754 = vmatprep.mubr.msk.bf16.mxu1 %vm17673_vm8, %v6001_v62  ;;  %vm17698_vm8 = vmmov %vm17514_vm0 }
 0x719   :  { %7178 = vmatmul.mubr.bf16.gmra.mrb[148].mxu0 %v6306_v16  ;;  %v17690_v16 = vld [vmem:[#allocation14_spill] sm:$0xff] }
 0x71a   :  { %7185 = vmatprep.mubr.bf16.mxu0 %v15144_v58  ;;  %v5919_v58 = vpop.permute.xlu0 %5918 }
 0x71b   :  { %v6318_v27 = vsel %vm17670_vm2, %v17669_v40, %v5919_v58  ;;  %vm17696_vm2 = vmmov %vm17514_vm0 }
 0x721   :  { %7186 = vmatmul.mubr.bf16.gmra.mrb[152].mxu0 %v6310_v33 }
 0x722   :  { %7193 = vmatprep.mubr.bf16.mxu0 %v15171_v44  ;;  %v5921_v44 = vpop.permute.xlu1 %5920 }
 0x723   :  { %v6322_v7 = vsel %vm17672_vm3, %v17671_v38, %v5921_v44  ;;  %v10352_v44 = vld [vmem:[#allocation3 + $0x100] sm:$0xff]   ;;  %vm17697_vm3 = vmmov %vm17514_vm0 }
 0x726   :  { %v5925_v49 = vpop.permute.xlu1 %5924 }
 0x727   :  { %v6330_v9 = vsel %vm17677_vm6, %v17676_v25, %v5925_v49  ;;  %vm17700_vm6 = vmmov %vm17514_vm0 }
 0x729   :  { %7194 = vmatmul.mubr.bf16.gmra.mrb[156].mxu0 %v6314_v56 }
 0x72a   :  { %7201 = vmatprep.mubr.bf16.mxu0 %v15200_v61  ;;  %v6003_v61 = vsel %vm5722_vm7, %v6000_v26, %v6002_v19  ;;  %vm17679_vm7 = vmmov %vm17514_vm0  ;;  %v5929_v57 = vpop.permute.xlu1 %5928 }
 0x72b   :  { %9755 = vmatmul.mubr.msk.bf16.gmra.mrb[228].mxu1 %vm17514_vm0, %v6003_v61  ;;  %v6338_v21 = vsel %vm17681_vm15, %v17680_v37, %v5929_v57  ;;  %v10353_v61 = vld [vmem:[#allocation3 + $0x108] sm:$0xff]   ;;  %v10318_v57 = vld [vmem:[#allocation3 + $0x110] ss:$0 sps:$4 sm:$0x11]   ;;  %vm17702_vm15 = vmmov %vm17514_vm0 }
 0x731   :  { %7202 = vmatmul.mubr.bf16.gmra.mrb[160].mxu0 %v6318_v27 }
 0x732   :  { %7209 = vmatprep.mubr.bf16.mxu0 %v15231_v50  ;;  %v5923_v50 = vpop.permute.xlu0 %5922 }
 0x733   :  { %v6326_v1 = vsel %vm17675_vm13, %v17674_v63, %v5923_v50  ;;  %vm17699_vm13 = vmmov %vm17514_vm0 }
 0x736   :  { %v5927_v31 = vpop.permute.xlu0 %5926 }
 0x739   :  { %7210 = vmatmul.mubr.bf16.gmra.mrb[164].mxu0 %v6322_v7 }
 0x73a   :  { %7217 = vmatprep.mubr.bf16.mxu0 %v15264_v55  ;;  %v6334_v55 = vsel %vm17679_vm7, %v17678_v5, %v5927_v31  ;;  %v10354_v5 = vld [vmem:[#allocation3 + $0x110] sm:$0xff]   ;;  %vm17701_vm7 = vmmov %vm17514_vm0 }
 0x741   :  { %7218 = vmatmul.mubr.bf16.gmra.mrb[168].mxu0 %v6326_v1 }
 0x742   :  { %7225 = vmatprep.mubr.bf16.mxu0 %v15298_v17  ;;  %v5931_v17 = vpop.permute.xlu0 %5930 }
 0x743   :  { %v6342_v32 = vsel %vm17683_vm10, %v17682_v13, %v5931_v17  ;;  %vm17704_vm10 = vcmask 1046528  }
 0x749   :  { %7226 = vmatmul.mubr.bf16.gmra.mrb[172].mxu0 %v6330_v9 }
 0x74a   :  { %7233 = vmatprep.mubr.bf16.mxu0 %v15329_v45  ;;  %v5933_v45 = vpop.permute.xlu1 %5932 }
 0x74b   :  { %v6346_v18 = vsel %vm17685_vm9, %v17684_v60, %v5933_v45  ;;  %vm17706_vm9 = vmmov %vm17514_vm0 }
 0x751   :  { %7234 = vmatmul.mubr.bf16.gmra.mrb[176].mxu0 %v6334_v55 }
 0x752   :  { %7241 = vmatprep.mubr.bf16.mxu0 %v15363_v28  ;;  %v5935_v28 = vpop.permute.xlu0 %5934 }
 0x753   :  { %v6350_v14 = vsel %vm17687_vm4, %v17686_v15, %v5935_v28  ;;  %v5874_v28 = vrot.slane %v10318_v57, 1  ;;  %v17703_v15 = vld [vmem:[#allocation17_spill] sm:$0xff] }
 0x759   :  { %7242 = vmatmul.mubr.bf16.gmra.mrb[180].mxu0 %v6338_v21 }
 0x75a   :  { %7249 = vmatprep.mubr.bf16.mxu0 %v15397_v12  ;;  %v5937_v12 = vpop.permute.xlu1 %5936 }
 0x75b   :  { %v6354_v52 = vsel %vm17689_vm1, %v17688_v10, %v5937_v12  ;;  %v17705_v10 = vld [vmem:[#allocation29_spill] sm:$0xff] }
 0x761   :  { %7250 = vmatmul.mubr.bf16.gmra.mrb[184].mxu0 %v6342_v32 }
 0x762   :  { %7257 = vmatprep.mubr.bf16.mxu0 %v15425_v51  ;;  %v5939_v51 = vpop.permute.xlu0 %5938 }
 0x763   :  { %v6358_v46 = vsel %vm17691_vm11, %v17690_v16, %v5939_v51  ;;  %v17707_v16 = vld [vmem:[#allocation32_spill] sm:$0xff] }
 0x769   :  { %7258 = vmatmul.mubr.bf16.gmra.mrb[188].mxu0 %v6346_v18  ;;  %v10355_v18 = vld [vmem:[#allocation3 + $0x118] sm:$0xff]  }
 0x76a   :  { %7265 = vmatprep.mubr.bf16.mxu0 %v15453_v8  ;;  %v5941_v8 = vpop.permute.xlu1 %5940 }
 0x76b   :  { %v6362_v33 = vsel %vm17693_vm14, %v17692_v36, %v5941_v8 }
 0x76e   :  { %v5981_v47 = vpop.permute.xlu1 %5980 }
 0x771   :  { %7266 = vmatmul.mubr.bf16.gmra.mrb[192].mxu0 %v6350_v14 }
 0x772   :  { %7273 = vmatprep.mubr.bf16.mxu0 %v15464_v39  ;;  %v5943_v39 = vpop.permute.xlu0 %5942  ;;  %v5983_v58 = vpop.permute.xlu1 %5982 }
 0x773   :  { %v6366_v43 = vsel %vm17694_vm5, %v14755_v4, %v5943_v39  ;;  %v6396_v4 = vsel %vm17696_vm2, %v10352_v44, %v5983_v58  ;;  %v17710_v58 = vld [vmem:[#allocation38_spill] sm:$0xff] }
 0x776   :  { %v5945_v22 = vpop.permute.xlu0 %5944  ;;  %v5985_v19 = vpop.permute.xlu1 %5984 }
 0x777   :  { %v6370_v26 = vsel %vm17697_vm3, %v14769_v42, %v5945_v22  ;;  %v6400_v50 = vsel %vm17698_vm8, %v10353_v61, %v5985_v19 }
 0x779   :  { %7274 = vmatmul.mubr.bf16.gmra.mrb[196].mxu0 %v6354_v52 }
 0x77a   :  { %7281 = vmatprep.mubr.bf16.mxu0 %v15472_v41  ;;  %v6392_v41 = vsel %vm17695_vm12, %v15493_v34, %v5981_v47  ;;  %v5947_v24 = vpop.permute.xlu0 %5946  ;;  %v5987_v25 = vpop.permute.xlu1 %5986 }
 0x77b   :  { %v6374_v42 = vsel %vm17514_vm0, %v14785_v35, %v5947_v24  ;;  %v6404_v55 = vsel %vm17699_vm13, %v10354_v5, %v5987_v25 }
 0x77e   :  { %v5949_v1 = vpop.permute.xlu0 %5948  ;;  %v5989_v13 = vpop.permute.xlu1 %5988 }
 0x77f   :  { %v6378_v35 = vsel %vm17700_vm6, %v14943_v59, %v5949_v1  ;;  %v6408_v59 = vsel %vm17702_vm15, %v10355_v18, %v5989_v13  ;;  %v17714_v13 = vld [vmem:[#allocation44_spill] sm:$0xff] }
 0x781   :  { %7282 = vmatmul.mubr.bf16.gmra.mrb[200].mxu0 %v6358_v46 }
 0x782   :  { %7289 = vmatprep.mubr.bf16.mxu0 %v15480_v3  ;;  %v5951_v21 = vpop.permute.xlu0 %5950  ;;  %v7704_v24 = vpop.permute.xlu1 %7703 }
 0x786   :  { %v5953_v12 = vpop.permute.xlu0 %5952  ;;  %v7714_v25 = vpop.permute.xlu1 %7713 }
 0x789   :  { %7290 = vmatmul.mubr.bf16.gmra.mrb[204].mxu0 %v6362_v33  ;;  %v17708_v33 = vld [vmem:[#allocation27_spill] sm:$0xff] }
 0x78a   :  { %7297 = vmatprep.mubr.bf16.mxu0 %v15487_v2 }
 0x791   :  { %7298 = vmatmul.mubr.bf16.gmra.mrb[208].mxu0 %v6366_v43 }
 0x792   :  { %7305 = vmatprep.mubr.bf16.mxu0 %v6392_v41  ;;  %v17709_v41 = vld [vmem:[#allocation31_spill] sm:$0xff] }
 0x794   :  { %v7091_v6 = vpop.f32.mrb[104].mxu0 }
 0x795   :  { %v15591_v3 = vadd.f32 %v15039_v53, %v7091_v6  ;;  %v7093_v56 = vpop.f32.mrb[105].mxu0 }
 0x796   :  { %v7094_v40 = vpop.f32.mrb[106].mxu0 }
 0x797   :  { %v15594_v2 = vadd.f32 %v15049_v20, %v7094_v40  ;;  %v7096_v27 = vpop.f32.mrb[107].mxu0 }
 0x799   :  { %7306 = vmatmul.mubr.bf16.gmra.mrb[212].mxu0 %v6370_v26 }
 0x79a   :  { %7313 = vmatprep.mubr.bf16.mxu0 %v6396_v4  ;;  %v17711_v4 = vld [vmem:[#allocation22_spill] sm:$0xff] }
 0x79c   :  { %v7099_v34 = vpop.f32.mrb[108].mxu0 }
 0x79d   :  { %v15600_v53 = vadd.f32 %v15031_v30, %v7099_v34  ;;  %v7101_v62 = vpop.f32.mrb[109].mxu0 }
 0x79e   :  { %v7102_v38 = vpop.f32.mrb[110].mxu0  ;;  %v7709_v62 = vpop.permute.xlu0 %7708 }
 0x79f   :  { %v15603_v20 = vadd.f32 %v15044_v29, %v7102_v38  ;;  %v7104_v7 = vpop.f32.mrb[111].mxu0  ;;  %v17712_v38 = vld [vmem:[#allocation34_spill] sm:$0xff]  ;;  %v8023_v5 = vmul.f32 %v7714_v25, %v15600_v53 }
 0x7a1   :  { %7314 = vmatmul.mubr.bf16.gmra.mrb[216].mxu0 %v6374_v42  ;;  %v8022_v42 = vmul.f32 %v7709_v62, %v15594_v2 }
 0x7a2   :  { %7321 = vmatprep.mubr.bf16.mxu0 %v6400_v50 }
 0x7a4   :  { %v7107_v63 = vpop.f32.mrb[112].mxu0 }
 0x7a5   :  { %v15609_v30 = vadd.f32 %v15067_v0, %v7107_v63  ;;  %v7109_v49 = vpop.f32.mrb[113].mxu0  ;;  %v17713_v63 = vld [vmem:[#allocation41_spill] sm:$0xff] }
 0x7a6   :  { %v7110_v9 = vpop.f32.mrb[114].mxu0 }
 0x7a7   :  { %v15612_v29 = vadd.f32 %v15077_v11, %v7110_v9  ;;  %v7112_v31 = vpop.f32.mrb[115].mxu0  ;;  %v6382_v11 = vsel %vm17701_vm7, %v14954_v23, %v5951_v21  ;;  %v8021_v9 = vmul.f32 %v7704_v24, %v15591_v3  ;;  %v8157_v21 = vmul.f32 %v8023_v5, %v8023_v5  ;;  %v17717_v24 = vld [vmem:[#allocation47_spill] sm:$0xff] }
 0x7a8   :  { %v7719_v31 = vpop.permute.xlu0 %7718 }
 0x7a9   :  { %7322 = vmatmul.mubr.bf16.gmra.mrb[220].mxu0 %v6378_v35  ;;  %v8155_v35 = vmul.f32 %v8021_v9, %v8021_v9 }
 0x7aa   :  { %7329 = vmatprep.mubr.bf16.mxu0 %v6404_v55  ;;  %v8156_v55 = vmul.f32 %v8022_v42, %v8022_v42 }
 0x7ac   :  { %v7115_v37 = vpop.f32.mrb[116].mxu0 }
 0x7ad   :  { %v15618_v0 = vadd.f32 %v15062_v54, %v7115_v37  ;;  %v7117_v17 = vpop.f32.mrb[117].mxu0  ;;  %v5875_v54 = vsel %vm17704_vm10, %v17703_v15, %v5874_v28  ;;  %v8085_v37 = vadd.f32 %v8022_v42, %v8021_v9  ;;  %v8219_v28 = vadd.f32 %v8156_v55, %v8155_v35  ;;  %v17718_v35 = vld [vmem:[#allocation10_spill] sm:$0xff] }
 0x7ae   :  { %v7118_v32 = vpop.f32.mrb[118].mxu0  ;;  %v8024_v17 = vmul.f32 %v7719_v31, %v15603_v20 }
 0x7af   :  { %v15623_v45 = vadd.f32 %v15072_v48, %v7118_v32  ;;  %v7120_v60 = vpop.f32.mrb[119].mxu0  ;;  %v6386_v48 = vsel %vm17706_vm9, %v5875_v54, %v5953_v12  ;;  %v8086_v15 = vadd.f32 %v8085_v37, %v8023_v5 }
 0x7b0   :  { %v7724_v60 = vpop.permute.xlu1 %7723 }
 0x7b1   :  { %7330 = vmatmul.mubr.bf16.gmra.mrb[224].mxu0 %v6382_v11  ;;  %v8025_v54 = vmul.f32 %v7724_v60, %v15609_v30  ;;  %v17719_v60 = vld [vmem:[#allocation33_spill] sm:$0xff] }
 0x7b2   :  { %7337 = vmatprep.mubr.bf16.mxu0 %v6408_v59  ;;  %v7729_v59 = vpop.permute.xlu0 %7728 }
 0x7b4   :  { %v7123_v14 = vpop.f32.mrb[120].mxu0 }
 0x7b5   :  { %v15629_v52 = vadd.f32 %v17705_v10, %v7123_v14  ;;  %v7125_v51 = vpop.f32.mrb[121].mxu0  ;;  %v17715_v14 = vld [vmem:[#allocation50_spill] sm:$0xff] }
 0x7b6   :  { %v7126_v23 = vpop.f32.mrb[122].mxu0  ;;  %v8220_v51 = vadd.f32 %v8219_v28, %v8157_v21 }
 0x7b7   :  { %v15633_v46 = vadd.f32 %v17707_v16, %v7126_v23  ;;  %v7128_v8 = vpop.f32.mrb[123].mxu0  ;;  %v8158_v23 = vmul.f32 %v8024_v17, %v8024_v17  ;;  %v8159_v16 = vmul.f32 %v8025_v54, %v8025_v54 }
 0x7b8   :  { %v8026_v8 = vmul.f32 %v7729_v59, %v15612_v29 }
 0x7b9   :  { %7338 = vmatmul.mubr.bf16.gmra.mrb[228].mxu0 %v6386_v48  ;;  %v8087_v48 = vadd.f32 %v8086_v15, %v8024_v17 }
 0x7bc   :  { %v7131_v36 = vpop.f32.mrb[124].mxu0 }
 0x7bd   :  { %v15636_v39 = vadd.f32 %v17708_v33, %v7131_v36  ;;  %v7133_v47 = vpop.f32.mrb[125].mxu0  ;;  %v7734_v36 = vpop.permute.xlu1 %7733 }
 0x7be   :  { %v7134_v43 = vpop.f32.mrb[126].mxu0  ;;  %v7739_v47 = vpop.permute.xlu0 %7738 }
 0x7bf   :  { %v15639_v6 = vadd.f32 %v17709_v41, %v7134_v43  ;;  %v7136_v22 = vpop.f32.mrb[127].mxu0  ;;  %v8221_v43 = vadd.f32 %v8220_v51, %v8158_v23  ;;  %v8088_v41 = vadd.f32 %v8087_v48, %v8025_v54 }
 0x7c0   :  { %v8027_v22 = vmul.f32 %v7734_v36, %v15618_v0 }
 0x7c1   :  { %v7744_v42 = vpop.permute.xlu1 %7743 }
 0x7c2   :  { %v8029_v9 = vmul.f32 %v7744_v42, %v15629_v52 }
 0x7c4   :  { %v7139_v56 = vpop.f32.mrb[128].mxu0 }
 0x7c5   :  { %v15642_v40 = vadd.f32 %v17710_v58, %v7139_v56  ;;  %v7141_v27 = vpop.f32.mrb[129].mxu0  ;;  %v17716_v56 = vld [vmem:[#allocation42_spill] sm:$0xff]  ;;  %v7754_v28 = vpop.permute.xlu1 %7753 }
 0x7c6   :  { %v7142_v44 = vpop.f32.mrb[130].mxu0 }
 0x7c7   :  { %v15645_v26 = vadd.f32 %v17711_v4, %v7142_v44  ;;  %v7144_v34 = vpop.f32.mrb[131].mxu0  ;;  %v8222_v4 = vadd.f32 %v8221_v43, %v8159_v16 }
 0x7c8   :  { %v8160_v34 = vmul.f32 %v8026_v8, %v8026_v8 }
 0x7cc   :  { %v7147_v19 = vpop.f32.mrb[132].mxu0 }
 0x7cd   :  { %v15648_v7 = vadd.f32 %v17712_v38, %v7147_v19  ;;  %v7149_v61 = vpop.f32.mrb[133].mxu0  ;;  %v8089_v38 = vadd.f32 %v8088_v41, %v8026_v8  ;;  %v7764_v41 = vpop.permute.xlu1 %7763 }
 0x7ce   :  { %v7150_v50 = vpop.f32.mrb[134].mxu0  ;;  %v8161_v61 = vmul.f32 %v8027_v22, %v8027_v22 }
 0x7cf   :  { %v15652_v1 = vadd.f32 %v17713_v63, %v7150_v50  ;;  %v7152_v49 = vpop.f32.mrb[135].mxu0  ;;  %v8028_v50 = vmul.f32 %v7739_v47, %v15623_v45  ;;  %v7749_v63 = vpop.permute.xlu0 %7748  ;;  %v8090_v25 = vadd.f32 %v8089_v38, %v8027_v22 }
 0x7d0   :  { %v8223_v49 = vadd.f32 %v8222_v4, %v8160_v34  ;;  %v8033_v4 = vmul.f32 %v7764_v41, %v15642_v40  ;;  %v17721_v34 = vld [vmem:[#allocation16_spill] sm:$0xff] }
 0x7d1   :  { %v8162_v55 = vmul.f32 %v8028_v50, %v8028_v50  ;;  %v8091_v17 = vadd.f32 %v8090_v25, %v8028_v50 }
 0x7d2   :  { %v8224_v5 = vadd.f32 %v8223_v49, %v8161_v61  ;;  %v8167_v42 = vmul.f32 %v8033_v4, %v8033_v4  ;;  %v7774_v49 = vpop.permute.xlu1 %7773 }
 0x7d3   :  { %v7759_v15 = vpop.permute.xlu0 %7758 }
 0x7d4   :  { %v7155_v57 = vpop.f32.mrb[136].mxu0  ;;  %v8225_v54 = vadd.f32 %v8224_v5, %v8162_v55  ;;  %v8032_v36 = vmul.f32 %v7759_v15, %v15639_v6  ;;  %v8035_v55 = vmul.f32 %v7774_v49, %v15648_v7 }
 0x7d5   :  { %v15658_v32 = vadd.f32 %v17714_v13, %v7155_v57  ;;  %v7157_v11 = vpop.f32.mrb[137].mxu0  ;;  %v8163_v13 = vmul.f32 %v8029_v9, %v8029_v9 }
 0x7d6   :  { %v7158_v18 = vpop.f32.mrb[138].mxu0  ;;  %v8030_v11 = vmul.f32 %v7749_v63, %v15633_v46  ;;  %v8166_v61 = vmul.f32 %v8032_v36, %v8032_v36 }
 0x7d7   :  { %v15662_v12 = vadd.f32 %v17715_v14, %v7158_v18  ;;  %v7160_v10 = vpop.f32.mrb[139].mxu0  ;;  %v8092_v14 = vadd.f32 %v8091_v17, %v8029_v9  ;;  %v8226_v51 = vadd.f32 %v8225_v54, %v8163_v13  ;;  %v8169_v54 = vmul.f32 %v8035_v55, %v8035_v55 }
 0x7d8   :  { %v8031_v10 = vmul.f32 %v7754_v28, %v15636_v39  ;;  %v8164_v23 = vmul.f32 %v8030_v11, %v8030_v11 }
 0x7d9   :  { %v8093_v16 = vadd.f32 %v8092_v14, %v8030_v11 }
 0x7da   :  { %v8165_v8 = vmul.f32 %v8031_v10, %v8031_v10 }
 0x7dc   :  { %v7163_v33 = vpop.f32.mrb[140].mxu0 }
 0x7dd   :  { %v15667_v58 = vadd.f32 %v17716_v56, %v7163_v33  ;;  %v7165_v27 = vpop.f32.mrb[141].mxu0  ;;  %v17720_v33 = vld [vmem:[#allocation54_spill] sm:$0xff]  ;;  %v7769_v56 = vpop.permute.xlu0 %7768 }
 0x7de   :  { %v7166_v44 = vpop.f32.mrb[142].mxu0  ;;  %v8227_v27 = vadd.f32 %v8226_v51, %v8164_v23  ;;  %v8034_v63 = vmul.f32 %v7769_v56, %v15645_v26 }
 0x7df   :  { %v15670_v62 = vadd.f32 %v17717_v24, %v7166_v44  ;;  %v7168_v19 = vpop.f32.mrb[143].mxu0  ;;  %v8094_v44 = vadd.f32 %v8093_v16, %v8031_v10  ;;  %v7784_v10 = vpop.permute.xlu1 %7783 }
 0x7e0   :  { %v8228_v38 = vadd.f32 %v8227_v27, %v8165_v8  ;;  %v8168_v11 = vmul.f32 %v8034_v63, %v8034_v63  ;;  %v8037_v16 = vmul.f32 %v7784_v10, %v15658_v32 }
 0x7e1   :  { %v8095_v50 = vadd.f32 %v8094_v44, %v8032_v36  ;;  %v7779_v9 = vpop.permute.xlu0 %7778 }
 0x7e2   :  { %v8036_v14 = vmul.f32 %v7779_v9, %v15652_v1 }
 0x7e3   :  { %v8096_v5 = vadd.f32 %v8095_v50, %v8033_v4  ;;  %v17727_v50 = vld [vmem:[#allocation40_spill] sm:$0xff]  ;;  %v7794_v49 = vpop.permute.xlu1 %7793 }
 0x7e4   :  { %v7171_v31 = vpop.f32.mrb[144].mxu0  ;;  %v8170_v41 = vmul.f32 %v8036_v14, %v8036_v14 }
 0x7e5   :  { %v15675_v57 = vadd.f32 %v17718_v35, %v7171_v31  ;;  %v7173_v37 = vpop.f32.mrb[145].mxu0  ;;  %v8229_v31 = vadd.f32 %v8228_v38, %v8166_v61  ;;  %v17722_v35 = vld [vmem:[#allocation39_spill] sm:$0xff]  ;;  %v8097_v15 = vadd.f32 %v8096_v5, %v8034_v63  ;;  %v7789_v51 = vpop.permute.xlu0 %7788  ;;  %v8171_v38 = vmul.f32 %v8037_v16, %v8037_v16 }
 0x7e6   :  { %v7174_v21 = vpop.f32.mrb[146].mxu0  ;;  %v15700_v8 = vpop.f32.mrb[224].mxu1  ;;  %v8038_v61 = vmul.f32 %v7789_v51, %v15662_v12 }
 0x7e7   :  { %v15679_v18 = vadd.f32 %v17719_v60, %v7174_v21  ;;  %v7176_v59 = vpop.f32.mrb[147].mxu0  ;;  %v8230_v13 = vadd.f32 %v8229_v31, %v8167_v42  ;;  %v17724_v60 = vld [vmem:[#allocation5_spill] sm:$0xff]  ;;  %v8039_v31 = vmul.f32 %v7794_v49, %v15667_v58 }
 0x7e9   :  { %v8231_v23 = vadd.f32 %v8230_v13, %v8168_v11  ;;  %v8173_v13 = vmul.f32 %v8039_v31, %v8039_v31 }
 0x7ec   :  { %v7179_v48 = vpop.f32.mrb[148].mxu0 }
 0x7ed   :  { %v15684_v47 = vadd.f32 %v17720_v33, %v7179_v48  ;;  %v7181_v43 = vpop.f32.mrb[149].mxu0  ;;  %v8098_v48 = vadd.f32 %v8097_v15, %v8035_v55  ;;  %v15702_v33 = vpop.f32.mrb[225].mxu1  ;;  %v8172_v55 = vmul.f32 %v8038_v61, %v8038_v61 }
 0x7ee   :  { %v7182_v22 = vpop.f32.mrb[150].mxu0  ;;  %v8232_v43 = vadd.f32 %v8231_v23, %v8169_v54  ;;  %v15707_v44 = vpop.f32.mrb[226].mxu1 }
 0x7ef   :  { %v15688_v24 = vadd.f32 %v17721_v34, %v7182_v22  ;;  %v7184_v19 = vpop.f32.mrb[151].mxu0  ;;  %v17726_v22 = vld [vmem:[#allocation35_spill] sm:$0xff]  ;;  %v15709_v34 = vpop.f32.mrb[227].mxu1 }
 0x7f0   :  { %v8099_v19 = vadd.f32 %v8098_v48, %v8036_v14  ;;  %v7804_v54 = vpop.permute.xlu1 %7803  ;;  %v17730_v48 = vld [vmem:[#allocation57_spill] sm:$0xff] }
 0x7f1   :  { %v8041_v23 = vmul.f32 %v7804_v54, %v15675_v57 }
 0x7f2   :  { %v8100_v9 = vadd.f32 %v8099_v19, %v8037_v16 }
 0x7f4   :  { %v7187_v25 = vpop.f32.mrb[152].mxu0 }
 0x7f5   :  { %v15693_v37 = vadd.f32 %v17722_v35, %v7187_v25  ;;  %v7189_v21 = vpop.f32.mrb[153].mxu0  ;;  %v8233_v25 = vadd.f32 %v8232_v43, %v8170_v41  ;;  %v7799_v35 = vpop.permute.xlu0 %7798 }
 0x7f6   :  { %v7190_v17 = vpop.f32.mrb[154].mxu0  ;;  %v8040_v11 = vmul.f32 %v7799_v35, %v15670_v62 }
 0x7f7   :  { %17723 = vst [vmem:[#allocation11_spill] sm:$0xff] %v15693_v37  ;;  %v15696_v59 = vadd.f32 %v17724_v60, %v7190_v17  ;;  %v7192_v28 = vpop.f32.mrb[155].mxu0  ;;  %v8234_v5 = vadd.f32 %v8233_v25, %v8171_v38  ;;  %v8101_v17 = vadd.f32 %v8100_v9, %v8038_v61  ;;  %v17729_v60 = vld [vmem:[#allocation55_spill] sm:$0xff]  ;;  %v7814_v38 = vpop.permute.xlu1 %7813 }
 0x7f8   :  { %v8174_v41 = vmul.f32 %v8040_v11, %v8040_v11  ;;  %v8043_v49 = vmul.f32 %v7814_v38, %v15684_v47  ;;  %v17732_v25 = vld [vmem:[#allocation43_spill] sm:$0xff]  ;;  %v17736_v38 = vld [vmem:[#allocation58_spill] sm:$0xff] }
 0x7f9   :  { %17725 = vst [vmem:[#allocation20_spill] sm:$0xff] %v15696_v59  ;;  %v8235_v10 = vadd.f32 %v8234_v5, %v8172_v55  ;;  %v8102_v51 = vadd.f32 %v8101_v17, %v8039_v31 }
 0x7fb   :  { %v8236_v43 = vadd.f32 %v8235_v10, %v8173_v13  ;;  %v17734_v13 = vld [vmem:[#allocation56_spill] sm:$0xff] }
 0x7fc   :  { %v7195_v36 = vpop.f32.mrb[156].mxu0 }
 0x7fd   :  { %v15705_v56 = vadd.f32 %v17726_v22, %v7195_v36  ;;  %v7197_v27 = vpop.f32.mrb[157].mxu0  ;;  %v7809_v22 = vpop.permute.xlu0 %7808 }
 0x7fe   :  { %v7198_v4 = vpop.f32.mrb[158].mxu0  ;;  %v8103_v27 = vadd.f32 %v8102_v51, %v8040_v11  ;;  %v8042_v19 = vmul.f32 %v7809_v22, %v15679_v18  ;;  %v15729_v5 = vpop.f32.mrb[228].mxu1  ;;  %v8177_v51 = vmul.f32 %v8043_v49, %v8043_v49 }
 0x7ff   :  { %v15713_v42 = vadd.f32 %v17727_v50, %v7198_v4  ;;  %v7200_v63 = vpop.f32.mrb[159].mxu0  ;;  %v8175_v4 = vmul.f32 %v8041_v23, %v8041_v23  ;;  %v8237_v50 = vadd.f32 %v8236_v43, %v8174_v41  ;;  %v15731_v35 = vpop.f32.mrb[229].mxu1 }
 0x800   :  { %v8104_v63 = vadd.f32 %v8103_v27, %v8041_v23  ;;  %v8176_v17 = vmul.f32 %v8042_v19, %v8042_v19 }
 0x801   :  { %17728 = vst [vmem:[#allocation4_spill] sm:$0xff] %v15713_v42  ;;  %v7819_v54 = vpop.permute.xlu0 %7818 }
 0x802   :  { %v8105_v10 = vadd.f32 %v8104_v63, %v8042_v19  ;;  %v8044_v23 = vmul.f32 %v7819_v54, %v15688_v24  ;;  %v17738_v63 = vld [vmem:[#allocation60_spill] sm:$0xff] }
 0x804   :  { %v7203_v21 = vpop.f32.mrb[160].mxu0  ;;  %v8106_v43 = vadd.f32 %v8105_v10, %v8043_v49 }
 0x805   :  { %v15718_v28 = vadd.f32 %v17729_v60, %v7203_v21  ;;  %v7205_v15 = vpop.f32.mrb[161].mxu0  ;;  %v8238_v21 = vadd.f32 %v8237_v50, %v8175_v4  ;;  %v8178_v4 = vmul.f32 %v8044_v23, %v8044_v23 }
 0x806   :  { %v7206_v14 = vpop.f32.mrb[162].mxu0  ;;  %v15736_v15 = vpop.f32.mrb[230].mxu1 }
 0x807   :  { %v15722_v16 = vadd.f32 %v17730_v48, %v7206_v14  ;;  %v7208_v36 = vpop.f32.mrb[163].mxu0  ;;  %v15738_v14 = vpop.f32.mrb[231].mxu1 }
 0x808   :  { %v7824_v48 = vpop.permute.xlu1 %7823  ;;  %v8239_v36 = vadd.f32 %v8238_v21, %v8176_v17 }
 0x809   :  { %17731 = vst [vmem:[#allocation18_spill] sm:$0xff] %v15722_v16  ;;  %v8045_v41 = vmul.f32 %v7824_v48, %v15693_v37 }
 0x80a   :  { %v8240_v27 = vadd.f32 %v8239_v36, %v8177_v51 }
 0x80c   :  { %v7211_v61 = vpop.f32.mrb[164].mxu0  ;;  %v7834_v49 = vpop.permute.xlu1 %7833  ;;  %v8241_v17 = vadd.f32 %v8240_v27, %v8178_v4  ;;  %v17741_v27 = vld [vmem:[#allocation59_spill] sm:$0xff] }
 0x80d   :  { %v15727_v9 = vadd.f32 %v17732_v25, %v7211_v61  ;;  %v7213_v31 = vpop.f32.mrb[165].mxu0  ;;  %v7829_v25 = vpop.permute.xlu0 %7828  ;;  %v8047_v10 = vmul.f32 %v7834_v49, %v15705_v56 }
 0x80e   :  { %v7214_v55 = vpop.f32.mrb[166].mxu0  ;;  %v8046_v19 = vmul.f32 %v7829_v25, %v15696_v59 }
 0x80f   :  { %17733 = vst [vmem:[#allocation28_spill] sm:$0xff] %v15727_v9  ;;  %v15734_v11 = vadd.f32 %v17734_v13, %v7214_v55  ;;  %v7216_v60 = vpop.f32.mrb[167].mxu0  ;;  %v8107_v55 = vadd.f32 %v8106_v43, %v8044_v23  ;;  %v8179_v13 = vmul.f32 %v8045_v41, %v8045_v41  ;;  %v17740_v43 = vld [vmem:[#allocation6_spill] sm:$0xff] }
 0x810   :  { %v8180_v48 = vmul.f32 %v8046_v19, %v8046_v19 }
 0x811   :  { %17735 = vst [vmem:[#allocation30_spill] sm:$0xff] %v15734_v11  ;;  %v8108_v54 = vadd.f32 %v8107_v55, %v8045_v41  ;;  %v8242_v51 = vadd.f32 %v8241_v17, %v8179_v13  ;;  %v7839_v36 = vpop.permute.xlu0 %7838 }
 0x812   :  { %v8048_v23 = vmul.f32 %v7839_v36, %v15713_v42 }
 0x814   :  { %v7219_v22 = vpop.f32.mrb[168].mxu0  ;;  %v8182_v49 = vmul.f32 %v8048_v23, %v8048_v23 }
 0x815   :  { %v15743_v61 = vadd.f32 %v17736_v38, %v7219_v22  ;;  %v7221_v50 = vpop.f32.mrb[169].mxu0  ;;  %v8109_v38 = vadd.f32 %v8108_v54, %v8046_v19  ;;  %v7849_v19 = vpop.permute.xlu0 %7848 }
 0x816   :  { %v7222_v31 = vpop.f32.mrb[170].mxu0  ;;  %v8181_v50 = vmul.f32 %v8047_v10, %v8047_v10  ;;  %v8050_v36 = vmul.f32 %v7849_v19, %v15722_v16 }
 0x817   :  { %17737 = vst [vmem:[#allocation36_spill] sm:$0xff] %v15743_v61  ;;  %v15747_v60 = vadd.f32 %v17738_v63, %v7222_v31  ;;  %v7224_v21 = vpop.f32.mrb[171].mxu0  ;;  %v7844_v31 = vpop.permute.xlu1 %7843  ;;  %v8110_v59 = vadd.f32 %v8109_v38, %v8047_v10  ;;  %v17743_v10 = vld [vmem:[#allocation61_spill] sm:$0xff] }
 0x818   :  { %v8243_v21 = vadd.f32 %v8242_v51, %v8180_v48  ;;  %v8049_v41 = vmul.f32 %v7844_v31, %v15718_v28 }
 0x819   :  { %17739 = vst [vmem:[#allocation37_spill] sm:$0xff] %v15747_v60  ;;  %v8111_v17 = vadd.f32 %v8110_v59, %v8048_v23  ;;  %v7859_v23 = vpop.permute.xlu0 %7858 }
 0x81a   :  { %v8244_v13 = vadd.f32 %v8243_v21, %v8181_v50  ;;  %v8183_v54 = vmul.f32 %v8049_v41, %v8049_v41  ;;  %v17744_v50 = vld [vmem:[#allocation63_spill] sm:$0xff]  ;;  %v8052_v16 = vmul.f32 %v7859_v23, %v15734_v11 }
 0x81b   :  { %v8112_v42 = vadd.f32 %v8111_v17, %v8049_v41 }
 0x81c   :  { %v7227_v22 = vpop.f32.mrb[172].mxu0 }
 0x81d   :  { %v15752_v37 = vadd.f32 %v17740_v43, %v7227_v22  ;;  %v7229_v25 = vpop.f32.mrb[173].mxu0  ;;  %v7854_v22 = vpop.permute.xlu1 %7853 }
 0x81e   :  { %v7230_v63 = vpop.f32.mrb[174].mxu0  ;;  %v8245_v25 = vadd.f32 %v8244_v13, %v8182_v49  ;;  %v8051_v51 = vmul.f32 %v7854_v22, %v15727_v9 }
 0x81f   :  { %v15756_v4 = vadd.f32 %v17741_v27, %v7230_v63  ;;  %v7232_v55 = vpop.f32.mrb[175].mxu0  ;;  %v8184_v27 = vmul.f32 %v8050_v36, %v8050_v36 }
 0x820   :  { %v8246_v63 = vadd.f32 %v8245_v25, %v8183_v54  ;;  %v8113_v55 = vadd.f32 %v8112_v42, %v8050_v36  ;;  %v8185_v19 = vmul.f32 %v8051_v51, %v8051_v51  ;;  %v17748_v36 = vld [vmem:[#allocation62_spill] sm:$0xff] }
 0x821   :  { %17742 = vst [vmem:[#allocation19_spill] sm:$0xff] %v15756_v4  ;;  %v7864_v13 = vpop.permute.xlu1 %7863 }
 0x822   :  { %v8247_v41 = vadd.f32 %v8246_v63, %v8184_v27  ;;  %v8114_v49 = vadd.f32 %v8113_v55, %v8051_v51  ;;  %v8053_v17 = vmul.f32 %v7864_v13, %v15743_v61 }
 0x824   :  { %v7235_v43 = vpop.f32.mrb[176].mxu0  ;;  %v8187_v9 = vmul.f32 %v8053_v17, %v8053_v17 }
 0x825   :  { %v15761_v48 = vadd.f32 %v17743_v10, %v7235_v43  ;;  %v7237_v38 = vpop.f32.mrb[177].mxu0  ;;  %v8248_v43 = vadd.f32 %v8247_v41, %v8185_v19  ;;  %v8186_v10 = vmul.f32 %v8052_v16, %v8052_v16  ;;  %v7874_v51 = vpop.permute.xlu1 %7873 }
 0x826   :  { %v7238_v31 = vpop.f32.mrb[178].mxu0  ;;  %v17746_v38 = vld [vmem:[#allocation7_spill] sm:$0xff]  ;;  %v8055_v19 = vmul.f32 %v7874_v51, %v15752_v37 }
 0x827   :  { %v15764_v21 = vadd.f32 %v17744_v50, %v7238_v31  ;;  %v7240_v59 = vpop.f32.mrb[179].mxu0  ;;  %v7869_v31 = vpop.permute.xlu0 %7868  ;;  %v8249_v27 = vadd.f32 %v8248_v43, %v8186_v10  ;;  %v17752_v43 = vld [vmem:[#allocation67_spill] sm:$0xff] }
 0x828   :  { %v8115_v59 = vadd.f32 %v8114_v49, %v8052_v16  ;;  %v8054_v42 = vmul.f32 %v7869_v31, %v15747_v60  ;;  %v8189_v61 = vmul.f32 %v8055_v19, %v8055_v19  ;;  %v17750_v49 = vld [vmem:[#allocation65_spill] sm:$0xff] }
 0x829   :  { %17745 = vst [vmem:[#allocation21_spill] sm:$0xff] %v15764_v21  ;;  %v8250_v13 = vadd.f32 %v8249_v27, %v8187_v9 }
 0x82a   :  { %v8116_v55 = vadd.f32 %v8115_v59, %v8053_v17  ;;  %v8188_v41 = vmul.f32 %v8054_v42, %v8054_v42 }
 0x82c   :  { %v7243_v22 = vpop.f32.mrb[180].mxu0 }
 0x82d   :  { %v15769_v54 = vadd.f32 %v17746_v38, %v7243_v22  ;;  %v7245_v25 = vpop.f32.mrb[181].mxu0  ;;  %v7879_v22 = vpop.permute.xlu0 %7878 }
 0x82e   :  { %v7246_v50 = vpop.f32.mrb[182].mxu0  ;;  %v8117_v25 = vadd.f32 %v8116_v55, %v8054_v42  ;;  %v8056_v16 = vmul.f32 %v7879_v22, %v15756_v4 }
 0x82f   :  { %17747 = vst [vmem:[#allocation45_spill] sm:$0xff] %v15769_v54  ;;  %v15773_v23 = vadd.f32 %v17748_v36, %v7246_v50  ;;  %v7248_v63 = vpop.f32.mrb[183].mxu0  ;;  %v7884_v50 = vpop.permute.xlu1 %7883 }
 0x830   :  { %v8251_v63 = vadd.f32 %v8250_v13, %v8188_v41  ;;  %v8118_v60 = vadd.f32 %v8117_v25, %v8055_v19  ;;  %v8057_v17 = vmul.f32 %v7884_v50, %v15761_v48  ;;  %v8190_v51 = vmul.f32 %v8056_v16, %v8056_v16  ;;  %v17754_v19 = vld [vmem:[#allocation64_spill] sm:$0xff] }
 0x831   :  { %17749 = vst [vmem:[#allocation46_spill] sm:$0xff] %v15773_v23  ;;  %v7889_v42 = vpop.permute.xlu0 %7888 }
 0x832   :  { %v8252_v59 = vadd.f32 %v8251_v63, %v8189_v61  ;;  %v8119_v27 = vadd.f32 %v8118_v60, %v8056_v16  ;;  %v8191_v55 = vmul.f32 %v8057_v17, %v8057_v17  ;;  %v8058_v22 = vmul.f32 %v7889_v42, %v15764_v21  ;;  %v17756_v61 = vld [vmem:[#allocation66_spill] sm:$0xff] }
 0x834   :  { %v7251_v38 = vpop.f32.mrb[184].mxu0  ;;  %v8120_v4 = vadd.f32 %v8119_v27, %v8057_v17 }
 0x835   :  { %v15778_v11 = vadd.f32 %v17750_v49, %v7251_v38  ;;  %v7253_v31 = vpop.f32.mrb[185].mxu0  ;;  %v7894_v38 = vpop.permute.xlu1 %7893 }
 0x836   :  { %v7254_v36 = vpop.f32.mrb[186].mxu0  ;;  %v8253_v31 = vadd.f32 %v8252_v59, %v8190_v51  ;;  %v8059_v13 = vmul.f32 %v7894_v38, %v15769_v54  ;;  %v7899_v16 = vpop.permute.xlu0 %7898 }
 0x837   :  { %17751 = vst [vmem:[#allocation48_spill] sm:$0xff] %v15778_v11  ;;  %v15782_v10 = vadd.f32 %v17752_v43, %v7254_v36  ;;  %v7256_v9 = vpop.f32.mrb[187].mxu0  ;;  %v8192_v43 = vmul.f32 %v8058_v22, %v8058_v22  ;;  %v8060_v21 = vmul.f32 %v7899_v16, %v15773_v23 }
 0x838   :  { %v8254_v36 = vadd.f32 %v8253_v31, %v8191_v55  ;;  %v8121_v9 = vadd.f32 %v8120_v4, %v8058_v22  ;;  %v8193_v42 = vmul.f32 %v8059_v13, %v8059_v13  ;;  %v17760_v22 = vld [vmem:[#allocation71_spill] sm:$0xff] }
 0x839   :  { %17753 = vst [vmem:[#allocation49_spill] sm:$0xff] %v15782_v10  ;;  %v7904_v59 = vpop.permute.xlu1 %7903 }
 0x83a   :  { %v8255_v17 = vadd.f32 %v8254_v36, %v8192_v43  ;;  %v8122_v51 = vadd.f32 %v8121_v9, %v8059_v13  ;;  %v8061_v27 = vmul.f32 %v7904_v59, %v15778_v11 }
 0x83c   :  { %v7259_v49 = vpop.f32.mrb[188].mxu0  ;;  %v8195_v54 = vmul.f32 %v8061_v27, %v8061_v27 }
 0x83d   :  { %v15787_v41 = vadd.f32 %v17754_v19, %v7259_v49  ;;  %v7261_v25 = vpop.f32.mrb[189].mxu0  ;;  %v8256_v49 = vadd.f32 %v8255_v17, %v8193_v42  ;;  %v8194_v19 = vmul.f32 %v8060_v21, %v8060_v21  ;;  %v7914_v13 = vpop.permute.xlu1 %7913 }
 0x83e   :  { %v7262_v50 = vpop.f32.mrb[190].mxu0  ;;  %v17758_v25 = vld [vmem:[#allocation69_spill] sm:$0xff] }
 0x83f   :  { %17755 = vst [vmem:[#allocation8_spill] sm:$0xff] %v15787_v41  ;;  %v15790_v63 = vadd.f32 %v17756_v61, %v7262_v50  ;;  %v7264_v60 = vpop.f32.mrb[191].mxu0  ;;  %v7909_v50 = vpop.permute.xlu0 %7908  ;;  %v8257_v43 = vadd.f32 %v8256_v49, %v8194_v19  ;;  %v8063_v42 = vmul.f32 %v7914_v13, %v15787_v41  ;;  %v17764_v49 = vld [vmem:[#allocation70_spill] sm:$0xff] }
 0x840   :  { %v8123_v60 = vadd.f32 %v8122_v51, %v8060_v21  ;;  %v8062_v4 = vmul.f32 %v7909_v50, %v15782_v10  ;;  %v17762_v51 = vld [vmem:[#allocation68_spill] sm:$0xff] }
 0x841   :  { %17757 = vst [vmem:[#allocation51_spill] sm:$0xff] %v15790_v63  ;;  %v8258_v59 = vadd.f32 %v8257_v43, %v8195_v54  ;;  %v8197_v11 = vmul.f32 %v8063_v42, %v8063_v42 }
 0x842   :  { %v8124_v9 = vadd.f32 %v8123_v60, %v8061_v27  ;;  %v8196_v17 = vmul.f32 %v8062_v4, %v8062_v4 }
 0x844   :  { %v7267_v38 = vpop.f32.mrb[192].mxu0 }
 0x845   :  { %v15795_v55 = vadd.f32 %v17758_v25, %v7267_v38  ;;  %v7269_v31 = vpop.f32.mrb[193].mxu0  ;;  %v7919_v38 = vpop.permute.xlu0 %7918 }
 0x846   :  { %v7270_v61 = vpop.f32.mrb[194].mxu0  ;;  %v8125_v31 = vadd.f32 %v8124_v9, %v8062_v4  ;;  %v8064_v21 = vmul.f32 %v7919_v38, %v15790_v63 }
 0x847   :  { %17759 = vst [vmem:[#allocation9_spill] sm:$0xff] %v15795_v55  ;;  %v15799_v16 = vadd.f32 %v17760_v22, %v7270_v61  ;;  %v7272_v36 = vpop.f32.mrb[195].mxu0  ;;  %v7924_v61 = vpop.permute.xlu1 %7923 }
 0x848   :  { %v8259_v36 = vadd.f32 %v8258_v59, %v8196_v17  ;;  %v8126_v10 = vadd.f32 %v8125_v31, %v8063_v42  ;;  %v8065_v27 = vmul.f32 %v7924_v61, %v15795_v55  ;;  %v8198_v13 = vmul.f32 %v8064_v21, %v8064_v21  ;;  %v17766_v42 = vld [vmem:[#allocation73_spill] sm:$0xff] }
 0x849   :  { %17761 = vst [vmem:[#allocation52_spill] sm:$0xff] %v15799_v16  ;;  %v7929_v4 = vpop.permute.xlu0 %7928 }
 0x84a   :  { %v8260_v60 = vadd.f32 %v8259_v36, %v8197_v11  ;;  %v8127_v43 = vadd.f32 %v8126_v10, %v8064_v21  ;;  %v8199_v9 = vmul.f32 %v8065_v27, %v8065_v27  ;;  %v8066_v38 = vmul.f32 %v7929_v4, %v15799_v16  ;;  %v17768_v11 = vld [vmem:[#allocation75_spill] sm:$0xff] }
 0x84c   :  { %v7275_v25 = vpop.f32.mrb[196].mxu0  ;;  %v8128_v63 = vadd.f32 %v8127_v43, %v8065_v27 }
 0x84d   :  { %v15804_v23 = vadd.f32 %v17762_v51, %v7275_v25  ;;  %v7277_v50 = vpop.f32.mrb[197].mxu0  ;;  %v7934_v25 = vpop.permute.xlu1 %7933 }
 0x84e   :  { %v7278_v22 = vpop.f32.mrb[198].mxu0  ;;  %v8261_v50 = vadd.f32 %v8260_v60, %v8198_v13  ;;  %v7939_v21 = vpop.permute.xlu0 %7938 }
 0x84f   :  { %17763 = vst [vmem:[#allocation23_spill] sm:$0xff] %v15804_v23  ;;  %v15808_v19 = vadd.f32 %v17764_v49, %v7278_v22  ;;  %v7280_v54 = vpop.f32.mrb[199].mxu0  ;;  %v8067_v59 = vmul.f32 %v7934_v25, %v15804_v23  ;;  %v8200_v49 = vmul.f32 %v8066_v38, %v8066_v38 }
 0x850   :  { %v8262_v22 = vadd.f32 %v8261_v50, %v8199_v9  ;;  %v8129_v54 = vadd.f32 %v8128_v63, %v8066_v38  ;;  %v17772_v38 = vld [vmem:[#allocation74_spill] sm:$0xff] }
 0x851   :  { %17765 = vst [vmem:[#allocation53_spill] sm:$0xff] %v15808_v19  ;;  %v8201_v4 = vmul.f32 %v8067_v59, %v8067_v59  ;;  %v8068_v16 = vmul.f32 %v7939_v21, %v15808_v19  ;;  %v7944_v60 = vpop.permute.xlu1 %7943 }
 0x852   :  { %v8263_v27 = vadd.f32 %v8262_v22, %v8200_v49  ;;  %v8130_v13 = vadd.f32 %v8129_v54, %v8067_v59 }
 0x854   :  { %v7283_v51 = vpop.f32.mrb[200].mxu0 }
 0x855   :  { %v15813_v17 = vadd.f32 %v17766_v42, %v7283_v51  ;;  %v7285_v31 = vpop.f32.mrb[201].mxu0  ;;  %v8264_v51 = vadd.f32 %v8263_v27, %v8201_v4  ;;  %v8202_v42 = vmul.f32 %v8068_v16, %v8068_v16  ;;  %v7954_v59 = vpop.permute.xlu1 %7953 }
 0x856   :  { %v7286_v61 = vpop.f32.mrb[202].mxu0  ;;  %v17770_v31 = vld [vmem:[#allocation72_spill] sm:$0xff] }
 0x857   :  { %17767 = vst [vmem:[#allocation24_spill] sm:$0xff] %v15813_v17  ;;  %v15816_v36 = vadd.f32 %v17768_v11, %v7286_v61  ;;  %v7288_v10 = vpop.f32.mrb[203].mxu0  ;;  %v8069_v43 = vmul.f32 %v7944_v60, %v15813_v17  ;;  %v7949_v61 = vpop.permute.xlu0 %7948  ;;  %v8265_v49 = vadd.f32 %v8264_v51, %v8202_v42  ;;  %v17775_v51 = vld [vmem:[#allocation79_spill] sm:$0xff] }
 0x858   :  { %v8131_v10 = vadd.f32 %v8130_v13, %v8068_v16  ;;  %v17774_v13 = vld [vmem:[#allocation77_spill] sm:$0xff] }
 0x859   :  { %17769 = vst [vmem:[#allocation25_spill] sm:$0xff] %v15816_v36  ;;  %v8203_v23 = vmul.f32 %v8069_v43, %v8069_v43  ;;  %v8070_v63 = vmul.f32 %v7949_v61, %v15816_v36 }
 0x85a   :  { %v8132_v54 = vadd.f32 %v8131_v10, %v8069_v43 }
 0x85b   :  { %v8266_v60 = vadd.f32 %v8265_v49, %v8203_v23  ;;  %v8204_v27 = vmul.f32 %v8070_v63, %v8070_v63 }
 0x85c   :  { %v7291_v25 = vpop.f32.mrb[204].mxu0 }
 0x85d   :  { %v15821_v9 = vadd.f32 %v17770_v31, %v7291_v25  ;;  %v7293_v50 = vpop.f32.mrb[205].mxu0  ;;  %v7959_v25 = vpop.permute.xlu0 %7958 }
 0x85e   :  { %v7294_v11 = vpop.f32.mrb[206].mxu0  ;;  %v8133_v50 = vadd.f32 %v8132_v54, %v8070_v63 }
 0x85f   :  { %17771 = vst [vmem:[#allocation26_spill] sm:$0xff] %v15821_v9  ;;  %v15825_v21 = vadd.f32 %v17772_v38, %v7294_v11  ;;  %v7296_v22 = vpop.f32.mrb[207].mxu0  ;;  %v8071_v4 = vmul.f32 %v7954_v59, %v15821_v9  ;;  %v7964_v11 = vpop.permute.xlu1 %7963 }
 0x860   :  { %v8267_v22 = vadd.f32 %v8266_v60, %v8204_v27 }
 0x861   :  { %17773 = vst [vmem:[#allocation12_spill] sm:$0xff] %v15825_v21  ;;  %v8205_v17 = vmul.f32 %v8071_v4, %v8071_v4  ;;  %v8072_v16 = vmul.f32 %v7959_v25, %v15825_v21  ;;  %v8134_v36 = vadd.f32 %v8133_v50, %v8071_v4  ;;  %v7969_v63 = vpop.permute.xlu0 %7968  ;;  %v17776_v21 = vld [vmem:[#allocation76_spill] sm:$0xff] }
 0x863   :  { %v8268_v10 = vadd.f32 %v8267_v22, %v8205_v17  ;;  %v8206_v59 = vmul.f32 %v8072_v16, %v8072_v16  ;;  %v8135_v49 = vadd.f32 %v8134_v36, %v8072_v16  ;;  %v7974_v60 = vpop.permute.xlu1 %7973  ;;  %v17777_v17 = vld [vmem:[#allocation78_spill] sm:$0xff] }
 0x864   :  { %v7299_v31 = vpop.f32.mrb[208].mxu0 }
 0x865   :  { %v15830_v19 = vadd.f32 %v17774_v13, %v7299_v31  ;;  %v7301_v61 = vpop.f32.mrb[209].mxu0  ;;  %v8269_v13 = vadd.f32 %v8268_v10, %v8206_v59  ;;  %v7979_v16 = vpop.permute.xlu0 %7978 }
 0x866   :  { %v7302_v38 = vpop.f32.mrb[210].mxu0 }
 0x867   :  { %v8073_v43 = vmul.f32 %v7964_v11, %v15830_v19  ;;  %v15834_v42 = vadd.f32 %v17775_v51, %v7302_v38  ;;  %v7304_v23 = vpop.f32.mrb[211].mxu0 }
 0x869   :  { %v8207_v54 = vmul.f32 %v8073_v43, %v8073_v43  ;;  %v8074_v25 = vmul.f32 %v7969_v63, %v15834_v42  ;;  %v8136_v61 = vadd.f32 %v8135_v49, %v8073_v43 }
 0x86b   :  { %v8270_v50 = vadd.f32 %v8269_v13, %v8207_v54  ;;  %v8208_v11 = vmul.f32 %v8074_v25, %v8074_v25  ;;  %v8137_v51 = vadd.f32 %v8136_v61, %v8074_v25  ;;  %v7984_v13 = vpop.permute.xlu1 %7983  ;;  %v7989_v61 = vpop.permute.xlu0 %7988 }
 0x86c   :  { %v7307_v31 = vpop.f32.mrb[212].mxu0 }
 0x86d   :  { %v15838_v9 = vadd.f32 %v17776_v21, %v7307_v31  ;;  %v7309_v4 = vpop.f32.mrb[213].mxu0  ;;  %v8271_v43 = vadd.f32 %v8270_v50, %v8208_v11 }
 0x86e   :  { %v7310_v27 = vpop.f32.mrb[214].mxu0 }
 0x86f   :  { %v8075_v38 = vmul.f32 %v7974_v60, %v15838_v9  ;;  %v15842_v22 = vadd.f32 %v17777_v17, %v7310_v27  ;;  %v7312_v36 = vpop.f32.mrb[215].mxu0 }
 0x871   :  { %v8209_v23 = vmul.f32 %v8075_v38, %v8075_v38  ;;  %v8076_v10 = vmul.f32 %v7979_v16, %v15842_v22  ;;  %v8138_v59 = vadd.f32 %v8137_v51, %v8075_v38 }
 0x873   :  { %v8272_v63 = vadd.f32 %v8271_v43, %v8209_v23  ;;  %v8210_v49 = vmul.f32 %v8076_v10, %v8076_v10  ;;  %v8139_v60 = vadd.f32 %v8138_v59, %v8076_v10  ;;  %v7994_v59 = vpop.permute.xlu1 %7993 }
 0x874   :  { %v7315_v21 = vpop.f32.mrb[216].mxu0 }
 0x875   :  { %v15846_v31 = vadd.f32 %v15702_v33, %v7315_v21  ;;  %v7317_v54 = vpop.f32.mrb[217].mxu0  ;;  %v8273_v36 = vadd.f32 %v8272_v63, %v8210_v49  ;;  %v7999_v49 = vpop.permute.xlu0 %7998 }
 0x876   :  { %v7318_v4 = vpop.f32.mrb[218].mxu0 }
 0x877   :  { %17778 = vst [vmem:[#allocation13_spill] sm:$0xff] %v15846_v31  ;;  %v8077_v27 = vmul.f32 %v7984_v13, %v15846_v31  ;;  %v15850_v17 = vadd.f32 %v15709_v34, %v7318_v4  ;;  %v7320_v25 = vpop.f32.mrb[219].mxu0 }
 0x879   :  { %17779 = vst [vmem:[#allocation14_spill] sm:$0xff] %v15850_v17  ;;  %v8140_v50 = vadd.f32 %v8139_v60, %v8077_v27  ;;  %v8211_v11 = vmul.f32 %v8077_v27, %v8077_v27  ;;  %v8078_v38 = vmul.f32 %v7989_v61, %v15850_v17 }
 0x87b   :  { %v8274_v16 = vadd.f32 %v8273_v36, %v8211_v11  ;;  %v8141_v51 = vadd.f32 %v8140_v50, %v8078_v38  ;;  %v8212_v33 = vmul.f32 %v8078_v38, %v8078_v38 }
 0x87c   :  { %v7323_v23 = vpop.f32.mrb[220].mxu0 }
 0x87d   :  { %v8275_v43 = vadd.f32 %v8274_v16, %v8212_v33  ;;  %v15854_v21 = vadd.f32 %v15700_v8, %v7323_v23  ;;  %v7325_v10 = vpop.f32.mrb[221].mxu0  ;;  %v8004_v16 = vpop.permute.xlu1 %8003 }
 0x87e   :  { %v7326_v54 = vpop.f32.mrb[222].mxu0  ;;  %v8009_v10 = vpop.permute.xlu0 %8008 }
 0x87f   :  { %17780 = vst [vmem:[#allocation15_spill] sm:$0xff] %v15854_v21  ;;  %v8079_v34 = vmul.f32 %v7994_v59, %v15854_v21  ;;  %v15858_v13 = vadd.f32 %v15707_v44, %v7326_v54  ;;  %v7328_v63 = vpop.f32.mrb[223].mxu0 }
 0x881   :  { %v8142_v4 = vadd.f32 %v8141_v51, %v8079_v34  ;;  %v8213_v60 = vmul.f32 %v8079_v34, %v8079_v34  ;;  %v8080_v27 = vmul.f32 %v7999_v49, %v15858_v13 }
 0x883   :  { %v8276_v25 = vadd.f32 %v8275_v43, %v8213_v60  ;;  %v8143_v61 = vadd.f32 %v8142_v4, %v8080_v27  ;;  %v8214_v36 = vmul.f32 %v8080_v27, %v8080_v27 }
 0x884   :  { %v7331_v50 = vpop.f32.mrb[224].mxu0 }
 0x885   :  { %v8277_v8 = vadd.f32 %v8276_v25, %v8214_v36  ;;  %v15862_v11 = vadd.f32 %v15731_v35, %v7331_v50  ;;  %v7333_v38 = vpop.f32.mrb[225].mxu0  ;;  %v8014_v25 = vpop.permute.xlu1 %8013 }
 0x886   :  { %v7334_v33 = vpop.f32.mrb[226].mxu0  ;;  %v8019_v38 = vpop.permute.xlu0 %8018 }
 0x887   :  { %v8081_v44 = vmul.f32 %v8004_v16, %v15862_v11  ;;  %v15866_v23 = vadd.f32 %v15738_v14, %v7334_v33  ;;  %v7336_v51 = vpop.f32.mrb[227].mxu0 }
 0x889   :  { %v8144_v59 = vadd.f32 %v8143_v61, %v8081_v44  ;;  %v8215_v54 = vmul.f32 %v8081_v44, %v8081_v44  ;;  %v8082_v43 = vmul.f32 %v8009_v10, %v15866_v23 }
 0x88b   :  { %v8278_v34 = vadd.f32 %v8277_v8, %v8215_v54  ;;  %v8145_v63 = vadd.f32 %v8144_v59, %v8082_v43  ;;  %v8216_v49 = vmul.f32 %v8082_v43, %v8082_v43 }
 0x88c   :  { %v7339_v4 = vpop.f32.mrb[228].mxu0 }
 0x88d   :  { %v8279_v35 = vadd.f32 %v8278_v34, %v8216_v49  ;;  %v15870_v60 = vadd.f32 %v15729_v5, %v7339_v4  ;;  %v7341_v27 = vpop.f32.mrb[229].mxu0 }
 0x88e   :  { %v7342_v36 = vpop.f32.mrb[230].mxu0 }
 0x88f   :  { %17781 = vst [vmem:[#allocation17_spill] sm:$0xff] %v15870_v60  ;;  %v8083_v14 = vmul.f32 %v8014_v25, %v15870_v60  ;;  %v15874_v50 = vadd.f32 %v15736_v15, %v7342_v36  ;;  %v7344_v61 = vpop.f32.mrb[231].mxu0 }
 0x891   :  { %v8146_v16 = vadd.f32 %v8145_v63, %v8083_v14  ;;  %v8217_v33 = vmul.f32 %v8083_v14, %v8083_v14  ;;  %v8084_v8 = vmul.f32 %v8019_v38, %v15874_v50 }
 0x893   :  { %v8280_v44 = vadd.f32 %v8279_v35, %v8217_v33  ;;  %v8147_v51 = vadd.f32 %v8146_v16, %v8084_v8  ;;  %v8218_v10 = vmul.f32 %v8084_v8, %v8084_v8  ;;  %v17798_v8 = vld [vmem:[#allocation23_spill] sm:$0xff]  ;;  %v17799_v33 = vld [vmem:[#allocation53_spill] sm:$0xff]  ;;  %v17800_v16 = vld [vmem:[#allocation24_spill] sm:$0xff] }
 0x895   :  { %v8148_v59 = vrot.slane %v8147_v51, 4  ;;  %v8281_v5 = vadd.f32 %v8280_v44, %v8218_v10  ;;  %v17797_v44 = vld [vmem:[#allocation52_spill] sm:$0xff] }
 0x896   :  { %v17805_v17 = vld [vmem:[#allocation17_spill] sm:$0xff] }
 0x897   :  { %v8149_v54 = vadd.f32 %v8148_v59, %v8147_v51  ;;  %v8282_v43 = vrot.slane %v8281_v5, 4  ;;  %v17801_v59 = vld [vmem:[#allocation25_spill] sm:$0xff]  ;;  %v17803_v51 = vld [vmem:[#allocation12_spill] sm:$0xff] }
 0x899   :  { %v8150_v34 = vrot.slane %v8149_v54, 2  ;;  %v8283_v49 = vadd.f32 %v8282_v43, %v8281_v5  ;;  %v16004_v43 = vld [vmem:[%s16863_s6] ss:$0 sm:$0xff] }
 0x89b   :  { %v8151_v4 = vadd.f32 %v8150_v34, %v8149_v54  ;;  %v8284_v27 = vrot.slane %v8283_v49, 2  ;;  %v17791_v34 = vld [vmem:[#allocation21_spill] sm:$0xff] }
 0x89d   :  { %v8152_v25 = vrot.slane %v8151_v4, 1  ;;  %v8285_v15 = vadd.f32 %v8284_v27, %v8283_v49 }
 0x89f   :  { %v8153_v36 = vadd.f32 %v8152_v25, %v8151_v4  ;;  %v8286_v61 = vrot.slane %v8285_v15, 1  ;;  %v17787_v25 = vld [vmem:[#allocation30_spill] sm:$0xff] }
 0x8a1   :  { %v15877_v60 = vmul.f32 0.055555556, %v8153_v36  ;;  %v8287_v63 = vadd.f32 %v8286_v61, %v8285_v15  ;;  %v17784_v15 = vld [vmem:[#allocation4_spill] sm:$0xff]  ;;  %v17785_v61 = vld [vmem:[#allocation18_spill] sm:$0xff]  ;;  %v17790_v36 = vld [vmem:[#allocation19_spill] sm:$0xff] }
 0x8a3   :  { %v8288_v14 = vmul.f32 0.055555556, %v8287_v63  ;;  %v8289_v35 = vmul.f32 %v15877_v60, %v15877_v60  ;;  %v17786_v63 = vld [vmem:[#allocation28_spill] sm:$0xff]  ;;  %v17804_v49 = vsub.f32 %v15874_v50, %v15877_v60  ;;  %v17806_v54 = vsub.f32 %v15591_v3, %v15877_v60 }
 0x8a4   :  { %v17807_v4 = vsub.f32 %v15594_v2, %v15877_v60  ;;  %v16035_v50 = vld [vmem:[%s16864_s7] ss:$0 sm:$0xff]  ;;  %v17809_v3 = vsub.f32 %v15603_v20, %v15877_v60  ;;  %v17810_v2 = vsub.f32 %v15609_v30, %v15877_v60  ;;  %v17812_v41 = vsub.f32 %v15612_v29, %v15877_v60 }
 0x8a5   :  { %v8290_v10 = vsub.f32 %v8288_v14, %v8289_v35  ;;  %v17782_v14 = vld [vmem:[#allocation11_spill] sm:$0xff]  ;;  %v17788_v35 = vld [vmem:[#allocation36_spill] sm:$0xff]  ;;  %v17814_v20 = vsub.f32 %v15618_v0, %v15877_v60  ;;  %v17816_v30 = vsub.f32 %v15623_v45, %v15877_v60  ;;  %v17818_v29 = vsub.f32 %v15629_v52, %v15877_v60 }
 0x8a6   :  { %v17824_v52 = vsub.f32 %v15642_v40, %v15877_v60 }
 0x8a7   :  { %v8355_v27 = vadd.f32 1e-05, %v8290_v10  ;;  %v17789_v10 = vld [vmem:[#allocation37_spill] sm:$0xff] }
 0x8a9   :  { %10321 = vrsqrt.f32 %v8355_v27  ;;  %v17783_v27 = vld [vmem:[#allocation20_spill] sm:$0xff] }
 0x8b3   :  { %v15999_v38 = vpop.eup %10321 }
 0x8b4   :  { %v8420_v55 = vmul.f32 %v15999_v38, %v17804_v49  ;;  %v16024_v21 = vmul.f32 %v15999_v38, %v17806_v54  ;;  %v16030_v5 = vmul.f32 %v15999_v38, %v17807_v4  ;;  %v17808_v49 = vsub.f32 %v15600_v53, %v15877_v60 }
 0x8b5   :  { %v16047_v54 = vmul.f32 %v15999_v38, %v17809_v3  ;;  %v16053_v4 = vmul.f32 %v15999_v38, %v17810_v2  ;;  %v16059_v53 = vmul.f32 %v15999_v38, %v17812_v41  ;;  %v16066_v3 = vmul.f32 %v15999_v38, %v17814_v20 }
 0x8b6   :  { %v16041_v31 = vmul.f32 %v15999_v38, %v17808_v49  ;;  %v8490_v49 = vmul.f32 %v16004_v43, %v8420_v55  ;;  %v16072_v2 = vmul.f32 %v15999_v38, %v17816_v30  ;;  %v16078_v41 = vmul.f32 %v15999_v38, %v17818_v29 }
 0x8b7   :  { %17811 = vst [vmem:[#allocation29_spill] sm:$0xff] %v16053_v4  ;;  %17813 = vst [vmem:[#allocation32_spill] sm:$0xff] %v16059_v53  ;;  %v17820_v55 = vsub.f32 %v15633_v46, %v15877_v60  ;;  %v17822_v20 = vsub.f32 %v15636_v39, %v15877_v60  ;;  %v17823_v30 = vsub.f32 %v15639_v6, %v15877_v60  ;;  %v17887_v53 = vld [vmem:[#allocation14_spill] sm:$0xff] }
 0x8b8   :  { %17815 = vst [vmem:[#allocation27_spill] sm:$0xff] %v16066_v3  ;;  %17817 = vst [vmem:[#allocation31_spill] sm:$0xff] %v16072_v2  ;;  %v8369_v29 = vmul.f32 %v15999_v38, %v17824_v52  ;;  %v16099_v46 = vadd.f32 %v16035_v50, %v8490_v49  ;;  %v17829_v52 = vsub.f32 %v15658_v32, %v15877_v60  ;;  %v17869_v3 = vld [vmem:[#allocation51_spill] sm:$0xff] }
 0x8b9   :  { %17819 = vst [vmem:[#allocation38_spill] sm:$0xff] %v16078_v41  ;;  %v16084_v0 = vmul.f32 %v15999_v38, %v17820_v55  ;;  %v8367_v45 = vmul.f32 %v15999_v38, %v17822_v20  ;;  %v8368_v2 = vmul.f32 %v15999_v38, %v17823_v30  ;;  %v17826_v55 = vsub.f32 %v15645_v26, %v15877_v60 }
 0x8ba   :  { %17825 = vst [vmem:[#allocation34_spill] sm:$0xff] %v16099_v46  ;;  %v17827_v20 = vsub.f32 %v15648_v7, %v15877_v60  ;;  %v17828_v30 = vsub.f32 %v15652_v1, %v15877_v60  ;;  %v8373_v49 = vmul.f32 %v15999_v38, %v17829_v52  ;;  %v17830_v26 = vsub.f32 %v15662_v12, %v15877_v60 }
 0x8bb   :  { %17821 = vst [vmem:[#allocation22_spill] sm:$0xff] %v16084_v0  ;;  %v8370_v39 = vmul.f32 %v15999_v38, %v17826_v55  ;;  %v17831_v7 = vsub.f32 %v15667_v58, %v15877_v60  ;;  %v17832_v1 = vsub.f32 %v15670_v62, %v15877_v60  ;;  %v17833_v32 = vsub.f32 %v15675_v57, %v15877_v60 }
 0x8bc   :  { %v8371_v6 = vmul.f32 %v15999_v38, %v17827_v20  ;;  %v8372_v40 = vmul.f32 %v15999_v38, %v17828_v30  ;;  %v8374_v55 = vmul.f32 %v15999_v38, %v17830_v26  ;;  %v17834_v12 = vsub.f32 %v15679_v18, %v15877_v60 }
 0x8bd   :  { %v8375_v20 = vmul.f32 %v15999_v38, %v17831_v7  ;;  %v8376_v30 = vmul.f32 %v15999_v38, %v17832_v1  ;;  %v8377_v52 = vmul.f32 %v15999_v38, %v17833_v32  ;;  %v17835_v58 = vsub.f32 %v15684_v47, %v15877_v60 }
 0x8be   :  { %v8378_v26 = vmul.f32 %v15999_v38, %v17834_v12  ;;  %v17836_v62 = vsub.f32 %v15688_v24, %v15877_v60  ;;  %v17837_v57 = vsub.f32 %v17782_v14, %v15877_v60  ;;  %v17838_v18 = vsub.f32 %v17783_v27, %v15877_v60 }
 0x8bf   :  { %v8379_v7 = vmul.f32 %v15999_v38, %v17835_v58  ;;  %v17839_v47 = vsub.f32 %v15705_v56, %v15877_v60  ;;  %v17840_v24 = vsub.f32 %v17784_v15, %v15877_v60  ;;  %v17841_v14 = vsub.f32 %v15718_v28, %v15877_v60 }
 0x8c0   :  { %v8380_v1 = vmul.f32 %v15999_v38, %v17836_v62  ;;  %v8381_v32 = vmul.f32 %v15999_v38, %v17837_v57  ;;  %v8382_v12 = vmul.f32 %v15999_v38, %v17838_v18  ;;  %v17842_v27 = vsub.f32 %v17785_v61, %v15877_v60 }
 0x8c1   :  { %v8383_v58 = vmul.f32 %v15999_v38, %v17839_v47  ;;  %v8384_v62 = vmul.f32 %v15999_v38, %v17840_v24  ;;  %v8385_v57 = vmul.f32 %v15999_v38, %v17841_v14  ;;  %v17843_v56 = vsub.f32 %v17786_v63, %v15877_v60 }
 0x8c2   :  { %v8386_v18 = vmul.f32 %v15999_v38, %v17842_v27  ;;  %v17844_v15 = vsub.f32 %v17787_v25, %v15877_v60  ;;  %v17845_v28 = vsub.f32 %v17788_v35, %v15877_v60  ;;  %v17846_v61 = vsub.f32 %v17789_v10, %v15877_v60 }
 0x8c3   :  { %v8387_v47 = vmul.f32 %v15999_v38, %v17843_v56  ;;  %v17847_v63 = vsub.f32 %v15752_v37, %v15877_v60  ;;  %v17849_v25 = vsub.f32 %v17790_v36, %v15877_v60  ;;  %v8447_v4 = vmul.f32 %v16004_v43, %v8377_v52 }
 0x8c4   :  { %v8388_v24 = vmul.f32 %v15999_v38, %v17844_v15  ;;  %v16181_v14 = vmul.f32 %v15999_v38, %v17845_v28  ;;  %v16187_v27 = vmul.f32 %v15999_v38, %v17846_v61  ;;  %v17851_v15 = vsub.f32 %v15761_v48, %v15877_v60  ;;  %v17855_v61 = vld [vmem:[#allocation45_spill] sm:$0xff] }
 0x8c5   :  { %v16193_v56 = vmul.f32 %v15999_v38, %v17847_v63  ;;  %v16199_v35 = vmul.f32 %v15999_v38, %v17849_v25  ;;  %v17853_v28 = vsub.f32 %v17791_v34, %v15877_v60  ;;  %v17856_v63 = vsub.f32 %v17855_v61, %v15877_v60  ;;  %v17858_v25 = vld [vmem:[#allocation46_spill] sm:$0xff] }
 0x8c6   :  { %v16205_v10 = vmul.f32 %v15999_v38, %v17851_v15  ;;  %v17859_v46 = vsub.f32 %v17858_v25, %v15877_v60  ;;  %v17861_v15 = vld [vmem:[#allocation48_spill] sm:$0xff]  ;;  %v8456_v52 = vmul.f32 %v16004_v43, %v8386_v18 }
 0x8c7   :  { %17848 = vst [vmem:[#allocation41_spill] sm:$0xff] %v16193_v56  ;;  %17850 = vst [vmem:[#allocation44_spill] sm:$0xff] %v16199_v35  ;;  %v16211_v37 = vmul.f32 %v15999_v38, %v17853_v28  ;;  %v16217_v36 = vmul.f32 %v15999_v38, %v17856_v63  ;;  %v17862_v0 = vsub.f32 %v17861_v15, %v15877_v60  ;;  %v17864_v28 = vld [vmem:[#allocation49_spill] sm:$0xff]  ;;  %v17867_v63 = vld [vmem:[#allocation8_spill] sm:$0xff] }
 0x8c8   :  { %17852 = vst [vmem:[#allocation50_spill] sm:$0xff] %v16205_v10  ;;  %v16223_v48 = vmul.f32 %v15999_v38, %v17859_v46  ;;  %v17865_v41 = vsub.f32 %v17864_v28, %v15877_v60  ;;  %v17870_v46 = vsub.f32 %v17869_v3, %v15877_v60  ;;  %v17871_v15 = vld [vmem:[#allocation9_spill] sm:$0xff]  ;;  %v17873_v28 = vsub.f32 %v17797_v44, %v15877_v60  ;;  %v17889_v10 = vld [vmem:[#allocation15_spill] sm:$0xff] }
 0x8c9   :  { %17854 = vst [vmem:[#allocation42_spill] sm:$0xff] %v16211_v37  ;;  %17857 = vst [vmem:[#allocation47_spill] sm:$0xff] %v16217_v36  ;;  %v16229_v34 = vmul.f32 %v15999_v38, %v17862_v0  ;;  %v17868_v36 = vsub.f32 %v17867_v63, %v15877_v60  ;;  %v17872_v0 = vsub.f32 %v17871_v15, %v15877_v60  ;;  %v17885_v37 = vld [vmem:[#allocation13_spill] sm:$0xff] }
 0x8ca   :  { %17860 = vst [vmem:[#allocation10_spill] sm:$0xff] %v16223_v48  ;;  %v16235_v61 = vmul.f32 %v15999_v38, %v17865_v41  ;;  %v8400_v48 = vmul.f32 %v15999_v38, %v17870_v46  ;;  %v8402_v41 = vmul.f32 %v15999_v38, %v17873_v28  ;;  %v17874_v63 = vsub.f32 %v17798_v8, %v15877_v60 }
 0x8cb   :  { %17863 = vst [vmem:[#allocation33_spill] sm:$0xff] %v16229_v34  ;;  %v8399_v25 = vmul.f32 %v15999_v38, %v17868_v36  ;;  %v8401_v34 = vmul.f32 %v15999_v38, %v17872_v0  ;;  %v17875_v3 = vsub.f32 %v17799_v33, %v15877_v60  ;;  %v17876_v15 = vsub.f32 %v17800_v16, %v15877_v60 }
 0x8cc   :  { %17866 = vst [vmem:[#allocation54_spill] sm:$0xff] %v16235_v61  ;;  %v8403_v36 = vmul.f32 %v15999_v38, %v17874_v63  ;;  %v17877_v44 = vsub.f32 %v17801_v59, %v15877_v60  ;;  %v17878_v61 = vld [vmem:[#allocation26_spill] sm:$0xff]  ;;  %v17880_v33 = vsub.f32 %v17803_v51, %v15877_v60  ;;  %v17881_v16 = vsub.f32 %v15830_v19, %v15877_v60 }
 0x8cd   :  { %v8404_v46 = vmul.f32 %v15999_v38, %v17875_v3  ;;  %v8405_v0 = vmul.f32 %v15999_v38, %v17876_v15  ;;  %v17879_v8 = vsub.f32 %v17878_v61, %v15877_v60  ;;  %v17882_v59 = vsub.f32 %v15834_v42, %v15877_v60 }
 0x8ce   :  { %v8406_v28 = vmul.f32 %v15999_v38, %v17877_v44  ;;  %v8408_v3 = vmul.f32 %v15999_v38, %v17880_v33  ;;  %v8409_v15 = vmul.f32 %v15999_v38, %v17881_v16  ;;  %v17883_v61 = vsub.f32 %v15838_v9, %v15877_v60 }
 0x8cf   :  { %v8407_v63 = vmul.f32 %v15999_v38, %v17879_v8  ;;  %v8410_v44 = vmul.f32 %v15999_v38, %v17882_v59  ;;  %v17884_v51 = vsub.f32 %v15842_v22, %v15877_v60  ;;  %v17886_v19 = vsub.f32 %v17885_v37, %v15877_v60 }
 0x8d0   :  { %v8411_v8 = vmul.f32 %v15999_v38, %v17883_v61  ;;  %v17888_v42 = vsub.f32 %v17887_v53, %v15877_v60  ;;  %v17890_v9 = vsub.f32 %v17889_v10, %v15877_v60  ;;  %v17891_v22 = vsub.f32 %v15858_v13, %v15877_v60 }
 0x8d1   :  { %v8412_v33 = vmul.f32 %v15999_v38, %v17884_v51  ;;  %v8413_v16 = vmul.f32 %v15999_v38, %v17886_v19  ;;  %v17892_v37 = vsub.f32 %v15862_v11, %v15877_v60  ;;  %v17893_v53 = vsub.f32 %v15866_v23, %v15877_v60  ;;  %v16329_v23 = vld [vmem:[%s16865_s8 + $0x8] sm:$0xff] }
 0x8d2   :  { %v8414_v59 = vmul.f32 %v15999_v38, %v17888_v42  ;;  %v8415_v61 = vmul.f32 %v15999_v38, %v17890_v9  ;;  %v8416_v51 = vmul.f32 %v15999_v38, %v17891_v22  ;;  %v17894_v10 = vsub.f32 %v17805_v17, %v15877_v60 }
 0x8d3   :  { %v8417_v19 = vmul.f32 %v15999_v38, %v17892_v37  ;;  %v8418_v42 = vmul.f32 %v15999_v38, %v17893_v53  ;;  %v8428_v13 = vmul.f32 %v16004_v43, %v16030_v5  ;;  %v8437_v35 = vmul.f32 %v16004_v43, %v8367_v45 }
 0x8d4   :  { %v8419_v9 = vmul.f32 %v15999_v38, %v17894_v10  ;;  %v8438_v11 = vmul.f32 %v16004_v43, %v8368_v2  ;;  %v8439_v17 = vmul.f32 %v16004_v43, %v8369_v29  ;;  %v8440_v60 = vmul.f32 %v16004_v43, %v8370_v39 }
 0x8d5   :  { %v8498_v22 = vadd.f32 %v16035_v50, %v8428_v13  ;;  %v8441_v38 = vmul.f32 %v16004_v43, %v8371_v6  ;;  %v8442_v5 = vmul.f32 %v16004_v43, %v8372_v40  ;;  %v8443_v53 = vmul.f32 %v16004_v43, %v8373_v49 }
 0x8d6   :  { %v8444_v45 = vmul.f32 %v16004_v43, %v8374_v55  ;;  %v8445_v10 = vmul.f32 %v16004_v43, %v8375_v20  ;;  %v8446_v13 = vmul.f32 %v16004_v43, %v8376_v30  ;;  %v8448_v29 = vmul.f32 %v16004_v43, %v8378_v26 }
 0x8d7   :  { %vm8562_vm4 = vcmp.gt.f32.partialorder %v8498_v22, 0.0  ;;  %v8626_v37 = vmul.f32 0.2, %v8498_v22  ;;  %v8449_v39 = vmul.f32 %v16004_v43, %v8379_v7  ;;  %v8450_v6 = vmul.f32 %v16004_v43, %v8380_v1 }
 0x8d8   :  { %v8451_v40 = vmul.f32 %v16004_v43, %v8381_v32  ;;  %v8452_v49 = vmul.f32 %v16004_v43, %v8382_v12  ;;  %v8453_v55 = vmul.f32 %v16004_v43, %v8383_v58  ;;  %v8454_v20 = vmul.f32 %v16004_v43, %v8384_v62 }
 0x8d9   :  { %v8690_v2 = vsel %vm8562_vm4, %v8498_v22, %v8626_v37  ;;  %v8455_v30 = vmul.f32 %v16004_v43, %v8385_v57  ;;  %v8457_v22 = vmul.f32 %v16004_v43, %v8387_v47  ;;  %v8458_v26 = vmul.f32 %v16004_v43, %v8388_v24 }
 0x8da   :  { %v8786_v56 = vmul.f32 %v16329_v23, %v8690_v2  ;;  %v8427_v7 = vmul.f32 %v16004_v43, %v16024_v21  ;;  %v16355_v1 = vmul.f32 %v16004_v43, %v8399_v25  ;;  %v16358_v32 = vmul.f32 %v16004_v43, %v8400_v48 }
 0x8db   :  { %v16361_v12 = vmul.f32 %v16004_v43, %v8401_v34  ;;  %v16364_v58 = vmul.f32 %v16004_v43, %v8402_v41  ;;  %v16367_v62 = vmul.f32 %v16004_v43, %v8403_v36  ;;  %v16370_v57 = vmul.f32 %v16004_v43, %v8404_v46 }
 0x8dc   :  { %8851 = vadd.xlane.f32.xlu0 %v8786_v56  ;;  %v16373_v21 = vmul.f32 %v16004_v43, %v8405_v0  ;;  %v16376_v18 = vmul.f32 %v16004_v43, %v8406_v28  ;;  %v16379_v47 = vmul.f32 %v16004_v43, %v8407_v63  ;;  %v16382_v24 = vmul.f32 %v16004_v43, %v8408_v3 }
 0x8dd   :  { %v16385_v56 = vmul.f32 %v16004_v43, %v8409_v15  ;;  %v16388_v48 = vmul.f32 %v16004_v43, %v8410_v44  ;;  %v16391_v34 = vmul.f32 %v16004_v43, %v8411_v8  ;;  %v16394_v25 = vmul.f32 %v16004_v43, %v8412_v33 }
 0x8de   :  { %v16397_v41 = vmul.f32 %v16004_v43, %v8413_v16  ;;  %v16400_v36 = vmul.f32 %v16004_v43, %v8414_v59  ;;  %v16403_v46 = vmul.f32 %v16004_v43, %v8415_v61  ;;  %v16406_v0 = vmul.f32 %v16004_v43, %v8416_v51  ;;  %v16427_v59 = vld [vmem:[%s16865_s8] sm:$0xff]  ;;  %v17895_v51 = vld [vmem:[#allocation41_spill] sm:$0xff] }
 0x8df   :  { %v16409_v28 = vmul.f32 %v16004_v43, %v8417_v19  ;;  %v16412_v63 = vmul.f32 %v16004_v43, %v8418_v42  ;;  %v16415_v3 = vmul.f32 %v16004_v43, %v8419_v9  ;;  %v8497_v15 = vadd.f32 %v16035_v50, %v8427_v7 }
 0x8e0   :  { %v8429_v44 = vmul.f32 %v16004_v43, %v16041_v31  ;;  %v8430_v8 = vmul.f32 %v16004_v43, %v16047_v54  ;;  %v8459_v33 = vmul.f32 %v16004_v43, %v16181_v14  ;;  %v8460_v61 = vmul.f32 %v16004_v43, %v16187_v27 }
 0x8e1   :  { %vm8561_vm1 = vcmp.gt.f32.partialorder %v8497_v15, 0.0  ;;  %v8625_v16 = vmul.f32 0.2, %v8497_v15  ;;  %v8461_v19 = vmul.f32 %v16004_v43, %v17895_v51  ;;  %v16434_v31 = vadd.f32 %v16035_v50, %v8437_v35 }
 0x8e2   :  { %v16437_v54 = vadd.f32 %v16035_v50, %v8438_v11  ;;  %v16440_v42 = vadd.f32 %v16035_v50, %v8439_v17  ;;  %v16443_v9 = vadd.f32 %v16035_v50, %v8440_v60  ;;  %v16446_v37 = vadd.f32 %v16035_v50, %v8441_v38 }
 0x8e3   :  { %v8689_v14 = vsel %vm8561_vm1, %v8497_v15, %v8625_v16  ;;  %v16450_v2 = vadd.f32 %v16035_v50, %v8442_v5  ;;  %v16453_v35 = vadd.f32 %v16035_v50, %v8443_v53  ;;  %v16456_v11 = vadd.f32 %v16035_v50, %v8444_v45 }
 0x8e4   :  { %v8785_v27 = vmul.f32 %v16427_v59, %v8689_v14  ;;  %v16459_v17 = vadd.f32 %v16035_v50, %v8445_v10  ;;  %v16462_v60 = vadd.f32 %v16035_v50, %v8446_v13  ;;  %v16465_v38 = vadd.f32 %v16035_v50, %v8447_v4 }
 0x8e5   :  { %v16468_v7 = vadd.f32 %v16035_v50, %v8448_v29  ;;  %v16471_v5 = vadd.f32 %v16035_v50, %v8449_v39  ;;  %v16474_v53 = vadd.f32 %v16035_v50, %v8450_v6  ;;  %v16477_v45 = vadd.f32 %v16035_v50, %v8451_v40 }
 0x8e6   :  { %8849 = vadd.xlane.f32.xlu1 %v8785_v27  ;;  %v16480_v10 = vadd.f32 %v16035_v50, %v8452_v49  ;;  %v16483_v13 = vadd.f32 %v16035_v50, %v8453_v55  ;;  %v16486_v4 = vadd.f32 %v16035_v50, %v8454_v20  ;;  %v16489_v29 = vadd.f32 %v16035_v50, %v8455_v30  ;;  %v17900_v49 = vld [vmem:[#allocation29_spill] sm:$0xff]  ;;  %v17901_v55 = vld [vmem:[#allocation44_spill] sm:$0xff]  ;;  %v17902_v20 = vld [vmem:[#allocation50_spill] sm:$0xff] }
 0x8e7   :  { %v16492_v39 = vadd.f32 %v16035_v50, %v8456_v52  ;;  %v16495_v6 = vadd.f32 %v16035_v50, %v8457_v22  ;;  %v16498_v40 = vadd.f32 %v16035_v50, %v8458_v26  ;;  %v8431_v15 = vmul.f32 %v16004_v43, %v17900_v49 }
 0x8e8   :  { %17896 = vst [vmem:[#allocation16_spill] sm:$0xff] %v16489_v29  ;;  %v8462_v16 = vmul.f32 %v16004_v43, %v17901_v55  ;;  %v8463_v51 = vmul.f32 %v16004_v43, %v17902_v20  ;;  %v8499_v30 = vadd.f32 %v16035_v50, %v8429_v44  ;;  %v8500_v52 = vadd.f32 %v16035_v50, %v8430_v8  ;;  %v17906_v20 = vld [vmem:[#allocation32_spill] sm:$0xff] }
 0x8e9   :  { %17897 = vst [vmem:[#allocation39_spill] sm:$0xff] %v16492_v39  ;;  %17898 = vst [vmem:[#allocation5_spill] sm:$0xff] %v16495_v6  ;;  %v8529_v14 = vadd.f32 %v16035_v50, %v8459_v33  ;;  %v8530_v22 = vadd.f32 %v16035_v50, %v8460_v61  ;;  %v8531_v26 = vadd.f32 %v16035_v50, %v8461_v19 }
 0x8ea   :  { %17899 = vst [vmem:[#allocation35_spill] sm:$0xff] %v16498_v40  ;;  %v16513_v27 = vadd.f32 %v16035_v50, %v16355_v1  ;;  %v16517_v49 = vadd.f32 %v16035_v50, %v16358_v32  ;;  %v16521_v55 = vadd.f32 %v16035_v50, %v16361_v12  ;;  %v16525_v44 = vadd.f32 %v16035_v50, %v16364_v58 }
 0x8eb   :  { %v16529_v8 = vadd.f32 %v16035_v50, %v16367_v62  ;;  %v16533_v1 = vadd.f32 %v16035_v50, %v16370_v57  ;;  %v16537_v32 = vadd.f32 %v16035_v50, %v16373_v21  ;;  %v16541_v12 = vadd.f32 %v16035_v50, %v16376_v18 }
 0x8ec   :  { %v16545_v58 = vadd.f32 %v16035_v50, %v16379_v47  ;;  %v16549_v62 = vadd.f32 %v16035_v50, %v16382_v24  ;;  %v16553_v57 = vadd.f32 %v16035_v50, %v16385_v56  ;;  %v16557_v21 = vadd.f32 %v16035_v50, %v16388_v48 }
 0x8ed   :  { %v16561_v18 = vadd.f32 %v16035_v50, %v16391_v34  ;;  %v16565_v47 = vadd.f32 %v16035_v50, %v16394_v25  ;;  %v16569_v24 = vadd.f32 %v16035_v50, %v16397_v41  ;;  %v16573_v56 = vadd.f32 %v16035_v50, %v16400_v36 }
 0x8ee   :  { %v16577_v48 = vadd.f32 %v16035_v50, %v16403_v46  ;;  %v16581_v34 = vadd.f32 %v16035_v50, %v16406_v0  ;;  %v16585_v25 = vadd.f32 %v16035_v50, %v16409_v28  ;;  %v16589_v41 = vadd.f32 %v16035_v50, %v16412_v63  ;;  %v17907_v63 = vld [vmem:[#allocation42_spill] sm:$0xff] }
 0x8ef   :  { %v16593_v36 = vadd.f32 %v16035_v50, %v16415_v3  ;;  %vm8593_vm11 = vcmp.gt.f32.partialorder %v8529_v14, 0.0  ;;  %v8657_v33 = vmul.f32 0.2, %v8529_v14  ;;  %vm8594_vm14 = vcmp.gt.f32.partialorder %v8530_v22, 0.0 }
 0x8f0   :  { %17903 = vst [vmem:[#allocation40_spill] sm:$0xff] %v16585_v25  ;;  %17904 = vst [vmem:[#allocation55_spill] sm:$0xff] %v16589_v41  ;;  %v8532_v46 = vadd.f32 %v16035_v50, %v8462_v16  ;;  %v8658_v61 = vmul.f32 0.2, %v8530_v22  ;;  %vm8563_vm5 = vcmp.gt.f32.partialorder %v8499_v30, 0.0  ;;  %vm8595_vm12 = vcmp.gt.f32.partialorder %v8531_v26, 0.0 }
 0x8f1   :  { %17905 = vst [vmem:[#allocation57_spill] sm:$0xff] %v16593_v36  ;;  %v8627_v0 = vmul.f32 0.2, %v8499_v30  ;;  %v8721_v19 = vsel %vm8593_vm11, %v8529_v14, %v8657_v33  ;;  %v8659_v28 = vmul.f32 0.2, %v8531_v26  ;;  %v8432_v40 = vmul.f32 %v16004_v43, %v17906_v20  ;;  %v8755_v14 = vld [vmem:[%s16865_s8 + $0x10] sm:$0xff] }
 0x8f2   :  { %v8464_v6 = vmul.f32 %v16004_v43, %v17907_v63  ;;  %v8817_v3 = vmul.f32 %v16427_v59, %v8721_v19  ;;  %v8722_v36 = vsel %vm8594_vm14, %v8530_v22, %v8658_v61  ;;  %v8501_v41 = vadd.f32 %v16035_v50, %v8431_v15  ;;  %v17908_v59 = vld [vmem:[#allocation27_spill] sm:$0xff] }
 0x8f3   :  { %v8818_v39 = vmul.f32 %v16329_v23, %v8722_v36  ;;  %v8691_v16 = vsel %vm8563_vm5, %v8499_v30, %v8627_v0  ;;  %v8628_v33 = vmul.f32 0.2, %v8500_v52  ;;  %v8533_v25 = vadd.f32 %v16035_v50, %v8463_v51  ;;  %v17909_v15 = vld [vmem:[#allocation47_spill] sm:$0xff] }
 0x8f4   :  { %8913 = vadd.xlane.f32.xlu0 %v8817_v3  ;;  %v8723_v20 = vsel %vm8595_vm12, %v8531_v26, %v8659_v28  ;;  %vm8564_vm2 = vcmp.gt.f32.partialorder %v8500_v52, 0.0  ;;  %v8660_v29 = vmul.f32 0.2, %v8532_v46  ;;  %vm8596_vm3 = vcmp.gt.f32.partialorder %v8532_v46, 0.0  ;;  %v8756_v51 = vld [vmem:[%s16865_s8 + $0x18] sm:$0xff] }
 0x8f5   :  { %8915 = vadd.xlane.f32.xlu1 %v8818_v39  ;;  %v8433_v22 = vmul.f32 %v16004_v43, %v17908_v59  ;;  %v8465_v23 = vmul.f32 %v16004_v43, %v17909_v15  ;;  %v8787_v30 = vmul.f32 %v8755_v14, %v8691_v16  ;;  %v8502_v36 = vadd.f32 %v16035_v50, %v8432_v40  ;;  %v17910_v63 = vld [vmem:[#allocation31_spill] sm:$0xff]  ;;  %v17911_v16 = vld [vmem:[#allocation10_spill] sm:$0xff] }
 0x8f6   :  { %v8819_v61 = vmul.f32 %v8755_v14, %v8723_v20  ;;  %v8692_v0 = vsel %vm8564_vm2, %v8500_v52, %v8628_v33  ;;  %v8629_v26 = vmul.f32 0.2, %v8501_v41  ;;  %v8534_v19 = vadd.f32 %v16035_v50, %v8464_v6  ;;  %v8757_v6 = vld [vmem:[%s16865_s8 + $0x20] sm:$0xff] }
 0x8f7   :  { %v8724_v39 = vsel %vm8596_vm3, %v8532_v46, %v8660_v29  ;;  %vm8565_vm8 = vcmp.gt.f32.partialorder %v8501_v41, 0.0  ;;  %v8661_v28 = vmul.f32 0.2, %v8533_v25  ;;  %vm8597_vm0 = vcmp.gt.f32.partialorder %v8533_v25, 0.0 }
 0x8f8   :  { %8853 = vadd.xlane.f32.xlu0 %v8787_v30  ;;  %v8434_v3 = vmul.f32 %v16004_v43, %v17910_v63  ;;  %v8466_v40 = vmul.f32 %v16004_v43, %v17911_v16  ;;  %v8788_v52 = vmul.f32 %v8756_v51, %v8692_v0  ;;  %v8503_v14 = vadd.f32 %v16035_v50, %v8433_v22  ;;  %v17912_v30 = vld [vmem:[#allocation38_spill] sm:$0xff]  ;;  %v17913_v0 = vld [vmem:[#allocation33_spill] sm:$0xff] }
 0x8f9   :  { %8917 = vadd.xlane.f32.xlu1 %v8819_v61  ;;  %v8820_v33 = vmul.f32 %v8756_v51, %v8724_v39  ;;  %v8693_v20 = vsel %vm8565_vm8, %v8501_v41, %v8629_v26  ;;  %v8630_v29 = vmul.f32 0.2, %v8502_v36  ;;  %v8535_v46 = vadd.f32 %v16035_v50, %v8465_v23  ;;  %v8758_v23 = vld [vmem:[%s16865_s8 + $0x28] sm:$0xff] }
 0x8fa   :  { %v8725_v59 = vsel %vm8597_vm0, %v8533_v25, %v8661_v28  ;;  %vm8566_vm13 = vcmp.gt.f32.partialorder %v8502_v36, 0.0  ;;  %v8662_v15 = vmul.f32 0.2, %v8534_v19  ;;  %vm8598_vm6 = vcmp.gt.f32.partialorder %v8534_v19, 0.0 }
 0x8fb   :  { %v8435_v61 = vmul.f32 %v16004_v43, %v17912_v30  ;;  %v8467_v22 = vmul.f32 %v16004_v43, %v17913_v0  ;;  %v8789_v41 = vmul.f32 %v8757_v6, %v8693_v20  ;;  %v8504_v51 = vadd.f32 %v16035_v50, %v8434_v3  ;;  %v17915_v20 = vld [vmem:[#allocation54_spill] sm:$0xff] }
 0x8fc   :  { %8855 = vadd.xlane.f32.xlu0 %v8788_v52  ;;  %v8821_v26 = vmul.f32 %v8757_v6, %v8725_v59  ;;  %v8694_v39 = vsel %vm8566_vm13, %v8502_v36, %v8630_v29  ;;  %v8631_v25 = vmul.f32 0.2, %v8503_v14  ;;  %v8536_v28 = vadd.f32 %v16035_v50, %v8466_v40  ;;  %v17914_v52 = vld [vmem:[#allocation22_spill] sm:$0xff] }
 0x8fd   :  { %8919 = vadd.xlane.f32.xlu1 %v8820_v33  ;;  %v8726_v63 = vsel %vm8598_vm6, %v8534_v19, %v8662_v15  ;;  %vm8567_vm7 = vcmp.gt.f32.partialorder %v8503_v14, 0.0  ;;  %v8663_v16 = vmul.f32 0.2, %v8535_v46  ;;  %vm8599_vm15 = vcmp.gt.f32.partialorder %v8535_v46, 0.0  ;;  %v8759_v40 = vld [vmem:[%s16865_s8 + $0x30] sm:$0xff] }
 0x8fe   :  { %v8436_v33 = vmul.f32 %v16004_v43, %v17914_v52  ;;  %v8468_v3 = vmul.f32 %v16004_v43, %v17915_v20  ;;  %v8790_v36 = vmul.f32 %v8758_v23, %v8694_v39  ;;  %v8505_v6 = vadd.f32 %v16035_v50, %v8435_v61 }
 0x8ff   :  { %v8822_v29 = vmul.f32 %v8758_v23, %v8726_v63  ;;  %v8695_v59 = vsel %vm8567_vm7, %v8503_v14, %v8631_v25  ;;  %v8632_v19 = vmul.f32 0.2, %v8504_v51  ;;  %v8537_v15 = vadd.f32 %v16035_v50, %v8467_v22  ;;  %v8760_v14 = vld [vmem:[%s16865_s8 + $0x38] sm:$0xff] }
 0x900   :  { %8857 = vadd.xlane.f32.xlu0 %v8789_v41  ;;  %v8727_v30 = vsel %vm8599_vm15, %v8535_v46, %v8663_v16  ;;  %vm8568_vm10 = vcmp.gt.f32.partialorder %v8504_v51, 0.0  ;;  %v8664_v0 = vmul.f32 0.2, %v8536_v28  ;;  %vm8600_vm9 = vcmp.gt.f32.partialorder %v8536_v28, 0.0 }
 0x901   :  { %8921 = vadd.xlane.f32.xlu1 %v8821_v26  ;;  %v8791_v41 = vmul.f32 %v8759_v40, %v8695_v59  ;;  %v8506_v43 = vadd.f32 %v16035_v50, %v8436_v33  ;;  %v8823_v26 = vmul.f32 %v8759_v40, %v8727_v30  ;;  %v8696_v61 = vsel %vm8568_vm10, %v8504_v51, %v8632_v19  ;;  %v8761_v51 = vld [vmem:[%s16865_s8 + $0x40] sm:$0xff]  ;;  %v8763_v30 = vld [vmem:[%s16865_s8 + $0x50] sm:$0xff] }
 0x902   :  { %v8633_v39 = vmul.f32 0.2, %v8505_v6  ;;  %v8538_v23 = vadd.f32 %v16035_v50, %v8468_v3  ;;  %v8728_v22 = vsel %vm8600_vm9, %v8536_v28, %v8664_v0  ;;  %vm8569_vm4 = vcmp.gt.f32.partialorder %v8505_v6, 0.0 }
 0x903   :  { %v8665_v46 = vmul.f32 0.2, %v8537_v15  ;;  %vm8601_vm1 = vcmp.gt.f32.partialorder %v8537_v15, 0.0  ;;  %v8792_v25 = vmul.f32 %v8760_v14, %v8696_v61  ;;  %v8824_v63 = vmul.f32 %v8760_v14, %v8728_v22  ;;  %v8764_v14 = vld [vmem:[%s16865_s8 + $0x58] sm:$0xff] }
 0x904   :  { %8859 = vadd.xlane.f32.xlu0 %v8790_v36  ;;  %v8697_v16 = vsel %vm8569_vm4, %v8505_v6, %v8633_v39  ;;  %v8634_v52 = vmul.f32 0.2, %v8506_v43  ;;  %vm8570_vm11 = vcmp.gt.f32.partialorder %v8506_v43, 0.0  ;;  %v8666_v20 = vmul.f32 0.2, %v8538_v23  ;;  %v8762_v36 = vld [vmem:[%s16865_s8 + $0x48] sm:$0xff] }
 0x905   :  { %8923 = vadd.xlane.f32.xlu1 %v8822_v29  ;;  %v8729_v33 = vsel %vm8601_vm1, %v8537_v15, %v8665_v46  ;;  %vm8602_vm14 = vcmp.gt.f32.partialorder %v8538_v23, 0.0  ;;  %v8793_v50 = vmul.f32 %v8761_v51, %v8697_v16  ;;  %v8635_v6 = vmul.f32 0.2, %v16434_v31 }
 0x906   :  { %v8825_v28 = vmul.f32 %v8761_v51, %v8729_v33  ;;  %v8698_v3 = vsel %vm8570_vm11, %v8506_v43, %v8634_v52  ;;  %v8730_v29 = vsel %vm8602_vm14, %v8538_v23, %v8666_v20  ;;  %vm8571_vm5 = vcmp.gt.f32.partialorder %v16434_v31, 0.0  ;;  %v8766_v33 = vld [vmem:[%s16865_s8 + $0x68] sm:$0xff] }
 0x907   :  { %v8667_v59 = vmul.f32 0.2, %v16513_v27  ;;  %vm8603_vm12 = vcmp.gt.f32.partialorder %v16513_v27, 0.0  ;;  %v8794_v40 = vmul.f32 %v8762_v36, %v8698_v3  ;;  %v8826_v19 = vmul.f32 %v8762_v36, %v8730_v29  ;;  %v8767_v36 = vld [vmem:[%s16865_s8 + $0x70] sm:$0xff] }
 0x908   :  { %8861 = vadd.xlane.f32.xlu0 %v8791_v41  ;;  %v8699_v15 = vsel %vm8571_vm5, %v16434_v31, %v8635_v6  ;;  %v8636_v0 = vmul.f32 0.2, %v16437_v54  ;;  %vm8572_vm2 = vcmp.gt.f32.partialorder %v16437_v54, 0.0  ;;  %v8668_v43 = vmul.f32 0.2, %v16517_v49 }
 0x909   :  { %8925 = vadd.xlane.f32.xlu1 %v8823_v26  ;;  %v8731_v41 = vsel %vm8603_vm12, %v16513_v27, %v8667_v59  ;;  %vm8604_vm3 = vcmp.gt.f32.partialorder %v16517_v49, 0.0  ;;  %v8795_v26 = vmul.f32 %v8763_v30, %v8699_v15  ;;  %v8637_v39 = vmul.f32 0.2, %v16440_v42 }
 0x90a   :  { %v8827_v61 = vmul.f32 %v8763_v30, %v8731_v41  ;;  %v8700_v31 = vsel %vm8572_vm2, %v16437_v54, %v8636_v0  ;;  %v8732_v27 = vsel %vm8604_vm3, %v16517_v49, %v8668_v43  ;;  %vm8573_vm8 = vcmp.gt.f32.partialorder %v16440_v42, 0.0  ;;  %v8769_v43 = vld [vmem:[%s16865_s8 + $0x80] sm:$0xff] }
 0x90b   :  { %v8669_v23 = vmul.f32 0.2, %v16521_v55  ;;  %vm8605_vm0 = vcmp.gt.f32.partialorder %v16521_v55, 0.0  ;;  %v8796_v22 = vmul.f32 %v8764_v14, %v8700_v31  ;;  %v8828_v46 = vmul.f32 %v8764_v14, %v8732_v27 }
 0x90c   :  { %8863 = vadd.xlane.f32.xlu0 %v8792_v25  ;;  %v8701_v54 = vsel %vm8573_vm8, %v16440_v42, %v8637_v39  ;;  %v8765_v25 = vld [vmem:[%s16865_s8 + $0x60] sm:$0xff]  ;;  %vm8574_vm13 = vcmp.gt.f32.partialorder %v16443_v9, 0.0  ;;  %v8670_v16 = vmul.f32 0.2, %v16525_v44  ;;  %vm8606_vm6 = vcmp.gt.f32.partialorder %v16525_v44, 0.0  ;;  %v8770_v39 = vld [vmem:[%s16865_s8 + $0x88] sm:$0xff] }
 0x90d   :  { %8927 = vadd.xlane.f32.xlu1 %v8824_v63  ;;  %v8638_v63 = vmul.f32 0.2, %v16443_v9  ;;  %v8733_v49 = vsel %vm8605_vm0, %v16521_v55, %v8669_v23  ;;  %v8797_v51 = vmul.f32 %v8765_v25, %v8701_v54  ;;  %v8639_v20 = vmul.f32 0.2, %v16446_v37  ;;  %v8771_v54 = vld [vmem:[%s16865_s8 + $0x90] sm:$0xff] }
 0x90e   :  { %v8829_v52 = vmul.f32 %v8765_v25, %v8733_v49  ;;  %v8734_v55 = vsel %vm8606_vm6, %v16525_v44, %v8670_v16  ;;  %vm8575_vm7 = vcmp.gt.f32.partialorder %v16446_v37, 0.0  ;;  %vm8607_vm15 = vcmp.gt.f32.partialorder %v16529_v8, 0.0 }
 0x90f   :  { %v8702_v42 = vsel %vm8574_vm13, %v16443_v9, %v8638_v63  ;;  %v8830_v3 = vmul.f32 %v8766_v33, %v8734_v55  ;;  %v8703_v9 = vsel %vm8575_vm7, %v16446_v37, %v8639_v20  ;;  %v8640_v6 = vmul.f32 0.2, %v16450_v2  ;;  %v8773_v55 = vld [vmem:[%s16865_s8 + $0xa0] sm:$0xff] }
 0x910   :  { %8865 = vadd.xlane.f32.xlu0 %v8793_v50  ;;  %v8671_v50 = vmul.f32 0.2, %v16529_v8  ;;  %vm8576_vm10 = vcmp.gt.f32.partialorder %v16450_v2, 0.0  ;;  %v8672_v29 = vmul.f32 0.2, %v16533_v1  ;;  %vm8608_vm9 = vcmp.gt.f32.partialorder %v16533_v1, 0.0 }
 0x911   :  { %8929 = vadd.xlane.f32.xlu1 %v8825_v28  ;;  %v8798_v28 = vmul.f32 %v8766_v33, %v8702_v42  ;;  %v8799_v59 = vmul.f32 %v8767_v36, %v8703_v9  ;;  %v8704_v37 = vsel %vm8576_vm10, %v16450_v2, %v8640_v6  ;;  %v8641_v15 = vmul.f32 0.2, %v16453_v35 }
 0x912   :  { %v8735_v44 = vsel %vm8607_vm15, %v16529_v8, %v8671_v50  ;;  %v8736_v8 = vsel %vm8608_vm9, %v16533_v1, %v8672_v29  ;;  %vm8577_vm4 = vcmp.gt.f32.partialorder %v16453_v35, 0.0  ;;  %v8673_v30 = vmul.f32 0.2, %v16537_v32 }
 0x913   :  { %vm8609_vm1 = vcmp.gt.f32.partialorder %v16537_v32, 0.0  ;;  %v8705_v2 = vsel %vm8577_vm4, %v16453_v35, %v8641_v15  ;;  %vm8578_vm11 = vcmp.gt.f32.partialorder %v16456_v11, 0.0  ;;  %vm8610_vm14 = vcmp.gt.f32.partialorder %v16541_v12, 0.0 }
 0x914   :  { %8867 = vadd.xlane.f32.xlu0 %v8794_v40  ;;  %v8831_v40 = vmul.f32 %v8767_v36, %v8735_v44  ;;  %v8737_v1 = vsel %vm8609_vm1, %v16537_v32, %v8673_v30  ;;  %v8801_v31 = vmul.f32 %v8769_v43, %v8705_v2  ;;  %v8643_v27 = vmul.f32 0.2, %v16459_v17  ;;  %v8774_v36 = vld [vmem:[%s16865_s8 + $0xa8] sm:$0xff]  ;;  %v8776_v30 = vld [vmem:[%s16865_s8 + $0xb8] sm:$0xff] }
 0x915   :  { %8931 = vadd.xlane.f32.xlu1 %v8826_v19  ;;  %v8768_v19 = vld [vmem:[%s16865_s8 + $0x78] sm:$0xff]  ;;  %v8833_v14 = vmul.f32 %v8769_v43, %v8737_v1  ;;  %vm8579_vm5 = vcmp.gt.f32.partialorder %v16459_v17, 0.0  ;;  %v8675_v23 = vmul.f32 0.2, %v16545_v58  ;;  %vm8611_vm12 = vcmp.gt.f32.partialorder %v16545_v58, 0.0 }
 0x916   :  { %v8800_v0 = vmul.f32 %v8768_v19, %v8704_v37  ;;  %v8832_v41 = vmul.f32 %v8768_v19, %v8736_v8  ;;  %v8644_v25 = vmul.f32 0.2, %v16462_v60  ;;  %vm8580_vm2 = vcmp.gt.f32.partialorder %v16462_v60, 0.0 }
 0x917   :  { %v8676_v63 = vmul.f32 0.2, %v16549_v62  ;;  %vm8612_vm3 = vcmp.gt.f32.partialorder %v16549_v62, 0.0  ;;  %vm8581_vm8 = vcmp.gt.f32.partialorder %v16465_v38, 0.0  ;;  %v8677_v42 = vmul.f32 0.2, %v16553_v57 }
 0x918   :  { %8869 = vadd.xlane.f32.xlu0 %v8795_v26  ;;  %v8642_v26 = vmul.f32 0.2, %v16456_v11  ;;  %vm8613_vm0 = vcmp.gt.f32.partialorder %v16553_v57, 0.0  ;;  %v8646_v50 = vmul.f32 0.2, %v16468_v7  ;;  %vm8582_vm13 = vcmp.gt.f32.partialorder %v16468_v7, 0.0 }
 0x919   :  { %8933 = vadd.xlane.f32.xlu1 %v8827_v61  ;;  %v8674_v61 = vmul.f32 0.2, %v16541_v12  ;;  %vm8614_vm6 = vcmp.gt.f32.partialorder %v16557_v21, 0.0  ;;  %v8647_v6 = vmul.f32 0.2, %v16471_v5  ;;  %vm8583_vm7 = vcmp.gt.f32.partialorder %v16471_v5, 0.0 }
 0x91a   :  { %v8706_v35 = vsel %vm8578_vm11, %v16456_v11, %v8642_v26  ;;  %v8707_v11 = vsel %vm8579_vm5, %v16459_v17, %v8643_v27  ;;  %v8708_v17 = vsel %vm8580_vm2, %v16462_v60, %v8644_v25  ;;  %v8679_v44 = vmul.f32 0.2, %v16561_v18  ;;  %v8777_v26 = vld [vmem:[%s16865_s8 + $0xc0] sm:$0xff] }
 0x91b   :  { %v8738_v32 = vsel %vm8610_vm14, %v16541_v12, %v8674_v61  ;;  %v8739_v12 = vsel %vm8611_vm12, %v16545_v58, %v8675_v23  ;;  %v8803_v49 = vmul.f32 %v8771_v54, %v8707_v11  ;;  %v8740_v58 = vsel %vm8612_vm3, %v16549_v62, %v8676_v63  ;;  %v17916_v63 = vld [vmem:[#allocation16_spill] sm:$0xff] }
 0x91c   :  { %8871 = vadd.xlane.f32.xlu0 %v8796_v22  ;;  %v8802_v22 = vmul.f32 %v8770_v39, %v8706_v35  ;;  %v8835_v16 = vmul.f32 %v8771_v54, %v8739_v12  ;;  %v8741_v62 = vsel %vm8613_vm0, %v16553_v57, %v8677_v42  ;;  %vm8615_vm15 = vcmp.gt.f32.partialorder %v16561_v18, 0.0  ;;  %v8778_v35 = vld [vmem:[%s16865_s8 + $0xc8] sm:$0xff]  ;;  %v8780_v12 = vld [vmem:[%s16865_s8 + $0xd8] sm:$0xff] }
 0x91d   :  { %8935 = vadd.xlane.f32.xlu1 %v8828_v46  ;;  %v8834_v46 = vmul.f32 %v8770_v39, %v8738_v32  ;;  %v8837_v9 = vmul.f32 %v8773_v55, %v8741_v62  ;;  %v8648_v37 = vmul.f32 0.2, %v16474_v53  ;;  %vm8584_vm10 = vcmp.gt.f32.partialorder %v16474_v53, 0.0  ;;  %v17918_v42 = vld [vmem:[#allocation39_spill] sm:$0xff] }
 0x91e   :  { %v8680_v19 = vmul.f32 0.2, %v16565_v47  ;;  %vm8616_vm9 = vcmp.gt.f32.partialorder %v16565_v47, 0.0  ;;  %vm8585_vm4 = vcmp.gt.f32.partialorder %v16477_v45, 0.0  ;;  %vm8617_vm1 = vcmp.gt.f32.partialorder %v16569_v24, 0.0 }
 0x91f   :  { %v8650_v1 = vmul.f32 0.2, %v16480_v10  ;;  %vm8586_vm11 = vcmp.gt.f32.partialorder %v16480_v10, 0.0  ;;  %v8682_v61 = vmul.f32 0.2, %v16573_v56  ;;  %vm8618_vm14 = vcmp.gt.f32.partialorder %v16573_v56, 0.0 }
 0x920   :  { %8873 = vadd.xlane.f32.xlu0 %v8797_v51  ;;  %v8772_v51 = vld [vmem:[%s16865_s8 + $0x98] sm:$0xff]  ;;  %v8651_v39 = vmul.f32 0.2, %v16483_v13  ;;  %vm8587_vm5 = vcmp.gt.f32.partialorder %v16483_v13, 0.0  ;;  %v8683_v27 = vmul.f32 0.2, %v16577_v48 }
 0x921   :  { %8937 = vadd.xlane.f32.xlu1 %v8829_v52  ;;  %v8645_v52 = vmul.f32 0.2, %v16465_v38  ;;  %v8804_v33 = vmul.f32 %v8772_v51, %v8708_v17  ;;  %v8836_v20 = vmul.f32 %v8772_v51, %v8740_v58  ;;  %vm8619_vm12 = vcmp.gt.f32.partialorder %v16577_v48, 0.0  ;;  %v8781_v58 = vld [vmem:[%s16865_s8 + $0xe0] sm:$0xff] }
 0x922   :  { %vm8588_vm2 = vcmp.gt.f32.partialorder %v16486_v4, 0.0  ;;  %v8684_v11 = vmul.f32 0.2, %v16581_v34  ;;  %vm8620_vm3 = vcmp.gt.f32.partialorder %v16581_v34, 0.0 }
 0x923   :  { %v8709_v60 = vsel %vm8581_vm8, %v16465_v38, %v8645_v52  ;;  %v8710_v38 = vsel %vm8582_vm13, %v16468_v7, %v8646_v50  ;;  %v8711_v7 = vsel %vm8583_vm7, %v16471_v5, %v8647_v6  ;;  %v8712_v5 = vsel %vm8584_vm10, %v16474_v53, %v8648_v37 }
 0x924   :  { %8875 = vadd.xlane.f32.xlu0 %v8798_v28  ;;  %v8678_v28 = vmul.f32 0.2, %v16557_v21  ;;  %v8806_v29 = vmul.f32 %v8774_v36, %v8710_v38  ;;  %v8808_v2 = vmul.f32 %v8776_v30, %v8712_v5  ;;  %vm8589_vm8 = vcmp.gt.f32.partialorder %v17916_v63, 0.0 }
 0x925   :  { %8939 = vadd.xlane.f32.xlu1 %v8830_v3  ;;  %v8805_v3 = vmul.f32 %v8773_v55, %v8709_v60  ;;  %vm8590_vm13 = vcmp.gt.f32.partialorder %v17918_v42, 0.0 }
 0x926   :  { %v8742_v57 = vsel %vm8614_vm6, %v16557_v21, %v8678_v28  ;;  %v8743_v21 = vsel %vm8615_vm15, %v16561_v18, %v8679_v44  ;;  %v8744_v18 = vsel %vm8616_vm9, %v16565_v47, %v8680_v19  ;;  %v8782_v28 = vld [vmem:[%s16865_s8 + $0xe8] sm:$0xff] }
 0x927   :  { %v8840_v43 = vmul.f32 %v8776_v30, %v8744_v18  ;;  %v8784_v30 = vld [vmem:[%s16865_s8 + $0xf8] sm:$0xff] }
 0x928   :  { %8877 = vadd.xlane.f32.xlu0 %v8799_v59  ;;  %v8838_v59 = vmul.f32 %v8774_v36, %v8742_v57  ;;  %v17921_v36 = vld [vmem:[#allocation57_spill] sm:$0xff] }
 0x929   :  { %8941 = vadd.xlane.f32.xlu1 %v8831_v40  ;;  %v8775_v40 = vld [vmem:[%s16865_s8 + $0xb0] sm:$0xff]  ;;  %v8687_v6 = vmul.f32 0.2, %v17921_v36  ;;  %vm8623_vm15 = vcmp.gt.f32.partialorder %v17921_v36, 0.0 }
 0x92a   :  { %v8807_v15 = vmul.f32 %v8775_v40, %v8711_v7  ;;  %v8839_v8 = vmul.f32 %v8775_v40, %v8743_v21  ;;  %v17922_v7 = vld [vmem:[#allocation35_spill] sm:$0xff]  ;;  %v17923_v21 = vld [vmem:[#allocation34_spill] sm:$0xff] }
 0x92b   :  { %v8656_v40 = vmul.f32 0.2, %v17922_v7  ;;  %v8751_v37 = vsel %vm8623_vm15, %v17921_v36, %v8687_v6  ;;  %vm8592_vm10 = vcmp.gt.f32.partialorder %v17922_v7, 0.0  ;;  %v8688_v19 = vmul.f32 0.2, %v17923_v21 }
 0x92c   :  { %8879 = vadd.xlane.f32.xlu0 %v8800_v0  ;;  %v8649_v0 = vmul.f32 0.2, %v16477_v45  ;;  %vm8624_vm9 = vcmp.gt.f32.partialorder %v17923_v21, 0.0 }
 0x92d   :  { %8943 = vadd.xlane.f32.xlu1 %v8832_v41  ;;  %v8681_v41 = vmul.f32 0.2, %v16569_v24  ;;  %v8720_v5 = vsel %vm8592_vm10, %v17922_v7, %v8656_v40 }
 0x92e   :  { %v8713_v53 = vsel %vm8585_vm4, %v16477_v45, %v8649_v0  ;;  %v8714_v45 = vsel %vm8586_vm11, %v16480_v10, %v8650_v1  ;;  %v8715_v10 = vsel %vm8587_vm5, %v16483_v13, %v8651_v39  ;;  %v8752_v0 = vsel %vm8624_vm9, %v17923_v21, %v8688_v19 }
 0x92f   :  { %v8745_v47 = vsel %vm8617_vm1, %v16569_v24, %v8681_v41  ;;  %v8746_v24 = vsel %vm8618_vm14, %v16573_v56, %v8682_v61  ;;  %v8810_v32 = vmul.f32 %v8778_v35, %v8714_v45  ;;  %v8747_v56 = vsel %vm8619_vm12, %v16577_v48, %v8683_v27 }
 0x930   :  { %8881 = vadd.xlane.f32.xlu0 %v8801_v31  ;;  %v8809_v31 = vmul.f32 %v8777_v26, %v8713_v53  ;;  %v8842_v23 = vmul.f32 %v8778_v35, %v8746_v24  ;;  %v8748_v48 = vsel %vm8620_vm3, %v16581_v34, %v8684_v11  ;;  %v8816_v18 = vmul.f32 %v8784_v30, %v8720_v5 }
 0x931   :  { %8945 = vadd.xlane.f32.xlu1 %v8833_v14  ;;  %v8841_v14 = vmul.f32 %v8777_v26, %v8745_v47  ;;  %v8844_v52 = vmul.f32 %v8780_v12, %v8748_v48  ;;  %v8848_v41 = vmul.f32 %v8784_v30, %v8752_v0  ;;  %vm9053_vm4 = vcmask 1041409  }
 0x932   :  { %vm9056_vm1 = vcmask 1024  }
 0x934   :  { %8883 = vadd.xlane.f32.xlu0 %v8802_v22  ;;  %v8779_v22 = vld [vmem:[%s16865_s8 + $0xd0] sm:$0xff] }
 0x935   :  { %8947 = vadd.xlane.f32.xlu1 %v8834_v46  ;;  %v8652_v46 = vmul.f32 0.2, %v16486_v4  ;;  %v8811_v54 = vmul.f32 %v8779_v22, %v8715_v10  ;;  %v8843_v25 = vmul.f32 %v8779_v22, %v8747_v56 }
 0x937   :  { %v8716_v13 = vsel %vm8588_vm2, %v16486_v4, %v8652_v46 }
 0x938   :  { %8885 = vadd.xlane.f32.xlu0 %v8803_v49  ;;  %v8653_v49 = vmul.f32 0.2, %v17916_v63  ;;  %v8812_v51 = vmul.f32 %v8780_v12, %v8716_v13 }
 0x939   :  { %8949 = vadd.xlane.f32.xlu1 %v8835_v16  ;;  %v17917_v16 = vld [vmem:[#allocation40_spill] sm:$0xff] }
 0x93a   :  { %v8685_v17 = vmul.f32 0.2, %v17917_v16  ;;  %vm8621_vm0 = vcmp.gt.f32.partialorder %v17917_v16, 0.0  ;;  %v8717_v4 = vsel %vm8589_vm8, %v17916_v63, %v8653_v49 }
 0x93b   :  { %v8813_v55 = vmul.f32 %v8781_v58, %v8717_v4 }
 0x93c   :  { %8887 = vadd.xlane.f32.xlu0 %v8804_v33  ;;  %v8654_v33 = vmul.f32 0.2, %v17918_v42  ;;  %v8749_v34 = vsel %vm8621_vm0, %v17917_v16, %v8685_v17 }
 0x93d   :  { %8951 = vadd.xlane.f32.xlu1 %v8836_v20  ;;  %v17919_v20 = vld [vmem:[#allocation55_spill] sm:$0xff]  ;;  %v8845_v50 = vmul.f32 %v8781_v58, %v8749_v34 }
 0x93e   :  { %v8686_v60 = vmul.f32 0.2, %v17919_v20  ;;  %vm8622_vm6 = vcmp.gt.f32.partialorder %v17919_v20, 0.0  ;;  %v8718_v62 = vsel %vm8590_vm13, %v17918_v42, %v8654_v33 }
 0x93f   :  { %v8814_v57 = vmul.f32 %v8782_v28, %v8718_v62 }
 0x940   :  { %8889 = vadd.xlane.f32.xlu0 %v8805_v3  ;;  %v17920_v3 = vld [vmem:[#allocation5_spill] sm:$0xff]  ;;  %v8750_v38 = vsel %vm8622_vm6, %v17919_v20, %v8686_v60 }
 0x941   :  { %8953 = vadd.xlane.f32.xlu1 %v8837_v9  ;;  %v8655_v9 = vmul.f32 0.2, %v17920_v3  ;;  %vm8591_vm7 = vcmp.gt.f32.partialorder %v17920_v3, 0.0  ;;  %v8846_v44 = vmul.f32 %v8782_v28, %v8750_v38 }
 0x944   :  { %8891 = vadd.xlane.f32.xlu0 %v8806_v29  ;;  %v8719_v29 = vsel %vm8591_vm7, %v17920_v3, %v8655_v9 }
 0x945   :  { %8955 = vadd.xlane.f32.xlu1 %v8838_v59  ;;  %v8783_v59 = vld [vmem:[%s16865_s8 + $0xf0] sm:$0xff] }
 0x948   :  { %8893 = vadd.xlane.f32.xlu0 %v8807_v15  ;;  %v8815_v15 = vmul.f32 %v8783_v59, %v8719_v29 }
 0x949   :  { %8957 = vadd.xlane.f32.xlu1 %v8839_v8  ;;  %v8847_v8 = vmul.f32 %v8783_v59, %v8751_v37 }
 0x94c   :  { %8895 = vadd.xlane.f32.xlu0 %v8808_v2 }
 0x94d   :  { %8959 = vadd.xlane.f32.xlu1 %v8840_v43 }
 0x950   :  { %8897 = vadd.xlane.f32.xlu0 %v8809_v31 }
 0x951   :  { %8961 = vadd.xlane.f32.xlu1 %v8841_v14 }
 0x954   :  { %8899 = vadd.xlane.f32.xlu0 %v8810_v32 }
 0x955   :  { %8963 = vadd.xlane.f32.xlu1 %v8842_v23 }
 0x958   :  { %8901 = vadd.xlane.f32.xlu0 %v8811_v54 }
 0x959   :  { %8965 = vadd.xlane.f32.xlu1 %v8843_v25 }
 0x95c   :  { %8903 = vadd.xlane.f32.xlu0 %v8812_v51 }
 0x95d   :  { %8967 = vadd.xlane.f32.xlu1 %v8844_v52 }
 0x960   :  { %8905 = vadd.xlane.f32.xlu0 %v8813_v55 }
 0x961   :  { %8969 = vadd.xlane.f32.xlu1 %v8845_v50 }
 0x964   :  { %8907 = vadd.xlane.f32.xlu0 %v8814_v57 }
 0x965   :  { %8971 = vadd.xlane.f32.xlu1 %v8846_v44 }
 0x968   :  { %8909 = vadd.xlane.f32.xlu0 %v8815_v15 }
 0x969   :  { %8973 = vadd.xlane.f32.xlu1 %v8847_v8  ;;  %v8852_v2 = vpop.xlane.xlu0 %8851 }
 0x96c   :  { %8911 = vadd.xlane.f32.xlu0 %v8816_v18 }
 0x96d   :  { %8975 = vadd.xlane.f32.xlu1 %v8848_v41 }
 0x973   :  { %v8850_v43 = vpop.xlane.xlu1 %8849 }
 0x974   :  { %v8977_v53 = vadd.f32 %v8852_v2, %v8850_v43 }
 0x981   :  { %v8914_v26 = vpop.xlane.xlu0 %8913 }
 0x982   :  { %v8916_v1 = vpop.xlane.xlu1 %8915 }
 0x983   :  { %v9014_v33 = vadd.f32 %v8916_v1, %v8914_v26 }
 0x985   :  { %v8854_v47 = vpop.xlane.xlu0 %8853 }
 0x986   :  { %v8918_v61 = vpop.xlane.xlu1 %8917  ;;  %v8978_v34 = vadd.f32 %v8977_v53, %v8854_v47 }
 0x987   :  { %v9015_v20 = vadd.f32 %v9014_v33, %v8918_v61 }
 0x989   :  { %v8856_v31 = vpop.xlane.xlu0 %8855 }
 0x98a   :  { %v8920_v14 = vpop.xlane.xlu1 %8919  ;;  %v8979_v55 = vadd.f32 %v8978_v34, %v8856_v31 }
 0x98b   :  { %v9016_v62 = vadd.f32 %v9015_v20, %v8920_v14 }
 0x98d   :  { %v8858_v45 = vpop.xlane.xlu0 %8857 }
 0x98e   :  { %v8922_v35 = vpop.xlane.xlu1 %8921  ;;  %v8980_v28 = vadd.f32 %v8979_v55, %v8858_v45 }
 0x98f   :  { %v9017_v3 = vadd.f32 %v9016_v62, %v8922_v35 }
 0x991   :  { %v8860_v39 = vpop.xlane.xlu0 %8859 }
 0x992   :  { %v8924_v24 = vpop.xlane.xlu1 %8923  ;;  %v8981_v38 = vadd.f32 %v8980_v28, %v8860_v39 }
 0x993   :  { %v9018_v6 = vadd.f32 %v9017_v3, %v8924_v24 }
 0x995   :  { %v8862_v27 = vpop.xlane.xlu0 %8861 }
 0x996   :  { %v8926_v32 = vpop.xlane.xlu1 %8925  ;;  %v8982_v57 = vadd.f32 %v8981_v38, %v8862_v27 }
 0x997   :  { %v9019_v44 = vadd.f32 %v9018_v6, %v8926_v32 }
 0x999   :  { %v8864_v23 = vpop.xlane.xlu0 %8863 }
 0x99a   :  { %v8928_v10 = vpop.xlane.xlu1 %8927  ;;  %v8983_v59 = vadd.f32 %v8982_v57, %v8864_v23 }
 0x99b   :  { %v9020_v40 = vadd.f32 %v9019_v44, %v8928_v10 }
 0x99d   :  { %v8866_v22 = vpop.xlane.xlu0 %8865 }
 0x99e   :  { %v8930_v46 = vpop.xlane.xlu1 %8929  ;;  %v8984_v37 = vadd.f32 %v8983_v59, %v8866_v22 }
 0x99f   :  { %v9021_v21 = vadd.f32 %v9020_v40, %v8930_v46 }
 0x9a1   :  { %v8868_v56 = vpop.xlane.xlu0 %8867 }
 0x9a2   :  { %v8932_v11 = vpop.xlane.xlu1 %8931  ;;  %v8985_v15 = vadd.f32 %v8984_v37, %v8868_v56 }
 0x9a3   :  { %v9022_v5 = vadd.f32 %v9021_v21, %v8932_v11 }
 0x9a5   :  { %v8870_v54 = vpop.xlane.xlu0 %8869 }
 0x9a6   :  { %v8934_v25 = vpop.xlane.xlu1 %8933  ;;  %v8986_v30 = vadd.f32 %v8985_v15, %v8870_v54 }
 0x9a7   :  { %v9023_v0 = vadd.f32 %v9022_v5, %v8934_v25 }
 0x9a9   :  { %v8872_v13 = vpop.xlane.xlu0 %8871 }
 0x9aa   :  { %v8936_v12 = vpop.xlane.xlu1 %8935  ;;  %v8987_v41 = vadd.f32 %v8986_v30, %v8872_v13 }
 0x9ab   :  { %v9024_v43 = vadd.f32 %v9023_v0, %v8936_v12 }
 0x9ad   :  { %v8874_v63 = vpop.xlane.xlu0 %8873 }
 0x9ae   :  { %v8938_v49 = vpop.xlane.xlu1 %8937  ;;  %v8988_v53 = vadd.f32 %v8987_v41, %v8874_v63 }
 0x9af   :  { %v9025_v26 = vadd.f32 %v9024_v43, %v8938_v49 }
 0x9b1   :  { %v8876_v48 = vpop.xlane.xlu0 %8875 }
 0x9b2   :  { %v8940_v16 = vpop.xlane.xlu1 %8939  ;;  %v8989_v47 = vadd.f32 %v8988_v53, %v8876_v48 }
 0x9b3   :  { %v9026_v31 = vadd.f32 %v9025_v26, %v8940_v16 }
 0x9b5   :  { %v8878_v17 = vpop.xlane.xlu0 %8877 }
 0x9b6   :  { %v8942_v51 = vpop.xlane.xlu1 %8941  ;;  %v8990_v14 = vadd.f32 %v8989_v47, %v8878_v17 }
 0x9b7   :  { %v9027_v45 = vadd.f32 %v9026_v31, %v8942_v51 }
 0x9b9   :  { %v8880_v52 = vpop.xlane.xlu0 %8879 }
 0x9ba   :  { %v8944_v4 = vpop.xlane.xlu1 %8943  ;;  %v8991_v39 = vadd.f32 %v8990_v14, %v8880_v52 }
 0x9bb   :  { %v9028_v27 = vadd.f32 %v9027_v45, %v8944_v4 }
 0x9bd   :  { %v8882_v58 = vpop.xlane.xlu0 %8881 }
 0x9be   :  { %v8946_v42 = vpop.xlane.xlu1 %8945  ;;  %v8992_v32 = vadd.f32 %v8991_v39, %v8882_v58 }
 0x9bf   :  { %v9029_v23 = vadd.f32 %v9028_v27, %v8946_v42 }
 0x9c1   :  { %v8884_v60 = vpop.xlane.xlu0 %8883 }
 0x9c2   :  { %v8948_v50 = vpop.xlane.xlu1 %8947  ;;  %v8993_v22 = vadd.f32 %v8992_v32, %v8884_v60 }
 0x9c3   :  { %v9030_v56 = vadd.f32 %v9029_v23, %v8948_v50 }
 0x9c5   :  { %v8886_v9 = vpop.xlane.xlu0 %8885 }
 0x9c6   :  { %v8950_v36 = vpop.xlane.xlu1 %8949  ;;  %v8994_v11 = vadd.f32 %v8993_v22, %v8886_v9 }
 0x9c7   :  { %v9031_v54 = vadd.f32 %v9030_v56, %v8950_v36 }
 0x9c9   :  { %v8888_v29 = vpop.xlane.xlu0 %8887 }
 0x9ca   :  { %v8952_v7 = vpop.xlane.xlu1 %8951  ;;  %v8995_v13 = vadd.f32 %v8994_v11, %v8888_v29 }
 0x9cb   :  { %v9032_v63 = vadd.f32 %v9031_v54, %v8952_v7 }
 0x9cd   :  { %v8890_v19 = vpop.xlane.xlu0 %8889 }
 0x9ce   :  { %v8954_v8 = vpop.xlane.xlu1 %8953  ;;  %v8996_v49 = vadd.f32 %v8995_v13, %v8890_v19 }
 0x9cf   :  { %v9033_v48 = vadd.f32 %v9032_v63, %v8954_v8 }
 0x9d1   :  { %v8892_v18 = vpop.xlane.xlu0 %8891 }
 0x9d2   :  { %v8956_v2 = vpop.xlane.xlu1 %8955  ;;  %v8997_v17 = vadd.f32 %v8996_v49, %v8892_v18 }
 0x9d3   :  { %v9034_v52 = vadd.f32 %v9033_v48, %v8956_v2 }
 0x9d5   :  { %v8894_v1 = vpop.xlane.xlu0 %8893 }
 0x9d6   :  { %v8958_v61 = vpop.xlane.xlu1 %8957  ;;  %v8998_v33 = vadd.f32 %v8997_v17, %v8894_v1 }
 0x9d7   :  { %v9035_v4 = vadd.f32 %v9034_v52, %v8958_v61 }
 0x9d9   :  { %v8896_v35 = vpop.xlane.xlu0 %8895 }
 0x9da   :  { %v8960_v24 = vpop.xlane.xlu1 %8959  ;;  %v8999_v42 = vadd.f32 %v8998_v33, %v8896_v35 }
 0x9db   :  { %v9036_v20 = vadd.f32 %v9035_v4, %v8960_v24 }
 0x9dd   :  { %v8898_v10 = vpop.xlane.xlu0 %8897 }
 0x9de   :  { %v8962_v46 = vpop.xlane.xlu1 %8961  ;;  %v9000_v60 = vadd.f32 %v8999_v42, %v8898_v10 }
 0x9df   :  { %v9037_v55 = vadd.f32 %v9036_v20, %v8962_v46 }
 0x9e1   :  { %v8900_v25 = vpop.xlane.xlu0 %8899 }
 0x9e2   :  { %v8964_v12 = vpop.xlane.xlu1 %8963  ;;  %v9001_v62 = vadd.f32 %v9000_v60, %v8900_v25 }
 0x9e3   :  { %v9038_v3 = vadd.f32 %v9037_v55, %v8964_v12 }
 0x9e5   :  { %v8902_v16 = vpop.xlane.xlu0 %8901 }
 0x9e6   :  { %v8966_v51 = vpop.xlane.xlu1 %8965  ;;  %v9002_v9 = vadd.f32 %v9001_v62, %v8902_v16 }
 0x9e7   :  { %v9039_v38 = vadd.f32 %v9038_v3, %v8966_v51 }
 0x9e9   :  { %v8904_v58 = vpop.xlane.xlu0 %8903 }
 0x9ea   :  { %v8968_v34 = vpop.xlane.xlu1 %8967  ;;  %v9003_v6 = vadd.f32 %v9002_v9, %v8904_v58 }
 0x9eb   :  { %v9040_v44 = vadd.f32 %v9039_v38, %v8968_v34 }
 0x9ed   :  { %v8906_v50 = vpop.xlane.xlu0 %8905 }
 0x9ee   :  { %v8970_v28 = vpop.xlane.xlu1 %8969  ;;  %v9004_v29 = vadd.f32 %v9003_v6, %v8906_v50 }
 0x9ef   :  { %v9041_v59 = vadd.f32 %v9040_v44, %v8970_v28 }
 0x9f1   :  { %v8908_v36 = vpop.xlane.xlu0 %8907 }
 0x9f2   :  { %v8972_v57 = vpop.xlane.xlu1 %8971  ;;  %v9005_v40 = vadd.f32 %v9004_v29, %v8908_v36 }
 0x9f3   :  { %v9042_v21 = vadd.f32 %v9041_v59, %v8972_v57 }
 0x9f5   :  { %v8910_v7 = vpop.xlane.xlu0 %8909 }
 0x9f6   :  { %v8974_v37 = vpop.xlane.xlu1 %8973  ;;  %v9006_v19 = vadd.f32 %v9005_v40, %v8910_v7 }
 0x9f7   :  { %v9043_v15 = vadd.f32 %v9042_v21, %v8974_v37 }
 0x9f9   :  { %v8912_v8 = vpop.xlane.xlu0 %8911 }
 0x9fa   :  { %v9007_v5 = vadd.f32 %v9006_v19, %v8912_v8  ;;  %v8976_v30 = vpop.xlane.xlu1 %8975 }
 0x9fb   :  { %v9044_v0 = vadd.f32 %v9043_v15, %v8976_v30 }
 0x9fc   :  { %v9008_v18 = vrot.slane %v9007_v5, 4 }
 0x9fd   :  { %v9045_v41 = vrot.slane %v9044_v0, 4 }
 0x9fe   :  { %v9009_v2 = vadd.f32 %v9008_v18, %v9007_v5 }
 0x9ff   :  { %v9046_v43 = vadd.f32 %v9045_v41, %v9044_v0 }
 0xa00   :  { %v9010_v53 = vrot.slane %v9009_v2, 2 }
 0xa01   :  { %v9047_v26 = vrot.slane %v9046_v43, 2 }
 0xa02   :  { %v9011_v1 = vadd.f32 %v9010_v53, %v9009_v2 }
 0xa03   :  { %v9048_v47 = vadd.f32 %v9047_v26, %v9046_v43 }
 0xa04   :  { %v9012_v61 = vrot.slane %v9011_v1, 1 }
 0xa05   :  { %v9049_v31 = vrot.slane %v9048_v47, 1 }
 0xa06   :  { %v9013_v14 = vadd.f32 %v9012_v61, %v9011_v1 }
 0xa07   :  { %v9050_v45 = vadd.f32 %v9049_v31, %v9048_v47 }
 0xa09   :  { %v9054_v35 = vsel %vm9053_vm4, %v9050_v45, %v9013_v14 }
 0xa0a   :  { %9057 = vst.msk [vmem:[%s16866_s11] sm:$0x3] %vm9056_vm1, %v9054_v35 }

</bundles_post_ra>
